<compile_context>
chip_gen: v5e
topology: v5e:2x2
jax: 0.10.0
libtpu: 0.0.40
codegen_flags: <defaults>
</compile_context>

<pallas_src>
import jax
import jax.numpy as jnp
from jax.experimental import pallas as pl
from jax.experimental.pallas import tpu as pltpu


def _linear_kernel(x_ref, wt_ref, b_ref, o_ref):
    """Grid = (N tiles [parallel],). No K reduction — full K per step.

    x_ref:  (M, K)   full activation, VMEM-resident
    wt_ref: (K, tn)  pre-transposed weight tile (lane-dense along N)
    b_ref:  (1, tn)  bias tile
    o_ref:  (M, tn)  output tile, written exactly once
    """
    y = jnp.dot(x_ref[...], wt_ref[...], preferred_element_type=jnp.float32)
    o_ref[...] = (b_ref[...] + y).astype(o_ref.dtype)


def linear_pallas(x2d, weight_t, bias, *, tn=384):
    """x2d: (M, K) f32; weight_t: (K, N) f32 (pre-transposed once at init);
    bias: (N,) f32 -> (M, N) f32."""
    M, K = x2d.shape
    K2, N = weight_t.shape
    assert K == K2
    assert N % tn == 0, "N must be divisible by the N-tile size"
    b2d = bias.reshape(1, N)

    return pl.pallas_call(
        _linear_kernel,
        out_shape=jax.ShapeDtypeStruct((M, N), x2d.dtype),
        grid_spec=pltpu.PrefetchScalarGridSpec(
            num_scalar_prefetch=0,
            grid=(N // tn,),  # single parallel N axis; no K reduction axis
            in_specs=[
                pl.BlockSpec((M, K), lambda j: (0, 0)),    # x: fully resident
                pl.BlockSpec((K, tn), lambda j: (0, j)),   # Wt: streamed, contiguous rows
                pl.BlockSpec((1, tn), lambda j: (0, j)),   # bias tile
            ],
            out_specs=pl.BlockSpec((M, tn), lambda j: (0, j)),
        ),
        compiler_params=pltpu.CompilerParams(
            dimension_semantics=("parallel",),
        ),
        cost_estimate=pl.CostEstimate(
            flops=2 * M * N * K,
            bytes_accessed=4 * (M * K + K * N + M * N + N),
            transcendentals=0,
        ),
    )(x2d, weight_t, b2d)


def model_forward(x, weight_t, bias):
    """x: (B, H, W, C_in); weight_t: (C_in, C_out) pre-transposed; bias: (C_out,)."""
    B, H, W, C_in = x.shape
    C_out = weight_t.shape[1]
    # dropout(p=0.0) is identity in both positions.
    x2d = x.reshape(B * H * W, C_in)
    y2d = linear_pallas(x2d, weight_t, bias)
    return y2d.reshape(B, H, W, C_out)


if __name__ == "__main__":
    key = jax.random.PRNGKey(0)
    k_x, k_w, k_b = jax.random.split(key, 3)

    B, H, W, C_in, C_out = 1, 7, 7, 3072, 768

    # Deterministic synthetic parameters (PyTorch Linear-like uniform init).
    bound = 1.0 / (C_in ** 0.5)
    weight = jax.random.uniform(k_w, (C_out, C_in), jnp.float32, -bound, bound)
    bias = jax.random.uniform(k_b, (C_out,), jnp.float32, -bound, bound)

    # One-time parameter prep (outside the per-call jit): weight.T -> (C_in, C_out).
    weight_t = jnp.asarray(weight).T
    weight_t = jax.block_until_ready(weight_t)

    x = jax.random.normal(k_x, (B, H, W, C_in), jnp.float32)

    fwd = jax.jit(model_forward)
    y = fwd(x, weight_t, bias)
    y = jax.block_until_ready(y)

    # Sanity check against plain-JAX reference.
    y_ref = x.reshape(-1, C_in) @ weight.T + bias
    y_ref = y_ref.reshape(B, H, W, C_out)
    assert y.shape == (B, H, W, C_out)
    assert jnp.allclose(y, y_ref, atol=1e-4, rtol=1e-4)

    print("KERNEL_OK")
</pallas_src>

<mosaic_0001>
module attributes {stable_mosaic.version = 11 : i64} {
  func.func @_linear_kernel(%arg0: i32, %arg1: memref<49x3072xf32, #tpu.memory_space<vmem>>, %arg2: memref<3072x384xf32, #tpu.memory_space<vmem>>, %arg3: memref<1x384xf32, #tpu.memory_space<vmem>>, %arg4: memref<49x384xf32, #tpu.memory_space<vmem>>) attributes {dimension_semantics = [#tpu.dimension_semantics<parallel>], iteration_bounds = array<i64: 2>, scalar_prefetch = 0 : i64, scratch_operands = 0 : i64, tpu.core_type = #tpu.core_type<tc>, window_params = [{pipeline_mode = #tpu.pipeline_mode<synchronous>, transform_indices = @transform_0, window_bounds = array<i64: 49, 3072>}, {transform_indices = @transform_1, window_bounds = array<i64: 3072, 384>}, {transform_indices = @transform_2, window_bounds = array<i64: 1, 384>}, {transform_indices = @transform_3, window_bounds = array<i64: 49, 384>}]} {
    %c0 = arith.constant 0 : index
    %c0_0 = arith.constant 0 : index
    %0 = vector.load %arg1[%c0, %c0_0] : memref<49x3072xf32, #tpu.memory_space<vmem>>, vector<49x3072xf32>
    %c0_1 = arith.constant 0 : index
    %c0_2 = arith.constant 0 : index
    %1 = vector.load %arg2[%c0_1, %c0_2] : memref<3072x384xf32, #tpu.memory_space<vmem>>, vector<3072x384xf32>
    %cst = arith.constant dense<0.000000e+00> : vector<49x384xf32>
    %2 = tpu.matmul %0, %1, %cst {dimension_numbers = #tpu.dot_dimension_numbers<[1], [0], [0], [1], [0, 0, 1, 1], [], []>} : vector<49x3072xf32>, vector<3072x384xf32>, vector<49x384xf32> -> vector<49x384xf32>
    %c0_3 = arith.constant 0 : index
    %c0_4 = arith.constant 0 : index
    %3 = vector.load %arg3[%c0_3, %c0_4] : memref<1x384xf32, #tpu.memory_space<vmem>>, vector<1x384xf32>
    %4 = vector.broadcast %3 : vector<1x384xf32> to vector<49x384xf32>
    %5 = arith.addf %4, %2 : vector<49x384xf32>
    %c0_5 = arith.constant 0 : index
    %c0_6 = arith.constant 0 : index
    %6 = vector.load %arg4[%c0_5, %c0_6] : memref<49x384xf32, #tpu.memory_space<vmem>>, vector<49x384xf32>
    tpu.vector_store %arg4[%c0_5, %c0_6], %5 {strides = array<i32>} : memref<49x384xf32, #tpu.memory_space<vmem>>, vector<49x384xf32>,
    return
  }
  func.func @transform_0(%arg0: i32) -> (i32, i32) {
    %c0_i32 = arith.constant 0 : i32
    %c0_i32_0 = arith.constant 0 : i32
    %c0_i32_1 = arith.constant 0 : i32
    return %c0_i32, %c0_i32_0 : i32, i32
  }
  func.func @transform_1(%arg0: i32) -> (i32, i32) {
    %c0_i32 = arith.constant 0 : i32
    %c0_i32_0 = arith.constant 0 : i32
    return %c0_i32, %arg0 : i32, i32
  }
  func.func @transform_2(%arg0: i32) -> (i32, i32) {
    %c0_i32 = arith.constant 0 : i32
    %c0_i32_0 = arith.constant 0 : i32
    return %c0_i32, %arg0 : i32, i32
  }
  func.func @transform_3(%arg0: i32) -> (i32, i32) {
    %c0_i32 = arith.constant 0 : i32
    %c0_i32_0 = arith.constant 0 : i32
    return %c0_i32, %arg0 : i32, i32
  }
}

</mosaic_0001>

<bundles_post_ra>
// kernel: model_forward.1
= control target key start
LH: loop header
LB: loop body
LE: loop exit
PB: predicated region body
PF: predicated region fallthrough
CT: control target
= control target key end

     0   :  { %8 = vsyncpa [#allocation3], 0  ;;  %s8254_s0 = inlined_call_operand.vmem [shape: f32[49,3072], index: 0, kind: input, shape index: {}]   ;;  %s8255_s1 = inlined_call_operand.hbm [shape: f32[3072,768], index: 1, kind: input, shape index: {}]   ;;  %s8256_s2 = inlined_call_operand.vmem [shape: f32[1,768], index: 2, kind: input, shape index: {}]   ;;  %s8257_s3 = inlined_call_operand.vmem [shape: f32[49,768], index: 3, kind: output, shape index: {}]  }
   0x1   :  { %10 = vsyncpa [#allocation3 + $0x1], 0  ;;  %s4934_s12 = smov 0   ;;  %s4936_s13 = smov 0  }
   0x2   :  { %s4938_s14 = smov 0   ;;  %s4940_s15 = smov 0  }
   0x3 LB: > { %s4953_s16 = sadd.s32 4294967295, %s4909_s15   ;;  %s4956_s17 = sadd.s32 1, %s4909_s15   ;;  %s4909_s15 = sphi %s4940_s15, %s8265_s15   ;;  %s4905_s14 = sphi %s4938_s14, %s8264_s14   ;;  %s4901_s13 = sphi %s4936_s13, %s8263_s13   ;;  %s4897_s12 = sphi %s4934_s12, %s8262_s12  }
   0x4   : > { %s41_s18 = ssub.s32 %s4909_s15, %s4956_s17  ;;  %s44_s19 = sadd.s32 1, %s4905_s14 }
   0x5   : > { %p42_p0 = scmp.eq.s32.totalorder %s41_s18, 0  ;;  %p51_p1 = scmp.ne.s32.totalorder %s4905_s14, %s4901_s13 }
   0x6   : > { %p52_p2 = scmp.eq.s32.totalorder %s4909_s15, 0  ;;  %p57_p3 = scmp.ne.s32.totalorder %s4901_s13, %s4897_s12 }
   0x7   : > { %s4966_s20 = scalar_select %p42_p0, %s4905_s14, %s44_s19  }
   0x8   : > { %p53_p4 = por %p52_p2, %p51_p1  ;;  %p58_p5 = scmp.eq.s32.totalorder %s4953_s16, 0 }
   0x9   : > { %p107_p6 = scmp.eq.s32.totalorder %s4953_s16, 1  ;;  %p4471_p8 = scmp.lt.s32.totalorder %s4909_s15, 2 }
   0xa   : > { %p4970_p7 = por %p58_p5, %p57_p3  ;;  %s136_s23 = sand.u32 1, %s4905_s14  }
   0xb   : > { %p4975_p9 = por %p107_p6, %p51_p1  ;;  %s4462_s24 = smul.u32 9216, %s136_s23 }
   0xc   : > { %s4460_s25 = smul.u32 24, %s4909_s15  ;;  %p4981_p10 = pnand %p4471_p8, %p53_p4 }
   0xd   : > { %s140_s30 = scalar_lea.vmem [#allocation2], %s4462_s24  ;;  %s137_s6 = scalar_lea.sflag [#allocation3], %s136_s23 }
   0xe   : > { %s145_s29 = scalar_lea.hbm %s8255_s1, %s4460_s25  ;;  %s148_s4 = sshll.u32 %s140_s30, 4  ;;  %s149_s4 = int_to_ptr.vmem [resolvable:$true] %s148_s4 }
   0xf   : > { %s146_s5 = sshll.u32 %s145_s29, 4  ;;  %p4849_p12 = pneg %p4981_p10  ;;  %s147_s5 = int_to_ptr.hbm [resolvable:$true] %s146_s5 }
  0x10   : > { %s4845_s7 = sshra.s32 %s147_s5, 4  ;;  %s4852_s11 = scalar_lea.hbm %s8255_s1, 18432  ;;  %s4846_s7 = int_to_ptr.hbm [resolvable:$true] %s4845_s7 }
  0x11   : > { %s4847_s8 = scalar_lea.hbm %s4846_s7, 9216  ;;  %p4853_p1 = scmp.lt.s32.totalorder %s4846_s7, %s8255_s1 }
  0x12   : > { %p4848_p11 = scmp.ne.s32.totalorder %s4846_s7, %s4847_s8  ;;  %p4854_p2 = scmp.lt.s32.totalorder %s4852_s11, %s4847_s8 }
  0x14   : > { %p4850_p13 = pnand %p4849_p12, %p4848_p11  ;;  %p4855_p3 = por %p4854_p2, %p4853_p1 }
  0x16   : > { %p4851_p0 = pneg %p4850_p13 }
  0x18   : > { %p4856_p4 = pnand %p4855_p3, %p4851_p0 }
  0x1a   : > { %4859 = shalt.err (!%p4856_p4)
}
  0x1b   : > { %s4911_s19 = smov 768   ;;  %s4912_s23 = smov 384  }
  0x1c   : > { %s4913_s24 = smov 24   ;;  %p4456_p5 = scmp.ge.s32.totalorder %s4909_s15, 1 }
  0x1d   : > { %4470 = dma.hbm_to_vmem [thread:$0]  (!%p4981_p10), %s147_s5, 147456, %s149_s4, %s137_s6, %s4911_s19, %s4912_s23, %s4913_s24  }
  0x1e   : > { %p164_p6 = scmp.lt.s32.totalorder %s4909_s15, 3 }
  0x20   : > { %p165_p8 = pnand %p4456_p5, %p164_p6 }
  0x21   : > { %s5001_s25 = sand.u32 (!%p165_p8), 1, %s4901_s13  }
  0x22   : > { %168 = sbr.rel (%p165_p8) target bundleno = 1221 (0x4c5), region = 32  ;;  %s171_s28 = scalar_lea.sflag (!%p165_p8), [#allocation3], %s5001_s25 }
  0x23   : > { %s4463_s27 = smul.u32 (!%p165_p8), 9216, %s5001_s25 }
  0x25   : > { %s5005_s29 = scalar_lea.vmem (!%p165_p8), [#allocation2], %s4463_s27 }
  0x27   : > { %4892 = dma.done.wait (%p4970_p7), %s171_s28, 147456  }
  0x28   : > { %4894 = vsyncadd (%p4970_p7), %s171_s28, 4294819840  ;;  %v421_v0 = vld [vmem:[%s5005_s29 + $0x168] sm:$0xff]  ;;  %v418_v2 = vld [vmem:[%s5005_s29 + $0x150] sm:$0xff]  ;;  %s202_s21 = smul.u32 3, %s4953_s16 }
  0x29   : > { %v517_v1 = vld [vmem:[%s5005_s29 + $0x468] sm:$0xff]  ;;  %1528 = vmatpush.msra.mxu0 %v421_v0  ;;  %v514_v4 = vld [vmem:[%s5005_s29 + $0x450] sm:$0xff]  ;;  %v415_v6 = vld [vmem:[%s5005_s29 + $0x138] sm:$0xff]  ;;  %s4464_s30 = smul.u32 168, %s5001_s25 }
  0x2a   : > { %1604 = vmatpush.msra.mxu2 %v517_v1  ;;  %v469_v3 = vld [vmem:[%s5005_s29 + $0x2e8] sm:$0xff]  ;;  %v466_v7 = vld [vmem:[%s5005_s29 + $0x2d0] sm:$0xff]  ;;  %v511_v8 = vld [vmem:[%s5005_s29 + $0x438] sm:$0xff]  ;;  %p6299_p7 = scmp.lt.s32.totalorder %s202_s21, 5 }
  0x2b   : > { %v565_v5 = vld [vmem:[%s5005_s29 + $0x5e8] sm:$0xff]  ;;  %1566 = vmatpush.msra.mxu1 %v469_v3  ;;  %1529 = vmatpush.msra.mxu0 %v418_v2  ;;  %v562_v9 = vld [vmem:[%s5005_s29 + $0x5d0] sm:$0xff]  ;;  %v463_v10 = vld [vmem:[%s5005_s29 + $0x2b8] sm:$0xff]  ;;  %s6392_s10 = scalar_lea.vmem [#allocation4], %s4464_s30 }
  0x2c   : > { %1642 = vmatpush.msra.mxu3 %v565_v5  ;;  %1605 = vmatpush.msra.mxu2 %v514_v4  ;;  %v412_v11 = vld [vmem:[%s5005_s29 + $0x120] sm:$0xff]  ;;  %v559_v13 = vld [vmem:[%s5005_s29 + $0x5b8] sm:$0xff]  ;;  %v409_v16 = vld [vmem:[%s5005_s29 + $0x108] sm:$0xff]  ;;  %s8267_s21 = smov (!%p6299_p7, %s202_s21), 5 }
  0x2d   : > { %1567 = vmatpush.msra.mxu1 %v466_v7  ;;  %v508_v12 = vld [vmem:[%s5005_s29 + $0x420] sm:$0xff]  ;;  %1530 = vmatpush.msra.mxu0 %v415_v6  ;;  %v505_v17 = vld [vmem:[%s5005_s29 + $0x408] sm:$0xff]  ;;  %v406_v20 = vld [vmem:[%s5005_s29 + $0xf0] sm:$0xff]  ;;  %s6341_s18 = scalar_lea.vmem %s8256_s2, %s8267_s21 }
  0x2e   : > { %1643 = vmatpush.msra.mxu3 %v562_v9  ;;  %1606 = vmatpush.msra.mxu2 %v511_v8  ;;  %v460_v14 = vld [vmem:[%s5005_s29 + $0x2a0] sm:$0xff]  ;;  %v457_v18 = vld [vmem:[%s5005_s29 + $0x288] sm:$0xff]  ;;  %v502_v21 = vld [vmem:[%s5005_s29 + $0x3f0] sm:$0xff] }
  0x2f   : > { %v556_v15 = vld [vmem:[%s5005_s29 + $0x5a0] sm:$0xff]  ;;  %1568 = vmatpush.msra.mxu1 %v463_v10  ;;  %1531 = vmatpush.msra.mxu0 %v412_v11  ;;  %v553_v19 = vld [vmem:[%s5005_s29 + $0x588] sm:$0xff]  ;;  %v454_v22 = vld [vmem:[%s5005_s29 + $0x270] sm:$0xff] }
  0x30   : > { %1644 = vmatpush.msra.mxu3 %v559_v13  ;;  %1607 = vmatpush.msra.mxu2 %v508_v12  ;;  %v550_v23 = vld [vmem:[%s5005_s29 + $0x570] sm:$0xff]  ;;  %v403_v24 = vld [vmem:[%s5005_s29 + $0xd8] sm:$0xff]  ;;  %v400_v28 = vld [vmem:[%s5005_s29 + $0xc0] sm:$0xff] }
  0x31   : > { %1569 = vmatpush.msra.mxu1 %v460_v14  ;;  %1532 = vmatpush.msra.mxu0 %v409_v16  ;;  %v499_v25 = vld [vmem:[%s5005_s29 + $0x3d8] sm:$0xff]  ;;  %v496_v29 = vld [vmem:[%s5005_s29 + $0x3c0] sm:$0xff]  ;;  %v397_v32 = vld [vmem:[%s5005_s29 + $0xa8] sm:$0xff] }
  0x32   : > { %1645 = vmatpush.msra.mxu3 %v556_v15  ;;  %1608 = vmatpush.msra.mxu2 %v505_v17  ;;  %v451_v26 = vld [vmem:[%s5005_s29 + $0x258] sm:$0xff]  ;;  %v448_v30 = vld [vmem:[%s5005_s29 + $0x240] sm:$0xff]  ;;  %v493_v33 = vld [vmem:[%s5005_s29 + $0x3a8] sm:$0xff] }
  0x33   : > { %1570 = vmatpush.msra.mxu1 %v457_v18  ;;  %1533 = vmatpush.msra.mxu0 %v406_v20  ;;  %v547_v27 = vld [vmem:[%s5005_s29 + $0x558] sm:$0xff]  ;;  %v544_v31 = vld [vmem:[%s5005_s29 + $0x540] sm:$0xff]  ;;  %v445_v34 = vld [vmem:[%s5005_s29 + $0x228] sm:$0xff] }
  0x34   : > { %1646 = vmatpush.msra.mxu3 %v553_v19  ;;  %1609 = vmatpush.msra.mxu2 %v502_v21  ;;  %v541_v35 = vld [vmem:[%s5005_s29 + $0x528] sm:$0xff]  ;;  %v394_v36 = vld [vmem:[%s5005_s29 + $0x90] sm:$0xff]  ;;  %v391_v40 = vld [vmem:[%s5005_s29 + $0x78] sm:$0xff] }
  0x35   : > { %1571 = vmatpush.msra.mxu1 %v454_v22  ;;  %1534 = vmatpush.msra.mxu0 %v403_v24  ;;  %v490_v37 = vld [vmem:[%s5005_s29 + $0x390] sm:$0xff]  ;;  %v487_v41 = vld [vmem:[%s5005_s29 + $0x378] sm:$0xff]  ;;  %v388_v44 = vld [vmem:[%s5005_s29 + $0x60] sm:$0xff] }
  0x36   : > { %1647 = vmatpush.msra.mxu3 %v550_v23  ;;  %1610 = vmatpush.msra.mxu2 %v499_v25  ;;  %v442_v38 = vld [vmem:[%s5005_s29 + $0x210] sm:$0xff]  ;;  %v439_v42 = vld [vmem:[%s5005_s29 + $0x1f8] sm:$0xff]  ;;  %v484_v45 = vld [vmem:[%s5005_s29 + $0x360] sm:$0xff] }
  0x37   : > { %1572 = vmatpush.msra.mxu1 %v451_v26  ;;  %1535 = vmatpush.msra.mxu0 %v400_v28  ;;  %v538_v39 = vld [vmem:[%s5005_s29 + $0x510] sm:$0xff]  ;;  %v535_v43 = vld [vmem:[%s5005_s29 + $0x4f8] sm:$0xff]  ;;  %v436_v46 = vld [vmem:[%s5005_s29 + $0x1e0] sm:$0xff] }
  0x38   : > { %1648 = vmatpush.msra.mxu3 %v547_v27  ;;  %1611 = vmatpush.msra.mxu2 %v496_v29  ;;  %v532_v47 = vld [vmem:[%s5005_s29 + $0x4e0] sm:$0xff]  ;;  %v385_v48 = vld [vmem:[%s5005_s29 + $0x48] sm:$0xff]  ;;  %v382_v52 = vld [vmem:[%s5005_s29 + $0x30] sm:$0xff] }
  0x39   : > { %1573 = vmatpush.msra.mxu1 %v448_v30  ;;  %1536 = vmatpush.msra.mxu0 %v397_v32  ;;  %v481_v49 = vld [vmem:[%s5005_s29 + $0x348] sm:$0xff]  ;;  %v478_v53 = vld [vmem:[%s5005_s29 + $0x330] sm:$0xff]  ;;  %v379_v56 = vld [vmem:[%s5005_s29 + $0x18] sm:$0xff] }
  0x3a   : > { %1649 = vmatpush.msra.mxu3 %v544_v31  ;;  %1612 = vmatpush.msra.mxu2 %v493_v33  ;;  %v433_v50 = vld [vmem:[%s5005_s29 + $0x1c8] sm:$0xff]  ;;  %v430_v54 = vld [vmem:[%s5005_s29 + $0x1b0] sm:$0xff]  ;;  %v475_v57 = vld [vmem:[%s5005_s29 + $0x318] sm:$0xff] }
  0x3b   : > { %1574 = vmatpush.msra.mxu1 %v445_v34  ;;  %1537 = vmatpush.msra.mxu0 %v394_v36  ;;  %v529_v51 = vld [vmem:[%s5005_s29 + $0x4c8] sm:$0xff]  ;;  %v526_v55 = vld [vmem:[%s5005_s29 + $0x4b0] sm:$0xff]  ;;  %v427_v58 = vld [vmem:[%s5005_s29 + $0x198] sm:$0xff] }
  0x3c   : > { %1650 = vmatpush.msra.mxu3 %v541_v35  ;;  %1613 = vmatpush.msra.mxu2 %v490_v37  ;;  %v523_v59 = vld [vmem:[%s5005_s29 + $0x498] sm:$0xff]  ;;  %v376_v60 = vld [vmem:[%s5005_s29] sm:$0xff]  ;;  %v210_v63 = vld [vmem:[%s8254_s0 + $0x10] sm:$0xff] }
  0x3d   : > { %1575 = vmatpush.msra.mxu1 %v442_v38  ;;  %1538 = vmatpush.msra.mxu0 %v391_v40  ;;  %v472_v61 = vld [vmem:[%s5005_s29 + $0x300] sm:$0xff]  ;;  %v709_v0 = vld [vmem:[%s5005_s29 + $0xa68] sm:$0xff]  ;;  %v211_v4 = vld [vmem:[%s8254_s0 + $0x18] sm:$0xff] }
  0x3e   : > { %1651 = vmatpush.msra.mxu3 %v538_v39  ;;  %1614 = vmatpush.msra.mxu2 %v487_v41  ;;  %v208_v62 = vld [vmem:[%s8254_s0] sm:$0xff]  ;;  %v209_v3 = vld [vmem:[%s8254_s0 + $0x8] sm:$0xff]  ;;  %v706_v8 = vld [vmem:[%s5005_s29 + $0xa50] sm:$0xff] }
  0x3f   : > { %1576 = vmatpush.msra.mxu1 %v439_v42  ;;  %1539 = vmatpush.msra.mxu0 %v388_v44  ;;  %v424_v1 = vld [vmem:[%s5005_s29 + $0x180] sm:$0xff]  ;;  %v613_v5 = vld [vmem:[%s5005_s29 + $0x768] sm:$0xff]  ;;  %v610_v9 = vld [vmem:[%s5005_s29 + $0x750] sm:$0xff] }
  0x40   : > { %1652 = vmatpush.msra.mxu3 %v535_v43  ;;  %1615 = vmatpush.msra.mxu2 %v484_v45  ;;  %v520_v2 = vld [vmem:[%s5005_s29 + $0x480] sm:$0xff]  ;;  %v757_v6 = vld [vmem:[%s5005_s29 + $0xbe8] sm:$0xff]  ;;  %v754_v10 = vld [vmem:[%s5005_s29 + $0xbd0] sm:$0xff] }
  0x41   : > { %1577 = vmatpush.msra.mxu1 %v436_v46  ;;  %1540 = vmatpush.msra.mxu0 %v385_v48  ;;  %v661_v7 = vld [vmem:[%s5005_s29 + $0x8e8] sm:$0xff]  ;;  %v658_v11 = vld [vmem:[%s5005_s29 + $0x8d0] sm:$0xff]  ;;  %v703_v12 = vld [vmem:[%s5005_s29 + $0xa38] sm:$0xff] }
  0x42   : > { %1653 = vmatpush.msra.mxu3 %v532_v47  ;;  %1616 = vmatpush.msra.mxu2 %v481_v49  ;;  %v607_v13 = vld [vmem:[%s5005_s29 + $0x738] sm:$0xff]  ;;  %v232_v14 = vld [vmem:[%s8254_s0 + $0xc0] sm:$0xff]  ;;  %v234_v15 = vld [vmem:[%s8254_s0 + $0xd0] sm:$0xff] }
  0x43   : > { %1578 = vmatpush.msra.mxu1 %v433_v50  ;;  %1541 = vmatpush.msra.mxu0 %v382_v52  ;;  %v751_v16 = vld [vmem:[%s5005_s29 + $0xbb8] sm:$0xff]  ;;  %v233_v18 = vld [vmem:[%s8254_s0 + $0xc8] sm:$0xff]  ;;  %v700_v19 = vld [vmem:[%s5005_s29 + $0xa20] sm:$0xff] }
  0x44   : > { %1654 = vmatpush.msra.mxu3 %v529_v51  ;;  %1617 = vmatpush.msra.mxu2 %v478_v53  ;;  %v655_v17 = vld [vmem:[%s5005_s29 + $0x8b8] sm:$0xff]  ;;  %v604_v21 = vld [vmem:[%s5005_s29 + $0x720] sm:$0xff]  ;;  %v697_v23 = vld [vmem:[%s5005_s29 + $0xa08] sm:$0xff] }
  0x45   : > { %1579 = vmatpush.msra.mxu1 %v430_v54  ;;  %1542 = vmatpush.msra.mxu0 %v379_v56  ;;  %v235_v20 = vld [vmem:[%s8254_s0 + $0xd8] sm:$0xff]  ;;  %v748_v22 = vld [vmem:[%s5005_s29 + $0xba0] sm:$0xff]  ;;  %v601_v25 = vld [vmem:[%s5005_s29 + $0x708] sm:$0xff] }
  0x46   : > { %1655 = vmatpush.msra.mxu3 %v526_v55  ;;  %1618 = vmatpush.msra.mxu2 %v475_v57  ;;  %v652_v24 = vld [vmem:[%s5005_s29 + $0x8a0] sm:$0xff]  ;;  %v745_v26 = vld [vmem:[%s5005_s29 + $0xb88] sm:$0xff]  ;;  %v694_v27 = vld [vmem:[%s5005_s29 + $0x9f0] sm:$0xff] }
  0x47   : > { %1580 = vmatpush.msra.mxu1 %v427_v58  ;;  %1543 = vmatpush.msra.mxu0 %v376_v60  ;;  %v649_v28 = vld [vmem:[%s5005_s29 + $0x888] sm:$0xff]  ;;  %v598_v29 = vld [vmem:[%s5005_s29 + $0x6f0] sm:$0xff]  ;;  %v256_v30 = vld [vmem:[%s8254_s0 + $0x180] sm:$0xff] }
  0x48   : > { %1656 = vmatpush.msra.mxu3 %v523_v59  ;;  %1619 = vmatpush.msra.mxu2 %v472_v61  ;;  %v258_v31 = vld [vmem:[%s8254_s0 + $0x190] sm:$0xff]  ;;  %v691_v33 = vld [vmem:[%s5005_s29 + $0x9d8] sm:$0xff]  ;;  %v257_v34 = vld [vmem:[%s8254_s0 + $0x188] sm:$0xff] }
  0x49   : > { %1544 = vmatmul.f32.vlgmr.msra.gmra.mxu0 %v208_v62  ;;  %1620 = vmatmul.f32.vlgmr.msra.gmra.mxu2 %v210_v63  ;;  %v742_v32 = vld [vmem:[%s5005_s29 + $0xb70] sm:$0xff]  ;;  %v595_v35 = vld [vmem:[%s5005_s29 + $0x6d8] sm:$0xff]  ;;  %v688_v39 = vld [vmem:[%s5005_s29 + $0x9c0] sm:$0xff] }
  0x4a   : > { %1756 = vmatpush.msrb.mxu2 %v709_v0  ;;  %1581 = vmatpush.msra.mxu1 %v424_v1  ;;  %v259_v36 = vld [vmem:[%s8254_s0 + $0x198] sm:$0xff]  ;;  %v646_v37 = vld [vmem:[%s5005_s29 + $0x870] sm:$0xff]  ;;  %v592_v41 = vld [vmem:[%s5005_s29 + $0x6c0] sm:$0xff] }
  0x4b   : > { %1657 = vmatpush.msra.mxu3 %v520_v2  ;;  %1582 = vmatmul.f32.vlgmr.msra.gmra.mxu1 %v209_v3  ;;  %v739_v38 = vld [vmem:[%s5005_s29 + $0xb58] sm:$0xff]  ;;  %v736_v42 = vld [vmem:[%s5005_s29 + $0xb40] sm:$0xff]  ;;  %v685_v43 = vld [vmem:[%s5005_s29 + $0x9a8] sm:$0xff] }
  0x4c   : > { %1658 = vmatmul.f32.vlgmr.msra.gmra.mxu3 %v211_v4  ;;  %1680 = vmatpush.msrb.mxu0 %v613_v5  ;;  %v643_v40 = vld [vmem:[%s5005_s29 + $0x858] sm:$0xff]  ;;  %v640_v44 = vld [vmem:[%s5005_s29 + $0x840] sm:$0xff]  ;;  %v589_v45 = vld [vmem:[%s5005_s29 + $0x6a8] sm:$0xff] }
  0x4d   : > { %1794 = vmatpush.msrb.mxu3 %v757_v6  ;;  %1718 = vmatpush.msrb.mxu1 %v661_v7  ;;  %v280_v46 = vld [vmem:[%s8254_s0 + $0x240] sm:$0xff]  ;;  %v282_v47 = vld [vmem:[%s8254_s0 + $0x250] sm:$0xff]  ;;  %v733_v48 = vld [vmem:[%s5005_s29 + $0xb28] sm:$0xff] }
  0x4e   : > { %1757 = vmatpush.msrb.mxu2 %v706_v8  ;;  %1681 = vmatpush.msrb.mxu0 %v610_v9  ;;  %v637_v49 = vld [vmem:[%s5005_s29 + $0x828] sm:$0xff]  ;;  %v682_v51 = vld [vmem:[%s5005_s29 + $0x990] sm:$0xff]  ;;  %v283_v52 = vld [vmem:[%s8254_s0 + $0x258] sm:$0xff] }
  0x4f   : > { %1795 = vmatpush.msrb.mxu3 %v754_v10  ;;  %1719 = vmatpush.msrb.mxu1 %v658_v11  ;;  %v281_v50 = vld [vmem:[%s8254_s0 + $0x248] sm:$0xff]  ;;  %v586_v53 = vld [vmem:[%s5005_s29 + $0x690] sm:$0xff]  ;;  %v679_v55 = vld [vmem:[%s5005_s29 + $0x978] sm:$0xff] }
  0x50   : > { %1758 = vmatpush.msrb.mxu2 %v703_v12  ;;  %1682 = vmatpush.msrb.mxu0 %v607_v13  ;;  %v730_v54 = vld [vmem:[%s5005_s29 + $0xb10] sm:$0xff]  ;;  %v583_v57 = vld [vmem:[%s5005_s29 + $0x678] sm:$0xff]  ;;  %v676_v59 = vld [vmem:[%s5005_s29 + $0x960] sm:$0xff] }
  0x51   : > { %1547 = vmatmul.f32.gmra.mxu0 %v232_v14  ;;  %1623 = vmatmul.f32.gmra.mxu2 %v234_v15  ;;  %v634_v56 = vld [vmem:[%s5005_s29 + $0x810] sm:$0xff]  ;;  %v727_v58 = vld [vmem:[%s5005_s29 + $0xaf8] sm:$0xff]  ;;  %v580_v61 = vld [vmem:[%s5005_s29 + $0x660] sm:$0xff] }
  0x52   : > { %1796 = vmatpush.msrb.mxu3 %v751_v16  ;;  %1720 = vmatpush.msrb.mxu1 %v655_v17  ;;  %v631_v60 = vld [vmem:[%s5005_s29 + $0x7f8] sm:$0xff]  ;;  %v304_v62 = vld [vmem:[%s8254_s0 + $0x300] sm:$0xff]  ;;  %v306_v63 = vld [vmem:[%s8254_s0 + $0x310] sm:$0xff] }
  0x53   : > { %1585 = vmatmul.f32.gmra.mxu1 %v233_v18  ;;  %1759 = vmatpush.msrb.mxu2 %v700_v19  ;;  %v724_v0 = vld [vmem:[%s5005_s29 + $0xae0] sm:$0xff]  ;;  %v673_v1 = vld [vmem:[%s5005_s29 + $0x948] sm:$0xff]  ;;  %v307_v4 = vld [vmem:[%s8254_s0 + $0x318] sm:$0xff] }
  0x54   : > { %1661 = vmatmul.f32.gmra.mxu3 %v235_v20  ;;  %1683 = vmatpush.msrb.mxu0 %v604_v21  ;;  %v305_v2 = vld [vmem:[%s8254_s0 + $0x308] sm:$0xff]  ;;  %v628_v5 = vld [vmem:[%s5005_s29 + $0x7e0] sm:$0xff]  ;;  %v670_v7 = vld [vmem:[%s5005_s29 + $0x930] sm:$0xff] }
  0x55   : > { %1797 = vmatpush.msrb.mxu3 %v748_v22  ;;  %1760 = vmatpush.msrb.mxu2 %v697_v23  ;;  %v577_v3 = vld [vmem:[%s5005_s29 + $0x648] sm:$0xff]  ;;  %v574_v9 = vld [vmem:[%s5005_s29 + $0x630] sm:$0xff]  ;;  %v667_v11 = vld [vmem:[%s5005_s29 + $0x918] sm:$0xff] }
  0x56   : > { %1721 = vmatpush.msrb.mxu1 %v652_v24  ;;  %1684 = vmatpush.msrb.mxu0 %v601_v25  ;;  %v721_v6 = vld [vmem:[%s5005_s29 + $0xac8] sm:$0xff]  ;;  %v718_v10 = vld [vmem:[%s5005_s29 + $0xab0] sm:$0xff]  ;;  %v571_v13 = vld [vmem:[%s5005_s29 + $0x618] sm:$0xff] }
  0x57   : > { %1798 = vmatpush.msrb.mxu3 %v745_v26  ;;  %1761 = vmatpush.msrb.mxu2 %v694_v27  ;;  %v625_v8 = vld [vmem:[%s5005_s29 + $0x7c8] sm:$0xff]  ;;  %v622_v12 = vld [vmem:[%s5005_s29 + $0x7b0] sm:$0xff]  ;;  %v328_v14 = vld [vmem:[%s8254_s0 + $0x3c0] sm:$0xff] }
  0x58   : > { %1722 = vmatpush.msrb.mxu1 %v649_v28  ;;  %1685 = vmatpush.msrb.mxu0 %v598_v29  ;;  %v330_v15 = vld [vmem:[%s8254_s0 + $0x3d0] sm:$0xff]  ;;  %v715_v16 = vld [vmem:[%s5005_s29 + $0xa98] sm:$0xff]  ;;  %v329_v18 = vld [vmem:[%s8254_s0 + $0x3c8] sm:$0xff] }
  0x59   : > { %1550 = vmatmul.f32.gmra.mxu0 %v256_v30  ;;  %1626 = vmatmul.f32.gmra.mxu2 %v258_v31  ;;  %v619_v17 = vld [vmem:[%s5005_s29 + $0x798] sm:$0xff]  ;;  %v664_v19 = vld [vmem:[%s5005_s29 + $0x900] sm:$0xff]  ;;  %v901_v23 = vld [vmem:[%s5005_s29 + $0x1068] sm:$0xff] }
  0x5a   : > { %1799 = vmatpush.msrb.mxu3 %v742_v32  ;;  %1762 = vmatpush.msrb.mxu2 %v691_v33  ;;  %v331_v20 = vld [vmem:[%s8254_s0 + $0x3d8] sm:$0xff]  ;;  %v568_v21 = vld [vmem:[%s5005_s29 + $0x600] sm:$0xff]  ;;  %v805_v25 = vld [vmem:[%s5005_s29 + $0xd68] sm:$0xff] }
  0x5b   : > { %1588 = vmatmul.f32.gmra.mxu1 %v257_v34  ;;  %1686 = vmatpush.msrb.mxu0 %v595_v35  ;;  %v712_v22 = vld [vmem:[%s5005_s29 + $0xa80] sm:$0xff]  ;;  %v949_v26 = vld [vmem:[%s5005_s29 + $0x11e8] sm:$0xff]  ;;  %v898_v28 = vld [vmem:[%s5005_s29 + $0x1050] sm:$0xff] }
  0x5c   : > { %1664 = vmatmul.f32.gmra.mxu3 %v259_v36  ;;  %1723 = vmatpush.msrb.mxu1 %v646_v37  ;;  %v616_v24 = vld [vmem:[%s5005_s29 + $0x780] sm:$0xff]  ;;  %v853_v27 = vld [vmem:[%s5005_s29 + $0xee8] sm:$0xff]  ;;  %v802_v29 = vld [vmem:[%s5005_s29 + $0xd50] sm:$0xff] }
  0x5d   : > { %1800 = vmatpush.msrb.mxu3 %v739_v38  ;;  %1763 = vmatpush.msrb.mxu2 %v688_v39  ;;  %v352_v30 = vld [vmem:[%s8254_s0 + $0x480] sm:$0x1]  ;;  %v354_v31 = vld [vmem:[%s8254_s0 + $0x490] sm:$0x1]  ;;  %v895_v33 = vld [vmem:[%s5005_s29 + $0x1038] sm:$0xff] }
  0x5e   : > { %1724 = vmatpush.msrb.mxu1 %v643_v40  ;;  %1687 = vmatpush.msrb.mxu0 %v592_v41  ;;  %v946_v32 = vld [vmem:[%s5005_s29 + $0x11d0] sm:$0xff]  ;;  %v353_v34 = vld [vmem:[%s8254_s0 + $0x488] sm:$0x1]  ;;  %v799_v35 = vld [vmem:[%s5005_s29 + $0xd38] sm:$0xff] }
  0x5f   : > { %1801 = vmatpush.msrb.mxu3 %v736_v42  ;;  %1764 = vmatpush.msrb.mxu2 %v685_v43  ;;  %v355_v36 = vld [vmem:[%s8254_s0 + $0x498] sm:$0x1]  ;;  %v850_v37 = vld [vmem:[%s5005_s29 + $0xed0] sm:$0xff]  ;;  %v892_v39 = vld [vmem:[%s5005_s29 + $0x1020] sm:$0xff] }
  0x60   : > { %1725 = vmatpush.msrb.mxu1 %v640_v44  ;;  %1688 = vmatpush.msrb.mxu0 %v589_v45  ;;  %v943_v38 = vld [vmem:[%s5005_s29 + $0x11b8] sm:$0xff]  ;;  %v796_v41 = vld [vmem:[%s5005_s29 + $0xd20] sm:$0xff]  ;;  %v889_v43 = vld [vmem:[%s5005_s29 + $0x1008] sm:$0xff] }
  0x61   : > { %1553 = vmatmul.f32.gmra.mxu0 %v280_v46  ;;  %1629 = vmatmul.f32.gmra.mxu2 %v282_v47  ;;  %v847_v40 = vld [vmem:[%s5005_s29 + $0xeb8] sm:$0xff]  ;;  %v940_v42 = vld [vmem:[%s5005_s29 + $0x11a0] sm:$0xff]  ;;  %v793_v45 = vld [vmem:[%s5005_s29 + $0xd08] sm:$0xff] }
  0x62   : > { %1802 = vmatpush.msrb.mxu3 %v733_v48  ;;  %1726 = vmatpush.msrb.mxu1 %v637_v49  ;;  %v844_v44 = vld [vmem:[%s5005_s29 + $0xea0] sm:$0xff]  ;;  %v214_v47 = vld [vmem:[%s8254_s0 + $0x30] sm:$0xff]  ;;  %v937_v48 = vld [vmem:[%s5005_s29 + $0x1188] sm:$0xff] }
  0x63   : > { %1591 = vmatmul.f32.gmra.mxu1 %v281_v50  ;;  %1765 = vmatpush.msrb.mxu2 %v682_v51  ;;  %v212_v46 = vld [vmem:[%s8254_s0 + $0x20] sm:$0xff]  ;;  %v841_v49 = vld [vmem:[%s5005_s29 + $0xe88] sm:$0xff]  ;;  %v886_v51 = vld [vmem:[%s5005_s29 + $0xff0] sm:$0xff] }
  0x64   : > { %1667 = vmatmul.f32.gmra.mxu3 %v283_v52  ;;  %1689 = vmatpush.msrb.mxu0 %v586_v53  ;;  %v213_v50 = vld [vmem:[%s8254_s0 + $0x28] sm:$0xff]  ;;  %v215_v52 = vld [vmem:[%s8254_s0 + $0x38] sm:$0xff]  ;;  %v790_v53 = vld [vmem:[%s5005_s29 + $0xcf0] sm:$0xff] }
  0x65   : > { %1803 = vmatpush.msrb.mxu3 %v730_v54  ;;  %1766 = vmatpush.msrb.mxu2 %v679_v55  ;;  %v934_v54 = vld [vmem:[%s5005_s29 + $0x1170] sm:$0xff]  ;;  %v883_v55 = vld [vmem:[%s5005_s29 + $0xfd8] sm:$0xff] }
  0x66   : > { %1727 = vmatpush.msrb.mxu1 %v634_v56  ;;  %1690 = vmatpush.msrb.mxu0 %v583_v57  ;;  %v838_v56 = vld [vmem:[%s5005_s29 + $0xe70] sm:$0xff]  ;;  %v787_v57 = vld [vmem:[%s5005_s29 + $0xcd8] sm:$0xff] }
  0x67   : > { %1804 = vmatpush.msrb.mxu3 %v727_v58  ;;  %1767 = vmatpush.msrb.mxu2 %v676_v59  ;;  %v931_v58 = vld [vmem:[%s5005_s29 + $0x1158] sm:$0xff]  ;;  %v880_v59 = vld [vmem:[%s5005_s29 + $0xfc0] sm:$0xff] }
  0x68   : > { %1728 = vmatpush.msrb.mxu1 %v631_v60  ;;  %1691 = vmatpush.msrb.mxu0 %v580_v61  ;;  %v835_v60 = vld [vmem:[%s5005_s29 + $0xe58] sm:$0xff]  ;;  %v784_v61 = vld [vmem:[%s5005_s29 + $0xcc0] sm:$0xff] }
  0x69   : > { %1556 = vmatmul.f32.gmra.mxu0 %v304_v62  ;;  %1632 = vmatmul.f32.gmra.mxu2 %v306_v63  ;;  %v236_v62 = vld [vmem:[%s8254_s0 + $0xe0] sm:$0xff]  ;;  %v238_v63 = vld [vmem:[%s8254_s0 + $0xf0] sm:$0xff] }
  0x6a   : > { %1805 = vmatpush.msrb.mxu3 %v724_v0  ;;  %1768 = vmatpush.msrb.mxu2 %v673_v1  ;;  %v928_v0 = vld [vmem:[%s5005_s29 + $0x1140] sm:$0xff]  ;;  %v877_v1 = vld [vmem:[%s5005_s29 + $0xfa8] sm:$0xff] }
  0x6b   : > { %1594 = vmatmul.f32.gmra.mxu1 %v305_v2  ;;  %1692 = vmatpush.msrb.mxu0 %v577_v3  ;;  %v237_v2 = vld [vmem:[%s8254_s0 + $0xe8] sm:$0xff] }
  0x6c   : > { %1670 = vmatmul.f32.gmra.mxu3 %v307_v4  ;;  %1729 = vmatpush.msrb.mxu1 %v628_v5  ;;  %v781_v3 = vld [vmem:[%s5005_s29 + $0xca8] sm:$0xff]  ;;  %v239_v4 = vld [vmem:[%s8254_s0 + $0xf8] sm:$0xff]  ;;  %v832_v5 = vld [vmem:[%s5005_s29 + $0xe40] sm:$0xff] }
  0x6d   : > { %1806 = vmatpush.msrb.mxu3 %v721_v6  ;;  %1769 = vmatpush.msrb.mxu2 %v670_v7  ;;  %v925_v6 = vld [vmem:[%s5005_s29 + $0x1128] sm:$0xff]  ;;  %v874_v7 = vld [vmem:[%s5005_s29 + $0xf90] sm:$0xff] }
  0x6e   : > { %1730 = vmatpush.msrb.mxu1 %v625_v8  ;;  %1693 = vmatpush.msrb.mxu0 %v574_v9  ;;  %v829_v8 = vld [vmem:[%s5005_s29 + $0xe28] sm:$0xff]  ;;  %v778_v9 = vld [vmem:[%s5005_s29 + $0xc90] sm:$0xff] }
  0x6f   : > { %1807 = vmatpush.msrb.mxu3 %v718_v10  ;;  %1770 = vmatpush.msrb.mxu2 %v667_v11  ;;  %v922_v10 = vld [vmem:[%s5005_s29 + $0x1110] sm:$0xff]  ;;  %v871_v11 = vld [vmem:[%s5005_s29 + $0xf78] sm:$0xff] }
  0x70   : > { %1731 = vmatpush.msrb.mxu1 %v622_v12  ;;  %1694 = vmatpush.msrb.mxu0 %v571_v13  ;;  %v826_v12 = vld [vmem:[%s5005_s29 + $0xe10] sm:$0xff]  ;;  %v775_v13 = vld [vmem:[%s5005_s29 + $0xc78] sm:$0xff] }
  0x71   : > { %1559 = vmatmul.f32.gmra.mxu0 %v328_v14  ;;  %1635 = vmatmul.f32.gmra.mxu2 %v330_v15  ;;  %v260_v14 = vld [vmem:[%s8254_s0 + $0x1a0] sm:$0xff]  ;;  %v262_v15 = vld [vmem:[%s8254_s0 + $0x1b0] sm:$0xff] }
  0x72   : > { %1808 = vmatpush.msrb.mxu3 %v715_v16  ;;  %1732 = vmatpush.msrb.mxu1 %v619_v17  ;;  %v919_v16 = vld [vmem:[%s5005_s29 + $0x10f8] sm:$0xff] }
  0x73   : > { %1597 = vmatmul.f32.gmra.mxu1 %v329_v18  ;;  %1771 = vmatpush.msrb.mxu2 %v664_v19  ;;  %v823_v17 = vld [vmem:[%s5005_s29 + $0xdf8] sm:$0xff]  ;;  %v261_v18 = vld [vmem:[%s8254_s0 + $0x1a8] sm:$0xff]  ;;  %v868_v19 = vld [vmem:[%s5005_s29 + $0xf60] sm:$0xff] }
  0x74   : > { %1673 = vmatmul.f32.gmra.mxu3 %v331_v20  ;;  %1695 = vmatpush.msrb.mxu0 %v568_v21  ;;  %v263_v20 = vld [vmem:[%s8254_s0 + $0x1b8] sm:$0xff]  ;;  %v772_v21 = vld [vmem:[%s5005_s29 + $0xc60] sm:$0xff] }
  0x75   : > { %1809 = vmatpush.msrb.mxu3 %v712_v22  ;;  %1908 = vmatpush.msra.mxu2 %v901_v23  ;;  %v916_v22 = vld [vmem:[%s5005_s29 + $0x10e0] sm:$0xff]  ;;  %v865_v23 = vld [vmem:[%s5005_s29 + $0xf48] sm:$0xff] }
  0x76   : > { %1733 = vmatpush.msrb.mxu1 %v616_v24  ;;  %1832 = vmatpush.msra.mxu0 %v805_v25  ;;  %v820_v24 = vld [vmem:[%s5005_s29 + $0xde0] sm:$0xff]  ;;  %v769_v25 = vld [vmem:[%s5005_s29 + $0xc48] sm:$0xff] }
  0x77   : > { %1946 = vmatpush.msra.mxu3 %v949_v26  ;;  %1909 = vmatpush.msra.mxu2 %v898_v28  ;;  %v913_v26 = vld [vmem:[%s5005_s29 + $0x10c8] sm:$0xff] }
  0x78   : > { %1870 = vmatpush.msra.mxu1 %v853_v27  ;;  %1833 = vmatpush.msra.mxu0 %v802_v29  ;;  %v862_v27 = vld [vmem:[%s5005_s29 + $0xf30] sm:$0xff]  ;;  %v817_v28 = vld [vmem:[%s5005_s29 + $0xdc8] sm:$0xff] }
  0x79   : > { %1562 = vmatmul.f32.gmra.mxu0 %v352_v30  ;;  %1638 = vmatmul.f32.gmra.mxu2 %v354_v31  ;;  %v766_v29 = vld [vmem:[%s5005_s29 + $0xc30] sm:$0xff]  ;;  %v284_v30 = vld [vmem:[%s8254_s0 + $0x260] sm:$0xff] }
  0x7a   : > { %1947 = vmatpush.msra.mxu3 %v946_v32  ;;  %1910 = vmatpush.msra.mxu2 %v895_v33  ;;  %v286_v31 = vld [vmem:[%s8254_s0 + $0x270] sm:$0xff]  ;;  %v859_v33 = vld [vmem:[%s5005_s29 + $0xf18] sm:$0xff] }
  0x7b   : > { %1600 = vmatmul.f32.gmra.mxu1 %v353_v34  ;;  %1834 = vmatpush.msra.mxu0 %v799_v35  ;;  %v910_v32 = vld [vmem:[%s5005_s29 + $0x10b0] sm:$0xff]  ;;  %v285_v34 = vld [vmem:[%s8254_s0 + $0x268] sm:$0xff]  ;;  %v763_v35 = vld [vmem:[%s5005_s29 + $0xc18] sm:$0xff] }
  0x7c   : > { %1676 = vmatmul.f32.gmra.mxu3 %v355_v36  ;;  %1871 = vmatpush.msra.mxu1 %v850_v37  ;;  %v287_v36 = vld [vmem:[%s8254_s0 + $0x278] sm:$0xff]  ;;  %v814_v37 = vld [vmem:[%s5005_s29 + $0xdb0] sm:$0xff] }
  0x7d   : > { %1948 = vmatpush.msra.mxu3 %v943_v38  ;;  %1911 = vmatpush.msra.mxu2 %v892_v39  ;;  %v907_v38 = vld [vmem:[%s5005_s29 + $0x1098] sm:$0xff]  ;;  %v856_v39 = vld [vmem:[%s5005_s29 + $0xf00] sm:$0xff] }
  0x7e   : > { %1872 = vmatpush.msra.mxu1 %v847_v40  ;;  %1835 = vmatpush.msra.mxu0 %v796_v41  ;;  %v811_v40 = vld [vmem:[%s5005_s29 + $0xd98] sm:$0xff]  ;;  %v760_v41 = vld [vmem:[%s5005_s29 + $0xc00] sm:$0xff] }
  0x7f   : > { %1949 = vmatpush.msra.mxu3 %v940_v42  ;;  %1912 = vmatpush.msra.mxu2 %v889_v43  ;;  %v904_v42 = vld [vmem:[%s5005_s29 + $0x1080] sm:$0xff]  ;;  %v1093_v43 = vld [vmem:[%s5005_s29 + $0x1668] sm:$0xff] }
  0x80   : > { %1873 = vmatpush.msra.mxu1 %v844_v44  ;;  %1836 = vmatpush.msra.mxu0 %v793_v45  ;;  %v808_v44 = vld [vmem:[%s5005_s29 + $0xd80] sm:$0xff]  ;;  %v997_v45 = vld [vmem:[%s5005_s29 + $0x1368] sm:$0xff] }
  0x81   : > { %1696 = vmatmul.f32.vlgmr.msrb.gmra.mxu0 %v212_v46  ;;  %1772 = vmatmul.f32.vlgmr.msrb.gmra.mxu2 %v214_v47  ;;  %v308_v46 = vld [vmem:[%s8254_s0 + $0x320] sm:$0xff]  ;;  %v310_v47 = vld [vmem:[%s8254_s0 + $0x330] sm:$0xff] }
  0x82   : > { %1950 = vmatpush.msra.mxu3 %v937_v48  ;;  %1874 = vmatpush.msra.mxu1 %v841_v49  ;;  %v1141_v48 = vld [vmem:[%s5005_s29 + $0x17e8] sm:$0xff] }
  0x83   : > { %1734 = vmatmul.f32.vlgmr.msrb.gmra.mxu1 %v213_v50  ;;  %1913 = vmatpush.msra.mxu2 %v886_v51  ;;  %v1045_v49 = vld [vmem:[%s5005_s29 + $0x14e8] sm:$0xff]  ;;  %v1090_v51 = vld [vmem:[%s5005_s29 + $0x1650] sm:$0xff] }
  0x84   : > { %1810 = vmatmul.f32.vlgmr.msrb.gmra.mxu3 %v215_v52  ;;  %1837 = vmatpush.msra.mxu0 %v790_v53  ;;  %v309_v50 = vld [vmem:[%s8254_s0 + $0x328] sm:$0xff]  ;;  %v311_v52 = vld [vmem:[%s8254_s0 + $0x338] sm:$0xff]  ;;  %v994_v53 = vld [vmem:[%s5005_s29 + $0x1350] sm:$0xff] }
  0x85   : > { %1951 = vmatpush.msra.mxu3 %v934_v54  ;;  %1914 = vmatpush.msra.mxu2 %v883_v55  ;;  %v1138_v54 = vld [vmem:[%s5005_s29 + $0x17d0] sm:$0xff]  ;;  %v1087_v55 = vld [vmem:[%s5005_s29 + $0x1638] sm:$0xff] }
  0x86   : > { %1875 = vmatpush.msra.mxu1 %v838_v56  ;;  %1838 = vmatpush.msra.mxu0 %v787_v57  ;;  %v1042_v56 = vld [vmem:[%s5005_s29 + $0x14d0] sm:$0xff]  ;;  %v991_v57 = vld [vmem:[%s5005_s29 + $0x1338] sm:$0xff] }
  0x87   : > { %1952 = vmatpush.msra.mxu3 %v931_v58  ;;  %1915 = vmatpush.msra.mxu2 %v880_v59  ;;  %v1135_v58 = vld [vmem:[%s5005_s29 + $0x17b8] sm:$0xff]  ;;  %v1084_v59 = vld [vmem:[%s5005_s29 + $0x1620] sm:$0xff] }
  0x88   : > { %1876 = vmatpush.msra.mxu1 %v835_v60  ;;  %1839 = vmatpush.msra.mxu0 %v784_v61  ;;  %v1039_v60 = vld [vmem:[%s5005_s29 + $0x14b8] sm:$0xff]  ;;  %v332_v61 = vld [vmem:[%s8254_s0 + $0x3e0] sm:$0xff] }
  0x89   : > { %1699 = vmatmul.f32.gmra.mxu0 %v236_v62  ;;  %1775 = vmatmul.f32.gmra.mxu2 %v238_v63  ;;  %v334_v62 = vld [vmem:[%s8254_s0 + $0x3f0] sm:$0xff]  ;;  %v988_v63 = vld [vmem:[%s5005_s29 + $0x1320] sm:$0xff] }
  0x8a   : > { %1953 = vmatpush.msra.mxu3 %v928_v0  ;;  %1916 = vmatpush.msra.mxu2 %v877_v1  ;;  %v1132_v0 = vld [vmem:[%s5005_s29 + $0x17a0] sm:$0xff]  ;;  %v1081_v1 = vld [vmem:[%s5005_s29 + $0x1608] sm:$0xff] }
  0x8b   : > { %1737 = vmatmul.f32.gmra.mxu1 %v237_v2  ;;  %1840 = vmatpush.msra.mxu0 %v781_v3  ;;  %v333_v2 = vld [vmem:[%s8254_s0 + $0x3e8] sm:$0xff]  ;;  %v335_v3 = vld [vmem:[%s8254_s0 + $0x3f8] sm:$0xff] }
  0x8c   : > { %1813 = vmatmul.f32.gmra.mxu3 %v239_v4  ;;  %1877 = vmatpush.msra.mxu1 %v832_v5  ;;  %v1036_v4 = vld [vmem:[%s5005_s29 + $0x14a0] sm:$0xff]  ;;  %v985_v5 = vld [vmem:[%s5005_s29 + $0x1308] sm:$0xff] }
  0x8d   : > { %1954 = vmatpush.msra.mxu3 %v925_v6  ;;  %1917 = vmatpush.msra.mxu2 %v874_v7  ;;  %v1129_v6 = vld [vmem:[%s5005_s29 + $0x1788] sm:$0xff] }
  0x8e   : > { %1878 = vmatpush.msra.mxu1 %v829_v8  ;;  %1841 = vmatpush.msra.mxu0 %v778_v9  ;;  %v1033_v7 = vld [vmem:[%s5005_s29 + $0x1488] sm:$0xff]  ;;  %v1078_v8 = vld [vmem:[%s5005_s29 + $0x15f0] sm:$0xff] }
  0x8f   : > { %1955 = vmatpush.msra.mxu3 %v922_v10  ;;  %1918 = vmatpush.msra.mxu2 %v871_v11  ;;  %v982_v9 = vld [vmem:[%s5005_s29 + $0x12f0] sm:$0xff]  ;;  %v356_v11 = vld [vmem:[%s8254_s0 + $0x4a0] sm:$0x1] }
  0x90   : > { %1879 = vmatpush.msra.mxu1 %v826_v12  ;;  %1842 = vmatpush.msra.mxu0 %v775_v13  ;;  %v1126_v10 = vld [vmem:[%s5005_s29 + $0x1770] sm:$0xff]  ;;  %v357_v13 = vld [vmem:[%s8254_s0 + $0x4a8] sm:$0x1] }
  0x91   : > { %1702 = vmatmul.f32.gmra.mxu0 %v260_v14  ;;  %1778 = vmatmul.f32.gmra.mxu2 %v262_v15  ;;  %v358_v12 = vld [vmem:[%s8254_s0 + $0x4b0] sm:$0x1]  ;;  %v1075_v14 = vld [vmem:[%s5005_s29 + $0x15d8] sm:$0xff] }
  0x92   : > { %1956 = vmatpush.msra.mxu3 %v919_v16  ;;  %1880 = vmatpush.msra.mxu1 %v823_v17  ;;  %v1030_v15 = vld [vmem:[%s5005_s29 + $0x1470] sm:$0xff]  ;;  %v359_v16 = vld [vmem:[%s8254_s0 + $0x4b8] sm:$0x1] }
  0x93   : > { %1740 = vmatmul.f32.gmra.mxu1 %v261_v18  ;;  %1919 = vmatpush.msra.mxu2 %v868_v19  ;;  %v979_v17 = vld [vmem:[%s5005_s29 + $0x12d8] sm:$0xff] }
  0x94   : > { %1816 = vmatmul.f32.gmra.mxu3 %v263_v20  ;;  %1843 = vmatpush.msra.mxu0 %v772_v21  ;;  %v1123_v18 = vld [vmem:[%s5005_s29 + $0x1758] sm:$0xff]  ;;  %v1072_v20 = vld [vmem:[%s5005_s29 + $0x15c0] sm:$0xff] }
  0x95   : > { %1957 = vmatpush.msra.mxu3 %v916_v22  ;;  %1920 = vmatpush.msra.mxu2 %v865_v23  ;;  %v1027_v19 = vld [vmem:[%s5005_s29 + $0x1458] sm:$0xff]  ;;  %v976_v21 = vld [vmem:[%s5005_s29 + $0x12c0] sm:$0xff]  ;;  %v1069_v23 = vld [vmem:[%s5005_s29 + $0x15a8] sm:$0xff] }
  0x96   : > { %1881 = vmatpush.msra.mxu1 %v820_v24  ;;  %1844 = vmatpush.msra.mxu0 %v769_v25  ;;  %v1120_v22 = vld [vmem:[%s5005_s29 + $0x1740] sm:$0xff]  ;;  %v218_v25 = vld [vmem:[%s8254_s0 + $0x50] sm:$0xff] }
  0x97   : > { %1958 = vmatpush.msra.mxu3 %v913_v26  ;;  %1921 = vmatpush.msra.mxu2 %v862_v27  ;;  %v216_v24 = vld [vmem:[%s8254_s0 + $0x40] sm:$0xff]  ;;  %v217_v26 = vld [vmem:[%s8254_s0 + $0x48] sm:$0xff] }
  0x98   : > { %1882 = vmatpush.msra.mxu1 %v817_v28  ;;  %1845 = vmatpush.msra.mxu0 %v766_v29  ;;  %v1024_v27 = vld [vmem:[%s5005_s29 + $0x1440] sm:$0xff]  ;;  %v973_v28 = vld [vmem:[%s5005_s29 + $0x12a8] sm:$0xff] }
  0x99   : > { %1705 = vmatmul.f32.gmra.mxu0 %v284_v30  ;;  %1781 = vmatmul.f32.gmra.mxu2 %v286_v31  ;;  %v1117_v29 = vld [vmem:[%s5005_s29 + $0x1728] sm:$0xff]  ;;  %v219_v30 = vld [vmem:[%s8254_s0 + $0x58] sm:$0xff] }
  0x9a   : > { %1959 = vmatpush.msra.mxu3 %v910_v32  ;;  %1922 = vmatpush.msra.mxu2 %v859_v33  ;;  %v1021_v31 = vld [vmem:[%s5005_s29 + $0x1428] sm:$0xff]  ;;  %v1066_v32 = vld [vmem:[%s5005_s29 + $0x1590] sm:$0xff] }
  0x9b   : > { %1743 = vmatmul.f32.gmra.mxu1 %v285_v34  ;;  %1846 = vmatpush.msra.mxu0 %v763_v35  ;;  %v970_v33 = vld [vmem:[%s5005_s29 + $0x1290] sm:$0xff]  ;;  %v1063_v35 = vld [vmem:[%s5005_s29 + $0x1578] sm:$0xff] }
  0x9c   : > { %1819 = vmatmul.f32.gmra.mxu3 %v287_v36  ;;  %1883 = vmatpush.msra.mxu1 %v814_v37  ;;  %v1114_v34 = vld [vmem:[%s5005_s29 + $0x1710] sm:$0xff]  ;;  %v240_v37 = vld [vmem:[%s8254_s0 + $0x100] sm:$0xff] }
  0x9d   : > { %1960 = vmatpush.msra.mxu3 %v907_v38  ;;  %1923 = vmatpush.msra.mxu2 %v856_v39  ;;  %v1018_v36 = vld [vmem:[%s5005_s29 + $0x1410] sm:$0xff]  ;;  %v241_v39 = vld [vmem:[%s8254_s0 + $0x108] sm:$0xff] }
  0x9e   : > { %1884 = vmatpush.msra.mxu1 %v811_v40  ;;  %1847 = vmatpush.msra.mxu0 %v760_v41  ;;  %v242_v38 = vld [vmem:[%s8254_s0 + $0x110] sm:$0xff]  ;;  %v967_v40 = vld [vmem:[%s5005_s29 + $0x1278] sm:$0xff] }
  0x9f   : > { %1961 = vmatpush.msra.mxu3 %v904_v42  ;;  %2060 = vmatpush.msrb.mxu2 %v1093_v43  ;;  %v1111_v41 = vld [vmem:[%s5005_s29 + $0x16f8] sm:$0xff] }
  0xa0   : > { %1885 = vmatpush.msra.mxu1 %v808_v44  ;;  %1984 = vmatpush.msrb.mxu0 %v997_v45  ;;  %v243_v42 = vld [vmem:[%s8254_s0 + $0x118] sm:$0xff]  ;;  %v1060_v44 = vld [vmem:[%s5005_s29 + $0x1560] sm:$0xff] }
  0xa1   : > { %1708 = vmatmul.f32.gmra.mxu0 %v308_v46  ;;  %1784 = vmatmul.f32.gmra.mxu2 %v310_v47  ;;  %v1015_v43 = vld [vmem:[%s5005_s29 + $0x13f8] sm:$0xff]  ;;  %v964_v45 = vld [vmem:[%s5005_s29 + $0x1260] sm:$0xff]  ;;  %v1057_v47 = vld [vmem:[%s5005_s29 + $0x1548] sm:$0xff] }
  0xa2   : > { %2098 = vmatpush.msrb.mxu3 %v1141_v48  ;;  %2022 = vmatpush.msrb.mxu1 %v1045_v49  ;;  %v1108_v46 = vld [vmem:[%s5005_s29 + $0x16e0] sm:$0xff]  ;;  %v961_v49 = vld [vmem:[%s5005_s29 + $0x1248] sm:$0xff] }
  0xa3   : > { %1746 = vmatmul.f32.gmra.mxu1 %v309_v50  ;;  %2061 = vmatpush.msrb.mxu2 %v1090_v51  ;;  %v1012_v48 = vld [vmem:[%s5005_s29 + $0x13e0] sm:$0xff]  ;;  %v1105_v50 = vld [vmem:[%s5005_s29 + $0x16c8] sm:$0xff] }
  0xa4   : > { %1822 = vmatmul.f32.gmra.mxu3 %v311_v52  ;;  %1985 = vmatpush.msrb.mxu0 %v994_v53  ;;  %v264_v52 = vld [vmem:[%s8254_s0 + $0x1c0] sm:$0xff]  ;;  %v266_v53 = vld [vmem:[%s8254_s0 + $0x1d0] sm:$0xff] }
  0xa5   : > { %2099 = vmatpush.msrb.mxu3 %v1138_v54  ;;  %2062 = vmatpush.msrb.mxu2 %v1087_v55  ;;  %v265_v55 = vld [vmem:[%s8254_s0 + $0x1c8] sm:$0xff] }
  0xa6   : > { %2023 = vmatpush.msrb.mxu1 %v1042_v56  ;;  %1986 = vmatpush.msrb.mxu0 %v991_v57  ;;  %v1009_v56 = vld [vmem:[%s5005_s29 + $0x13c8] sm:$0xff]  ;;  %v1054_v57 = vld [vmem:[%s5005_s29 + $0x1530] sm:$0xff] }
  0xa7   : > { %2100 = vmatpush.msrb.mxu3 %v1135_v58  ;;  %2063 = vmatpush.msrb.mxu2 %v1084_v59  ;;  %v267_v58 = vld [vmem:[%s8254_s0 + $0x1d8] sm:$0xff]  ;;  %v958_v59 = vld [vmem:[%s5005_s29 + $0x1230] sm:$0xff] }
  0xa8   : > { %2024 = vmatpush.msrb.mxu1 %v1039_v60  ;;  %1987 = vmatpush.msrb.mxu0 %v988_v63  ;;  %v1102_v60 = vld [vmem:[%s5005_s29 + $0x16b0] sm:$0xff] }
  0xa9   : > { %1711 = vmatmul.f32.gmra.mxu0 %v332_v61  ;;  %1787 = vmatmul.f32.gmra.mxu2 %v334_v62  ;;  %v1051_v61 = vld [vmem:[%s5005_s29 + $0x1518] sm:$0xff] }
  0xaa   : > { %2101 = vmatpush.msrb.mxu3 %v1132_v0  ;;  %2064 = vmatpush.msrb.mxu2 %v1081_v1  ;;  %v1006_v0 = vld [vmem:[%s5005_s29 + $0x13b0] sm:$0xff] }
  0xab   : > { %1749 = vmatmul.f32.gmra.mxu1 %v333_v2  ;;  %1988 = vmatpush.msrb.mxu0 %v985_v5  ;;  %v955_v2 = vld [vmem:[%s5005_s29 + $0x1218] sm:$0xff]  ;;  %v288_v5 = vld [vmem:[%s8254_s0 + $0x280] sm:$0xff] }
  0xac   : > { %1825 = vmatmul.f32.gmra.mxu3 %v335_v3  ;;  %2025 = vmatpush.msrb.mxu1 %v1036_v4  ;;  %v1099_v3 = vld [vmem:[%s5005_s29 + $0x1698] sm:$0xff] }
  0xad   : > { %2102 = vmatpush.msrb.mxu3 %v1129_v6  ;;  %2065 = vmatpush.msrb.mxu2 %v1078_v8  ;;  %v290_v6 = vld [vmem:[%s8254_s0 + $0x290] sm:$0xff]  ;;  %v289_v8 = vld [vmem:[%s8254_s0 + $0x288] sm:$0xff] }
  0xae   : > { %2026 = vmatpush.msrb.mxu1 %v1033_v7  ;;  %1989 = vmatpush.msrb.mxu0 %v982_v9 }
  0xaf   : > { %2103 = vmatpush.msrb.mxu3 %v1126_v10  ;;  %2066 = vmatpush.msrb.mxu2 %v1075_v14  ;;  %v291_v14 = vld [vmem:[%s8254_s0 + $0x298] sm:$0xff] }
  0xb0   : > { %2027 = vmatpush.msrb.mxu1 %v1030_v15  ;;  %1990 = vmatpush.msrb.mxu0 %v979_v17  ;;  %v1096_v15 = vld [vmem:[%s5005_s29 + $0x1680] sm:$0xff] }
  0xb1   : > { %1714 = vmatmul.f32.gmra.mxu0 %v356_v11  ;;  %1790 = vmatmul.f32.gmra.mxu2 %v358_v12  ;;  %v1003_v11 = vld [vmem:[%s5005_s29 + $0x1398] sm:$0xff]  ;;  %v1048_v12 = vld [vmem:[%s5005_s29 + $0x1500] sm:$0xff] }
  0xb2   : > { %2028 = vmatpush.msrb.mxu1 %v1027_v19  ;;  %2104 = vmatpush.msrb.mxu3 %v1123_v18  ;;  %v1000_v17 = vld [vmem:[%s5005_s29 + $0x1380] sm:$0xff] }
  0xb3   : > { %1752 = vmatmul.f32.gmra.mxu1 %v357_v13  ;;  %2067 = vmatpush.msrb.mxu2 %v1072_v20  ;;  %v952_v13 = vld [vmem:[%s5005_s29 + $0x1200] sm:$0xff]  ;;  %v1189_v20 = vld [vmem:[%s5005_s29 + $0x1968] sm:$0xff] }
  0xb4   : > { %1828 = vmatmul.f32.gmra.mxu3 %v359_v16  ;;  %1991 = vmatpush.msrb.mxu0 %v976_v21  ;;  %v1285_v16 = vld [vmem:[%s5005_s29 + $0x1c68] sm:$0xff] }
  0xb5   : > { %2105 = vmatpush.msrb.mxu3 %v1120_v22  ;;  %2068 = vmatpush.msrb.mxu2 %v1069_v23  ;;  %v1333_v21 = vld [vmem:[%s5005_s29 + $0x1de8] sm:$0xff] }
  0xb6   : > { %2029 = vmatpush.msrb.mxu1 %v1024_v27  ;;  %1992 = vmatpush.msrb.mxu0 %v973_v28  ;;  %v1237_v23 = vld [vmem:[%s5005_s29 + $0x1ae8] sm:$0xff]  ;;  %v314_v27 = vld [vmem:[%s8254_s0 + $0x350] sm:$0xff] }
  0xb7   : > { %2106 = vmatpush.msrb.mxu3 %v1117_v29  ;;  %2069 = vmatpush.msrb.mxu2 %v1066_v32  ;;  %v1186_v32 = vld [vmem:[%s5005_s29 + $0x1950] sm:$0xff] }
  0xb8   : > { %2030 = vmatpush.msrb.mxu1 %v1021_v31  ;;  %1993 = vmatpush.msrb.mxu0 %v970_v33  ;;  %v313_v31 = vld [vmem:[%s8254_s0 + $0x348] sm:$0xff]  ;;  %v1330_v33 = vld [vmem:[%s5005_s29 + $0x1dd0] sm:$0xff] }
  0xb9   : > { %1848 = vmatmul.f32.vlgmr.msra.gmra.mxu0 %v216_v24  ;;  %1924 = vmatmul.f32.vlgmr.msra.gmra.mxu2 %v218_v25  ;;  %v1282_v24 = vld [vmem:[%s5005_s29 + $0x1c50] sm:$0xff] }
  0xba   : > { %2107 = vmatpush.msrb.mxu3 %v1114_v34  ;;  %2031 = vmatpush.msrb.mxu1 %v1018_v36  ;;  %v315_v34 = vld [vmem:[%s8254_s0 + $0x358] sm:$0xff]  ;;  %v1234_v36 = vld [vmem:[%s5005_s29 + $0x1ad0] sm:$0xff] }
  0xbb   : > { %1886 = vmatmul.f32.vlgmr.msra.gmra.mxu1 %v217_v26  ;;  %2070 = vmatpush.msrb.mxu2 %v1063_v35  ;;  %v312_v26 = vld [vmem:[%s8254_s0 + $0x340] sm:$0xff]  ;;  %v1279_v35 = vld [vmem:[%s5005_s29 + $0x1c38] sm:$0xff] }
  0xbc   : > { %1962 = vmatmul.f32.vlgmr.msra.gmra.mxu3 %v219_v30  ;;  %1994 = vmatpush.msrb.mxu0 %v967_v40 }
  0xbd   : > { %2108 = vmatpush.msrb.mxu3 %v1111_v41  ;;  %2071 = vmatpush.msrb.mxu2 %v1060_v44 }
  0xbe   : > { %2032 = vmatpush.msrb.mxu1 %v1015_v43  ;;  %1995 = vmatpush.msrb.mxu0 %v964_v45  ;;  %v1276_v43 = vld [vmem:[%s5005_s29 + $0x1c20] sm:$0xff] }
  0xbf   : > { %2109 = vmatpush.msrb.mxu3 %v1108_v46  ;;  %2072 = vmatpush.msrb.mxu2 %v1057_v47  ;;  %v336_v45 = vld [vmem:[%s8254_s0 + $0x400] sm:$0xff]  ;;  %v338_v46 = vld [vmem:[%s8254_s0 + $0x410] sm:$0xff] }
  0xc0   : > { %2033 = vmatpush.msrb.mxu1 %v1012_v48  ;;  %1996 = vmatpush.msrb.mxu0 %v961_v49  ;;  %v337_v48 = vld [vmem:[%s8254_s0 + $0x408] sm:$0xff] }
  0xc1   : > { %1851 = vmatmul.f32.gmra.mxu0 %v240_v37  ;;  %1927 = vmatmul.f32.gmra.mxu2 %v242_v38  ;;  %v1183_v37 = vld [vmem:[%s5005_s29 + $0x1938] sm:$0xff] }
  0xc2   : > { %2110 = vmatpush.msrb.mxu3 %v1105_v50  ;;  %2034 = vmatpush.msrb.mxu1 %v1009_v56  ;;  %v1327_v38 = vld [vmem:[%s5005_s29 + $0x1db8] sm:$0xff]  ;;  %v1177_v56 = vld [vmem:[%s5005_s29 + $0x1908] sm:$0xff] }
  0xc3   : > { %1889 = vmatmul.f32.gmra.mxu1 %v241_v39  ;;  %2073 = vmatpush.msrb.mxu2 %v1054_v57  ;;  %v1321_v57 = vld [vmem:[%s5005_s29 + $0x1d88] sm:$0xff] }
  0xc4   : > { %1965 = vmatmul.f32.gmra.mxu3 %v243_v42  ;;  %1997 = vmatpush.msrb.mxu0 %v958_v59  ;;  %v1231_v42 = vld [vmem:[%s5005_s29 + $0x1ab8] sm:$0xff] }
  0xc5   : > { %2074 = vmatpush.msrb.mxu2 %v1051_v61  ;;  %2111 = vmatpush.msrb.mxu3 %v1102_v60  ;;  %v1225_v60 = vld [vmem:[%s5005_s29 + $0x1a88] sm:$0xff]  ;;  %v1270_v61 = vld [vmem:[%s5005_s29 + $0x1bf0] sm:$0xff] }
  0xc6   : > { %v1545_v51 = vpop.f32.mrf.mxu0  ;;  %2035 = vmatpush.msrb.mxu1 %v1006_v0  ;;  %1998 = vmatpush.msrb.mxu0 %v955_v2  ;;  %v1318_v0 = vld [vmem:[%s5005_s29 + $0x1d70] sm:$0xff]  ;;  %v360_v2 = vld [vmem:[%s8254_s0 + $0x4c0] sm:$0x1] }
  0xc7   : > { %2112 = vmatpush.msrb.mxu3 %v1099_v3  ;;  %2075 = vmatpush.msrb.mxu2 %v1048_v12  ;;  %v362_v3 = vld [vmem:[%s8254_s0 + $0x4d0] sm:$0x1]  ;;  %v1171_v12 = vld [vmem:[%s5005_s29 + $0x18d8] sm:$0xff] }
  0xc8   : > { %v1583_v54 = vpop.f32.mrf.mxu1  ;;  %2036 = vmatpush.msrb.mxu1 %v1003_v11  ;;  %1999 = vmatpush.msrb.mxu0 %v952_v13  ;;  %v363_v11 = vld [vmem:[%s8254_s0 + $0x4d8] sm:$0x1] }
  0xc9   : > { %1854 = vmatmul.f32.gmra.mxu0 %v264_v52  ;;  %1930 = vmatmul.f32.gmra.mxu2 %v266_v53  ;;  %v1584_v62 = vadd.f32 %v1583_v54, %v1545_v51  ;;  %v1180_v51 = vld [vmem:[%s5005_s29 + $0x1920] sm:$0xff]  ;;  %v1273_v53 = vld [vmem:[%s5005_s29 + $0x1c08] sm:$0xff]  ;;  %v339_v54 = vld [vmem:[%s8254_s0 + $0x418] sm:$0xff] }
  0xca   : > { %2212 = vmatpush.msra.mxu2 %v1285_v16  ;;  %2113 = vmatpush.msrb.mxu3 %v1096_v15  ;;  %v1324_v52 = vld [vmem:[%s5005_s29 + $0x1da0] sm:$0xff]  ;;  %v1315_v13 = vld [vmem:[%s5005_s29 + $0x1d58] sm:$0xff] }
  0xcb   : > { %1892 = vmatmul.f32.gmra.mxu1 %v265_v55  ;;  %2136 = vmatpush.msra.mxu0 %v1189_v20  ;;  %v1228_v55 = vld [vmem:[%s5005_s29 + $0x1aa0] sm:$0xff] }
  0xcc   : > { %1968 = vmatmul.f32.gmra.mxu3 %v267_v58  ;;  %v1621_v63 = vpop.f32.mrf.mxu2  ;;  %2037 = vmatpush.msrb.mxu1 %v1000_v17  ;;  %v1264_v15 = vld [vmem:[%s5005_s29 + $0x1bc0] sm:$0xff] }
  0xcd   : > { %v1622_v1 = vadd.f32 %v1621_v63, %v1584_v62  ;;  %2250 = vmatpush.msra.mxu3 %v1333_v21  ;;  %2213 = vmatpush.msra.mxu2 %v1282_v24  ;;  %v1174_v63 = vld [vmem:[%s5005_s29 + $0x18f0] sm:$0xff]  ;;  %v1312_v20 = vld [vmem:[%s5005_s29 + $0x1d40] sm:$0xff]  ;;  %v1261_v21 = vld [vmem:[%s5005_s29 + $0x1ba8] sm:$0xff] }
  0xce   : > { %v1548_v4 = vpop.f32.mrf.mxu0  ;;  %2174 = vmatpush.msra.mxu1 %v1237_v23  ;;  %2137 = vmatpush.msra.mxu0 %v1186_v32  ;;  %v220_v23 = vld [vmem:[%s8254_s0 + $0x60] sm:$0xff]  ;;  %v222_v24 = vld [vmem:[%s8254_s0 + $0x70] sm:$0xff]  ;;  %v1309_v32 = vld [vmem:[%s5005_s29 + $0x1d28] sm:$0xff] }
  0xcf   : > { %v1659_v7 = vpop.f32.mrf.mxu3  ;;  %2251 = vmatpush.msra.mxu3 %v1330_v33  ;;  %2214 = vmatpush.msra.mxu2 %v1279_v35  ;;  %v223_v33 = vld [vmem:[%s8254_s0 + $0x78] sm:$0xff]  ;;  %v1258_v35 = vld [vmem:[%s5005_s29 + $0x1b90] sm:$0xff] }
  0xd0   : > { %v5475_v9 = vadd.f32 %v1659_v7, %v1622_v1  ;;  %v1586_v10 = vpop.f32.mrf.mxu1  ;;  %2175 = vmatpush.msra.mxu1 %v1234_v36  ;;  %2138 = vmatpush.msra.mxu0 %v1183_v37  ;;  %v361_v7 = vld [vmem:[%s8254_s0 + $0x4c8] sm:$0x1] }
  0xd1   : > { %1857 = vmatmul.f32.gmra.mxu0 %v288_v5  ;;  %1933 = vmatmul.f32.gmra.mxu2 %v290_v6  ;;  %v1587_v18 = vadd.f32 %v1586_v10, %v1548_v4  ;;  %v1222_v10 = vld [vmem:[%s5005_s29 + $0x1a70] sm:$0xff] }
  0xd2   : > { %2252 = vmatpush.msra.mxu3 %v1327_v38  ;;  %2176 = vmatpush.msra.mxu1 %v1231_v42  ;;  %v1162_v38 = vld [vmem:[%s5005_s29 + $0x1890] sm:$0xff] }
  0xd3   : > { %1895 = vmatmul.f32.gmra.mxu1 %v289_v8  ;;  %2215 = vmatpush.msra.mxu2 %v1276_v43  ;;  %v1267_v8 = vld [vmem:[%s5005_s29 + $0x1bd8] sm:$0xff]  ;;  %v1210_v42 = vld [vmem:[%s5005_s29 + $0x1a10] sm:$0xff] }
  0xd4   : > { %1971 = vmatmul.f32.gmra.mxu3 %v291_v14  ;;  %v1624_v19 = vpop.f32.mrf.mxu2  ;;  %2139 = vmatpush.msra.mxu0 %v1180_v51  ;;  %v1219_v14 = vld [vmem:[%s5005_s29 + $0x1a58] sm:$0xff] }
  0xd5   : > { %v1625_v22 = vadd.f32 %v1624_v19, %v1587_v18  ;;  %2253 = vmatpush.msra.mxu3 %v1324_v52  ;;  %2216 = vmatpush.msra.mxu2 %v1273_v53  ;;  %v1168_v19 = vld [vmem:[%s5005_s29 + $0x18c0] sm:$0xff]  ;;  %v1159_v51 = vld [vmem:[%s5005_s29 + $0x1878] sm:$0xff] }
  0xd6   : > { %v1551_v25 = vpop.f32.mrf.mxu0  ;;  %2177 = vmatpush.msra.mxu1 %v1228_v55  ;;  %2140 = vmatpush.msra.mxu0 %v1177_v56  ;;  %v1303_v52 = vld [vmem:[%s5005_s29 + $0x1cf8] sm:$0xff]  ;;  %v1252_v55 = vld [vmem:[%s5005_s29 + $0x1b60] sm:$0xff] }
  0xd7   : > { %v1662_v28 = vpop.f32.mrf.mxu3  ;;  %2254 = vmatpush.msra.mxu3 %v1321_v57  ;;  %2217 = vmatpush.msra.mxu2 %v1270_v61  ;;  %v247_v53 = vld [vmem:[%s8254_s0 + $0x138] sm:$0xff]  ;;  %v1156_v56 = vld [vmem:[%s5005_s29 + $0x1860] sm:$0xff] }
  0xd8   : > { %v5496_v29 = vadd.f32 %v1662_v28, %v1625_v22  ;;  %v1589_v30 = vpop.f32.mrf.mxu1  ;;  %2178 = vmatpush.msra.mxu1 %v1225_v60  ;;  %2141 = vmatpush.msra.mxu0 %v1174_v63  ;;  %v1300_v57 = vld [vmem:[%s5005_s29 + $0x1ce0] sm:$0xff]  ;;  %v1249_v60 = vld [vmem:[%s5005_s29 + $0x1b48] sm:$0xff] }
  0xd9   : > { %1860 = vmatmul.f32.gmra.mxu0 %v312_v26  ;;  %1936 = vmatmul.f32.gmra.mxu2 %v314_v27  ;;  %v1590_v39 = vadd.f32 %v1589_v30, %v1551_v25  ;;  %v221_v26 = vld [vmem:[%s8254_s0 + $0x68] sm:$0xff]  ;;  %v1216_v30 = vld [vmem:[%s5005_s29 + $0x1a40] sm:$0xff] }
  0xda   : > { %2255 = vmatpush.msra.mxu3 %v1318_v0  ;;  %2218 = vmatpush.msra.mxu2 %v1267_v8  ;;  %v1153_v63 = vld [vmem:[%s5005_s29 + $0x1848] sm:$0xff] }
  0xdb   : > { %1898 = vmatmul.f32.gmra.mxu1 %v313_v31  ;;  %2142 = vmatpush.msra.mxu0 %v1171_v12  ;;  %v1165_v31 = vld [vmem:[%s5005_s29 + $0x18a8] sm:$0xff]  ;;  %v1246_v12 = vld [vmem:[%s5005_s29 + $0x1b30] sm:$0xff] }
  0xdc   : > { %1974 = vmatmul.f32.gmra.mxu3 %v315_v34  ;;  %v1627_v40 = vpop.f32.mrf.mxu2  ;;  %2179 = vmatpush.msra.mxu1 %v1222_v10  ;;  %v1213_v34 = vld [vmem:[%s5005_s29 + $0x1a28] sm:$0xff] }
  0xdd   : > { %v1628_v41 = vadd.f32 %v1627_v40, %v1590_v39  ;;  %2256 = vmatpush.msra.mxu3 %v1315_v13  ;;  %2219 = vmatpush.msra.mxu2 %v1264_v15  ;;  %v1306_v39 = vld [vmem:[%s5005_s29 + $0x1d10] sm:$0xff]  ;;  %v1297_v0 = vld [vmem:[%s5005_s29 + $0x1cc8] sm:$0xff]  ;;  %v271_v13 = vld [vmem:[%s8254_s0 + $0x1f8] sm:$0xff] }
  0xde   : > { %v1554_v44 = vpop.f32.mrf.mxu0  ;;  %2180 = vmatpush.msra.mxu1 %v1219_v14  ;;  %2143 = vmatpush.msra.mxu0 %v1168_v19  ;;  %v269_v10 = vld [vmem:[%s8254_s0 + $0x1e8] sm:$0xff]  ;;  %v1294_v14 = vld [vmem:[%s5005_s29 + $0x1cb0] sm:$0xff]  ;;  %v1243_v15 = vld [vmem:[%s5005_s29 + $0x1b18] sm:$0xff] }
  0xdf   : > { %v1665_v47 = vpop.f32.mrf.mxu3  ;;  %2257 = vmatpush.msra.mxu3 %v1312_v20  ;;  %2220 = vmatpush.msra.mxu2 %v1261_v21  ;;  %v1147_v20 = vld [vmem:[%s5005_s29 + $0x1818] sm:$0xff] }
  0xe0   : > { %v5521_v49 = vadd.f32 %v1665_v47, %v1628_v41  ;;  %v1592_v50 = vpop.f32.mrf.mxu1  ;;  %2181 = vmatpush.msra.mxu1 %v1216_v30  ;;  %2144 = vmatpush.msra.mxu0 %v1165_v31  ;;  %v1255_v41 = vld [vmem:[%s5005_s29 + $0x1b78] sm:$0xff] }
  0xe1   : > { %1863 = vmatmul.f32.gmra.mxu0 %v336_v45  ;;  %1939 = vmatmul.f32.gmra.mxu2 %v338_v46  ;;  %v1593_v58 = vadd.f32 %v1592_v50, %v1554_v44  ;;  %v244_v44 = vld [vmem:[%s8254_s0 + $0x120] sm:$0xff]  ;;  %v246_v45 = vld [vmem:[%s8254_s0 + $0x130] sm:$0xff]  ;;  %v245_v50 = vld [vmem:[%s8254_s0 + $0x128] sm:$0xff] }
  0xe2   : > { %2258 = vmatpush.msra.mxu3 %v1309_v32  ;;  %2182 = vmatpush.msra.mxu1 %v1213_v34  ;;  %v1291_v21 = vld [vmem:[%s5005_s29 + $0x1c98] sm:$0xff]  ;;  %v1144_v34 = vld [vmem:[%s5005_s29 + $0x1800] sm:$0xff] }
  0xe3   : > { %1901 = vmatmul.f32.gmra.mxu1 %v337_v48  ;;  %2221 = vmatpush.msra.mxu2 %v1258_v35  ;;  %v1195_v32 = vld [vmem:[%s5005_s29 + $0x1998] sm:$0xff]  ;;  %v1288_v35 = vld [vmem:[%s5005_s29 + $0x1c80] sm:$0xff] }
  0xe4   : > { %1977 = vmatmul.f32.gmra.mxu3 %v339_v54  ;;  %v1630_v59 = vpop.f32.mrf.mxu2  ;;  %2145 = vmatpush.msra.mxu0 %v1162_v38  ;;  %v1207_v54 = vld [vmem:[%s5005_s29 + $0x19f8] sm:$0xff] }
  0xe5   : > { %v1631_v62 = vadd.f32 %v1630_v59, %v1593_v58  ;;  %2259 = vmatpush.msra.mxu3 %v1306_v39  ;;  %2183 = vmatpush.msra.mxu1 %v1210_v42 }
  0xe6   : > { %v1557_v1 = vpop.f32.mrf.mxu0  ;;  %2222 = vmatpush.msra.mxu2 %v1255_v41  ;;  %2146 = vmatpush.msra.mxu0 %v1159_v51  ;;  %v1525_v41 = vld [vmem:[%s5005_s29 + $0x23e8] sm:$0xff] }
  0xe7   : > { %v1668_v4 = vpop.f32.mrf.mxu3  ;;  %2260 = vmatpush.msra.mxu3 %v1303_v52  ;;  %2184 = vmatpush.msra.mxu1 %v1207_v54  ;;  %v317_v54 = vld [vmem:[%s8254_s0 + $0x368] sm:$0xff] }
  0xe8   : > { %v5542_v5 = vadd.f32 %v1668_v4, %v1631_v62  ;;  %v1595_v6 = vpop.f32.mrf.mxu1  ;;  %2223 = vmatpush.msra.mxu2 %v1252_v55  ;;  %2147 = vmatpush.msra.mxu0 %v1156_v56  ;;  %v1204_v62 = vld [vmem:[%s5005_s29 + $0x19e0] sm:$0xff]  ;;  %v1378_v55 = vld [vmem:[%s5005_s29 + $0x1f50] sm:$0xff] }
  0xe9   : > { %1866 = vmatmul.f32.gmra.mxu0 %v360_v2  ;;  %1942 = vmatmul.f32.gmra.mxu2 %v362_v3  ;;  %v1596_v16 = vadd.f32 %v1595_v6, %v1557_v1  ;;  %v268_v2 = vld [vmem:[%s8254_s0 + $0x1e0] sm:$0xff]  ;;  %v270_v3 = vld [vmem:[%s8254_s0 + $0x1f0] sm:$0xff] }
  0xea   : > { %2261 = vmatpush.msra.mxu3 %v1300_v57  ;;  %2224 = vmatpush.msra.mxu2 %v1249_v60  ;;  %v1522_v56 = vld [vmem:[%s5005_s29 + $0x23d0] sm:$0xff]  ;;  %v1471_v57 = vld [vmem:[%s5005_s29 + $0x2238] sm:$0xff] }
  0xeb   : > { %1904 = vmatmul.f32.gmra.mxu1 %v361_v7  ;;  %2148 = vmatpush.msra.mxu0 %v1153_v63  ;;  %v1519_v60 = vld [vmem:[%s5005_s29 + $0x23b8] sm:$0xff] }
  0xec   : > { %1980 = vmatmul.f32.gmra.mxu3 %v363_v11  ;;  %v1633_v17 = vpop.f32.mrf.mxu2  ;;  %2185 = vmatpush.msra.mxu1 %v1204_v62  ;;  %v1201_v11 = vld [vmem:[%s5005_s29 + $0x19c8] sm:$0xff] }
  0xed   : > { %v1634_v18 = vadd.f32 %v1633_v17, %v1596_v16  ;;  %2262 = vmatpush.msra.mxu3 %v1297_v0  ;;  %2225 = vmatpush.msra.mxu2 %v1246_v12  ;;  %v1423_v0 = vld [vmem:[%s5005_s29 + $0x20b8] sm:$0xff] }
  0xee   : > { %v1560_v22 = vpop.f32.mrf.mxu0  ;;  %2186 = vmatpush.msra.mxu1 %v1201_v11 }
  0xef   : > { %v1671_v25 = vpop.f32.mrf.mxu3  ;;  %2226 = vmatpush.msra.mxu2 %v1243_v15  ;;  %2263 = vmatpush.msra.mxu3 %v1294_v14  ;;  %v1465_v14 = vld [vmem:[%s5005_s29 + $0x2208] sm:$0xff]  ;;  %v343_v15 = vld [vmem:[%s8254_s0 + $0x438] sm:$0xff] }
  0xf0   : > { %v5568_v27 = vadd.f32 %v1671_v25, %v1634_v18  ;;  %v1598_v28 = vpop.f32.mrf.mxu1  ;;  %v1198_v18 = vld [vmem:[%s5005_s29 + $0x19b0] sm:$0xff] }
  0xf1   : > { %2000 = vmatmul.f32.vlgmr.msrb.gmra.mxu0 %v220_v23  ;;  %2076 = vmatmul.f32.vlgmr.msrb.gmra.mxu2 %v222_v24  ;;  %v1599_v36 = vadd.f32 %v1598_v28, %v1560_v22  ;;  %v292_v23 = vld [vmem:[%s8254_s0 + $0x2a0] sm:$0xff]  ;;  %v294_v24 = vld [vmem:[%s8254_s0 + $0x2b0] sm:$0xff]  ;;  %v293_v28 = vld [vmem:[%s8254_s0 + $0x2a8] sm:$0xff] }
  0xf2   : > { %2187 = vmatpush.msra.mxu1 %v1198_v18  ;;  %2264 = vmatpush.msra.mxu3 %v1291_v21  ;;  %v1462_v21 = vld [vmem:[%s5005_s29 + $0x21f0] sm:$0xff] }
  0xf3   : > { %2038 = vmatmul.f32.vlgmr.msrb.gmra.mxu1 %v221_v26 }
  0xf4   : > { %2114 = vmatmul.f32.vlgmr.msrb.gmra.mxu3 %v223_v33  ;;  %v1636_v37 = vpop.f32.mrf.mxu2  ;;  %v1240_v33 = vld [vmem:[%s5005_s29 + $0x1b00] sm:$0xff]  ;;  %2188 = vmatpush.msra.mxu1 %v1195_v32 }
  0xf5   : > { %v1637_v40 = vadd.f32 %v1636_v37, %v1599_v36  ;;  %2227 = vmatpush.msra.mxu2 %v1240_v33  ;;  %v1477_v36 = vld [vmem:[%s5005_s29 + $0x2268] sm:$0xff]  ;;  %v1192_v37 = vld [vmem:[%s5005_s29 + $0x1980] sm:$0xff]  ;;  %2265 = vmatpush.msra.mxu3 %v1288_v35  ;;  %v1459_v35 = vld [vmem:[%s5005_s29 + $0x21d8] sm:$0xff] }
  0xf6   : > { %v1563_v43 = vpop.f32.mrf.mxu0  ;;  %2189 = vmatpush.msra.mxu1 %v1192_v37  ;;  %v1363_v37 = vld [vmem:[%s5005_s29 + $0x1ed8] sm:$0xff] }
  0xf7   : > { %v1674_v46 = vpop.f32.mrf.mxu3  ;;  %2364 = vmatpush.msrb.mxu2 %v1477_v36  ;;  %2402 = vmatpush.msrb.mxu3 %v1525_v41  ;;  %v1414_v36 = vld [vmem:[%s5005_s29 + $0x2070] sm:$0xff] }
  0xf8   : > { %v5588_v47 = vadd.f32 %v1674_v46, %v1637_v40  ;;  %v1601_v48 = vpop.f32.mrf.mxu1  ;;  %v1381_v40 = vld [vmem:[%s5005_s29 + $0x1f68] sm:$0xff]  ;;  %v316_v46 = vld [vmem:[%s8254_s0 + $0x360] sm:$0xff] }
  0xf9   : > { %2003 = vmatmul.f32.gmra.mxu0 %v244_v44  ;;  %2079 = vmatmul.f32.gmra.mxu2 %v246_v45  ;;  %v1602_v58 = vadd.f32 %v1601_v48, %v1563_v43  ;;  %v1429_v43 = vld [vmem:[%s5005_s29 + $0x20e8] sm:$0xff]  ;;  %v1474_v44 = vld [vmem:[%s5005_s29 + $0x2250] sm:$0xff] }
  0xfa   : > { %v318_v48 = vld [vmem:[%s8254_s0 + $0x370] sm:$0xff]  ;;  %2326 = vmatpush.msrb.mxu1 %v1429_v43  ;;  %2365 = vmatpush.msrb.mxu2 %v1474_v44  ;;  %v1360_v44 = vld [vmem:[%s5005_s29 + $0x1ec0] sm:$0xff] }
  0xfb   : > { %2041 = vmatmul.f32.gmra.mxu1 %v245_v50  ;;  %2403 = vmatpush.msrb.mxu3 %v1522_v56 }
  0xfc   : > { %2117 = vmatmul.f32.gmra.mxu3 %v247_v53  ;;  %v1639_v59 = vpop.f32.mrf.mxu2  ;;  %2366 = vmatpush.msrb.mxu2 %v1471_v57  ;;  %v1408_v57 = vld [vmem:[%s5005_s29 + $0x2040] sm:$0xff] }
  0xfd   : > { %v1640_v61 = vadd.f32 %v1639_v59, %v1602_v58  ;;  %v1426_v58 = vld [vmem:[%s5005_s29 + $0x20d0] sm:$0xff]  ;;  %v1375_v59 = vld [vmem:[%s5005_s29 + $0x1f38] sm:$0xff]  ;;  %2404 = vmatpush.msrb.mxu3 %v1519_v60  ;;  %v1405_v60 = vld [vmem:[%s5005_s29 + $0x2028] sm:$0xff] }
  0xfe   : > { %v1697_v1 = vpop.f32.mrf.mxu0  ;;  %2327 = vmatpush.msrb.mxu1 %v1426_v58  ;;  %v1357_v58 = vld [vmem:[%s5005_s29 + $0x1ea8] sm:$0xff] }
  0xff   : > { %v1677_v4 = vpop.f32.mrf.mxu3  ;;  %v1698_v6 = vadd.f32 %v1697_v1, %v5475_v9  ;;  %v1150_v9 = vld [vmem:[%s5005_s29 + $0x1830] sm:$0xff]  ;;  %v1468_v1 = vld [vmem:[%s5005_s29 + $0x2220] sm:$0xff] }
 0x100   : > { %v5613_v7 = vadd.f32 %v1677_v4, %v1640_v61  ;;  %v1735_v8 = vpop.f32.mrf.mxu1  ;;  %2149 = vmatpush.msra.mxu0 %v1150_v9  ;;  %v342_v4 = vld [vmem:[%s8254_s0 + $0x430] sm:$0xff]  ;;  %2328 = vmatpush.msrb.mxu1 %v1423_v0  ;;  %v1516_v9 = vld [vmem:[%s5005_s29 + $0x23a0] sm:$0xff] }
 0x101   : > { %2006 = vmatmul.f32.gmra.mxu0 %v268_v2  ;;  %2082 = vmatmul.f32.gmra.mxu2 %v270_v3  ;;  %v1736_v16 = vadd.f32 %v1735_v8, %v1698_v6  ;;  %v340_v3 = vld [vmem:[%s8254_s0 + $0x420] sm:$0xff]  ;;  %v1354_v0 = vld [vmem:[%s5005_s29 + $0x1e90] sm:$0xff] }
 0x102   : > { %2150 = vmatpush.msra.mxu0 %v1147_v20  ;;  %2367 = vmatpush.msrb.mxu2 %v1468_v1  ;;  %v1417_v20 = vld [vmem:[%s5005_s29 + $0x2088] sm:$0xff]  ;;  %v1498_v1 = vld [vmem:[%s5005_s29 + $0x2310] sm:$0xff] }
 0x103   : > { %2044 = vmatmul.f32.gmra.mxu1 %v269_v10  ;;  %v341_v10 = vld [vmem:[%s8254_s0 + $0x428] sm:$0xff]  ;;  %2405 = vmatpush.msrb.mxu3 %v1516_v9 }
 0x104   : > { %2120 = vmatmul.f32.gmra.mxu3 %v271_v13  ;;  %v1773_v17 = vpop.f32.mrf.mxu2  ;;  %2151 = vmatpush.msra.mxu0 %v1144_v34  ;;  %v1372_v13 = vld [vmem:[%s5005_s29 + $0x1f20] sm:$0xff] }
 0x105   : > { %v1774_v19 = vadd.f32 %v1773_v17, %v1736_v16  ;;  %v1369_v16 = vld [vmem:[%s5005_s29 + $0x1f08] sm:$0xff]  ;;  %2368 = vmatpush.msrb.mxu2 %v1465_v14 }
 0x106   : > { %v1700_v22 = vpop.f32.mrf.mxu0  ;;  %2288 = vmatpush.msrb.mxu0 %v1381_v40  ;;  %v1513_v17 = vld [vmem:[%s5005_s29 + $0x2388] sm:$0xff]  ;;  %v1456_v40 = vld [vmem:[%s5005_s29 + $0x21c0] sm:$0xff] }
 0x107   : > { %v1701_v25 = vadd.f32 %v1700_v22, %v5496_v29  ;;  %v1811_v26 = vpop.f32.mrf.mxu3  ;;  %v295_v29 = vld [vmem:[%s8254_s0 + $0x2b8] sm:$0xff]  ;;  %2406 = vmatpush.msrb.mxu3 %v1513_v17  ;;  %2369 = vmatpush.msrb.mxu2 %v1462_v21 }
 0x108   : > { %v5639_v30 = vadd.f32 %v1811_v26, %v1774_v19  ;;  %v1738_v31 = vpop.f32.mrf.mxu1  ;;  %2289 = vmatpush.msrb.mxu0 %v1378_v55  ;;  %v364_v26 = vld [vmem:[%s8254_s0 + $0x4e0] sm:$0x1]  ;;  %v225_v55 = vld [vmem:[%s8254_s0 + $0x88] sm:$0xff]  ;;  %v251_v17 = vld [vmem:[%s8254_s0 + $0x158] sm:$0xff] }
 0x109   : > { %2009 = vmatmul.f32.gmra.mxu0 %v292_v23  ;;  %2085 = vmatmul.f32.gmra.mxu2 %v294_v24  ;;  %v1739_v38 = vadd.f32 %v1738_v31, %v1701_v25  ;;  %v1366_v23 = vld [vmem:[%s5005_s29 + $0x1ef0] sm:$0xff] }
 0x10a   : > { %2290 = vmatpush.msrb.mxu0 %v1375_v59  ;;  %v1510_v24 = vld [vmem:[%s5005_s29 + $0x2370] sm:$0xff]  ;;  %2370 = vmatpush.msrb.mxu2 %v1459_v35  ;;  %v1501_v59 = vld [vmem:[%s5005_s29 + $0x2328] sm:$0xff] }
 0x10b   : > { %2047 = vmatmul.f32.gmra.mxu1 %v293_v28  ;;  %v366_v28 = vld [vmem:[%s8254_s0 + $0x4f0] sm:$0x1]  ;;  %2407 = vmatpush.msrb.mxu3 %v1510_v24 }
 0x10c   : > { %2123 = vmatmul.f32.gmra.mxu3 %v295_v29  ;;  %v1776_v39 = vpop.f32.mrf.mxu2  ;;  %2291 = vmatpush.msrb.mxu0 %v1372_v13  ;;  %v365_v29 = vld [vmem:[%s8254_s0 + $0x4e8] sm:$0x1] }
 0x10d   : > { %v1777_v42 = vadd.f32 %v1776_v39, %v1739_v38  ;;  %v1507_v38 = vld [vmem:[%s5005_s29 + $0x2358] sm:$0xff]  ;;  %2371 = vmatpush.msrb.mxu2 %v1456_v40 }
 0x10e   : > { %v1703_v45 = vpop.f32.mrf.mxu0  ;;  %2292 = vmatpush.msrb.mxu0 %v1369_v16  ;;  %v1411_v39 = vld [vmem:[%s5005_s29 + $0x2058] sm:$0xff]  ;;  %2408 = vmatpush.msrb.mxu3 %v1507_v38  ;;  %v1393_v38 = vld [vmem:[%s5005_s29 + $0x1fc8] sm:$0xff] }
 0x10f   : > { %v1704_v50 = vadd.f32 %v1703_v45, %v5521_v49  ;;  %v1814_v51 = vpop.f32.mrf.mxu3  ;;  %v319_v49 = vld [vmem:[%s8254_s0 + $0x378] sm:$0xff]  ;;  %v1504_v45 = vld [vmem:[%s5005_s29 + $0x2340] sm:$0xff] }
 0x110   : > { %v5661_v52 = vadd.f32 %v1814_v51, %v1777_v42  ;;  %v1741_v53 = vpop.f32.mrf.mxu1  ;;  %2293 = vmatpush.msrb.mxu0 %v1366_v23  ;;  %v226_v51 = vld [vmem:[%s8254_s0 + $0x90] sm:$0xff]  ;;  %2409 = vmatpush.msrb.mxu3 %v1504_v45  ;;  %v1495_v16 = vld [vmem:[%s5005_s29 + $0x22f8] sm:$0xff]  ;;  %v1441_v23 = vld [vmem:[%s5005_s29 + $0x2148] sm:$0xff] }
 0x111   : > { %2012 = vmatmul.f32.gmra.mxu0 %v316_v46  ;;  %2088 = vmatmul.f32.gmra.mxu2 %v318_v48  ;;  %v1742_v61 = vadd.f32 %v1741_v53, %v1704_v50  ;;  %v1453_v46 = vld [vmem:[%s5005_s29 + $0x21a8] sm:$0xff]  ;;  %v224_v50 = vld [vmem:[%s8254_s0 + $0x80] sm:$0xff]  ;;  %v275_v40 = vld [vmem:[%s8254_s0 + $0x218] sm:$0xff] }
 0x112   : > { %2294 = vmatpush.msrb.mxu0 %v1363_v37  ;;  %2372 = vmatpush.msrb.mxu2 %v1453_v46  ;;  %v273_v37 = vld [vmem:[%s8254_s0 + $0x208] sm:$0xff]  ;;  %v1390_v45 = vld [vmem:[%s5005_s29 + $0x1fb0] sm:$0xff] }
 0x113   : > { %2050 = vmatmul.f32.gmra.mxu1 %v317_v54  ;;  %2410 = vmatpush.msrb.mxu3 %v1501_v59 }
 0x114   : > { %2126 = vmatmul.f32.gmra.mxu3 %v319_v49  ;;  %v1779_v62 = vpop.f32.mrf.mxu2  ;;  %2295 = vmatpush.msrb.mxu0 %v1360_v44 }
 0x115   : > { %v1780_v63 = vadd.f32 %v1779_v62, %v1742_v61  ;;  %v1450_v61 = vld [vmem:[%s5005_s29 + $0x2190] sm:$0xff]  ;;  %2411 = vmatpush.msrb.mxu3 %v1498_v1 }
 0x116   : > { %v1706_v2 = vpop.f32.mrf.mxu0  ;;  %2296 = vmatpush.msrb.mxu0 %v1357_v58  ;;  %2373 = vmatpush.msrb.mxu2 %v1450_v61  ;;  %v1336_v61 = vld [vmem:[%s5005_s29 + $0x1e00] sm:$0xff] }
 0x117   : > { %v1707_v6 = vadd.f32 %v1706_v2, %v5542_v5  ;;  %v1817_v8 = vpop.f32.mrf.mxu3  ;;  %v1420_v5 = vld [vmem:[%s5005_s29 + $0x20a0] sm:$0xff]  ;;  %2412 = vmatpush.msrb.mxu3 %v1495_v16 }
 0x118   : > { %v5687_v11 = vadd.f32 %v1817_v8, %v1780_v63  ;;  %v1744_v12 = vpop.f32.mrf.mxu1  ;;  %2329 = vmatpush.msrb.mxu1 %v1420_v5  ;;  %2297 = vmatpush.msrb.mxu0 %v1354_v0  ;;  %v248_v8 = vld [vmem:[%s8254_s0 + $0x140] sm:$0xff]  ;;  %v1351_v5 = vld [vmem:[%s5005_s29 + $0x1e78] sm:$0xff] }
 0x119   : > { %2015 = vmatmul.f32.gmra.mxu0 %v340_v3  ;;  %2091 = vmatmul.f32.gmra.mxu2 %v342_v4  ;;  %v1745_v18 = vadd.f32 %v1744_v12, %v1707_v6  ;;  %v1447_v3 = vld [vmem:[%s5005_s29 + $0x2178] sm:$0xff]  ;;  %v1402_v4 = vld [vmem:[%s5005_s29 + $0x2010] sm:$0xff]  ;;  %v1384_v0 = vld [vmem:[%s5005_s29 + $0x1f80] sm:$0xff] }
 0x11a   : > { %2330 = vmatpush.msrb.mxu1 %v1417_v20  ;;  %2374 = vmatpush.msrb.mxu2 %v1447_v3  ;;  %v1492_v20 = vld [vmem:[%s5005_s29 + $0x22e0] sm:$0xff]  ;;  %v422_v3 = vld [vmem:[%s5005_s29 + $0x170] sm:$0xff] }
 0x11b   : > { %2053 = vmatmul.f32.gmra.mxu1 %v341_v10  ;;  %v250_v10 = vld [vmem:[%s8254_s0 + $0x150] sm:$0xff]  ;;  %2298 = vmatpush.msrb.mxu0 %v1351_v5 }
 0x11c   : > { %2129 = vmatmul.f32.gmra.mxu3 %v343_v15  ;;  %v1782_v19 = vpop.f32.mrf.mxu2  ;;  %2331 = vmatpush.msrb.mxu1 %v1414_v36  ;;  %v249_v15 = vld [vmem:[%s8254_s0 + $0x148] sm:$0xff] }
 0x11d   : > { %v1783_v22 = vadd.f32 %v1782_v19, %v1745_v18  ;;  %v1444_v18 = vld [vmem:[%s5005_s29 + $0x2160] sm:$0xff]  ;;  %2413 = vmatpush.msrb.mxu3 %v1492_v20 }
 0x11e   : > { %v1709_v25 = vpop.f32.mrf.mxu0  ;;  %2332 = vmatpush.msrb.mxu1 %v1411_v39  ;;  %v1348_v19 = vld [vmem:[%s5005_s29 + $0x1e60] sm:$0xff]  ;;  %2375 = vmatpush.msrb.mxu2 %v1444_v18  ;;  %v1438_v39 = vld [vmem:[%s5005_s29 + $0x2130] sm:$0xff]  ;;  %v419_v18 = vld [vmem:[%s5005_s29 + $0x158] sm:$0xff] }
 0x11f   : > { %v1710_v31 = vadd.f32 %v1709_v25, %v5568_v27  ;;  %v1820_v32 = vpop.f32.mrf.mxu3  ;;  %v367_v27 = vld [vmem:[%s8254_s0 + $0x4f8] sm:$0x1]  ;;  %2299 = vmatpush.msrb.mxu0 %v1348_v19  ;;  %v1396_v25 = vld [vmem:[%s5005_s29 + $0x1fe0] sm:$0xff] }
 0x120   : > { %v5709_v33 = vadd.f32 %v1820_v32, %v1783_v22  ;;  %v1747_v34 = vpop.f32.mrf.mxu1  ;;  %2333 = vmatpush.msrb.mxu1 %v1408_v57  ;;  %v272_v32 = vld [vmem:[%s8254_s0 + $0x200] sm:$0xff]  ;;  %2376 = vmatpush.msrb.mxu2 %v1441_v23  ;;  %v297_v57 = vld [vmem:[%s8254_s0 + $0x2c8] sm:$0xff]  ;;  %v563_v19 = vld [vmem:[%s5005_s29 + $0x5d8] sm:$0xff] }
 0x121   : > { %2018 = vmatmul.f32.gmra.mxu0 %v364_v26  ;;  %2094 = vmatmul.f32.gmra.mxu2 %v366_v28  ;;  %v1748_v41 = vadd.f32 %v1747_v34, %v1710_v31  ;;  %v1345_v26 = vld [vmem:[%s5005_s29 + $0x1e48] sm:$0xff]  ;;  %v274_v34 = vld [vmem:[%s8254_s0 + $0x210] sm:$0xff]  ;;  %v512_v20 = vld [vmem:[%s5005_s29 + $0x440] sm:$0xff] }
 0x122   : > { %2334 = vmatpush.msrb.mxu1 %v1405_v60  ;;  %v1489_v28 = vld [vmem:[%s5005_s29 + $0x22c8] sm:$0xff]  ;;  %2300 = vmatpush.msrb.mxu0 %v1345_v26  ;;  %v1432_v60 = vld [vmem:[%s5005_s29 + $0x2100] sm:$0xff] }
 0x123   : > { %2056 = vmatmul.f32.gmra.mxu1 %v365_v29  ;;  %2414 = vmatpush.msrb.mxu3 %v1489_v28  ;;  %v560_v23 = vld [vmem:[%s5005_s29 + $0x5c0] sm:$0xff] }
 0x124   : > { %2132 = vmatmul.f32.gmra.mxu3 %v367_v27  ;;  %v1785_v42 = vpop.f32.mrf.mxu2  ;;  %2335 = vmatpush.msrb.mxu1 %v1402_v4  ;;  %v566_v4 = vld [vmem:[%s5005_s29 + $0x5f0] sm:$0xff]  ;;  %v464_v28 = vld [vmem:[%s5005_s29 + $0x2c0] sm:$0xff] }
 0x125   : > { %v1786_v43 = vadd.f32 %v1785_v42, %v1748_v41  ;;  %2377 = vmatpush.msrb.mxu2 %v1438_v39  ;;  %v1486_v41 = vld [vmem:[%s5005_s29 + $0x22b0] sm:$0xff]  ;;  %v1435_v42 = vld [vmem:[%s5005_s29 + $0x2118] sm:$0xff] }
 0x126   : > { %v1712_v48 = vpop.f32.mrf.mxu0  ;;  %2415 = vmatpush.msrb.mxu3 %v1486_v41  ;;  %v506_v41 = vld [vmem:[%s5005_s29 + $0x410] sm:$0xff] }
 0x127   : > { %v1713_v53 = vadd.f32 %v1712_v48, %v5588_v47  ;;  %v1823_v54 = vpop.f32.mrf.mxu3  ;;  %v227_v47 = vld [vmem:[%s8254_s0 + $0x98] sm:$0xff]  ;;  %2378 = vmatpush.msrb.mxu2 %v1435_v42 }
 0x128   : > { %v5736_v56 = vadd.f32 %v1823_v54, %v1786_v43  ;;  %v1750_v49 = vpop.f32.mrf.mxu1  ;;  %v1339_v48 = vld [vmem:[%s5005_s29 + $0x1e18] sm:$0xff]  ;;  %v298_v54 = vld [vmem:[%s8254_s0 + $0x2d0] sm:$0xff] }
 0x129   : > { %2152 = vmatmul.f32.vlgmr.msra.gmra.mxu0 %v224_v50  ;;  %2228 = vmatmul.f32.vlgmr.msra.gmra.mxu2 %v226_v51  ;;  %v1751_v62 = vadd.f32 %v1750_v49, %v1713_v53  ;;  %v1483_v50 = vld [vmem:[%s5005_s29 + $0x2298] sm:$0xff]  ;;  %v296_v53 = vld [vmem:[%s8254_s0 + $0x2c0] sm:$0xff] }
 0x12a   : > { %2416 = vmatpush.msrb.mxu3 %v1483_v50  ;;  %2379 = vmatpush.msrb.mxu2 %v1432_v60  ;;  %v347_v42 = vld [vmem:[%s8254_s0 + $0x458] sm:$0xff] }
 0x12b   : > { %2190 = vmatmul.f32.vlgmr.msra.gmra.mxu1 %v225_v55  ;;  %v503_v50 = vld [vmem:[%s5005_s29 + $0x3f8] sm:$0xff] }
 0x12c   : > { %2266 = vmatmul.f32.vlgmr.msra.gmra.mxu3 %v227_v47  ;;  %v1788_v63 = vpop.f32.mrf.mxu2  ;;  %v1387_v47 = vld [vmem:[%s5005_s29 + $0x1f98] sm:$0xff] }
 0x12d   : > { %v1789_v2 = vadd.f32 %v1788_v63, %v1751_v62  ;;  %v1480_v62 = vld [vmem:[%s5005_s29 + $0x2280] sm:$0xff]  ;;  %v518_v63 = vld [vmem:[%s5005_s29 + $0x470] sm:$0xff] }
 0x12e   : > { %v1715_v6 = vpop.f32.mrf.mxu0  ;;  %2516 = vmatpush.msra.mxu2 %v518_v63  ;;  %2417 = vmatpush.msrb.mxu3 %v1480_v62  ;;  %v500_v62 = vld [vmem:[%s5005_s29 + $0x3e0] sm:$0xff]  ;;  %v455_v63 = vld [vmem:[%s5005_s29 + $0x278] sm:$0xff] }
 0x12f   : > { %v1716_v12 = vadd.f32 %v1715_v6, %v5613_v7  ;;  %v1826_v13 = vpop.f32.mrf.mxu3  ;;  %v1399_v7 = vld [vmem:[%s5005_s29 + $0x1ff8] sm:$0xff] }
 0x130   : > { %v5757_v9 = vadd.f32 %v1826_v13, %v1789_v2  ;;  %v1753_v14 = vpop.f32.mrf.mxu1  ;;  %2336 = vmatpush.msrb.mxu1 %v1399_v7  ;;  %v320_v13 = vld [vmem:[%s8254_s0 + $0x380] sm:$0xff]  ;;  %2554 = vmatpush.msra.mxu3 %v566_v4  ;;  %v321_v7 = vld [vmem:[%s8254_s0 + $0x388] sm:$0xff] }
 0x131   : > { %2155 = vmatmul.f32.gmra.mxu0 %v248_v8  ;;  %2231 = vmatmul.f32.gmra.mxu2 %v250_v10  ;;  %v1754_v21 = vadd.f32 %v1753_v14, %v1716_v12  ;;  %v470_v8 = vld [vmem:[%s5005_s29 + $0x2f0] sm:$0xff]  ;;  %v515_v10 = vld [vmem:[%s5005_s29 + $0x458] sm:$0xff] }
 0x132   : > { %2337 = vmatpush.msrb.mxu1 %v1396_v25  ;;  %v322_v14 = vld [vmem:[%s8254_s0 + $0x390] sm:$0xff]  ;;  %2517 = vmatpush.msra.mxu2 %v515_v10  ;;  %v401_v10 = vld [vmem:[%s5005_s29 + $0xc8] sm:$0xff] }
 0x133   : > { %2193 = vmatmul.f32.gmra.mxu1 %v249_v15  ;;  %2555 = vmatpush.msra.mxu3 %v563_v19 }
 0x134   : > { %2269 = vmatmul.f32.gmra.mxu3 %v251_v17  ;;  %v1791_v22 = vpop.f32.mrf.mxu2  ;;  %2338 = vmatpush.msrb.mxu1 %v1393_v38 }
 0x135   : > { %v1792_v24 = vadd.f32 %v1791_v22, %v1754_v21  ;;  %v467_v21 = vld [vmem:[%s5005_s29 + $0x2d8] sm:$0xff]  ;;  %v416_v22 = vld [vmem:[%s5005_s29 + $0x140] sm:$0xff]  ;;  %2518 = vmatpush.msra.mxu2 %v512_v20  ;;  %2556 = vmatpush.msra.mxu3 %v560_v23  ;;  %v449_v20 = vld [vmem:[%s5005_s29 + $0x248] sm:$0xff] }
 0x136   : > { %v1849_v31 = vpop.f32.mrf.mxu0  ;;  %2339 = vmatpush.msrb.mxu1 %v1390_v45  ;;  %v446_v23 = vld [vmem:[%s5005_s29 + $0x230] sm:$0xff] }
 0x137   : > { %v1829_v29 = vpop.f32.mrf.mxu3  ;;  %v1850_v35 = vadd.f32 %v1849_v31, %v5639_v30  ;;  %v1342_v30 = vld [vmem:[%s5005_s29 + $0x1e30] sm:$0xff]  ;;  %v509_v31 = vld [vmem:[%s5005_s29 + $0x428] sm:$0xff] }
 0x138   : > { %v5782_v36 = vadd.f32 %v1829_v29, %v1792_v24  ;;  %v1887_v27 = vpop.f32.mrf.mxu1  ;;  %2301 = vmatpush.msrb.mxu0 %v1342_v30  ;;  %2340 = vmatpush.msrb.mxu1 %v1387_v47  ;;  %v346_v29 = vld [vmem:[%s8254_s0 + $0x450] sm:$0xff]  ;;  %v557_v30 = vld [vmem:[%s5005_s29 + $0x5a8] sm:$0xff] }
 0x139   : > { %2158 = vmatmul.f32.gmra.mxu0 %v272_v32  ;;  %2234 = vmatmul.f32.gmra.mxu2 %v274_v34  ;;  %v1888_v43 = vadd.f32 %v1887_v27, %v1850_v35  ;;  %v344_v34 = vld [vmem:[%s8254_s0 + $0x440] sm:$0xff] }
 0x13a   : > { %2302 = vmatpush.msrb.mxu0 %v1339_v48  ;;  %2341 = vmatpush.msrb.mxu1 %v1384_v0  ;;  %v458_v48 = vld [vmem:[%s5005_s29 + $0x290] sm:$0xff]  ;;  %v404_v0 = vld [vmem:[%s5005_s29 + $0xe0] sm:$0xff] }
 0x13b   : > { %2196 = vmatmul.f32.gmra.mxu1 %v273_v37  ;;  %2519 = vmatpush.msra.mxu2 %v509_v31  ;;  %v345_v37 = vld [vmem:[%s8254_s0 + $0x448] sm:$0xff]  ;;  %v539_v31 = vld [vmem:[%s5005_s29 + $0x518] sm:$0xff] }
 0x13c   : > { %2272 = vmatmul.f32.gmra.mxu3 %v275_v40  ;;  %v1925_v44 = vpop.f32.mrf.mxu2  ;;  %2303 = vmatpush.msrb.mxu0 %v1336_v61  ;;  %v413_v40 = vld [vmem:[%s5005_s29 + $0x128] sm:$0xff] }
 0x13d   : > { %v1926_v46 = vadd.f32 %v1925_v44, %v1888_v43  ;;  %2478 = vmatpush.msra.mxu1 %v470_v8  ;;  %2557 = vmatpush.msra.mxu3 %v557_v30  ;;  %v410_v43 = vld [vmem:[%s5005_s29 + $0x110] sm:$0xff] }
 0x13e   : > { %v1852_v51 = vpop.f32.mrf.mxu0  ;;  %2440 = vmatpush.msra.mxu0 %v422_v3  ;;  %v554_v44 = vld [vmem:[%s5005_s29 + $0x590] sm:$0xff]  ;;  %2520 = vmatpush.msra.mxu2 %v506_v41  ;;  %v497_v3 = vld [vmem:[%s5005_s29 + $0x3c8] sm:$0xff] }
 0x13f   : > { %v1853_v55 = vadd.f32 %v1852_v51, %v5661_v52  ;;  %v1963_v49 = vpop.f32.mrf.mxu3  ;;  %v299_v52 = vld [vmem:[%s8254_s0 + $0x2d8] sm:$0xff]  ;;  %2479 = vmatpush.msra.mxu1 %v467_v21  ;;  %2558 = vmatpush.msra.mxu3 %v554_v44  ;;  %v398_v21 = vld [vmem:[%s5005_s29 + $0xb0] sm:$0xff] }
 0x140   : > { %v5808_v58 = vadd.f32 %v1963_v49, %v1926_v46  ;;  %v1890_v59 = vpop.f32.mrf.mxu1  ;;  %2441 = vmatpush.msra.mxu0 %v419_v18  ;;  %v368_v49 = vld [vmem:[%s8254_s0 + $0x500] sm:$0x1]  ;;  %2521 = vmatpush.msra.mxu2 %v503_v50  ;;  %v229_v18 = vld [vmem:[%s8254_s0 + $0xa8] sm:$0xff]  ;;  %v255_v44 = vld [vmem:[%s8254_s0 + $0x178] sm:$0xff] }
 0x141   : > { %2161 = vmatmul.f32.gmra.mxu0 %v296_v53  ;;  %2237 = vmatmul.f32.gmra.mxu2 %v298_v54  ;;  %v1891_v1 = vadd.f32 %v1890_v59, %v1853_v55  ;;  %v407_v53 = vld [vmem:[%s5005_s29 + $0xf8] sm:$0xff] }
 0x142   : > { %2442 = vmatpush.msra.mxu0 %v416_v22  ;;  %2480 = vmatpush.msra.mxu1 %v464_v28  ;;  %v551_v54 = vld [vmem:[%s5005_s29 + $0x578] sm:$0xff]  ;;  %v542_v22 = vld [vmem:[%s5005_s29 + $0x530] sm:$0xff] }
 0x143   : > { %2199 = vmatmul.f32.gmra.mxu1 %v297_v57  ;;  %v370_v57 = vld [vmem:[%s8254_s0 + $0x510] sm:$0x1]  ;;  %2559 = vmatpush.msra.mxu3 %v551_v54  ;;  %v395_v28 = vld [vmem:[%s5005_s29 + $0x98] sm:$0xff] }
 0x144   : > { %2275 = vmatmul.f32.gmra.mxu3 %v299_v52  ;;  %v1928_v2 = vpop.f32.mrf.mxu2  ;;  %2443 = vmatpush.msra.mxu0 %v413_v40  ;;  %v369_v52 = vld [vmem:[%s8254_s0 + $0x508] sm:$0x1] }
 0x145   : > { %v1929_v6 = vadd.f32 %v1928_v2, %v1891_v1  ;;  %2522 = vmatpush.msra.mxu2 %v500_v62  ;;  %v548_v1 = vld [vmem:[%s5005_s29 + $0x560] sm:$0xff] }
 0x146   : > { %v1855_v12 = vpop.f32.mrf.mxu0  ;;  %2444 = vmatpush.msra.mxu0 %v410_v43  ;;  %v452_v2 = vld [vmem:[%s5005_s29 + $0x260] sm:$0xff]  ;;  %2560 = vmatpush.msra.mxu3 %v548_v1  ;;  %v434_v1 = vld [vmem:[%s5005_s29 + $0x1d0] sm:$0xff] }
 0x147   : > { %v1856_v15 = vadd.f32 %v1855_v12, %v5687_v11  ;;  %v1966_v5 = vpop.f32.mrf.mxu3  ;;  %v323_v11 = vld [vmem:[%s8254_s0 + $0x398] sm:$0xff]  ;;  %2523 = vmatpush.msra.mxu2 %v497_v3  ;;  %v545_v12 = vld [vmem:[%s5005_s29 + $0x548] sm:$0xff]  ;;  %v536_v43 = vld [vmem:[%s5005_s29 + $0x500] sm:$0xff] }
 0x148   : > { %v5830_v16 = vadd.f32 %v1966_v5, %v1929_v6  ;;  %v1893_v17 = vpop.f32.mrf.mxu1  ;;  %2445 = vmatpush.msra.mxu0 %v407_v53  ;;  %v230_v5 = vld [vmem:[%s8254_s0 + $0xb0] sm:$0xff]  ;;  %2561 = vmatpush.msra.mxu3 %v545_v12  ;;  %v279_v3 = vld [vmem:[%s8254_s0 + $0x238] sm:$0xff] }
 0x149   : > { %2164 = vmatmul.f32.gmra.mxu0 %v320_v13  ;;  %2240 = vmatmul.f32.gmra.mxu2 %v322_v14  ;;  %v1894_v24 = vadd.f32 %v1893_v17, %v1856_v15  ;;  %v494_v13 = vld [vmem:[%s5005_s29 + $0x3b0] sm:$0xff]  ;;  %v228_v15 = vld [vmem:[%s8254_s0 + $0xa0] sm:$0xff]  ;;  %v431_v12 = vld [vmem:[%s5005_s29 + $0x1b8] sm:$0xff] }
 0x14a   : > { %2446 = vmatpush.msra.mxu0 %v404_v0  ;;  %2524 = vmatpush.msra.mxu2 %v494_v13  ;;  %v482_v53 = vld [vmem:[%s5005_s29 + $0x350] sm:$0xff]  ;;  %v277_v0 = vld [vmem:[%s8254_s0 + $0x228] sm:$0xff] }
 0x14b   : > { %2202 = vmatmul.f32.gmra.mxu1 %v321_v7  ;;  %2562 = vmatpush.msra.mxu3 %v542_v22 }
 0x14c   : > { %2278 = vmatmul.f32.gmra.mxu3 %v323_v11  ;;  %v1931_v25 = vpop.f32.mrf.mxu2  ;;  %2447 = vmatpush.msra.mxu0 %v401_v10 }
 0x14d   : > { %v1932_v26 = vadd.f32 %v1931_v25, %v1894_v24  ;;  %v491_v24 = vld [vmem:[%s5005_s29 + $0x398] sm:$0xff]  ;;  %2563 = vmatpush.msra.mxu3 %v539_v31 }
 0x14e   : > { %v1858_v32 = vpop.f32.mrf.mxu0  ;;  %2448 = vmatpush.msra.mxu0 %v398_v21  ;;  %2525 = vmatpush.msra.mxu2 %v491_v24  ;;  %v377_v24 = vld [vmem:[%s5005_s29 + $0x8] sm:$0xff] }
 0x14f   : > { %v1859_v35 = vadd.f32 %v1858_v32, %v5709_v33  ;;  %v1969_v27 = vpop.f32.mrf.mxu3  ;;  %v461_v33 = vld [vmem:[%s5005_s29 + $0x2a8] sm:$0xff]  ;;  %2564 = vmatpush.msra.mxu3 %v536_v43 }
 0x150   : > { %v5856_v38 = vadd.f32 %v1969_v27, %v1932_v26  ;;  %v1896_v39 = vpop.f32.mrf.mxu1  ;;  %2481 = vmatpush.msra.mxu1 %v461_v33  ;;  %2449 = vmatpush.msra.mxu0 %v395_v28  ;;  %v252_v27 = vld [vmem:[%s8254_s0 + $0x160] sm:$0xff]  ;;  %v425_v28 = vld [vmem:[%s5005_s29 + $0x188] sm:$0xff] }
 0x151   : > { %2167 = vmatmul.f32.gmra.mxu0 %v344_v34  ;;  %2243 = vmatmul.f32.gmra.mxu2 %v346_v29  ;;  %v1897_v45 = vadd.f32 %v1896_v39, %v1859_v35  ;;  %v488_v34 = vld [vmem:[%s5005_s29 + $0x380] sm:$0xff]  ;;  %v443_v29 = vld [vmem:[%s5005_s29 + $0x218] sm:$0xff] }
 0x152   : > { %2482 = vmatpush.msra.mxu1 %v458_v48  ;;  %2526 = vmatpush.msra.mxu2 %v488_v34  ;;  %v392_v33 = vld [vmem:[%s5005_s29 + $0x80] sm:$0xff]  ;;  %v533_v48 = vld [vmem:[%s5005_s29 + $0x4e8] sm:$0xff]  ;;  %v614_v34 = vld [vmem:[%s5005_s29 + $0x770] sm:$0xff] }
 0x153   : > { %2205 = vmatmul.f32.gmra.mxu1 %v345_v37  ;;  %v254_v37 = vld [vmem:[%s8254_s0 + $0x170] sm:$0xff]  ;;  %2450 = vmatpush.msra.mxu0 %v392_v33 }
 0x154   : > { %2281 = vmatmul.f32.gmra.mxu3 %v347_v42  ;;  %v1934_v46 = vpop.f32.mrf.mxu2  ;;  %2483 = vmatpush.msra.mxu1 %v455_v63  ;;  %v253_v42 = vld [vmem:[%s8254_s0 + $0x168] sm:$0xff] }
 0x155   : > { %v1935_v51 = vadd.f32 %v1934_v46, %v1897_v45  ;;  %v485_v45 = vld [vmem:[%s5005_s29 + $0x368] sm:$0xff]  ;;  %2565 = vmatpush.msra.mxu3 %v533_v48  ;;  %v704_v48 = vld [vmem:[%s5005_s29 + $0xa40] sm:$0xff] }
 0x156   : > { %v1861_v55 = vpop.f32.mrf.mxu0  ;;  %2484 = vmatpush.msra.mxu1 %v452_v2  ;;  %v389_v46 = vld [vmem:[%s5005_s29 + $0x68] sm:$0xff]  ;;  %2527 = vmatpush.msra.mxu2 %v485_v45  ;;  %v479_v2 = vld [vmem:[%s5005_s29 + $0x338] sm:$0xff] }
 0x157   : > { %v1862_v59 = vadd.f32 %v1861_v55, %v5736_v56  ;;  %v1972_v47 = vpop.f32.mrf.mxu3  ;;  %v371_v56 = vld [vmem:[%s8254_s0 + $0x518] sm:$0x1]  ;;  %2451 = vmatpush.msra.mxu0 %v389_v46  ;;  %v437_v55 = vld [vmem:[%s5005_s29 + $0x1e8] sm:$0xff] }
 0x158   : > { %v5878_v60 = vadd.f32 %v1972_v47, %v1935_v51  ;;  %v1899_v61 = vpop.f32.mrf.mxu1  ;;  %2485 = vmatpush.msra.mxu1 %v449_v20  ;;  %v276_v47 = vld [vmem:[%s8254_s0 + $0x220] sm:$0xff]  ;;  %2528 = vmatpush.msra.mxu2 %v482_v53  ;;  %v301_v20 = vld [vmem:[%s8254_s0 + $0x2e8] sm:$0xff]  ;;  %v611_v45 = vld [vmem:[%s5005_s29 + $0x758] sm:$0xff] }
 0x159   : > { %2170 = vmatmul.f32.gmra.mxu0 %v368_v49  ;;  %2246 = vmatmul.f32.gmra.mxu2 %v370_v57  ;;  %v1900_v4 = vadd.f32 %v1899_v61, %v1862_v59  ;;  %v386_v49 = vld [vmem:[%s5005_s29 + $0x50] sm:$0xff]  ;;  %v755_v46 = vld [vmem:[%s5005_s29 + $0xbd8] sm:$0xff]  ;;  %v752_v53 = vld [vmem:[%s5005_s29 + $0xbc0] sm:$0xff] }
 0x15a   : > { %2486 = vmatpush.msra.mxu1 %v446_v23  ;;  %v530_v57 = vld [vmem:[%s5005_s29 + $0x4d0] sm:$0xff]  ;;  %2452 = vmatpush.msra.mxu0 %v386_v49  ;;  %v473_v23 = vld [vmem:[%s5005_s29 + $0x308] sm:$0xff] }
 0x15b   : > { %2208 = vmatmul.f32.gmra.mxu1 %v369_v52  ;;  %v278_v61 = vld [vmem:[%s8254_s0 + $0x230] sm:$0xff]  ;;  %2566 = vmatpush.msra.mxu3 %v530_v57  ;;  %v656_v57 = vld [vmem:[%s5005_s29 + $0x8c0] sm:$0xff] }
 0x15c   : > { %2284 = vmatmul.f32.gmra.mxu3 %v371_v56  ;;  %v1937_v6 = vpop.f32.mrf.mxu2  ;;  %2487 = vmatpush.msra.mxu1 %v443_v29  ;;  %v758_v29 = vld [vmem:[%s5005_s29 + $0xbf0] sm:$0xff] }
 0x15d   : > { %v1938_v8 = vadd.f32 %v1937_v6, %v1900_v4  ;;  %2529 = vmatpush.msra.mxu2 %v479_v2  ;;  %v527_v4 = vld [vmem:[%s5005_s29 + $0x4b8] sm:$0xff]  ;;  %v476_v6 = vld [vmem:[%s5005_s29 + $0x320] sm:$0xff] }
 0x15e   : > { %v1864_v14 = vpop.f32.mrf.mxu0  ;;  %2567 = vmatpush.msra.mxu3 %v527_v4  ;;  %v698_v4 = vld [vmem:[%s5005_s29 + $0xa10] sm:$0xff] }
 0x15f   : > { %v1865_v17 = vadd.f32 %v1864_v14, %v5757_v9  ;;  %v1975_v7 = vpop.f32.mrf.mxu3  ;;  %v231_v9 = vld [vmem:[%s8254_s0 + $0xb8] sm:$0xff]  ;;  %2530 = vmatpush.msra.mxu2 %v476_v6  ;;  %v380_v14 = vld [vmem:[%s5005_s29 + $0x20] sm:$0xff] }
 0x160   : > { %v5905_v19 = vadd.f32 %v1975_v7, %v1938_v8  ;;  %v1902_v11 = vpop.f32.mrf.mxu1  ;;  %v302_v7 = vld [vmem:[%s8254_s0 + $0x2f0] sm:$0xff]  ;;  %v351_v6 = vld [vmem:[%s8254_s0 + $0x478] sm:$0xff] }
 0x161   : > { %2304 = vmatmul.f32.vlgmr.msrb.gmra.mxu0 %v228_v15  ;;  %2380 = vmatmul.f32.vlgmr.msrb.gmra.mxu2 %v230_v5  ;;  %v1903_v25 = vadd.f32 %v1902_v11, %v1865_v17  ;;  %v524_v15 = vld [vmem:[%s5005_s29 + $0x4a0] sm:$0xff] }
 0x162   : > { %v300_v17 = vld [vmem:[%s8254_s0 + $0x2e0] sm:$0xff]  ;;  %2568 = vmatpush.msra.mxu3 %v524_v15  ;;  %2531 = vmatpush.msra.mxu2 %v473_v23  ;;  %v695_v15 = vld [vmem:[%s5005_s29 + $0x9f8] sm:$0xff] }
 0x163   : > { %2342 = vmatmul.f32.vlgmr.msrb.gmra.mxu1 %v229_v18 }
 0x164   : > { %2418 = vmatmul.f32.vlgmr.msrb.gmra.mxu3 %v231_v9  ;;  %v1940_v26 = vpop.f32.mrf.mxu2  ;;  %v428_v9 = vld [vmem:[%s5005_s29 + $0x1a0] sm:$0xff] }
 0x165   : > { %v1941_v32 = vadd.f32 %v1940_v26, %v1903_v25  ;;  %v710_v25 = vld [vmem:[%s5005_s29 + $0xa70] sm:$0xff]  ;;  %v521_v26 = vld [vmem:[%s5005_s29 + $0x488] sm:$0xff] }
 0x166   : > { %v1867_v35 = vpop.f32.mrf.mxu0  ;;  %2668 = vmatpush.msrb.mxu2 %v710_v25  ;;  %2569 = vmatpush.msra.mxu3 %v521_v26  ;;  %v692_v25 = vld [vmem:[%s5005_s29 + $0x9e0] sm:$0xff]  ;;  %v647_v26 = vld [vmem:[%s5005_s29 + $0x878] sm:$0xff] }
 0x167   : > { %v1868_v39 = vadd.f32 %v1867_v35, %v5782_v36  ;;  %v1978_v40 = vpop.f32.mrf.mxu3  ;;  %v440_v36 = vld [vmem:[%s5005_s29 + $0x200] sm:$0xff] }
 0x168   : > { %v5926_v30 = vadd.f32 %v1978_v40, %v1941_v32  ;;  %v1905_v41 = vpop.f32.mrf.mxu1  ;;  %2488 = vmatpush.msra.mxu1 %v440_v36  ;;  %v324_v40 = vld [vmem:[%s8254_s0 + $0x3a0] sm:$0xff]  ;;  %2706 = vmatpush.msrb.mxu3 %v758_v29  ;;  %v325_v36 = vld [vmem:[%s8254_s0 + $0x3a8] sm:$0xff] }
 0x169   : > { %2307 = vmatmul.f32.gmra.mxu0 %v252_v27  ;;  %2383 = vmatmul.f32.gmra.mxu2 %v254_v37  ;;  %v1906_v50 = vadd.f32 %v1905_v41, %v1868_v39  ;;  %v662_v27 = vld [vmem:[%s5005_s29 + $0x8f0] sm:$0xff]  ;;  %v707_v37 = vld [vmem:[%s5005_s29 + $0xa58] sm:$0xff] }
 0x16a   : > { %2489 = vmatpush.msra.mxu1 %v437_v55  ;;  %v326_v41 = vld [vmem:[%s8254_s0 + $0x3b0] sm:$0xff]  ;;  %2669 = vmatpush.msrb.mxu2 %v707_v37  ;;  %v593_v37 = vld [vmem:[%s5005_s29 + $0x6c8] sm:$0xff] }
 0x16b   : > { %2345 = vmatmul.f32.gmra.mxu1 %v253_v42  ;;  %2707 = vmatpush.msrb.mxu3 %v755_v46  ;;  %v590_v46 = vld [vmem:[%s5005_s29 + $0x6b0] sm:$0xff] }
 0x16c   : > { %2421 = vmatmul.f32.gmra.mxu3 %v255_v44  ;;  %v1943_v51 = vpop.f32.mrf.mxu2  ;;  %2490 = vmatpush.msra.mxu1 %v434_v1 }
 0x16d   : > { %v1944_v54 = vadd.f32 %v1943_v51, %v1906_v50  ;;  %v659_v50 = vld [vmem:[%s5005_s29 + $0x8d8] sm:$0xff]  ;;  %v608_v51 = vld [vmem:[%s5005_s29 + $0x740] sm:$0xff]  ;;  %2670 = vmatpush.msrb.mxu2 %v704_v48  ;;  %2708 = vmatpush.msrb.mxu3 %v752_v53 }
 0x16e   : > { %v2001_v59 = vpop.f32.mrf.mxu0  ;;  %2491 = vmatpush.msra.mxu1 %v431_v12  ;;  %v4507_v48 = vld [vmem:[%s8254_s0] sm:$0xff] }
 0x16f   : > { %v1981_v52 = vpop.f32.mrf.mxu3  ;;  %v2002_v62 = vadd.f32 %v2001_v59, %v5808_v58  ;;  %v383_v58 = vld [vmem:[%s5005_s29 + $0x38] sm:$0xff]  ;;  %v701_v59 = vld [vmem:[%s5005_s29 + $0xa28] sm:$0xff] }
 0x170   : > { %v5951_v63 = vadd.f32 %v1981_v52, %v1944_v54  ;;  %v2039_v56 = vpop.f32.mrf.mxu1  ;;  %2453 = vmatpush.msra.mxu0 %v383_v58  ;;  %2492 = vmatpush.msra.mxu1 %v428_v9  ;;  %v350_v52 = vld [vmem:[%s8254_s0 + $0x470] sm:$0xff]  ;;  %v749_v58 = vld [vmem:[%s5005_s29 + $0xba8] sm:$0xff] }
 0x171   : > { %2310 = vmatmul.f32.gmra.mxu0 %v276_v47  ;;  %2386 = vmatmul.f32.gmra.mxu2 %v278_v61  ;;  %v2040_v8 = vadd.f32 %v2039_v56, %v2002_v62  ;;  %v348_v61 = vld [vmem:[%s8254_s0 + $0x460] sm:$0xff] }
 0x172   : > { %2454 = vmatpush.msra.mxu0 %v380_v14  ;;  %2493 = vmatpush.msra.mxu1 %v425_v28  ;;  %v650_v14 = vld [vmem:[%s5005_s29 + $0x890] sm:$0xff]  ;;  %v596_v28 = vld [vmem:[%s5005_s29 + $0x6e0] sm:$0xff] }
 0x173   : > { %2348 = vmatmul.f32.gmra.mxu1 %v277_v0  ;;  %2671 = vmatpush.msrb.mxu2 %v701_v59  ;;  %v349_v0 = vld [vmem:[%s8254_s0 + $0x468] sm:$0xff]  ;;  %v731_v59 = vld [vmem:[%s5005_s29 + $0xb18] sm:$0xff] }
 0x174   : > { %2424 = vmatmul.f32.gmra.mxu3 %v279_v3  ;;  %v2077_v10 = vpop.f32.mrf.mxu2  ;;  %2455 = vmatpush.msra.mxu0 %v377_v24  ;;  %v605_v3 = vld [vmem:[%s5005_s29 + $0x728] sm:$0xff] }
 0x175   : > { %v2078_v13 = vadd.f32 %v2077_v10, %v2040_v8  ;;  %2630 = vmatpush.msrb.mxu1 %v662_v27  ;;  %2709 = vmatpush.msrb.mxu3 %v749_v58  ;;  %v602_v8 = vld [vmem:[%s5005_s29 + $0x710] sm:$0xff]  ;;  %v584_v58 = vld [vmem:[%s5005_s29 + $0x680] sm:$0xff] }
 0x176   : > { %v2004_v5 = vpop.f32.mrf.mxu0  ;;  %2592 = vmatpush.msrb.mxu0 %v614_v34  ;;  %v746_v10 = vld [vmem:[%s5005_s29 + $0xb90] sm:$0xff]  ;;  %2672 = vmatpush.msrb.mxu2 %v698_v4  ;;  %v689_v34 = vld [vmem:[%s5005_s29 + $0x9c8] sm:$0xff]  ;;  %v728_v4 = vld [vmem:[%s5005_s29 + $0xb00] sm:$0xff] }
 0x177   : > { %v2005_v18 = vadd.f32 %v2004_v5, %v5830_v16  ;;  %v2115_v11 = vpop.f32.mrf.mxu3  ;;  %v303_v16 = vld [vmem:[%s8254_s0 + $0x2f8] sm:$0xff]  ;;  %2631 = vmatpush.msrb.mxu1 %v659_v50  ;;  %2710 = vmatpush.msrb.mxu3 %v746_v10  ;;  %v638_v50 = vld [vmem:[%s5005_s29 + $0x830] sm:$0xff]  ;;  %v581_v10 = vld [vmem:[%s5005_s29 + $0x668] sm:$0xff] }
 0x178   : > { %v5977_v21 = vadd.f32 %v2115_v11, %v2078_v13  ;;  %v2042_v22 = vpop.f32.mrf.mxu1  ;;  %2593 = vmatpush.msrb.mxu0 %v611_v45  ;;  %v372_v11 = vld [vmem:[%s8254_s0 + $0x520] sm:$0x1]  ;;  %2673 = vmatpush.msrb.mxu2 %v695_v15  ;;  %v641_v45 = vld [vmem:[%s5005_s29 + $0x848] sm:$0xff]  ;;  %v4514_v15 = vld [vmem:[%s8254_s0 + $0xd8] sm:$0xff] }
 0x179   : > { %2313 = vmatmul.f32.gmra.mxu0 %v300_v17  ;;  %2389 = vmatmul.f32.gmra.mxu2 %v302_v7  ;;  %v2043_v31 = vadd.f32 %v2042_v22, %v2005_v18  ;;  %v599_v17 = vld [vmem:[%s5005_s29 + $0x6f8] sm:$0xff] }
 0x17a   : > { %2594 = vmatpush.msrb.mxu0 %v608_v51  ;;  %2632 = vmatpush.msrb.mxu1 %v656_v57  ;;  %v743_v7 = vld [vmem:[%s5005_s29 + $0xb78] sm:$0xff] }
 0x17b   : > { %2351 = vmatmul.f32.gmra.mxu1 %v301_v20  ;;  %v374_v20 = vld [vmem:[%s8254_s0 + $0x530] sm:$0x1]  ;;  %2711 = vmatpush.msrb.mxu3 %v743_v7  ;;  %v683_v51 = vld [vmem:[%s5005_s29 + $0x998] sm:$0xff] }
 0x17c   : > { %2427 = vmatmul.f32.gmra.mxu3 %v303_v16  ;;  %v2080_v32 = vpop.f32.mrf.mxu2  ;;  %2595 = vmatpush.msrb.mxu0 %v605_v3  ;;  %v373_v16 = vld [vmem:[%s8254_s0 + $0x528] sm:$0x1]  ;;  %v587_v57 = vld [vmem:[%s5005_s29 + $0x698] sm:$0xff] }
 0x17d   : > { %v2081_v35 = vadd.f32 %v2080_v32, %v2043_v31  ;;  %v644_v31 = vld [vmem:[%s5005_s29 + $0x860] sm:$0xff]  ;;  %2674 = vmatpush.msrb.mxu2 %v692_v25  ;;  %v626_v25 = vld [vmem:[%s5005_s29 + $0x7d0] sm:$0xff] }
 0x17e   : > { %v2007_v39 = vpop.f32.mrf.mxu0  ;;  %2596 = vmatpush.msrb.mxu0 %v602_v8  ;;  %v740_v32 = vld [vmem:[%s5005_s29 + $0xb60] sm:$0xff]  ;;  %v677_v8 = vld [vmem:[%s5005_s29 + $0x968] sm:$0xff] }
 0x17f   : > { %v2008_v42 = vadd.f32 %v2007_v39, %v5856_v38  ;;  %v2118_v33 = vpop.f32.mrf.mxu3  ;;  %v327_v38 = vld [vmem:[%s8254_s0 + $0x3b8] sm:$0xff]  ;;  %2712 = vmatpush.msrb.mxu3 %v740_v32  ;;  %2675 = vmatpush.msrb.mxu2 %v689_v34  ;;  %v737_v39 = vld [vmem:[%s5005_s29 + $0xb48] sm:$0xff]  ;;  %v668_v32 = vld [vmem:[%s5005_s29 + $0x920] sm:$0xff] }
 0x180   : > { %v5999_v43 = vadd.f32 %v2118_v33, %v2081_v35  ;;  %v2045_v44 = vpop.f32.mrf.mxu1  ;;  %2597 = vmatpush.msrb.mxu0 %v599_v17  ;;  %v674_v17 = vld [vmem:[%s5005_s29 + $0x950] sm:$0xff]  ;;  %v719_v34 = vld [vmem:[%s5005_s29 + $0xab8] sm:$0xff] }
 0x181   : > { %2316 = vmatmul.f32.gmra.mxu0 %v324_v40  ;;  %2392 = vmatmul.f32.gmra.mxu2 %v326_v41  ;;  %v2046_v54 = vadd.f32 %v2045_v44, %v2008_v42  ;;  %v686_v40 = vld [vmem:[%s5005_s29 + $0x9b0] sm:$0xff] }
 0x182   : > { %2598 = vmatpush.msrb.mxu0 %v596_v28  ;;  %2713 = vmatpush.msrb.mxu3 %v737_v39  ;;  %v4516_v28 = vld [vmem:[%s8254_s0 + $0x190] sm:$0xff]  ;;  %v572_v39 = vld [vmem:[%s5005_s29 + $0x620] sm:$0xff] }
 0x183   : > { %2354 = vmatmul.f32.gmra.mxu1 %v325_v36  ;;  %2676 = vmatpush.msrb.mxu2 %v686_v40  ;;  %v716_v40 = vld [vmem:[%s5005_s29 + $0xaa0] sm:$0xff] }
 0x184   : > { %2430 = vmatmul.f32.gmra.mxu3 %v327_v38  ;;  %v2083_v55 = vpop.f32.mrf.mxu2  ;;  %2599 = vmatpush.msrb.mxu0 %v593_v37  ;;  %v734_v38 = vld [vmem:[%s5005_s29 + $0xb30] sm:$0xff]  ;;  %v623_v37 = vld [vmem:[%s5005_s29 + $0x7b8] sm:$0xff] }
 0x185   : > { %v2084_v49 = vadd.f32 %v2083_v55, %v2046_v54  ;;  %v4509_v54 = vld [vmem:[%s8254_s0 + $0x8] sm:$0xff]  ;;  %2714 = vmatpush.msrb.mxu3 %v734_v38  ;;  %v4510_v55 = vld [vmem:[%s8254_s0 + $0x18] sm:$0xff]  ;;  %2677 = vmatpush.msrb.mxu2 %v683_v51  ;;  %v4519_v38 = vld [vmem:[%s8254_s0 + $0x240] sm:$0xff] }
 0x186   : > { %v2010_v47 = vpop.f32.mrf.mxu0  ;;  %2600 = vmatpush.msrb.mxu0 %v590_v46  ;;  %v569_v46 = vld [vmem:[%s5005_s29 + $0x608] sm:$0xff] }
 0x187   : > { %v2011_v62 = vadd.f32 %v2010_v47, %v5878_v60  ;;  %v2121_v56 = vpop.f32.mrf.mxu3  ;;  %v653_v60 = vld [vmem:[%s5005_s29 + $0x8a8] sm:$0xff]  ;;  %2715 = vmatpush.msrb.mxu3 %v731_v59  ;;  %v854_v59 = vld [vmem:[%s5005_s29 + $0xef0] sm:$0xff] }
 0x188   : > { %v6025_v1 = vadd.f32 %v2121_v56, %v2084_v49  ;;  %v2048_v2 = vpop.f32.mrf.mxu1  ;;  %2633 = vmatpush.msrb.mxu1 %v653_v60  ;;  %2601 = vmatpush.msrb.mxu0 %v587_v57  ;;  %v4512_v60 = vld [vmem:[%s8254_s0 + $0xd0] sm:$0xff]  ;;  %v617_v51 = vld [vmem:[%s5005_s29 + $0x788] sm:$0xff] }
 0x189   : > { %2319 = vmatmul.f32.gmra.mxu0 %v348_v61  ;;  %2395 = vmatmul.f32.gmra.mxu2 %v350_v52  ;;  %v2049_v12 = vadd.f32 %v2048_v2, %v2011_v62  ;;  %v680_v61 = vld [vmem:[%s5005_s29 + $0x980] sm:$0xff]  ;;  %v635_v52 = vld [vmem:[%s5005_s29 + $0x818] sm:$0xff]  ;;  %v950_v57 = vld [vmem:[%s5005_s29 + $0x11f0] sm:$0xff] }
 0x18a   : > { %2634 = vmatpush.msrb.mxu1 %v650_v14  ;;  %2678 = vmatpush.msrb.mxu2 %v680_v61  ;;  %v4513_v14 = vld [vmem:[%s8254_s0 + $0xc8] sm:$0xff] }
 0x18b   : > { %2357 = vmatmul.f32.gmra.mxu1 %v349_v0  ;;  %2602 = vmatpush.msrb.mxu0 %v584_v58  ;;  %v4524_v58 = vld [vmem:[%s8254_s0 + $0x310] sm:$0xff] }
 0x18c   : > { %2433 = vmatmul.f32.gmra.mxu3 %v351_v6  ;;  %v2086_v13 = vpop.f32.mrf.mxu2  ;;  %2635 = vmatpush.msrb.mxu1 %v647_v26  ;;  %v4511_v6 = vld [vmem:[%s8254_s0 + $0xc0] sm:$0xff]  ;;  %v671_v26 = vld [vmem:[%s5005_s29 + $0x938] sm:$0xff] }
 0x18d   : > { %v2087_v5 = vadd.f32 %v2086_v13, %v2049_v12  ;;  %2716 = vmatpush.msrb.mxu3 %v728_v4  ;;  %v725_v12 = vld [vmem:[%s5005_s29 + $0xae8] sm:$0xff]  ;;  %2679 = vmatpush.msrb.mxu2 %v677_v8  ;;  %v896_v4 = vld [vmem:[%s5005_s29 + $0x1040] sm:$0xff] }
 0x18e   : > { %v2013_v18 = vpop.f32.mrf.mxu0  ;;  %2636 = vmatpush.msrb.mxu1 %v644_v31  ;;  %2603 = vmatpush.msrb.mxu0 %v581_v10  ;;  %v575_v31 = vld [vmem:[%s5005_s29 + $0x638] sm:$0xff]  ;;  %v4525_v8 = vld [vmem:[%s8254_s0 + $0x308] sm:$0xff] }
 0x18f   : > { %v2014_v22 = vadd.f32 %v2013_v18, %v5905_v19  ;;  %v2124_v9 = vpop.f32.mrf.mxu3  ;;  %v375_v19 = vld [vmem:[%s8254_s0 + $0x538] sm:$0x1]  ;;  %2717 = vmatpush.msrb.mxu3 %v725_v12  ;;  %v629_v18 = vld [vmem:[%s5005_s29 + $0x7e8] sm:$0xff]  ;;  %2680 = vmatpush.msrb.mxu2 %v674_v17 }
 0x190   : > { %v6047_v23 = vadd.f32 %v2124_v9, %v2087_v5  ;;  %v2051_v24 = vpop.f32.mrf.mxu1  ;;  %2637 = vmatpush.msrb.mxu1 %v641_v45  ;;  %v665_v45 = vld [vmem:[%s5005_s29 + $0x908] sm:$0xff]  ;;  %v4526_v10 = vld [vmem:[%s8254_s0 + $0x318] sm:$0xff] }
 0x191   : > { %2322 = vmatmul.f32.gmra.mxu0 %v372_v11  ;;  %2398 = vmatmul.f32.gmra.mxu2 %v374_v20  ;;  %v2052_v29 = vadd.f32 %v2051_v24, %v2014_v22  ;;  %v578_v11 = vld [vmem:[%s5005_s29 + $0x650] sm:$0xff] }
 0x192   : > { %2638 = vmatpush.msrb.mxu1 %v638_v50  ;;  %v722_v20 = vld [vmem:[%s5005_s29 + $0xad0] sm:$0xff]  ;;  %2604 = vmatpush.msrb.mxu0 %v578_v11  ;;  %v713_v50 = vld [vmem:[%s5005_s29 + $0xa88] sm:$0xff] }
 0x193   : > { %2360 = vmatmul.f32.gmra.mxu1 %v373_v16  ;;  %2718 = vmatpush.msrb.mxu3 %v722_v20  ;;  %v890_v11 = vld [vmem:[%s5005_s29 + $0x1010] sm:$0xff]  ;;  %v4527_v20 = vld [vmem:[%s8254_s0 + $0x3c0] sm:$0xff] }
 0x194   : > { %2436 = vmatmul.f32.gmra.mxu3 %v375_v19  ;;  %v2089_v35 = vpop.f32.mrf.mxu2  ;;  %2639 = vmatpush.msrb.mxu1 %v635_v52  ;;  %v4515_v19 = vld [vmem:[%s8254_s0 + $0x180] sm:$0xff] }
 0x195   : > { %v2090_v27 = vadd.f32 %v2089_v35, %v2052_v29  ;;  %2681 = vmatpush.msrb.mxu2 %v671_v26  ;;  %v4517_v29 = vld [vmem:[%s8254_s0 + $0x188] sm:$0xff]  ;;  %2605 = vmatpush.msrb.mxu0 %v575_v31  ;;  %v4518_v35 = vld [vmem:[%s8254_s0 + $0x198] sm:$0xff]  ;;  %v794_v26 = vld [vmem:[%s5005_s29 + $0xd10] sm:$0xff] }
 0x196   : > { %v2016_v41 = vpop.f32.mrf.mxu0  ;;  %2719 = vmatpush.msrb.mxu3 %v719_v34  ;;  %v4530_v31 = vld [vmem:[%s8254_s0 + $0x3d8] sm:$0xff]  ;;  %v842_v34 = vld [vmem:[%s5005_s29 + $0xe90] sm:$0xff] }
 0x197   : > { %v2017_v42 = vadd.f32 %v2016_v41, %v5926_v30  ;;  %v2127_v33 = vpop.f32.mrf.mxu3  ;;  %v4508_v30 = vld [vmem:[%s8254_s0 + $0x10] sm:$0xff]  ;;  %2682 = vmatpush.msrb.mxu2 %v668_v32  ;;  %2606 = vmatpush.msrb.mxu0 %v572_v39 }
 0x198   : > { %v6065_v44 = vadd.f32 %v2127_v33, %v2090_v27  ;;  %v2054_v36 = vpop.f32.mrf.mxu1  ;;  %2720 = vmatpush.msrb.mxu3 %v716_v40 }
 0x199   : > { %2456 = vmatmul.f32.vlgmr.msra.gmra.mxu0 %v4507_v48  ;;  %2532 = vmatmul.f32.vlgmr.msra.gmra.mxu2 %v4508_v30  ;;  %v2055_v53 = vadd.f32 %v2054_v36, %v2017_v42  ;;  %v620_v36 = vld [vmem:[%s5005_s29 + $0x7a0] sm:$0xff]  ;;  %v4520_v48 = vld [vmem:[%s8254_s0 + $0x250] sm:$0xff] }
 0x19a   : > { %v902_v30 = vld [vmem:[%s5005_s29 + $0x1070] sm:$0xff]  ;;  %2683 = vmatpush.msrb.mxu2 %v665_v45  ;;  %2607 = vmatpush.msrb.mxu0 %v569_v46  ;;  %v4531_v45 = vld [vmem:[%s8254_s0 + $0x480] sm:$0x1] }
 0x19b   : > { %2494 = vmatmul.f32.vlgmr.msra.gmra.mxu1 %v4509_v54  ;;  %v4522_v54 = vld [vmem:[%s8254_s0 + $0x258] sm:$0xff]  ;;  %2721 = vmatpush.msrb.mxu3 %v713_v50  ;;  %v4532_v46 = vld [vmem:[%s8254_s0 + $0x490] sm:$0x1]  ;;  %v884_v50 = vld [vmem:[%s5005_s29 + $0xfe0] sm:$0xff] }
 0x19c   : > { %2570 = vmatmul.f32.vlgmr.msra.gmra.mxu3 %v4510_v55  ;;  %v2092_v49 = vpop.f32.mrf.mxu2  ;;  %2820 = vmatpush.msra.mxu2 %v902_v30 }
 0x19d   : > { %v2093_v47 = vadd.f32 %v2092_v49, %v2055_v53  ;;  %v4521_v53 = vld [vmem:[%s8254_s0 + $0x248] sm:$0xff]  ;;  %v806_v49 = vld [vmem:[%s5005_s29 + $0xd70] sm:$0xff]  ;;  %2858 = vmatpush.msra.mxu3 %v950_v57 }
 0x19e   : > { %v2019_v62 = vpop.f32.mrf.mxu0  ;;  %2744 = vmatpush.msra.mxu0 %v806_v49  ;;  %v836_v49 = vld [vmem:[%s5005_s29 + $0xe60] sm:$0xff]  ;;  %v881_v57 = vld [vmem:[%s5005_s29 + $0xfc8] sm:$0xff] }
 0x19f   : > { %v2020_v56 = vadd.f32 %v2019_v62, %v5951_v63  ;;  %v2130_v0 = vpop.f32.mrf.mxu3  ;;  %v632_v63 = vld [vmem:[%s5005_s29 + $0x800] sm:$0xff] }
 0x1a0   : > { %v6089_v2 = vadd.f32 %v2130_v0, %v2093_v47  ;;  %v2057_v3 = vpop.f32.mrf.mxu1  ;;  %2640 = vmatpush.msrb.mxu1 %v632_v63  ;;  %v899_v47 = vld [vmem:[%s5005_s29 + $0x1058] sm:$0xff]  ;;  %v944_v63 = vld [vmem:[%s5005_s29 + $0x11c0] sm:$0xff] }
 0x1a1   : > { %2459 = vmatmul.f32.gmra.mxu0 %v4511_v6  ;;  %2535 = vmatmul.f32.gmra.mxu2 %v4512_v60  ;;  %v2058_v13 = vadd.f32 %v2057_v3, %v2020_v56  ;;  %v803_v56 = vld [vmem:[%s5005_s29 + $0xd58] sm:$0xff]  ;;  %v4523_v3 = vld [vmem:[%s8254_s0 + $0x300] sm:$0xff] }
 0x1a2   : > { %2641 = vmatpush.msrb.mxu1 %v629_v18  ;;  %2821 = vmatpush.msra.mxu2 %v899_v47  ;;  %v947_v0 = vld [vmem:[%s5005_s29 + $0x11d8] sm:$0xff]  ;;  %v800_v60 = vld [vmem:[%s5005_s29 + $0xd40] sm:$0xff]  ;;  %v941_v18 = vld [vmem:[%s5005_s29 + $0x11a8] sm:$0xff] }
 0x1a3   : > { %2497 = vmatmul.f32.gmra.mxu1 %v4513_v14  ;;  %v851_v6 = vld [vmem:[%s5005_s29 + $0xed8] sm:$0xff]  ;;  %2745 = vmatpush.msra.mxu0 %v803_v56  ;;  %v893_v14 = vld [vmem:[%s5005_s29 + $0x1028] sm:$0xff] }
 0x1a4   : > { %2573 = vmatmul.f32.gmra.mxu3 %v4514_v15  ;;  %v2095_v5 = vpop.f32.mrf.mxu2  ;;  %2642 = vmatpush.msrb.mxu1 %v626_v25  ;;  %v845_v25 = vld [vmem:[%s5005_s29 + $0xea8] sm:$0xff] }
 0x1a5   : > { %v2096_v7 = vadd.f32 %v2095_v5, %v2058_v13  ;;  %2859 = vmatpush.msra.mxu3 %v947_v0  ;;  %2822 = vmatpush.msra.mxu2 %v896_v4  ;;  %v848_v13 = vld [vmem:[%s5005_s29 + $0xec0] sm:$0xff]  ;;  %v785_v47 = vld [vmem:[%s5005_s29 + $0xcc8] sm:$0xff] }
 0x1a6   : > { %v6113_v22 = vpop.f32.mrf.mxu0  ;;  %2643 = vmatpush.msrb.mxu1 %v623_v37  ;;  %2746 = vmatpush.msra.mxu0 %v800_v60  ;;  %v935_v37 = vld [vmem:[%s5005_s29 + $0x1178] sm:$0xff]  ;;  %v929_v56 = vld [vmem:[%s5005_s29 + $0x1148] sm:$0xff]  ;;  %v4535_v4 = vld [vmem:[%s8254_s0 + $0x20] sm:$0xff] }
 0x1a7   : > { %v2133_v9 = vpop.f32.mrf.mxu3  ;;  %2860 = vmatpush.msra.mxu3 %v944_v63  ;;  %2823 = vmatpush.msra.mxu2 %v893_v14  ;;  %v2154_v60 = vadd.f32 %v6113_v22, %v5977_v21  ;;  %v4537_v63 = vld [vmem:[%s8254_s0 + $0x28] sm:$0xff]  ;;  %v782_v14 = vld [vmem:[%s5005_s29 + $0xcb0] sm:$0xff]  ;;  %v875_v22 = vld [vmem:[%s5005_s29 + $0xf98] sm:$0xff] }
 0x1a8   : > { %v6115_v24 = vadd.f32 %v2133_v9, %v2096_v7  ;;  %v6117_v16 = vpop.f32.mrf.mxu1  ;;  %2644 = vmatpush.msrb.mxu1 %v620_v36  ;;  %v797_v7 = vld [vmem:[%s5005_s29 + $0xd28] sm:$0xff]  ;;  %v4528_v9 = vld [vmem:[%s8254_s0 + $0x3d0] sm:$0xff] }
 0x1a9   : > { %2462 = vmatmul.f32.gmra.mxu0 %v4515_v19  ;;  %2538 = vmatmul.f32.gmra.mxu2 %v4516_v28  ;;  %v938_v19 = vld [vmem:[%s5005_s29 + $0x1190] sm:$0xff]  ;;  %v4529_v28 = vld [vmem:[%s8254_s0 + $0x3c8] sm:$0xff] }
 0x1aa   : > { %2645 = vmatpush.msrb.mxu1 %v617_v51  ;;  %2747 = vmatpush.msra.mxu0 %v797_v7  ;;  %v839_v51 = vld [vmem:[%s5005_s29 + $0xe78] sm:$0xff]  ;;  %v926_v7 = vld [vmem:[%s5005_s29 + $0x1130] sm:$0xff] }
 0x1ab   : > { %2500 = vmatmul.f32.gmra.mxu1 %v4517_v29  ;;  %2861 = vmatpush.msra.mxu3 %v941_v18  ;;  %v887_v29 = vld [vmem:[%s5005_s29 + $0xff8] sm:$0xff]  ;;  %v830_v21 = vld [vmem:[%s5005_s29 + $0xe30] sm:$0xff] }
 0x1ac   : > { %2576 = vmatmul.f32.gmra.mxu3 %v4518_v35  ;;  %v6136_v27 = vpop.f32.mrf.mxu2  ;;  %2782 = vmatpush.msra.mxu1 %v854_v59  ;;  %v791_v35 = vld [vmem:[%s5005_s29 + $0xcf8] sm:$0xff] }
 0x1ad   : > { %2824 = vmatpush.msra.mxu2 %v890_v11  ;;  %2748 = vmatpush.msra.mxu0 %v794_v26  ;;  %v779_v18 = vld [vmem:[%s5005_s29 + $0xc98] sm:$0xff] }
 0x1ae   : > { %v6141_v41 = vpop.f32.mrf.mxu0  ;;  %2783 = vmatpush.msra.mxu1 %v851_v6  ;;  %2862 = vmatpush.msra.mxu3 %v938_v19  ;;  %v4536_v6 = vld [vmem:[%s8254_s0 + $0x30] sm:$0xff]  ;;  %v827_v19 = vld [vmem:[%s5005_s29 + $0xe18] sm:$0xff] }
 0x1af   : > { %v6143_v42 = vpop.f32.mrf.mxu3  ;;  %2825 = vmatpush.msra.mxu2 %v887_v29  ;;  %2749 = vmatpush.msra.mxu0 %v791_v35  ;;  %v2157_v29 = vadd.f32 %v6141_v41, %v5999_v43  ;;  %v4542_v35 = vld [vmem:[%s8254_s0 + $0xf8] sm:$0xff]  ;;  %v824_v43 = vld [vmem:[%s5005_s29 + $0xe00] sm:$0xff] }
 0x1b0   : > { %v6145_v33 = vpop.f32.mrf.mxu1  ;;  %2784 = vmatpush.msra.mxu1 %v848_v13  ;;  %2863 = vmatpush.msra.mxu3 %v935_v37  ;;  %v833_v13 = vld [vmem:[%s5005_s29 + $0xe48] sm:$0xff] }
 0x1b1   : > { %2465 = vmatmul.f32.gmra.mxu0 %v4519_v38  ;;  %2541 = vmatmul.f32.gmra.mxu2 %v4520_v48  ;;  %v4533_v38 = vld [vmem:[%s8254_s0 + $0x488] sm:$0x1]  ;;  %v4534_v48 = vld [vmem:[%s8254_s0 + $0x498] sm:$0x1] }
 0x1b2   : > { %2785 = vmatpush.msra.mxu1 %v845_v25  ;;  %2826 = vmatpush.msra.mxu2 %v884_v50  ;;  %v2192_v25 = vadd.f32 %v6117_v16, %v2154_v60  ;;  %v917_v50 = vld [vmem:[%s5005_s29 + $0x10e8] sm:$0xff] }
 0x1b3   : > { %2503 = vmatmul.f32.gmra.mxu1 %v4521_v53  ;;  %v788_v53 = vld [vmem:[%s5005_s29 + $0xce0] sm:$0xff] }
 0x1b4   : > { %2579 = vmatmul.f32.gmra.mxu3 %v4522_v54  ;;  %v6165_v55 = vpop.f32.mrf.mxu2  ;;  %2786 = vmatpush.msra.mxu1 %v842_v34  ;;  %v932_v54 = vld [vmem:[%s5005_s29 + $0x1160] sm:$0xff]  ;;  %v2230_v16 = vadd.f32 %v6136_v27, %v2192_v25  ;;  %v4540_v34 = vld [vmem:[%s8254_s0 + $0xf0] sm:$0xff]  ;;  %v4541_v27 = vld [vmem:[%s8254_s0 + $0xe8] sm:$0xff] }
 0x1b5   : > { %2750 = vmatpush.msra.mxu0 %v788_v53  ;;  %2864 = vmatpush.msra.mxu3 %v932_v54  ;;  %v866_v53 = vld [vmem:[%s5005_s29 + $0xf50] sm:$0xff]  ;;  %v821_v54 = vld [vmem:[%s5005_s29 + $0xde8] sm:$0xff] }
 0x1b6   : > { %v6171_v61 = vpop.f32.mrf.mxu0  ;;  %2787 = vmatpush.msra.mxu1 %v839_v51  ;;  %2827 = vmatpush.msra.mxu2 %v881_v57  ;;  %v2268_v41 = vadd.f32 %v6143_v42, %v2230_v16  ;;  %v770_v42 = vld [vmem:[%s5005_s29 + $0xc50] sm:$0xff]  ;;  %v764_v16 = vld [vmem:[%s5005_s29 + $0xc20] sm:$0xff] }
 0x1b7   : > { %v6173_v52 = vpop.f32.mrf.mxu3  ;;  %2751 = vmatpush.msra.mxu0 %v785_v47  ;;  %2865 = vmatpush.msra.mxu3 %v929_v56  ;;  %v914_v56 = vld [vmem:[%s5005_s29 + $0x10d0] sm:$0xff]  ;;  %v2160_v60 = vadd.f32 %v6171_v61, %v6025_v1  ;;  %v863_v1 = vld [vmem:[%s5005_s29 + $0xf38] sm:$0xff] }
 0x1b8   : > { %v6175_v62 = vpop.f32.mrf.mxu1  ;;  %2788 = vmatpush.msra.mxu1 %v836_v49  ;;  %v2195_v49 = vadd.f32 %v6145_v33, %v2157_v29  ;;  %v4543_v33 = vld [vmem:[%s8254_s0 + $0x1a0] sm:$0xff]  ;;  %v767_v61 = vld [vmem:[%s5005_s29 + $0xc38] sm:$0xff] }
 0x1b9   : > { %2468 = vmatmul.f32.gmra.mxu0 %v4523_v3  ;;  %2544 = vmatmul.f32.gmra.mxu2 %v4524_v58  ;;  %v878_v3 = vld [vmem:[%s5005_s29 + $0xfb0] sm:$0xff] }
 0x1ba   : > { %2828 = vmatpush.msra.mxu2 %v878_v3  ;;  %2789 = vmatpush.msra.mxu1 %v833_v13  ;;  %v4546_v13 = vld [vmem:[%s8254_s0 + $0x1b8] sm:$0xff] }
 0x1bb   : > { %2506 = vmatmul.f32.gmra.mxu1 %v4525_v8  ;;  %v4538_v8 = vld [vmem:[%s8254_s0 + $0x38] sm:$0xff]  ;;  %2752 = vmatpush.msra.mxu0 %v782_v14 }
 0x1bc   : > { %2582 = vmatmul.f32.gmra.mxu3 %v4526_v10  ;;  %v6195_v12 = vpop.f32.mrf.mxu2  ;;  %2829 = vmatpush.msra.mxu2 %v875_v22 }
 0x1bd   : > { %2866 = vmatpush.msra.mxu3 %v926_v7  ;;  %2790 = vmatpush.msra.mxu1 %v830_v21  ;;  %v818_v7 = vld [vmem:[%s5005_s29 + $0xdd0] sm:$0xff] }
 0x1be   : > { %v6199_v15 = vpop.f32.mrf.mxu0  ;;  %2753 = vmatpush.msra.mxu0 %v779_v18  ;;  %v911_v18 = vld [vmem:[%s5005_s29 + $0x10b8] sm:$0xff] }
 0x1bf   : > { %v6201_v5 = vpop.f32.mrf.mxu3  ;;  %2791 = vmatpush.msra.mxu1 %v827_v19 }
 0x1c0   : > { %v6203_v17 = vpop.f32.mrf.mxu1 }
 0x1c1   : > { %2471 = vmatmul.f32.gmra.mxu0 %v4527_v20  ;;  %2547 = vmatmul.f32.gmra.mxu2 %v4528_v9  ;;  %v923_v20 = vld [vmem:[%s5005_s29 + $0x1118] sm:$0xff]  ;;  %v872_v9 = vld [vmem:[%s5005_s29 + $0xf80] sm:$0xff] }
 0x1c2   : > { %2867 = vmatpush.msra.mxu3 %v923_v20  ;;  %2830 = vmatpush.msra.mxu2 %v872_v9  ;;  %v860_v20 = vld [vmem:[%s5005_s29 + $0xf20] sm:$0xff]  ;;  %v815_v9 = vld [vmem:[%s5005_s29 + $0xdb8] sm:$0xff] }
 0x1c3   : > { %2509 = vmatmul.f32.gmra.mxu1 %v4529_v28 }
 0x1c4   : > { %2585 = vmatmul.f32.gmra.mxu3 %v4530_v31  ;;  %v6223_v32 = vpop.f32.mrf.mxu2  ;;  %v4539_v31 = vld [vmem:[%s8254_s0 + $0xe0] sm:$0xff]  ;;  %2792 = vmatpush.msra.mxu1 %v824_v43  ;;  %v761_v43 = vld [vmem:[%s5005_s29 + $0xc08] sm:$0xff] }
 0x1c6   : > { %v6229_v39 = vpop.f32.mrf.mxu0  ;;  %2793 = vmatpush.msra.mxu1 %v821_v54  ;;  %v4549_v54 = vld [vmem:[%s8254_s0 + $0x268] sm:$0xff] }
 0x1c7   : > { %v6231_v40 = vpop.f32.mrf.mxu3 }
 0x1c8   : > { %v6233_v36 = vpop.f32.mrf.mxu1  ;;  %2794 = vmatpush.msra.mxu1 %v818_v7 }
 0x1c9   : > { %2474 = vmatmul.f32.gmra.mxu0 %v4531_v45  ;;  %2550 = vmatmul.f32.gmra.mxu2 %v4532_v46  ;;  %v776_v45 = vld [vmem:[%s5005_s29 + $0xc80] sm:$0xff] }
 0x1ca   : > { %v920_v46 = vld [vmem:[%s5005_s29 + $0x1100] sm:$0xff]  ;;  %2754 = vmatpush.msra.mxu0 %v776_v45  ;;  %2795 = vmatpush.msra.mxu1 %v815_v9 }
 0x1cb   : > { %2512 = vmatmul.f32.gmra.mxu1 %v4533_v38  ;;  %2868 = vmatpush.msra.mxu3 %v920_v46  ;;  %v869_v38 = vld [vmem:[%s5005_s29 + $0xf68] sm:$0xff]  ;;  %v812_v45 = vld [vmem:[%s5005_s29 + $0xda0] sm:$0xff] }
 0x1cc   : > { %2588 = vmatmul.f32.gmra.mxu3 %v4534_v48  ;;  %v6247_v30 = vpop.f32.mrf.mxu2  ;;  %v773_v48 = vld [vmem:[%s5005_s29 + $0xc68] sm:$0xff]  ;;  %2831 = vmatpush.msra.mxu2 %v869_v38  ;;  %v4548_v38 = vld [vmem:[%s8254_s0 + $0x270] sm:$0xff] }
 0x1cd   : > { %2755 = vmatpush.msra.mxu0 %v773_v48  ;;  %2869 = vmatpush.msra.mxu3 %v917_v50  ;;  %v857_v46 = vld [vmem:[%s5005_s29 + $0xf08] sm:$0xff] }
 0x1ce   : > { %v6255_v59 = vpop.f32.mrf.mxu0  ;;  %2832 = vmatpush.msra.mxu2 %v866_v53  ;;  %2796 = vmatpush.msra.mxu1 %v812_v45  ;;  %v905_v50 = vld [vmem:[%s5005_s29 + $0x1088] sm:$0xff] }
 0x1cf   : > { %v6259_v0 = vpop.f32.mrf.mxu3  ;;  %2756 = vmatpush.msra.mxu0 %v770_v42  ;;  %2870 = vmatpush.msra.mxu3 %v914_v56  ;;  %v1142_v42 = vld [vmem:[%s5005_s29 + $0x17f0] sm:$0xff] }
 0x1d0   : > { %v6262_v58 = vpop.f32.mrf.mxu1  ;;  %2833 = vmatpush.msra.mxu2 %v863_v1  ;;  %v2166_v1 = vadd.f32 %v6229_v39, %v6065_v44  ;;  %v1088_v44 = vld [vmem:[%s5005_s29 + $0x1640] sm:$0xff] }
 0x1d1   : > { %2608 = vmatmul.f32.vlgmr.msrb.gmra.mxu0 %v4535_v4  ;;  %2684 = vmatmul.f32.vlgmr.msrb.gmra.mxu2 %v4536_v6  ;;  %v2233_v4 = vadd.f32 %v6165_v55, %v2195_v49  ;;  %v4544_v6 = vld [vmem:[%s8254_s0 + $0x1b0] sm:$0xff]  ;;  %v4550_v49 = vld [vmem:[%s8254_s0 + $0x278] sm:$0xff] }
 0x1d2   : > { %2757 = vmatpush.msra.mxu0 %v767_v61  ;;  %2871 = vmatpush.msra.mxu3 %v911_v18  ;;  %v995_v18 = vld [vmem:[%s5005_s29 + $0x1358] sm:$0xff] }
 0x1d3   : > { %2646 = vmatmul.f32.vlgmr.msrb.gmra.mxu1 %v4537_v63  ;;  %v4545_v63 = vld [vmem:[%s8254_s0 + $0x1a8] sm:$0xff]  ;;  %v2271_v21 = vadd.f32 %v6173_v52, %v2233_v4  ;;  %2834 = vmatpush.msra.mxu2 %v860_v20  ;;  %v1046_v4 = vld [vmem:[%s5005_s29 + $0x14f0] sm:$0xff]  ;;  %v1139_v20 = vld [vmem:[%s5005_s29 + $0x17d8] sm:$0xff] }
 0x1d4   : > { %2722 = vmatmul.f32.vlgmr.msrb.gmra.mxu3 %v4538_v8  ;;  %v6278_v10 = vpop.f32.mrf.mxu2  ;;  %v4264_v8 = vld [vmem:[%s6341_s18] sm:$0x7]  ;;  %2758 = vmatpush.msra.mxu0 %v764_v16 }
 0x1d5   : > { %v6367_v19 = vperm.slane %v4264_v8, 0  ;;  %2835 = vmatpush.msra.mxu2 %v857_v46  ;;  %v992_v16 = vld [vmem:[%s5005_s29 + $0x1340] sm:$0xff] }
 0x1d6   : > { %v6287_v11 = vpop.f32.mrf.mxu0  ;;  %2759 = vmatpush.msra.mxu0 %v761_v43 }
 0x1d7   : > { %v6292_v26 = vpop.f32.mrf.mxu3 }
 0x1d8   : > { %v6295_v28 = vpop.f32.mrf.mxu1 }
 0x1d9   : > { %2611 = vmatmul.f32.gmra.mxu0 %v4539_v31  ;;  %2687 = vmatmul.f32.gmra.mxu2 %v4540_v34  ;;  %v908_v31 = vld [vmem:[%s5005_s29 + $0x10a0] sm:$0xff]  ;;  %v2198_v34 = vadd.f32 %v6175_v62, %v2160_v60 }
 0x1da   : > { %2872 = vmatpush.msra.mxu3 %v908_v31  ;;  %v4547_v62 = vld [vmem:[%s8254_s0 + $0x260] sm:$0xff] }
 0x1db   : > { %2649 = vmatmul.f32.gmra.mxu1 %v4541_v27  ;;  %v1136_v31 = vld [vmem:[%s5005_s29 + $0x17c0] sm:$0xff] }
 0x1dc   : > { %2725 = vmatmul.f32.gmra.mxu3 %v4542_v35  ;;  %v6318_v37 = vpop.f32.mrf.mxu2 }
 0x1dd   : > { %2873 = vmatpush.msra.mxu3 %v905_v50  ;;  %v4558_v50 = vld [vmem:[%s8254_s0 + $0x3f8] sm:$0xff] }
 0x1de   : > { %v2305_v51 = vpop.f32.mrf.mxu0 }
 0x1df   : > { %v6334_v57 = vpop.f32.mrf.mxu3  ;;  %v2306_v47 = vadd.f32 %v2305_v51, %v2268_v41  ;;  %v2236_v41 = vadd.f32 %v6195_v12, %v2198_v34  ;;  %v809_v51 = vld [vmem:[%s5005_s29 + $0xd88] sm:$0xff]  ;;  %v2163_v12 = vadd.f32 %v6199_v15, %v6047_v23  ;;  %v1094_v15 = vld [vmem:[%s5005_s29 + $0x1670] sm:$0xff]  ;;  %3010 = vmatpush.msrb.mxu3 %v1142_v42 }
 0x1e0   : > { %v2343_v3 = vpop.f32.mrf.mxu1  ;;  %2797 = vmatpush.msra.mxu1 %v809_v51  ;;  %2972 = vmatpush.msrb.mxu2 %v1094_v15  ;;  %v1130_v15 = vld [vmem:[%s5005_s29 + $0x1790] sm:$0xff] }
 0x1e1   : > { %2614 = vmatmul.f32.gmra.mxu0 %v4543_v33  ;;  %2690 = vmatmul.f32.gmra.mxu2 %v4544_v6  ;;  %v2344_v55 = vadd.f32 %v2343_v3, %v2306_v47  ;;  %v998_v47 = vld [vmem:[%s5005_s29 + $0x1370] sm:$0xff]  ;;  %v2274_v56 = vadd.f32 %v6201_v5, %v2236_v41  ;;  %v1091_v33 = vld [vmem:[%s5005_s29 + $0x1658] sm:$0xff]  ;;  %v2201_v60 = vadd.f32 %v6203_v17, %v2163_v12  ;;  %v4555_v41 = vld [vmem:[%s8254_s0 + $0x3e0] sm:$0xff] }
 0x1e2   : > { %2896 = vmatpush.msrb.mxu0 %v998_v47  ;;  %2934 = vmatpush.msrb.mxu1 %v1046_v4  ;;  %v4552_v17 = vld [vmem:[%s8254_s0 + $0x330] sm:$0xff]  ;;  %v989_v12 = vld [vmem:[%s5005_s29 + $0x1328] sm:$0xff] }
 0x1e3   : > { %2652 = vmatmul.f32.gmra.mxu1 %v4545_v63  ;;  %2973 = vmatpush.msrb.mxu2 %v1091_v33  ;;  %v2239_v5 = vadd.f32 %v6223_v32, %v2201_v60  ;;  %v4553_v32 = vld [vmem:[%s8254_s0 + $0x328] sm:$0xff]  ;;  %v1034_v42 = vld [vmem:[%s5005_s29 + $0x1490] sm:$0xff] }
 0x1e4   : > { %2728 = vmatmul.f32.gmra.mxu3 %v4546_v13  ;;  %v2381_v14 = vpop.f32.mrf.mxu2  ;;  %2897 = vmatpush.msrb.mxu0 %v995_v18 }
 0x1e5   : > { %v2382_v22 = vadd.f32 %v2381_v14, %v2344_v55  ;;  %v4551_v14 = vld [vmem:[%s8254_s0 + $0x320] sm:$0xff]  ;;  %v2277_v39 = vadd.f32 %v6231_v40, %v2239_v5  ;;  %3011 = vmatpush.msrb.mxu3 %v1139_v20  ;;  %2974 = vmatpush.msrb.mxu2 %v1088_v44  ;;  %v1031_v5 = vld [vmem:[%s5005_s29 + $0x1478] sm:$0xff]  ;;  %v977_v20 = vld [vmem:[%s5005_s29 + $0x12c8] sm:$0xff] }
 0x1e6   : > { %v2308_v25 = vpop.f32.mrf.mxu0  ;;  %2898 = vmatpush.msrb.mxu0 %v992_v16  ;;  %v1121_v44 = vld [vmem:[%s5005_s29 + $0x1748] sm:$0xff] }
 0x1e7   : > { %v2309_v52 = vadd.f32 %v2308_v25, %v2271_v21  ;;  %v2419_v29 = vpop.f32.mrf.mxu3  ;;  %v4554_v21 = vld [vmem:[%s8254_s0 + $0x338] sm:$0xff]  ;;  %3012 = vmatpush.msrb.mxu3 %v1136_v31 }
 0x1e8   : > { %v2420_v27 = vadd.f32 %v2419_v29, %v2382_v22  ;;  %v2346_v35 = vpop.f32.mrf.mxu1  ;;  %v1043_v25 = vld [vmem:[%s5005_s29 + $0x14d8] sm:$0xff]  ;;  %v1085_v29 = vld [vmem:[%s5005_s29 + $0x1628] sm:$0xff]  ;;  %2899 = vmatpush.msrb.mxu0 %v989_v12 }
 0x1e9   : > { %2617 = vmatmul.f32.gmra.mxu0 %v4547_v62  ;;  %2693 = vmatmul.f32.gmra.mxu2 %v4548_v38  ;;  %v2347_v53 = vadd.f32 %v2346_v35, %v2309_v52  ;;  %v1040_v52 = vld [vmem:[%s5005_s29 + $0x14c0] sm:$0xff]  ;;  %v2169_v38 = vadd.f32 %v6255_v59, %v6089_v2  ;;  %v1082_v2 = vld [vmem:[%s5005_s29 + $0x1610] sm:$0xff]  ;;  %v1019_v12 = vld [vmem:[%s5005_s29 + $0x1418] sm:$0xff] }
 0x1ea   : > { %v4272_v48 = vadd.f32 %v6367_v19, %v2420_v27  ;;  %2935 = vmatpush.msrb.mxu1 %v1043_v25  ;;  %v2204_v27 = vadd.f32 %v6233_v36, %v2166_v1  ;;  %2975 = vmatpush.msrb.mxu2 %v1085_v29  ;;  %v4556_v36 = vld [vmem:[%s8254_s0 + $0x3f0] sm:$0xff] }
 0x1eb   : > { %2655 = vmatmul.f32.gmra.mxu1 %v4549_v54  ;;  %v974_v29 = vld [vmem:[%s5005_s29 + $0x12b0] sm:$0xff] }
 0x1ec   : > { %4293 = vst [vmem:[%s6392_s10] sm:$0xff] %v4272_v48  ;;  %2731 = vmatmul.f32.gmra.mxu3 %v4550_v49  ;;  %v2384_v23 = vpop.f32.mrf.mxu2  ;;  %2936 = vmatpush.msrb.mxu1 %v1040_v52  ;;  %v2242_v43 = vadd.f32 %v6247_v30, %v2204_v27  ;;  %v4557_v30 = vld [vmem:[%s8254_s0 + $0x3e8] sm:$0xff]  ;;  %v1118_v27 = vld [vmem:[%s5005_s29 + $0x1730] sm:$0xff] }
 0x1ed   : > { %v2385_v3 = vadd.f32 %v2384_v23, %v2347_v53  ;;  %v1133_v53 = vld [vmem:[%s5005_s29 + $0x17a8] sm:$0xff]  ;;  %v986_v23 = vld [vmem:[%s5005_s29 + $0x1310] sm:$0xff]  ;;  %2976 = vmatpush.msrb.mxu2 %v1082_v2 }
 0x1ee   : > { %v2311_v6 = vpop.f32.mrf.mxu0  ;;  %v2280_v59 = vadd.f32 %v6259_v0, %v2242_v43  ;;  %3013 = vmatpush.msrb.mxu3 %v1133_v53  ;;  %v1037_v49 = vld [vmem:[%s5005_s29 + $0x14a8] sm:$0xff]  ;;  %2900 = vmatpush.msrb.mxu0 %v986_v23  ;;  %v983_v0 = vld [vmem:[%s5005_s29 + $0x12f8] sm:$0xff]  ;;  %v968_v23 = vld [vmem:[%s5005_s29 + $0x1280] sm:$0xff] }
 0x1ef   : > { %v2312_v55 = vadd.f32 %v2311_v6, %v2274_v56  ;;  %v2422_v63 = vpop.f32.mrf.mxu3  ;;  %2937 = vmatpush.msrb.mxu1 %v1037_v49  ;;  %v1079_v56 = vld [vmem:[%s5005_s29 + $0x15f8] sm:$0xff]  ;;  %v1025_v52 = vld [vmem:[%s5005_s29 + $0x1448] sm:$0xff] }
 0x1f0   : > { %v2423_v8 = vadd.f32 %v2422_v63, %v2385_v3  ;;  %v2349_v13 = vpop.f32.mrf.mxu1  ;;  %v2207_v3 = vadd.f32 %v6262_v58, %v2169_v38  ;;  %3014 = vmatpush.msrb.mxu3 %v1130_v15  ;;  %v1127_v6 = vld [vmem:[%s5005_s29 + $0x1778] sm:$0xff]  ;;  %2977 = vmatpush.msrb.mxu2 %v1079_v56  ;;  %v1076_v63 = vld [vmem:[%s5005_s29 + $0x15e0] sm:$0xff]  ;;  %v1061_v56 = vld [vmem:[%s5005_s29 + $0x1568] sm:$0xff] }
 0x1f1   : > { %2620 = vmatmul.f32.gmra.mxu0 %v4551_v14  ;;  %2696 = vmatmul.f32.gmra.mxu2 %v4552_v17  ;;  %v2350_v61 = vadd.f32 %v2349_v13, %v2312_v55  ;;  %v4559_v58 = vld [vmem:[%s8254_s0 + $0x4a0] sm:$0x1]  ;;  %v4560_v13 = vld [vmem:[%s8254_s0 + $0x4b0] sm:$0x1]  ;;  %v1067_v43 = vld [vmem:[%s5005_s29 + $0x1598] sm:$0xff] }
 0x1f2   : > { %v4275_v7 = vadd.f32 %v6367_v19, %v2423_v8  ;;  %2938 = vmatpush.msrb.mxu1 %v1034_v42  ;;  %v2245_v8 = vadd.f32 %v6278_v10, %v2207_v3  ;;  %2901 = vmatpush.msrb.mxu0 %v983_v0  ;;  %v980_v17 = vld [vmem:[%s5005_s29 + $0x12e0] sm:$0xff]  ;;  %v971_v38 = vld [vmem:[%s5005_s29 + $0x1298] sm:$0xff] }
 0x1f3   : > { %2658 = vmatmul.f32.gmra.mxu1 %v4553_v32  ;;  %3015 = vmatpush.msrb.mxu3 %v1127_v6  ;;  %v1124_v10 = vld [vmem:[%s5005_s29 + $0x1760] sm:$0xff]  ;;  %v4569_v6 = vld [vmem:[%s8254_s0 + $0x108] sm:$0xff] }
 0x1f4   : > { %4296 = vst [vmem:[%s6392_s10 + $0x18] sm:$0xff] %v4275_v7  ;;  %2734 = vmatmul.f32.gmra.mxu3 %v4554_v21  ;;  %v2387_v22 = vpop.f32.mrf.mxu2  ;;  %v2172_v7 = vadd.f32 %v6287_v11, %v6115_v24  ;;  %2978 = vmatpush.msrb.mxu2 %v1076_v63  ;;  %v1028_v32 = vld [vmem:[%s5005_s29 + $0x1460] sm:$0xff]  ;;  %v1073_v21 = vld [vmem:[%s5005_s29 + $0x15c8] sm:$0xff]  ;;  %v2283_v24 = vadd.f32 %v6292_v26, %v2245_v8  ;;  %v1058_v63 = vld [vmem:[%s5005_s29 + $0x1550] sm:$0xff] }
 0x1f5   : > { %v2388_v9 = vadd.f32 %v2387_v22, %v2350_v61  ;;  %v4561_v61 = vld [vmem:[%s8254_s0 + $0x4a8] sm:$0x1]  ;;  %v4562_v22 = vld [vmem:[%s8254_s0 + $0x4b8] sm:$0x1]  ;;  %2939 = vmatpush.msrb.mxu1 %v1031_v5  ;;  %2902 = vmatpush.msrb.mxu0 %v980_v17  ;;  %v1112_v15 = vld [vmem:[%s5005_s29 + $0x1700] sm:$0xff] }
 0x1f6   : > { %v2314_v34 = vpop.f32.mrf.mxu0  ;;  %3016 = vmatpush.msrb.mxu3 %v1124_v10  ;;  %2979 = vmatpush.msrb.mxu2 %v1073_v21  ;;  %v2210_v25 = vadd.f32 %v6295_v28, %v2172_v7  ;;  %v4564_v28 = vld [vmem:[%s8254_s0 + $0x50] sm:$0xff]  ;;  %v1016_v42 = vld [vmem:[%s5005_s29 + $0x1400] sm:$0xff] }
 0x1f7   : > { %v2315_v35 = vadd.f32 %v2314_v34, %v2277_v39  ;;  %v2425_v45 = vpop.f32.mrf.mxu3  ;;  %v1070_v39 = vld [vmem:[%s5005_s29 + $0x15b0] sm:$0xff]  ;;  %2940 = vmatpush.msrb.mxu1 %v1028_v32  ;;  %2903 = vmatpush.msrb.mxu0 %v977_v20  ;;  %v4571_v32 = vld [vmem:[%s8254_s0 + $0x1c0] sm:$0xff] }
 0x1f8   : > { %v2426_v46 = vadd.f32 %v2425_v45, %v2388_v9  ;;  %v2352_v40 = vpop.f32.mrf.mxu1  ;;  %3017 = vmatpush.msrb.mxu3 %v1121_v44  ;;  %2980 = vmatpush.msrb.mxu2 %v1070_v39  ;;  %v4563_v45 = vld [vmem:[%s8254_s0 + $0x40] sm:$0xff]  ;;  %v1106_v5 = vld [vmem:[%s5005_s29 + $0x16d0] sm:$0xff]  ;;  %v4573_v44 = vld [vmem:[%s8254_s0 + $0x1c8] sm:$0xff] }
 0x1f9   : > { %2623 = vmatmul.f32.gmra.mxu0 %v4555_v41  ;;  %2699 = vmatmul.f32.gmra.mxu2 %v4556_v36  ;;  %v2353_v48 = vadd.f32 %v2352_v40, %v2315_v35  ;;  %v2248_v35 = vadd.f32 %v6318_v37, %v2210_v25  ;;  %v4565_v41 = vld [vmem:[%s8254_s0 + $0x48] sm:$0xff]  ;;  %v4566_v36 = vld [vmem:[%s8254_s0 + $0x58] sm:$0xff]  ;;  %v4572_v21 = vld [vmem:[%s8254_s0 + $0x1d0] sm:$0xff] }
 0x1fa   : > { %v4278_v62 = vadd.f32 %v6367_v19, %v2426_v46  ;;  %v1022_v46 = vld [vmem:[%s5005_s29 + $0x1430] sm:$0xff]  ;;  %2941 = vmatpush.msrb.mxu1 %v1025_v52  ;;  %2904 = vmatpush.msrb.mxu0 %v974_v29  ;;  %v4574_v39 = vld [vmem:[%s8254_s0 + $0x1d8] sm:$0xff] }
 0x1fb   : > { %2661 = vmatmul.f32.gmra.mxu1 %v4557_v30  ;;  %3018 = vmatpush.msrb.mxu3 %v1118_v27  ;;  %v2286_v30 = vadd.f32 %v6334_v57, %v2248_v35  ;;  %v4567_v57 = vld [vmem:[%s8254_s0 + $0x100] sm:$0xff]  ;;  %v1049_v35 = vld [vmem:[%s5005_s29 + $0x1508] sm:$0xff] }
 0x1fc   : > { %4299 = vst [vmem:[%s6392_s10 + $0x30] sm:$0xff] %v4278_v62  ;;  %2737 = vmatmul.f32.gmra.mxu3 %v4558_v50  ;;  %v2390_v51 = vpop.f32.mrf.mxu2  ;;  %2942 = vmatpush.msrb.mxu1 %v1022_v46  ;;  %v1004_v27 = vld [vmem:[%s5005_s29 + $0x13a0] sm:$0xff]  ;;  %v4576_v46 = vld [vmem:[%s8254_s0 + $0x290] sm:$0xff] }
 0x1fd   : > { %v2391_v54 = vadd.f32 %v2390_v51, %v2353_v48  ;;  %v1115_v48 = vld [vmem:[%s5005_s29 + $0x1718] sm:$0xff]  ;;  %2981 = vmatpush.msrb.mxu2 %v1067_v43  ;;  %2905 = vmatpush.msrb.mxu0 %v971_v38  ;;  %v1064_v51 = vld [vmem:[%s5005_s29 + $0x1580] sm:$0xff]  ;;  %v1097_v43 = vld [vmem:[%s5005_s29 + $0x1688] sm:$0xff] }
 0x1fe   : > { %v2317_v47 = vpop.f32.mrf.mxu0  ;;  %3019 = vmatpush.msrb.mxu3 %v1115_v48  ;;  %2943 = vmatpush.msrb.mxu1 %v1019_v12  ;;  %v1190_v48 = vld [vmem:[%s5005_s29 + $0x1970] sm:$0xff]  ;;  %v1283_v12 = vld [vmem:[%s5005_s29 + $0x1c58] sm:$0xff] }
 0x1ff   : > { %v2318_v4 = vadd.f32 %v2317_v47, %v2280_v59  ;;  %v2428_v33 = vpop.f32.mrf.mxu3  ;;  %2982 = vmatpush.msrb.mxu2 %v1064_v51  ;;  %v4568_v47 = vld [vmem:[%s8254_s0 + $0x110] sm:$0xff]  ;;  %2906 = vmatpush.msrb.mxu0 %v968_v23  ;;  %v1331_v23 = vld [vmem:[%s5005_s29 + $0x1dd8] sm:$0xff] }
 0x200   : > { %v2429_v60 = vadd.f32 %v2428_v33, %v2391_v54  ;;  %v2355_v55 = vpop.f32.mrf.mxu1  ;;  %3020 = vmatpush.msrb.mxu3 %v1112_v15  ;;  %v1109_v33 = vld [vmem:[%s5005_s29 + $0x16e8] sm:$0xff]  ;;  %2944 = vmatpush.msrb.mxu1 %v1016_v42  ;;  %v1238_v51 = vld [vmem:[%s5005_s29 + $0x1af0] sm:$0xff]  ;;  %v4579_v15 = vld [vmem:[%s8254_s0 + $0x340] sm:$0xff] }
 0x201   : > { %2626 = vmatmul.f32.gmra.mxu0 %v4559_v58  ;;  %2702 = vmatmul.f32.gmra.mxu2 %v4560_v13  ;;  %v2356_v1 = vadd.f32 %v2355_v55, %v2318_v4  ;;  %v965_v4 = vld [vmem:[%s5005_s29 + $0x1268] sm:$0xff]  ;;  %v962_v13 = vld [vmem:[%s5005_s29 + $0x1250] sm:$0xff]  ;;  %v1235_v42 = vld [vmem:[%s5005_s29 + $0x1ad8] sm:$0xff] }
 0x202   : > { %v4281_v14 = vadd.f32 %v6367_v19, %v2429_v60  ;;  %2983 = vmatpush.msrb.mxu2 %v1061_v56  ;;  %v4570_v60 = vld [vmem:[%s8254_s0 + $0x118] sm:$0xff]  ;;  %2907 = vmatpush.msrb.mxu0 %v965_v4  ;;  %v1013_v58 = vld [vmem:[%s5005_s29 + $0x13e8] sm:$0xff]  ;;  %v1184_v56 = vld [vmem:[%s5005_s29 + $0x1940] sm:$0xff] }
 0x203   : > { %2664 = vmatmul.f32.gmra.mxu1 %v4561_v61  ;;  %3021 = vmatpush.msrb.mxu3 %v1109_v33  ;;  %v1055_v61 = vld [vmem:[%s5005_s29 + $0x1538] sm:$0xff]  ;;  %v4581_v33 = vld [vmem:[%s8254_s0 + $0x348] sm:$0xff] }
 0x204   : > { %4302 = vst [vmem:[%s6392_s10 + $0x48] sm:$0xff] %v4281_v14  ;;  %2740 = vmatmul.f32.gmra.mxu3 %v4562_v22  ;;  %v2393_v18 = vpop.f32.mrf.mxu2  ;;  %2984 = vmatpush.msrb.mxu2 %v1058_v63  ;;  %v959_v22 = vld [vmem:[%s5005_s29 + $0x1238] sm:$0xff]  ;;  %v1277_v63 = vld [vmem:[%s5005_s29 + $0x1c28] sm:$0xff] }
 0x205   : > { %v2394_v11 = vadd.f32 %v2393_v18, %v2356_v1  ;;  %2945 = vmatpush.msrb.mxu1 %v1013_v58  ;;  %2908 = vmatpush.msrb.mxu0 %v962_v13  ;;  %v1010_v1 = vld [vmem:[%s5005_s29 + $0x13d0] sm:$0xff]  ;;  %v1052_v18 = vld [vmem:[%s5005_s29 + $0x1520] sm:$0xff] }
 0x206   : > { %v2320_v9 = vpop.f32.mrf.mxu0  ;;  %3022 = vmatpush.msrb.mxu3 %v1106_v5  ;;  %2985 = vmatpush.msrb.mxu2 %v1055_v61  ;;  %v1229_v61 = vld [vmem:[%s5005_s29 + $0x1aa8] sm:$0xff] }
 0x207   : > { %v2321_v16 = vadd.f32 %v2320_v9, %v2283_v24  ;;  %v2431_v31 = vpop.f32.mrf.mxu3  ;;  %2946 = vmatpush.msrb.mxu1 %v1010_v1  ;;  %2909 = vmatpush.msrb.mxu0 %v959_v22  ;;  %v1007_v9 = vld [vmem:[%s5005_s29 + $0x13b8] sm:$0xff]  ;;  %v4584_v1 = vld [vmem:[%s8254_s0 + $0x410] sm:$0xff] }
 0x208   : > { %v2432_v26 = vadd.f32 %v2431_v31, %v2394_v11  ;;  %v2358_v34 = vpop.f32.mrf.mxu1  ;;  %v1103_v11 = vld [vmem:[%s5005_s29 + $0x16b8] sm:$0xff]  ;;  %2986 = vmatpush.msrb.mxu2 %v1052_v18  ;;  %v1100_v31 = vld [vmem:[%s5005_s29 + $0x16a0] sm:$0xff]  ;;  %v4585_v18 = vld [vmem:[%s8254_s0 + $0x408] sm:$0xff] }
 0x209   : > { %2760 = vmatmul.f32.vlgmr.msra.gmra.mxu0 %v4563_v45  ;;  %2836 = vmatmul.f32.vlgmr.msra.gmra.mxu2 %v4564_v28  ;;  %v2359_v37 = vadd.f32 %v2358_v34, %v2321_v16  ;;  %v956_v16 = vld [vmem:[%s5005_s29 + $0x1220] sm:$0xff]  ;;  %v953_v45 = vld [vmem:[%s5005_s29 + $0x1208] sm:$0xff] }
 0x20a   : > { %v4284_v40 = vadd.f32 %v6367_v19, %v2432_v26  ;;  %3023 = vmatpush.msrb.mxu3 %v1103_v11  ;;  %2947 = vmatpush.msrb.mxu1 %v1007_v9  ;;  %v4575_v28 = vld [vmem:[%s8254_s0 + $0x280] sm:$0xff]  ;;  %v1319_v9 = vld [vmem:[%s5005_s29 + $0x1d78] sm:$0xff] }
 0x20b   : > { %2798 = vmatmul.f32.vlgmr.msra.gmra.mxu1 %v4565_v41  ;;  %2910 = vmatpush.msrb.mxu0 %v956_v16 }
 0x20c   : > { %4305 = vst [vmem:[%s6392_s10 + $0x60] sm:$0xff] %v4284_v40  ;;  %2874 = vmatmul.f32.vlgmr.msra.gmra.mxu3 %v4566_v36  ;;  %v2396_v62 = vpop.f32.mrf.mxu2  ;;  %v1286_v40 = vld [vmem:[%s5005_s29 + $0x1c70] sm:$0xff]  ;;  %2948 = vmatpush.msrb.mxu1 %v1004_v27  ;;  %v4577_v36 = vld [vmem:[%s8254_s0 + $0x288] sm:$0xff]  ;;  %v4587_v27 = vld [vmem:[%s8254_s0 + $0x4c0] sm:$0x1] }
 0x20d   : > { %v2397_v50 = vadd.f32 %v2396_v62, %v2359_v37  ;;  %3024 = vmatpush.msrb.mxu3 %v1100_v31  ;;  %2987 = vmatpush.msrb.mxu2 %v1049_v35  ;;  %v1001_v37 = vld [vmem:[%s5005_s29 + $0x1388] sm:$0xff]  ;;  %v4578_v62 = vld [vmem:[%s8254_s0 + $0x298] sm:$0xff]  ;;  %v4588_v35 = vld [vmem:[%s8254_s0 + $0x4d0] sm:$0x1] }
 0x20e   : > { %v2323_v53 = vpop.f32.mrf.mxu0  ;;  %2911 = vmatpush.msrb.mxu0 %v953_v45  ;;  %2949 = vmatpush.msrb.mxu1 %v1001_v37  ;;  %v1172_v45 = vld [vmem:[%s5005_s29 + $0x18e0] sm:$0xff]  ;;  %v4589_v37 = vld [vmem:[%s8254_s0 + $0x4c8] sm:$0x1] }
 0x20f   : > { %v2324_v2 = vadd.f32 %v2323_v53, %v2286_v30  ;;  %v2434_v59 = vpop.f32.mrf.mxu3  ;;  %3124 = vmatpush.msra.mxu2 %v1286_v40  ;;  %v1334_v30 = vld [vmem:[%s5005_s29 + $0x1df0] sm:$0xff]  ;;  %3025 = vmatpush.msrb.mxu3 %v1097_v43  ;;  %v1265_v40 = vld [vmem:[%s5005_s29 + $0x1bc8] sm:$0xff] }
 0x210   : > { %v2435_v54 = vadd.f32 %v2434_v59, %v2397_v50  ;;  %v2361_v49 = vpop.f32.mrf.mxu1  ;;  %3048 = vmatpush.msra.mxu0 %v1190_v48  ;;  %3086 = vmatpush.msra.mxu1 %v1238_v51  ;;  %v1313_v48 = vld [vmem:[%s5005_s29 + $0x1d48] sm:$0xff] }
 0x211   : > { %2763 = vmatmul.f32.gmra.mxu0 %v4567_v57  ;;  %2839 = vmatmul.f32.gmra.mxu2 %v4568_v47  ;;  %v2362_v0 = vadd.f32 %v2361_v49, %v2324_v2  ;;  %v1187_v49 = vld [vmem:[%s5005_s29 + $0x1958] sm:$0xff]  ;;  %v4580_v57 = vld [vmem:[%s8254_s0 + $0x350] sm:$0xff]  ;;  %v1280_v47 = vld [vmem:[%s5005_s29 + $0x1c40] sm:$0xff] }
 0x212   : > { %v4287_v3 = vadd.f32 %v6367_v19, %v2435_v54  ;;  %3162 = vmatpush.msra.mxu3 %v1334_v30  ;;  %3125 = vmatpush.msra.mxu2 %v1283_v12  ;;  %v1262_v30 = vld [vmem:[%s5005_s29 + $0x1bb0] sm:$0xff] }
 0x213   : > { %2801 = vmatmul.f32.gmra.mxu1 %v4569_v6  ;;  %3049 = vmatpush.msra.mxu0 %v1187_v49  ;;  %v1310_v49 = vld [vmem:[%s5005_s29 + $0x1d30] sm:$0xff] }
 0x214   : > { %4308 = vst [vmem:[%s6392_s10 + $0x78] sm:$0xff] %v4287_v3  ;;  %2877 = vmatmul.f32.gmra.mxu3 %v4570_v60  ;;  %v2399_v55 = vpop.f32.mrf.mxu2  ;;  %v1328_v3 = vld [vmem:[%s5005_s29 + $0x1dc0] sm:$0xff]  ;;  %3126 = vmatpush.msra.mxu2 %v1280_v47  ;;  %v1259_v47 = vld [vmem:[%s5005_s29 + $0x1b98] sm:$0xff] }
 0x215   : > { %v2400_v8 = vadd.f32 %v2399_v55, %v2362_v0  ;;  %3163 = vmatpush.msra.mxu3 %v1331_v23  ;;  %v4582_v0 = vld [vmem:[%s8254_s0 + $0x358] sm:$0xff]  ;;  %3087 = vmatpush.msra.mxu1 %v1235_v42  ;;  %v1232_v55 = vld [vmem:[%s5005_s29 + $0x1ac0] sm:$0xff] }
 0x216   : > { %v2457_v14 = vpop.f32.mrf.mxu0  ;;  %3050 = vmatpush.msra.mxu0 %v1184_v56  ;;  %3127 = vmatpush.msra.mxu2 %v1277_v63  ;;  %v4591_v23 = vld [vmem:[%s8254_s0 + $0x60] sm:$0xff]  ;;  %v4593_v56 = vld [vmem:[%s8254_s0 + $0x68] sm:$0xff] }
 0x217   : > { %v2437_v17 = vpop.f32.mrf.mxu3  ;;  %3164 = vmatpush.msra.mxu3 %v1328_v3  ;;  %3088 = vmatpush.msra.mxu1 %v1232_v55  ;;  %v4594_v3 = vld [vmem:[%s8254_s0 + $0x78] sm:$0xff] }
 0x218   : > { %v2438_v10 = vadd.f32 %v2437_v17, %v2400_v8  ;;  %v2495_v7 = vpop.f32.mrf.mxu1  ;;  %v1325_v17 = vld [vmem:[%s5005_s29 + $0x1da8] sm:$0xff]  ;;  %v1211_v55 = vld [vmem:[%s5005_s29 + $0x1a18] sm:$0xff] }
 0x219   : > { %2766 = vmatmul.f32.gmra.mxu0 %v4571_v32  ;;  %2842 = vmatmul.f32.gmra.mxu2 %v4572_v21  ;;  %v2496_v20 = vadd.f32 %v2495_v7, %v2457_v14  ;;  %v1181_v14 = vld [vmem:[%s5005_s29 + $0x1928] sm:$0xff]  ;;  %v4583_v7 = vld [vmem:[%s8254_s0 + $0x400] sm:$0xff]  ;;  %v1178_v32 = vld [vmem:[%s5005_s29 + $0x1910] sm:$0xff] }
 0x21a   : > { %v4290_v24 = vadd.f32 %v6367_v19, %v2438_v10  ;;  %v1274_v10 = vld [vmem:[%s5005_s29 + $0x1c10] sm:$0xff]  ;;  %3051 = vmatpush.msra.mxu0 %v1181_v14  ;;  %3165 = vmatpush.msra.mxu3 %v1325_v17  ;;  %v1160_v14 = vld [vmem:[%s5005_s29 + $0x1880] sm:$0xff] }
 0x21b   : > { %2804 = vmatmul.f32.gmra.mxu1 %v4573_v44  ;;  %v1322_v21 = vld [vmem:[%s5005_s29 + $0x1d90] sm:$0xff]  ;;  %3128 = vmatpush.msra.mxu2 %v1274_v10  ;;  %v1271_v44 = vld [vmem:[%s5005_s29 + $0x1bf8] sm:$0xff]  ;;  %v1304_v17 = vld [vmem:[%s5005_s29 + $0x1d00] sm:$0xff] }
 0x21c   : > { %4311 = vst [vmem:[%s6392_s10 + $0x90] sm:$0x1] %v4290_v24  ;;  %2880 = vmatmul.f32.gmra.mxu3 %v4574_v39  ;;  %v2533_v19 = vpop.f32.mrf.mxu2  ;;  %v4586_v24 = vld [vmem:[%s8254_s0 + $0x418] sm:$0xff]  ;;  %3089 = vmatpush.msra.mxu1 %v1229_v61  ;;  %v4595_v10 = vld [vmem:[%s8254_s0 + $0x120] sm:$0xff]  ;;  %v1253_v61 = vld [vmem:[%s5005_s29 + $0x1b68] sm:$0xff] }
 0x21d   : > { %v2534_v25 = vadd.f32 %v2533_v19, %v2496_v20  ;;  %v1226_v20 = vld [vmem:[%s5005_s29 + $0x1a90] sm:$0xff]  ;;  %3052 = vmatpush.msra.mxu0 %v1178_v32  ;;  %3166 = vmatpush.msra.mxu3 %v1322_v21  ;;  %v1175_v19 = vld [vmem:[%s5005_s29 + $0x18f8] sm:$0xff]  ;;  %v1157_v32 = vld [vmem:[%s5005_s29 + $0x1868] sm:$0xff] }
 0x21e   : > { %v2460_v26 = vpop.f32.mrf.mxu0  ;;  %3090 = vmatpush.msra.mxu1 %v1226_v20  ;;  %3129 = vmatpush.msra.mxu2 %v1271_v44  ;;  %v1301_v21 = vld [vmem:[%s5005_s29 + $0x1ce8] sm:$0xff]  ;;  %v1250_v20 = vld [vmem:[%s5005_s29 + $0x1b50] sm:$0xff] }
 0x21f   : > { %v2571_v34 = vpop.f32.mrf.mxu3  ;;  %3053 = vmatpush.msra.mxu0 %v1175_v19  ;;  %3167 = vmatpush.msra.mxu3 %v1319_v9  ;;  %v1154_v19 = vld [vmem:[%s5005_s29 + $0x1850] sm:$0xff] }
 0x220   : > { %v6560_v52 = vadd.f32 %v2571_v34, %v2534_v25  ;;  %v2498_v29 = vpop.f32.mrf.mxu1  ;;  %v1268_v34 = vld [vmem:[%s5005_s29 + $0x1be0] sm:$0xff]  ;;  %v1298_v9 = vld [vmem:[%s5005_s29 + $0x1cd0] sm:$0xff] }
 0x221   : > { %2769 = vmatmul.f32.gmra.mxu0 %v4575_v28  ;;  %2845 = vmatmul.f32.gmra.mxu2 %v4576_v46  ;;  %v2499_v41 = vadd.f32 %v2498_v29, %v2460_v26  ;;  %v1223_v29 = vld [vmem:[%s5005_s29 + $0x1a78] sm:$0xff]  ;;  %v1220_v28 = vld [vmem:[%s5005_s29 + $0x1a60] sm:$0xff] }
 0x222   : > { %3130 = vmatpush.msra.mxu2 %v1268_v34  ;;  %3091 = vmatpush.msra.mxu1 %v1223_v29  ;;  %v1316_v46 = vld [vmem:[%s5005_s29 + $0x1d60] sm:$0xff] }
 0x223   : > { %2807 = vmatmul.f32.gmra.mxu1 %v4577_v36  ;;  %3054 = vmatpush.msra.mxu0 %v1172_v45  ;;  %v4599_v45 = vld [vmem:[%s8254_s0 + $0x1e0] sm:$0xff] }
 0x224   : > { %2883 = vmatmul.f32.gmra.mxu3 %v4578_v62  ;;  %v2536_v38 = vpop.f32.mrf.mxu2  ;;  %3092 = vmatpush.msra.mxu1 %v1220_v28  ;;  %v4600_v28 = vld [vmem:[%s8254_s0 + $0x1f0] sm:$0xff] }
 0x225   : > { %v2537_v50 = vadd.f32 %v2536_v38, %v2499_v41  ;;  %v4590_v41 = vld [vmem:[%s8254_s0 + $0x4d8] sm:$0x1]  ;;  %3168 = vmatpush.msra.mxu3 %v1316_v46  ;;  %3131 = vmatpush.msra.mxu2 %v1265_v40  ;;  %v1169_v38 = vld [vmem:[%s5005_s29 + $0x18c8] sm:$0xff] }
 0x226   : > { %v2463_v53 = vpop.f32.mrf.mxu0  ;;  %3055 = vmatpush.msra.mxu0 %v1169_v38  ;;  %v1151_v46 = vld [vmem:[%s5005_s29 + $0x1838] sm:$0xff] }
 0x227   : > { %v2574_v2 = vpop.f32.mrf.mxu3  ;;  %3169 = vmatpush.msra.mxu3 %v1313_v48  ;;  %3132 = vmatpush.msra.mxu2 %v1262_v30  ;;  %v1295_v40 = vld [vmem:[%s5005_s29 + $0x1cb8] sm:$0xff]  ;;  %v1148_v48 = vld [vmem:[%s5005_s29 + $0x1820] sm:$0xff] }
 0x228   : > { %v6584_v59 = vadd.f32 %v2574_v2, %v2537_v50  ;;  %v2501_v54 = vpop.f32.mrf.mxu1  ;;  %v1217_v2 = vld [vmem:[%s5005_s29 + $0x1a48] sm:$0xff]  ;;  %v1292_v30 = vld [vmem:[%s5005_s29 + $0x1ca0] sm:$0xff] }
 0x229   : > { %2772 = vmatmul.f32.gmra.mxu0 %v4579_v15  ;;  %2848 = vmatmul.f32.gmra.mxu2 %v4580_v57  ;;  %v2502_v4 = vadd.f32 %v2501_v54, %v2463_v53  ;;  %v1166_v54 = vld [vmem:[%s5005_s29 + $0x18b0] sm:$0xff] }
 0x22a   : > { %v4592_v15 = vld [vmem:[%s8254_s0 + $0x70] sm:$0xff]  ;;  %3093 = vmatpush.msra.mxu1 %v1217_v2  ;;  %3056 = vmatpush.msra.mxu0 %v1166_v54 }
 0x22b   : > { %2810 = vmatmul.f32.gmra.mxu1 %v4581_v33  ;;  %v1214_v57 = vld [vmem:[%s5005_s29 + $0x1a30] sm:$0xff]  ;;  %3170 = vmatpush.msra.mxu3 %v1310_v49  ;;  %v1163_v33 = vld [vmem:[%s5005_s29 + $0x1898] sm:$0xff]  ;;  %v1196_v49 = vld [vmem:[%s5005_s29 + $0x19a0] sm:$0xff] }
 0x22c   : > { %2886 = vmatmul.f32.gmra.mxu3 %v4582_v0  ;;  %v2539_v6 = vpop.f32.mrf.mxu2  ;;  %3094 = vmatpush.msra.mxu1 %v1214_v57  ;;  %v1307_v0 = vld [vmem:[%s5005_s29 + $0x1d18] sm:$0xff]  ;;  %v4603_v57 = vld [vmem:[%s8254_s0 + $0x2a0] sm:$0xff] }
 0x22d   : > { %v2540_v60 = vadd.f32 %v2539_v6, %v2502_v4  ;;  %3133 = vmatpush.msra.mxu2 %v1259_v47  ;;  %3057 = vmatpush.msra.mxu0 %v1163_v33  ;;  %v4604_v47 = vld [vmem:[%s8254_s0 + $0x2b0] sm:$0xff]  ;;  %v4606_v33 = vld [vmem:[%s8254_s0 + $0x2b8] sm:$0xff] }
 0x22e   : > { %v2466_v8 = vpop.f32.mrf.mxu0  ;;  %3171 = vmatpush.msra.mxu3 %v1307_v0  ;;  %3095 = vmatpush.msra.mxu1 %v1211_v55 }
 0x22f   : > { %v2577_v58 = vpop.f32.mrf.mxu3  ;;  %3058 = vmatpush.msra.mxu0 %v1160_v14 }
 0x230   : > { %v6606_v13 = vadd.f32 %v2577_v58, %v2540_v60  ;;  %v2504_v5 = vpop.f32.mrf.mxu1  ;;  %v1256_v60 = vld [vmem:[%s5005_s29 + $0x1b80] sm:$0xff]  ;;  %3172 = vmatpush.msra.mxu3 %v1304_v17 }
 0x231   : > { %2775 = vmatmul.f32.gmra.mxu0 %v4583_v7  ;;  %2851 = vmatmul.f32.gmra.mxu2 %v4584_v1  ;;  %v2505_v22 = vadd.f32 %v2504_v5, %v2466_v8  ;;  %v4596_v7 = vld [vmem:[%s8254_s0 + $0x130] sm:$0xff]  ;;  %v1208_v1 = vld [vmem:[%s5005_s29 + $0x1a00] sm:$0xff] }
 0x232   : > { %3134 = vmatpush.msra.mxu2 %v1256_v60  ;;  %3096 = vmatpush.msra.mxu1 %v1208_v1  ;;  %v1526_v60 = vld [vmem:[%s5005_s29 + $0x23f0] sm:$0xff]  ;;  %v1379_v1 = vld [vmem:[%s5005_s29 + $0x1f58] sm:$0xff] }
 0x233   : > { %2813 = vmatmul.f32.gmra.mxu1 %v4585_v18  ;;  %v4597_v18 = vld [vmem:[%s8254_s0 + $0x128] sm:$0xff]  ;;  %3059 = vmatpush.msra.mxu0 %v1157_v32  ;;  %v4607_v32 = vld [vmem:[%s8254_s0 + $0x360] sm:$0xff] }
 0x234   : > { %2889 = vmatmul.f32.gmra.mxu3 %v4586_v24  ;;  %v2542_v11 = vpop.f32.mrf.mxu2  ;;  %3135 = vmatpush.msra.mxu2 %v1253_v61  ;;  %v4598_v24 = vld [vmem:[%s8254_s0 + $0x138] sm:$0xff] }
 0x235   : > { %v2543_v39 = vadd.f32 %v2542_v11, %v2505_v22  ;;  %3173 = vmatpush.msra.mxu3 %v1301_v21  ;;  %3060 = vmatpush.msra.mxu0 %v1154_v19  ;;  %v1523_v61 = vld [vmem:[%s5005_s29 + $0x23d8] sm:$0xff]  ;;  %v4608_v21 = vld [vmem:[%s8254_s0 + $0x370] sm:$0xff] }
 0x236   : > { %v2469_v25 = vpop.f32.mrf.mxu0  ;;  %3136 = vmatpush.msra.mxu2 %v1250_v20  ;;  %v4609_v20 = vld [vmem:[%s8254_s0 + $0x368] sm:$0xff] }
 0x237   : > { %v2580_v16 = vpop.f32.mrf.mxu3  ;;  %3174 = vmatpush.msra.mxu3 %v1298_v9  ;;  %3061 = vmatpush.msra.mxu0 %v1151_v46  ;;  %v1424_v9 = vld [vmem:[%s5005_s29 + $0x20c0] sm:$0xff]  ;;  %v1466_v46 = vld [vmem:[%s5005_s29 + $0x2210] sm:$0xff] }
 0x238   : > { %v6630_v31 = vadd.f32 %v2580_v16, %v2543_v39  ;;  %v2507_v26 = vpop.f32.mrf.mxu1  ;;  %v1205_v39 = vld [vmem:[%s5005_s29 + $0x19e8] sm:$0xff] }
 0x239   : > { %2778 = vmatmul.f32.gmra.mxu0 %v4587_v27  ;;  %2854 = vmatmul.f32.gmra.mxu2 %v4588_v35  ;;  %v2508_v43 = vadd.f32 %v2507_v26, %v2469_v25  ;;  %v1202_v27 = vld [vmem:[%s5005_s29 + $0x19d0] sm:$0xff]  ;;  %v1247_v35 = vld [vmem:[%s5005_s29 + $0x1b38] sm:$0xff] }
 0x23a   : > { %3097 = vmatpush.msra.mxu1 %v1205_v39  ;;  %3137 = vmatpush.msra.mxu2 %v1247_v35 }
 0x23b   : > { %2816 = vmatmul.f32.gmra.mxu1 %v4589_v37  ;;  %v4601_v37 = vld [vmem:[%s8254_s0 + $0x1e8] sm:$0xff]  ;;  %3175 = vmatpush.msra.mxu3 %v1295_v40  ;;  %v4612_v40 = vld [vmem:[%s8254_s0 + $0x430] sm:$0xff] }
 0x23c   : > { %2892 = vmatmul.f32.gmra.mxu3 %v4590_v41  ;;  %v2545_v36 = vpop.f32.mrf.mxu2  ;;  %3098 = vmatpush.msra.mxu1 %v1202_v27  ;;  %v4602_v41 = vld [vmem:[%s8254_s0 + $0x1f8] sm:$0xff] }
 0x23d   : > { %v2546_v62 = vadd.f32 %v2545_v36, %v2508_v43  ;;  %3062 = vmatpush.msra.mxu0 %v1148_v48  ;;  %3176 = vmatpush.msra.mxu3 %v1292_v30  ;;  %v1418_v48 = vld [vmem:[%s5005_s29 + $0x2090] sm:$0xff]  ;;  %v1463_v30 = vld [vmem:[%s5005_s29 + $0x21f8] sm:$0xff] }
 0x23e   : > { %v2472_v50 = vpop.f32.mrf.mxu0 }
 0x23f   : > { %v2583_v51 = vpop.f32.mrf.mxu3 }
 0x240   : > { %v6653_v12 = vadd.f32 %v2583_v51, %v2546_v62  ;;  %v2510_v53 = vpop.f32.mrf.mxu1  ;;  %v1199_v62 = vld [vmem:[%s5005_s29 + $0x19b8] sm:$0xff] }
 0x241   : > { %2912 = vmatmul.f32.vlgmr.msrb.gmra.mxu0 %v4591_v23  ;;  %2988 = vmatmul.f32.vlgmr.msrb.gmra.mxu2 %v4592_v15  ;;  %v2511_v42 = vadd.f32 %v2510_v53, %v2472_v50  ;;  %v1241_v23 = vld [vmem:[%s5005_s29 + $0x1b08] sm:$0xff] }
 0x242   : > { %3099 = vmatpush.msra.mxu1 %v1199_v62  ;;  %v1145_v15 = vld [vmem:[%s5005_s29 + $0x1808] sm:$0xff]  ;;  %v4614_v62 = vld [vmem:[%s8254_s0 + $0x438] sm:$0xff] }
 0x243   : > { %2950 = vmatmul.f32.vlgmr.msrb.gmra.mxu1 %v4593_v56  ;;  %v1193_v56 = vld [vmem:[%s5005_s29 + $0x1988] sm:$0xff]  ;;  %3063 = vmatpush.msra.mxu0 %v1145_v15 }
 0x244   : > { %3026 = vmatmul.f32.vlgmr.msrb.gmra.mxu3 %v4594_v3  ;;  %v2548_v4 = vpop.f32.mrf.mxu2  ;;  %3100 = vmatpush.msra.mxu1 %v1196_v49 }
 0x245   : > { %v2549_v6 = vadd.f32 %v2548_v4, %v2511_v42  ;;  %v1289_v42 = vld [vmem:[%s5005_s29 + $0x1c88] sm:$0xff] }
 0x246   : > { %v2475_v63 = vpop.f32.mrf.mxu0  ;;  %v4605_v4 = vld [vmem:[%s8254_s0 + $0x2a8] sm:$0xff]  ;;  %3177 = vmatpush.msra.mxu3 %v1289_v42  ;;  %3101 = vmatpush.msra.mxu1 %v1193_v56  ;;  %v4615_v42 = vld [vmem:[%s8254_s0 + $0x4e0] sm:$0x1]  ;;  %v4616_v56 = vld [vmem:[%s8254_s0 + $0x4f0] sm:$0x1] }
 0x247   : > { %v2586_v8 = vpop.f32.mrf.mxu3 }
 0x248   : > { %v6676_v58 = vadd.f32 %v2586_v8, %v2549_v6  ;;  %v2513_v5 = vpop.f32.mrf.mxu1  ;;  %v1382_v6 = vld [vmem:[%s5005_s29 + $0x1f70] sm:$0xff]  ;;  %v1475_v8 = vld [vmem:[%s5005_s29 + $0x2258] sm:$0xff]  ;;  %3314 = vmatpush.msrb.mxu3 %v1526_v60 }
 0x249   : > { %2915 = vmatmul.f32.gmra.mxu0 %v4595_v10  ;;  %2991 = vmatmul.f32.gmra.mxu2 %v4596_v7  ;;  %v2514_v22 = vadd.f32 %v2513_v5, %v2475_v63  ;;  %v1430_v63 = vld [vmem:[%s5005_s29 + $0x20f0] sm:$0xff]  ;;  %v4618_v60 = vld [vmem:[%s8254_s0 + $0x4f8] sm:$0x1] }
 0x24a   : > { %3200 = vmatpush.msrb.mxu0 %v1382_v6  ;;  %3238 = vmatpush.msrb.mxu1 %v1430_v63  ;;  %v4617_v6 = vld [vmem:[%s8254_s0 + $0x4e8] sm:$0x1] }
 0x24b   : > { %2953 = vmatmul.f32.gmra.mxu1 %v4597_v18  ;;  %3315 = vmatpush.msrb.mxu3 %v1523_v61  ;;  %v1376_v18 = vld [vmem:[%s5005_s29 + $0x1f40] sm:$0xff] }
 0x24c   : > { %3029 = vmatmul.f32.gmra.mxu3 %v4598_v24  ;;  %v2551_v11 = vpop.f32.mrf.mxu2  ;;  %3201 = vmatpush.msrb.mxu0 %v1379_v1  ;;  %v1520_v24 = vld [vmem:[%s5005_s29 + $0x23c0] sm:$0xff] }
 0x24d   : > { %v2552_v44 = vadd.f32 %v2551_v11, %v2514_v22  ;;  %v1427_v22 = vld [vmem:[%s5005_s29 + $0x20d8] sm:$0xff]  ;;  %3316 = vmatpush.msrb.mxu3 %v1520_v24  ;;  %v1406_v24 = vld [vmem:[%s5005_s29 + $0x2030] sm:$0xff] }
 0x24e   : > { %v2609_v25 = vpop.f32.mrf.mxu0  ;;  %3239 = vmatpush.msrb.mxu1 %v1427_v22  ;;  %3202 = vmatpush.msrb.mxu0 %v1376_v18  ;;  %v1502_v22 = vld [vmem:[%s5005_s29 + $0x2330] sm:$0xff]  ;;  %v4619_v18 = vld [vmem:[%s8254_s0 + $0x80] sm:$0xff] }
 0x24f   : > { %v2589_v16 = vpop.f32.mrf.mxu3  ;;  %v2610_v26 = vadd.f32 %v2609_v25, %v6560_v52  ;;  %v1244_v52 = vld [vmem:[%s5005_s29 + $0x1b20] sm:$0xff]  ;;  %v1469_v25 = vld [vmem:[%s5005_s29 + $0x2228] sm:$0xff] }
 0x250   : > { %v6701_v34 = vadd.f32 %v2589_v16, %v2552_v44  ;;  %v2647_v29 = vpop.f32.mrf.mxu1  ;;  %3138 = vmatpush.msra.mxu2 %v1244_v52  ;;  %v4610_v44 = vld [vmem:[%s8254_s0 + $0x378] sm:$0xff]  ;;  %3240 = vmatpush.msrb.mxu1 %v1424_v9  ;;  %v4611_v52 = vld [vmem:[%s8254_s0 + $0x420] sm:$0xff] }
 0x251   : > { %2918 = vmatmul.f32.gmra.mxu0 %v4599_v45  ;;  %2994 = vmatmul.f32.gmra.mxu2 %v4600_v28  ;;  %v2648_v43 = vadd.f32 %v2647_v29, %v2610_v26  ;;  %v1373_v45 = vld [vmem:[%s5005_s29 + $0x1f28] sm:$0xff]  ;;  %v1355_v9 = vld [vmem:[%s5005_s29 + $0x1e98] sm:$0xff] }
 0x252   : > { %3139 = vmatpush.msra.mxu2 %v1241_v23  ;;  %v1517_v28 = vld [vmem:[%s5005_s29 + $0x23a8] sm:$0xff]  ;;  %3203 = vmatpush.msrb.mxu0 %v1373_v45 }
 0x253   : > { %2956 = vmatmul.f32.gmra.mxu1 %v4601_v37  ;;  %3317 = vmatpush.msrb.mxu3 %v1517_v28  ;;  %v1514_v37 = vld [vmem:[%s5005_s29 + $0x2390] sm:$0xff] }
 0x254   : > { %3032 = vmatmul.f32.gmra.mxu3 %v4602_v41  ;;  %v2685_v36 = vpop.f32.mrf.mxu2 }
 0x255   : > { %v2686_v38 = vadd.f32 %v2685_v36, %v2648_v43  ;;  %v1370_v43 = vld [vmem:[%s5005_s29 + $0x1f10] sm:$0xff]  ;;  %v4613_v36 = vld [vmem:[%s8254_s0 + $0x428] sm:$0xff]  ;;  %3318 = vmatpush.msrb.mxu3 %v1514_v37 }
 0x256   : > { %v2612_v50 = vpop.f32.mrf.mxu0  ;;  %3204 = vmatpush.msrb.mxu0 %v1370_v43  ;;  %v4623_v43 = vld [vmem:[%s8254_s0 + $0x140] sm:$0xff]  ;;  %v4624_v37 = vld [vmem:[%s8254_s0 + $0x150] sm:$0xff] }
 0x257   : > { %v2613_v51 = vadd.f32 %v2612_v50, %v6584_v59  ;;  %v2723_v53 = vpop.f32.mrf.mxu3  ;;  %v1478_v59 = vld [vmem:[%s5005_s29 + $0x2270] sm:$0xff] }
 0x258   : > { %v6724_v2 = vadd.f32 %v2723_v53, %v2686_v38  ;;  %v2650_v54 = vpop.f32.mrf.mxu1  ;;  %3276 = vmatpush.msrb.mxu2 %v1478_v59  ;;  %v1511_v53 = vld [vmem:[%s5005_s29 + $0x2378] sm:$0xff] }
 0x259   : > { %2921 = vmatmul.f32.gmra.mxu0 %v4603_v57  ;;  %2997 = vmatmul.f32.gmra.mxu2 %v4604_v47  ;;  %v2651_v3 = vadd.f32 %v2650_v54, %v2613_v51  ;;  %v1367_v51 = vld [vmem:[%s5005_s29 + $0x1ef8] sm:$0xff]  ;;  %v1460_v47 = vld [vmem:[%s5005_s29 + $0x21e0] sm:$0xff] }
 0x25a   : > { %3277 = vmatpush.msrb.mxu2 %v1475_v8  ;;  %3205 = vmatpush.msrb.mxu0 %v1367_v51  ;;  %v1415_v59 = vld [vmem:[%s5005_s29 + $0x2078] sm:$0xff]  ;;  %v1361_v8 = vld [vmem:[%s5005_s29 + $0x1ec8] sm:$0xff]  ;;  %v1442_v51 = vld [vmem:[%s5005_s29 + $0x2150] sm:$0xff] }
 0x25b   : > { %2959 = vmatmul.f32.gmra.mxu1 %v4605_v4  ;;  %3319 = vmatpush.msrb.mxu3 %v1511_v53  ;;  %v1508_v4 = vld [vmem:[%s5005_s29 + $0x2360] sm:$0xff] }
 0x25c   : > { %3035 = vmatmul.f32.gmra.mxu3 %v4606_v33  ;;  %v2688_v0 = vpop.f32.mrf.mxu2  ;;  %v1457_v33 = vld [vmem:[%s5005_s29 + $0x21c8] sm:$0xff] }
 0x25d   : > { %v2689_v55 = vadd.f32 %v2688_v0, %v2651_v3  ;;  %v1412_v3 = vld [vmem:[%s5005_s29 + $0x2060] sm:$0xff]  ;;  %3320 = vmatpush.msrb.mxu3 %v1508_v4 }
 0x25e   : > { %v2615_v5 = vpop.f32.mrf.mxu0  ;;  %v4627_v4 = vld [vmem:[%s8254_s0 + $0x200] sm:$0xff] }
 0x25f   : > { %v2616_v14 = vadd.f32 %v2615_v5, %v6606_v13  ;;  %v2726_v17 = vpop.f32.mrf.mxu3  ;;  %v1472_v13 = vld [vmem:[%s5005_s29 + $0x2240] sm:$0xff]  ;;  %v1505_v5 = vld [vmem:[%s5005_s29 + $0x2348] sm:$0xff] }
 0x260   : > { %v6749_v10 = vadd.f32 %v2726_v17, %v2689_v55  ;;  %v2653_v7 = vpop.f32.mrf.mxu1  ;;  %3278 = vmatpush.msrb.mxu2 %v1472_v13  ;;  %3321 = vmatpush.msrb.mxu3 %v1505_v5  ;;  %v1358_v13 = vld [vmem:[%s5005_s29 + $0x1eb0] sm:$0xff]  ;;  %v1391_v5 = vld [vmem:[%s5005_s29 + $0x1fb8] sm:$0xff] }
 0x261   : > { %2924 = vmatmul.f32.gmra.mxu0 %v4607_v32  ;;  %3000 = vmatmul.f32.gmra.mxu2 %v4608_v21  ;;  %v2654_v11 = vadd.f32 %v2653_v7, %v2616_v14  ;;  %v1454_v14 = vld [vmem:[%s5005_s29 + $0x21b0] sm:$0xff]  ;;  %v1409_v21 = vld [vmem:[%s5005_s29 + $0x2048] sm:$0xff] }
 0x262   : > { %3279 = vmatpush.msrb.mxu2 %v1469_v25  ;;  %3322 = vmatpush.msrb.mxu3 %v1502_v22  ;;  %v1499_v25 = vld [vmem:[%s5005_s29 + $0x2318] sm:$0xff] }
 0x263   : > { %2962 = vmatmul.f32.gmra.mxu1 %v4609_v20 }
 0x264   : > { %3038 = vmatmul.f32.gmra.mxu3 %v4610_v44  ;;  %v2691_v39 = vpop.f32.mrf.mxu2  ;;  %3280 = vmatpush.msrb.mxu2 %v1466_v46  ;;  %v4621_v44 = vld [vmem:[%s8254_s0 + $0x88] sm:$0xff] }
 0x265   : > { %v2692_v19 = vadd.f32 %v2691_v39, %v2654_v11  ;;  %v1451_v11 = vld [vmem:[%s5005_s29 + $0x2198] sm:$0xff]  ;;  %3323 = vmatpush.msrb.mxu3 %v1499_v25 }
 0x266   : > { %v2618_v16 = vpop.f32.mrf.mxu0  ;;  %3281 = vmatpush.msrb.mxu2 %v1463_v30  ;;  %v4622_v39 = vld [vmem:[%s8254_s0 + $0x98] sm:$0xff] }
 0x267   : > { %v2619_v26 = vadd.f32 %v2618_v16, %v6630_v31  ;;  %v2729_v29 = vpop.f32.mrf.mxu3  ;;  %v1421_v31 = vld [vmem:[%s5005_s29 + $0x20a8] sm:$0xff]  ;;  %v4626_v30 = vld [vmem:[%s8254_s0 + $0x158] sm:$0xff] }
 0x268   : > { %v6772_v27 = vadd.f32 %v2729_v29, %v2692_v19  ;;  %v2656_v35 = vpop.f32.mrf.mxu1  ;;  %3241 = vmatpush.msrb.mxu1 %v1421_v31  ;;  %3282 = vmatpush.msrb.mxu2 %v1460_v47  ;;  %v1403_v29 = vld [vmem:[%s5005_s29 + $0x2018] sm:$0xff]  ;;  %v1496_v31 = vld [vmem:[%s5005_s29 + $0x2300] sm:$0xff] }
 0x269   : > { %2927 = vmatmul.f32.gmra.mxu0 %v4611_v52  ;;  %3003 = vmatmul.f32.gmra.mxu2 %v4612_v40  ;;  %v2657_v41 = vadd.f32 %v2656_v35, %v2619_v26  ;;  %v1448_v26 = vld [vmem:[%s5005_s29 + $0x2180] sm:$0xff]  ;;  %v4634_v25 = vld [vmem:[%s8254_s0 + $0x2d8] sm:$0xff] }
 0x26a   : > { %3242 = vmatpush.msrb.mxu1 %v1418_v48  ;;  %3283 = vmatpush.msrb.mxu2 %v1457_v33  ;;  %v1352_v40 = vld [vmem:[%s5005_s29 + $0x1e80] sm:$0xff]  ;;  %v4625_v48 = vld [vmem:[%s8254_s0 + $0x148] sm:$0xff]  ;;  %v4628_v33 = vld [vmem:[%s8254_s0 + $0x210] sm:$0xff] }
 0x26b   : > { %2965 = vmatmul.f32.gmra.mxu1 %v4613_v36  ;;  %3324 = vmatpush.msrb.mxu3 %v1496_v31  ;;  %v1349_v36 = vld [vmem:[%s5005_s29 + $0x1e68] sm:$0xff] }
 0x26c   : > { %3041 = vmatmul.f32.gmra.mxu3 %v4614_v62  ;;  %v2694_v38 = vpop.f32.mrf.mxu2  ;;  %3243 = vmatpush.msrb.mxu1 %v1415_v59  ;;  %v1493_v62 = vld [vmem:[%s5005_s29 + $0x22e8] sm:$0xff] }
 0x26d   : > { %v2695_v50 = vadd.f32 %v2694_v38, %v2657_v41  ;;  %3284 = vmatpush.msrb.mxu2 %v1454_v14  ;;  %v1445_v41 = vld [vmem:[%s5005_s29 + $0x2168] sm:$0xff]  ;;  %3325 = vmatpush.msrb.mxu3 %v1493_v62  ;;  %v4636_v62 = vld [vmem:[%s8254_s0 + $0x390] sm:$0xff] }
 0x26e   : > { %v2621_v54 = vpop.f32.mrf.mxu0  ;;  %3244 = vmatpush.msrb.mxu1 %v1412_v3  ;;  %v1439_v3 = vld [vmem:[%s5005_s29 + $0x2138] sm:$0xff] }
 0x26f   : > { %v2622_v49 = vadd.f32 %v2621_v54, %v6653_v12  ;;  %v2732_v23 = vpop.f32.mrf.mxu3  ;;  %v1364_v12 = vld [vmem:[%s5005_s29 + $0x1ee0] sm:$0xff]  ;;  %3285 = vmatpush.msrb.mxu2 %v1451_v11  ;;  %v1397_v54 = vld [vmem:[%s5005_s29 + $0x1fe8] sm:$0xff] }
 0x270   : > { %v6797_v15 = vadd.f32 %v2732_v23, %v2695_v50  ;;  %v2659_v57 = vpop.f32.mrf.mxu1  ;;  %3206 = vmatpush.msrb.mxu0 %v1364_v12  ;;  %3245 = vmatpush.msrb.mxu1 %v1409_v21  ;;  %v1490_v23 = vld [vmem:[%s5005_s29 + $0x22d0] sm:$0xff]  ;;  %v4631_v11 = vld [vmem:[%s8254_s0 + $0x2c0] sm:$0xff] }
 0x271   : > { %2930 = vmatmul.f32.gmra.mxu0 %v4615_v42  ;;  %3006 = vmatmul.f32.gmra.mxu2 %v4616_v56  ;;  %v2660_v0 = vadd.f32 %v2659_v57, %v2622_v49  ;;  %v1346_v49 = vld [vmem:[%s5005_s29 + $0x1e50] sm:$0xff] }
 0x272   : > { %3207 = vmatpush.msrb.mxu0 %v1361_v8  ;;  %3246 = vmatpush.msrb.mxu1 %v1406_v24  ;;  %v1394_v12 = vld [vmem:[%s5005_s29 + $0x1fd0] sm:$0xff]  ;;  %v1337_v24 = vld [vmem:[%s5005_s29 + $0x1e08] sm:$0xff] }
 0x273   : > { %2968 = vmatmul.f32.gmra.mxu1 %v4617_v6  ;;  %3286 = vmatpush.msrb.mxu2 %v1448_v26  ;;  %v1487_v6 = vld [vmem:[%s5005_s29 + $0x22b8] sm:$0xff] }
 0x274   : > { %3044 = vmatmul.f32.gmra.mxu3 %v4618_v60  ;;  %v2697_v55 = vpop.f32.mrf.mxu2  ;;  %3208 = vmatpush.msrb.mxu0 %v1358_v13  ;;  %v423_v26 = vld [vmem:[%s5005_s29 + $0x178] sm:$0xff] }
 0x275   : > { %v2698_v63 = vadd.f32 %v2697_v55, %v2660_v0  ;;  %3247 = vmatpush.msrb.mxu1 %v1403_v29  ;;  %3287 = vmatpush.msrb.mxu2 %v1445_v41  ;;  %v1343_v0 = vld [vmem:[%s5005_s29 + $0x1e38] sm:$0xff]  ;;  %v4629_v55 = vld [vmem:[%s8254_s0 + $0x208] sm:$0xff]  ;;  %v564_v41 = vld [vmem:[%s5005_s29 + $0x5e0] sm:$0xff] }
 0x276   : > { %v2624_v17 = vpop.f32.mrf.mxu0  ;;  %3209 = vmatpush.msrb.mxu0 %v1355_v9  ;;  %3326 = vmatpush.msrb.mxu3 %v1490_v23  ;;  %v4633_v9 = vld [vmem:[%s8254_s0 + $0x2c8] sm:$0xff]  ;;  %v567_v29 = vld [vmem:[%s5005_s29 + $0x5f8] sm:$0xff] }
 0x277   : > { %v2625_v7 = vadd.f32 %v2624_v17, %v6676_v58  ;;  %v2735_v1 = vpop.f32.mrf.mxu3  ;;  %v4620_v58 = vld [vmem:[%s8254_s0 + $0x90] sm:$0xff]  ;;  %3288 = vmatpush.msrb.mxu2 %v1442_v51  ;;  %v1340_v17 = vld [vmem:[%s5005_s29 + $0x1e20] sm:$0xff]  ;;  %v4637_v51 = vld [vmem:[%s8254_s0 + $0x388] sm:$0xff] }
 0x278   : > { %v6821_v61 = vadd.f32 %v2735_v1, %v2698_v63  ;;  %v2662_v32 = vpop.f32.mrf.mxu1  ;;  %3210 = vmatpush.msrb.mxu0 %v1352_v40  ;;  %v4630_v63 = vld [vmem:[%s8254_s0 + $0x218] sm:$0xff]  ;;  %3327 = vmatpush.msrb.mxu3 %v1487_v6  ;;  %v465_v23 = vld [vmem:[%s5005_s29 + $0x2c8] sm:$0xff]  ;;  %v4640_v6 = vld [vmem:[%s8254_s0 + $0x450] sm:$0xff] }
 0x279   : > { %3064 = vmatmul.f32.vlgmr.msra.gmra.mxu0 %v4619_v18  ;;  %3140 = vmatmul.f32.vlgmr.msra.gmra.mxu2 %v4620_v58  ;;  %v2663_v20 = vadd.f32 %v2662_v32, %v2625_v7  ;;  %v1484_v7 = vld [vmem:[%s5005_s29 + $0x22a0] sm:$0xff]  ;;  %v1433_v58 = vld [vmem:[%s5005_s29 + $0x2108] sm:$0xff] }
 0x27a   : > { %3211 = vmatpush.msrb.mxu0 %v1349_v36  ;;  %3289 = vmatpush.msrb.mxu2 %v1439_v3  ;;  %v1388_v18 = vld [vmem:[%s5005_s29 + $0x1fa0] sm:$0xff] }
 0x27b   : > { %3102 = vmatmul.f32.vlgmr.msra.gmra.mxu1 %v4621_v44  ;;  %3328 = vmatpush.msrb.mxu3 %v1484_v7  ;;  %v1481_v44 = vld [vmem:[%s5005_s29 + $0x2288] sm:$0xff]  ;;  %v4635_v36 = vld [vmem:[%s8254_s0 + $0x380] sm:$0xff] }
 0x27c   : > { %3178 = vmatmul.f32.vlgmr.msra.gmra.mxu3 %v4622_v39  ;;  %v2700_v19 = vpop.f32.mrf.mxu2  ;;  %3212 = vmatpush.msrb.mxu0 %v1346_v49  ;;  %v1385_v39 = vld [vmem:[%s5005_s29 + $0x1f88] sm:$0xff]  ;;  %v504_v7 = vld [vmem:[%s5005_s29 + $0x400] sm:$0xff] }
 0x27d   : > { %v2701_v16 = vadd.f32 %v2700_v19, %v2663_v20  ;;  %v4632_v20 = vld [vmem:[%s8254_s0 + $0x2d0] sm:$0xff]  ;;  %3329 = vmatpush.msrb.mxu3 %v1481_v44  ;;  %v4643_v44 = vld [vmem:[%s8254_s0 + $0x500] sm:$0x1] }
 0x27e   : > { %v2627_v35 = vpop.f32.mrf.mxu0  ;;  %3213 = vmatpush.msrb.mxu0 %v1343_v0  ;;  %v507_v0 = vld [vmem:[%s5005_s29 + $0x418] sm:$0xff] }
 0x27f   : > { %v2628_v45 = vadd.f32 %v2627_v35, %v6701_v34  ;;  %v2738_v28 = vpop.f32.mrf.mxu3  ;;  %v1400_v34 = vld [vmem:[%s5005_s29 + $0x2000] sm:$0xff]  ;;  %3466 = vmatpush.msra.mxu3 %v567_v29  ;;  %v4646_v29 = vld [vmem:[%s8254_s0 + $0x518] sm:$0x1] }
 0x280   : > { %v6845_v46 = vadd.f32 %v2738_v28, %v2701_v16  ;;  %v2665_v52 = vpop.f32.mrf.mxu1  ;;  %3248 = vmatpush.msrb.mxu1 %v1400_v34  ;;  %3214 = vmatpush.msrb.mxu0 %v1340_v17  ;;  %v516_v28 = vld [vmem:[%s5005_s29 + $0x460] sm:$0xff]  ;;  %v459_v17 = vld [vmem:[%s5005_s29 + $0x298] sm:$0xff] }
 0x281   : > { %3067 = vmatmul.f32.gmra.mxu0 %v4623_v43  ;;  %3143 = vmatmul.f32.gmra.mxu2 %v4624_v37  ;;  %v2666_v38 = vadd.f32 %v2665_v52, %v2628_v45  ;;  %v471_v45 = vld [vmem:[%s5005_s29 + $0x2f8] sm:$0xff]  ;;  %v420_v34 = vld [vmem:[%s5005_s29 + $0x160] sm:$0xff] }
 0x282   : > { %3249 = vmatpush.msrb.mxu1 %v1397_v54  ;;  %3215 = vmatpush.msrb.mxu0 %v1337_v24 }
 0x283   : > { %3105 = vmatmul.f32.gmra.mxu1 %v4625_v48  ;;  %3467 = vmatpush.msra.mxu3 %v564_v41  ;;  %v417_v48 = vld [vmem:[%s5005_s29 + $0x148] sm:$0xff] }
 0x284   : > { %3181 = vmatmul.f32.gmra.mxu3 %v4626_v30  ;;  %v2703_v50 = vpop.f32.mrf.mxu2  ;;  %3250 = vmatpush.msrb.mxu1 %v1394_v12  ;;  %v561_v30 = vld [vmem:[%s5005_s29 + $0x5c8] sm:$0xff] }
 0x285   : > { %v2704_v53 = vadd.f32 %v2703_v50, %v2666_v38  ;;  %3352 = vmatpush.msra.mxu0 %v423_v26  ;;  %v468_v38 = vld [vmem:[%s5005_s29 + $0x2e0] sm:$0xff]  ;;  %3468 = vmatpush.msra.mxu3 %v561_v30  ;;  %v4645_v26 = vld [vmem:[%s8254_s0 + $0x508] sm:$0x1]  ;;  %v447_v30 = vld [vmem:[%s5005_s29 + $0x238] sm:$0xff] }
 0x286   : > { %v2761_v57 = vpop.f32.mrf.mxu0  ;;  %3251 = vmatpush.msrb.mxu1 %v1391_v5  ;;  %v4642_v5 = vld [vmem:[%s8254_s0 + $0x458] sm:$0xff] }
 0x287   : > { %v2741_v47 = vpop.f32.mrf.mxu3  ;;  %v2762_v59 = vadd.f32 %v2761_v57, %v6724_v2  ;;  %v1436_v2 = vld [vmem:[%s5005_s29 + $0x2120] sm:$0xff]  ;;  %3353 = vmatpush.msra.mxu0 %v420_v34  ;;  %v510_v57 = vld [vmem:[%s5005_s29 + $0x430] sm:$0xff] }
 0x288   : > { %v6870_v42 = vadd.f32 %v2741_v47, %v2704_v53  ;;  %v2799_v56 = vpop.f32.mrf.mxu1  ;;  %3290 = vmatpush.msrb.mxu2 %v1436_v2  ;;  %3252 = vmatpush.msrb.mxu1 %v1388_v18  ;;  %v4638_v53 = vld [vmem:[%s8254_s0 + $0x398] sm:$0xff]  ;;  %v4639_v2 = vld [vmem:[%s8254_s0 + $0x440] sm:$0xff] }
 0x289   : > { %3070 = vmatmul.f32.gmra.mxu0 %v4627_v4  ;;  %3146 = vmatmul.f32.gmra.mxu2 %v4628_v33  ;;  %v2800_v60 = vadd.f32 %v2799_v56, %v2762_v59  ;;  %v414_v4 = vld [vmem:[%s5005_s29 + $0x130] sm:$0xff] }
 0x28a   : > { %3291 = vmatpush.msrb.mxu2 %v1433_v58  ;;  %3253 = vmatpush.msrb.mxu1 %v1385_v39  ;;  %v558_v33 = vld [vmem:[%s5005_s29 + $0x5b0] sm:$0xff] }
 0x28b   : > { %3108 = vmatmul.f32.gmra.mxu1 %v4629_v55  ;;  %3354 = vmatpush.msra.mxu0 %v417_v48  ;;  %v555_v55 = vld [vmem:[%s5005_s29 + $0x598] sm:$0xff]  ;;  %v4644_v39 = vld [vmem:[%s8254_s0 + $0x510] sm:$0x1]  ;;  %v4647_v48 = vld [vmem:[%s8254_s0 + $0xa0] sm:$0xff] }
 0x28c   : > { %3184 = vmatmul.f32.gmra.mxu3 %v4630_v63  ;;  %v2837_v8 = vpop.f32.mrf.mxu2  ;;  %3390 = vmatpush.msra.mxu1 %v471_v45 }
 0x28d   : > { %v2838_v14 = vadd.f32 %v2837_v8, %v2800_v60  ;;  %3355 = vmatpush.msra.mxu0 %v414_v4  ;;  %3469 = vmatpush.msra.mxu3 %v558_v33  ;;  %v411_v60 = vld [vmem:[%s5005_s29 + $0x118] sm:$0xff]  ;;  %v4641_v8 = vld [vmem:[%s8254_s0 + $0x448] sm:$0xff] }
 0x28e   : > { %v2764_v1 = vpop.f32.mrf.mxu0  ;;  %3391 = vmatpush.msra.mxu1 %v468_v38  ;;  %v543_v38 = vld [vmem:[%s5005_s29 + $0x538] sm:$0xff] }
 0x28f   : > { %v2765_v32 = vadd.f32 %v2764_v1, %v6749_v10  ;;  %v2875_v21 = vpop.f32.mrf.mxu3  ;;  %v519_v10 = vld [vmem:[%s5005_s29 + $0x478] sm:$0xff]  ;;  %3356 = vmatpush.msra.mxu0 %v411_v60  ;;  %3470 = vmatpush.msra.mxu3 %v555_v55  ;;  %v4651_v60 = vld [vmem:[%s8254_s0 + $0x160] sm:$0xff]  ;;  %v4652_v55 = vld [vmem:[%s8254_s0 + $0x170] sm:$0xff] }
 0x290   : > { %v6893_v13 = vadd.f32 %v2875_v21, %v2838_v14  ;;  %v2802_v22 = vpop.f32.mrf.mxu1  ;;  %3428 = vmatpush.msra.mxu2 %v519_v10  ;;  %3392 = vmatpush.msra.mxu1 %v465_v23  ;;  %v552_v21 = vld [vmem:[%s5005_s29 + $0x580] sm:$0xff] }
 0x291   : > { %3073 = vmatmul.f32.gmra.mxu0 %v4631_v11  ;;  %3149 = vmatmul.f32.gmra.mxu2 %v4632_v20  ;;  %v2803_v19 = vadd.f32 %v2802_v22, %v2765_v32  ;;  %v408_v32 = vld [vmem:[%s5005_s29 + $0x100] sm:$0xff]  ;;  %v501_v20 = vld [vmem:[%s5005_s29 + $0x3e8] sm:$0xff] }
 0x292   : > { %3429 = vmatpush.msra.mxu2 %v516_v28  ;;  %3357 = vmatpush.msra.mxu0 %v408_v32  ;;  %v456_v10 = vld [vmem:[%s5005_s29 + $0x280] sm:$0xff]  ;;  %v402_v28 = vld [vmem:[%s5005_s29 + $0xd0] sm:$0xff]  ;;  %v483_v32 = vld [vmem:[%s5005_s29 + $0x358] sm:$0xff] }
 0x293   : > { %3111 = vmatmul.f32.gmra.mxu1 %v4633_v9  ;;  %3471 = vmatpush.msra.mxu3 %v552_v21  ;;  %v549_v9 = vld [vmem:[%s5005_s29 + $0x568] sm:$0xff]  ;;  %v396_v23 = vld [vmem:[%s5005_s29 + $0xa0] sm:$0xff] }
 0x294   : > { %3187 = vmatmul.f32.gmra.mxu3 %v4634_v25  ;;  %v2840_v16 = vpop.f32.mrf.mxu2  ;;  %v498_v25 = vld [vmem:[%s5005_s29 + $0x3d0] sm:$0xff] }
 0x295   : > { %v2841_v35 = vadd.f32 %v2840_v16, %v2803_v19  ;;  %v453_v19 = vld [vmem:[%s5005_s29 + $0x268] sm:$0xff]  ;;  %3472 = vmatpush.msra.mxu3 %v549_v9  ;;  %v4655_v9 = vld [vmem:[%s8254_s0 + $0x220] sm:$0xff] }
 0x296   : > { %v2767_v52 = vpop.f32.mrf.mxu0 }
 0x297   : > { %v2768_v40 = vadd.f32 %v2767_v52, %v6772_v27  ;;  %v2878_v31 = vpop.f32.mrf.mxu3  ;;  %v513_v27 = vld [vmem:[%s5005_s29 + $0x448] sm:$0xff]  ;;  %v546_v52 = vld [vmem:[%s5005_s29 + $0x550] sm:$0xff] }
 0x298   : > { %v6918_v43 = vadd.f32 %v2878_v31, %v2841_v35  ;;  %v2805_v37 = vpop.f32.mrf.mxu1  ;;  %3430 = vmatpush.msra.mxu2 %v513_v27  ;;  %3473 = vmatpush.msra.mxu3 %v546_v52  ;;  %v399_v27 = vld [vmem:[%s5005_s29 + $0xb8] sm:$0xff]  ;;  %v432_v52 = vld [vmem:[%s5005_s29 + $0x1c0] sm:$0xff] }
 0x299   : > { %3076 = vmatmul.f32.gmra.mxu0 %v4635_v36  ;;  %3152 = vmatmul.f32.gmra.mxu2 %v4636_v62  ;;  %v2806_v50 = vadd.f32 %v2805_v37, %v2768_v40  ;;  %v495_v40 = vld [vmem:[%s5005_s29 + $0x3b8] sm:$0xff]  ;;  %v450_v62 = vld [vmem:[%s5005_s29 + $0x250] sm:$0xff] }
 0x29a   : > { %3431 = vmatpush.msra.mxu2 %v510_v57  ;;  %3474 = vmatpush.msra.mxu3 %v543_v38  ;;  %v540_v57 = vld [vmem:[%s5005_s29 + $0x520] sm:$0xff] }
 0x29b   : > { %3114 = vmatmul.f32.gmra.mxu1 %v4637_v51 }
 0x29c   : > { %3190 = vmatmul.f32.gmra.mxu3 %v4638_v53  ;;  %v2843_v54 = vpop.f32.mrf.mxu2  ;;  %3432 = vmatpush.msra.mxu2 %v507_v0  ;;  %v4649_v53 = vld [vmem:[%s8254_s0 + $0xa8] sm:$0xff] }
 0x29d   : > { %v2844_v49 = vadd.f32 %v2843_v54, %v2806_v50  ;;  %v492_v50 = vld [vmem:[%s5005_s29 + $0x3a0] sm:$0xff]  ;;  %v4650_v54 = vld [vmem:[%s8254_s0 + $0xb8] sm:$0xff]  ;;  %3475 = vmatpush.msra.mxu3 %v540_v57 }
 0x29e   : > { %v2770_v47 = vpop.f32.mrf.mxu0  ;;  %3433 = vmatpush.msra.mxu2 %v504_v7  ;;  %v4654_v7 = vld [vmem:[%s8254_s0 + $0x178] sm:$0xff] }
 0x29f   : > { %v2771_v59 = vadd.f32 %v2770_v47, %v6797_v15  ;;  %v2881_v56 = vpop.f32.mrf.mxu3  ;;  %v462_v15 = vld [vmem:[%s5005_s29 + $0x2b0] sm:$0xff]  ;;  %v4662_v57 = vld [vmem:[%s8254_s0 + $0x2f8] sm:$0xff] }
 0x2a0   : > { %v6941_v12 = vadd.f32 %v2881_v56, %v2844_v49  ;;  %v2808_v3 = vpop.f32.mrf.mxu1  ;;  %3393 = vmatpush.msra.mxu1 %v462_v15  ;;  %3434 = vmatpush.msra.mxu2 %v501_v20  ;;  %v444_v56 = vld [vmem:[%s5005_s29 + $0x220] sm:$0xff]  ;;  %v537_v15 = vld [vmem:[%s5005_s29 + $0x508] sm:$0xff] }
 0x2a1   : > { %3079 = vmatmul.f32.gmra.mxu0 %v4639_v2  ;;  %3155 = vmatmul.f32.gmra.mxu2 %v4640_v6  ;;  %v2809_v63 = vadd.f32 %v2808_v3, %v2771_v59  ;;  %v489_v59 = vld [vmem:[%s5005_s29 + $0x388] sm:$0xff] }
 0x2a2   : > { %3394 = vmatpush.msra.mxu1 %v459_v17  ;;  %3435 = vmatpush.msra.mxu2 %v498_v25  ;;  %v393_v6 = vld [vmem:[%s5005_s29 + $0x88] sm:$0xff]  ;;  %v4656_v25 = vld [vmem:[%s8254_s0 + $0x230] sm:$0xff] }
 0x2a3   : > { %3117 = vmatmul.f32.gmra.mxu1 %v4641_v8  ;;  %3476 = vmatpush.msra.mxu3 %v537_v15  ;;  %v390_v8 = vld [vmem:[%s5005_s29 + $0x70] sm:$0xff]  ;;  %v4653_v17 = vld [vmem:[%s8254_s0 + $0x168] sm:$0xff] }
 0x2a4   : > { %3193 = vmatmul.f32.gmra.mxu3 %v4642_v5  ;;  %v2846_v14 = vpop.f32.mrf.mxu2  ;;  %3395 = vmatpush.msra.mxu1 %v456_v10  ;;  %v534_v5 = vld [vmem:[%s5005_s29 + $0x4f0] sm:$0xff] }
 0x2a5   : > { %v2847_v1 = vadd.f32 %v2846_v14, %v2809_v63  ;;  %3436 = vmatpush.msra.mxu2 %v495_v40  ;;  %v486_v63 = vld [vmem:[%s5005_s29 + $0x370] sm:$0xff]  ;;  %3477 = vmatpush.msra.mxu3 %v534_v5 }
 0x2a6   : > { %v2773_v22 = vpop.f32.mrf.mxu0  ;;  %3396 = vmatpush.msra.mxu1 %v453_v19  ;;  %v480_v19 = vld [vmem:[%s5005_s29 + $0x340] sm:$0xff]  ;;  %v4664_v5 = vld [vmem:[%s8254_s0 + $0x3b0] sm:$0xff] }
 0x2a7   : > { %v2774_v18 = vadd.f32 %v2773_v22, %v6821_v61  ;;  %v2884_v58 = vpop.f32.mrf.mxu3  ;;  %v405_v61 = vld [vmem:[%s5005_s29 + $0xe8] sm:$0xff]  ;;  %3437 = vmatpush.msra.mxu2 %v492_v50  ;;  %v438_v22 = vld [vmem:[%s5005_s29 + $0x1f0] sm:$0xff]  ;;  %v4659_v50 = vld [vmem:[%s8254_s0 + $0x2e0] sm:$0xff] }
 0x2a8   : > { %v6966_v24 = vadd.f32 %v2884_v58, %v2847_v1  ;;  %v2811_v11 = vpop.f32.mrf.mxu1  ;;  %3358 = vmatpush.msra.mxu0 %v405_v61  ;;  %3397 = vmatpush.msra.mxu1 %v450_v62  ;;  %v531_v58 = vld [vmem:[%s5005_s29 + $0x4d8] sm:$0xff] }
 0x2a9   : > { %3082 = vmatmul.f32.gmra.mxu0 %v4643_v44  ;;  %3158 = vmatmul.f32.gmra.mxu2 %v4644_v39  ;;  %v2812_v16 = vadd.f32 %v2811_v11, %v2774_v18  ;;  %v387_v18 = vld [vmem:[%s5005_s29 + $0x58] sm:$0xff] }
 0x2aa   : > { %3359 = vmatpush.msra.mxu0 %v402_v28  ;;  %3398 = vmatpush.msra.mxu1 %v447_v30  ;;  %v435_v61 = vld [vmem:[%s5005_s29 + $0x1d8] sm:$0xff]  ;;  %v378_v30 = vld [vmem:[%s5005_s29 + $0x10] sm:$0xff] }
 0x2ab   : > { %3120 = vmatmul.f32.gmra.mxu1 %v4645_v26  ;;  %3438 = vmatpush.msra.mxu2 %v489_v59  ;;  %v528_v26 = vld [vmem:[%s5005_s29 + $0x4c0] sm:$0xff]  ;;  %v615_v59 = vld [vmem:[%s5005_s29 + $0x778] sm:$0xff] }
 0x2ac   : > { %3196 = vmatmul.f32.gmra.mxu3 %v4646_v29  ;;  %v2849_v35 = vpop.f32.mrf.mxu2  ;;  %3360 = vmatpush.msra.mxu0 %v399_v27 }
 0x2ad   : > { %v2850_v45 = vadd.f32 %v2849_v35, %v2812_v16  ;;  %3399 = vmatpush.msra.mxu1 %v444_v56  ;;  %3439 = vmatpush.msra.mxu2 %v486_v63  ;;  %v384_v16 = vld [vmem:[%s5005_s29 + $0x40] sm:$0xff]  ;;  %v4657_v35 = vld [vmem:[%s8254_s0 + $0x228] sm:$0xff]  ;;  %v759_v56 = vld [vmem:[%s5005_s29 + $0xbf8] sm:$0xff] }
 0x2ae   : > { %v2776_v31 = vpop.f32.mrf.mxu0  ;;  %3361 = vmatpush.msra.mxu0 %v396_v23  ;;  %3478 = vmatpush.msra.mxu3 %v531_v58  ;;  %v4661_v23 = vld [vmem:[%s8254_s0 + $0x2e8] sm:$0xff]  ;;  %v756_v63 = vld [vmem:[%s5005_s29 + $0xbe0] sm:$0xff] }
 0x2af   : > { %v2777_v37 = vadd.f32 %v2776_v31, %v6845_v46  ;;  %v2887_v34 = vpop.f32.mrf.mxu3  ;;  %v4648_v46 = vld [vmem:[%s8254_s0 + $0xb0] sm:$0xff]  ;;  %3440 = vmatpush.msra.mxu2 %v483_v32  ;;  %v381_v31 = vld [vmem:[%s5005_s29 + $0x28] sm:$0xff] }
 0x2b0   : > { %v6990_v41 = vadd.f32 %v2887_v34, %v2850_v45  ;;  %v2814_v36 = vpop.f32.mrf.mxu1  ;;  %3362 = vmatpush.msra.mxu0 %v393_v6  ;;  %v4658_v45 = vld [vmem:[%s8254_s0 + $0x238] sm:$0xff]  ;;  %3479 = vmatpush.msra.mxu3 %v528_v26  ;;  %v4665_v32 = vld [vmem:[%s8254_s0 + $0x3a8] sm:$0xff]  ;;  %v4668_v26 = vld [vmem:[%s8254_s0 + $0x470] sm:$0xff] }
 0x2b1   : > { %3216 = vmatmul.f32.vlgmr.msrb.gmra.mxu0 %v4647_v48  ;;  %3292 = vmatmul.f32.vlgmr.msrb.gmra.mxu2 %v4648_v46  ;;  %v2815_v51 = vadd.f32 %v2814_v36, %v2777_v37  ;;  %v525_v37 = vld [vmem:[%s5005_s29 + $0x4a8] sm:$0xff]  ;;  %v474_v46 = vld [vmem:[%s5005_s29 + $0x310] sm:$0xff] }
 0x2b2   : > { %3363 = vmatpush.msra.mxu0 %v390_v8  ;;  %3441 = vmatpush.msra.mxu2 %v480_v19  ;;  %v429_v48 = vld [vmem:[%s5005_s29 + $0x1a8] sm:$0xff]  ;;  %v4663_v8 = vld [vmem:[%s8254_s0 + $0x3a0] sm:$0xff] }
 0x2b3   : > { %3254 = vmatmul.f32.vlgmr.msrb.gmra.mxu1 %v4649_v53  ;;  %3480 = vmatpush.msra.mxu3 %v525_v37  ;;  %v522_v53 = vld [vmem:[%s5005_s29 + $0x490] sm:$0xff]  ;;  %v657_v58 = vld [vmem:[%s5005_s29 + $0x8c8] sm:$0xff]  ;;  %v696_v37 = vld [vmem:[%s5005_s29 + $0xa00] sm:$0xff] }
 0x2b4   : > { %3330 = vmatmul.f32.vlgmr.msrb.gmra.mxu3 %v4650_v54  ;;  %v2852_v49 = vpop.f32.mrf.mxu2  ;;  %3364 = vmatpush.msra.mxu0 %v387_v18  ;;  %v426_v54 = vld [vmem:[%s5005_s29 + $0x190] sm:$0xff] }
 0x2b5   : > { %v2853_v47 = vadd.f32 %v2852_v49, %v2815_v51  ;;  %v4660_v51 = vld [vmem:[%s8254_s0 + $0x2f0] sm:$0xff]  ;;  %3481 = vmatpush.msra.mxu3 %v522_v53  ;;  %v4671_v53 = vld [vmem:[%s8254_s0 + $0x520] sm:$0x1] }
 0x2b6   : > { %v2779_v3 = vpop.f32.mrf.mxu0  ;;  %3365 = vmatpush.msra.mxu0 %v384_v16  ;;  %v699_v16 = vld [vmem:[%s5005_s29 + $0xa18] sm:$0xff] }
 0x2b7   : > { %v2780_v4 = vadd.f32 %v2779_v3, %v6870_v42  ;;  %v2890_v33 = vpop.f32.mrf.mxu3  ;;  %v441_v42 = vld [vmem:[%s5005_s29 + $0x208] sm:$0xff]  ;;  %3618 = vmatpush.msrb.mxu3 %v759_v56  ;;  %v4674_v56 = vld [vmem:[%s8254_s0 + $0x538] sm:$0x1] }
 0x2b8   : > { %v7014_v0 = vadd.f32 %v2890_v33, %v2853_v47  ;;  %v2817_v2 = vpop.f32.mrf.mxu1  ;;  %3400 = vmatpush.msra.mxu1 %v441_v42  ;;  %3366 = vmatpush.msra.mxu0 %v381_v31  ;;  %v708_v33 = vld [vmem:[%s5005_s29 + $0xa60] sm:$0xff]  ;;  %v651_v31 = vld [vmem:[%s5005_s29 + $0x898] sm:$0xff] }
 0x2b9   : > { %3219 = vmatmul.f32.gmra.mxu0 %v4651_v60  ;;  %3295 = vmatmul.f32.gmra.mxu2 %v4652_v55  ;;  %v2818_v14 = vadd.f32 %v2817_v2, %v2780_v4  ;;  %v663_v4 = vld [vmem:[%s5005_s29 + $0x8f8] sm:$0xff]  ;;  %v612_v42 = vld [vmem:[%s5005_s29 + $0x760] sm:$0xff] }
 0x2ba   : > { %3401 = vmatpush.msra.mxu1 %v438_v22  ;;  %3367 = vmatpush.msra.mxu0 %v378_v30 }
 0x2bb   : > { %3257 = vmatmul.f32.gmra.mxu1 %v4653_v17  ;;  %3619 = vmatpush.msrb.mxu3 %v756_v63  ;;  %v609_v17 = vld [vmem:[%s5005_s29 + $0x748] sm:$0xff] }
 0x2bc   : > { %3333 = vmatmul.f32.gmra.mxu3 %v4654_v7  ;;  %v2855_v1 = vpop.f32.mrf.mxu2  ;;  %3402 = vmatpush.msra.mxu1 %v435_v61  ;;  %v753_v7 = vld [vmem:[%s5005_s29 + $0xbc8] sm:$0xff] }
 0x2bd   : > { %v2856_v21 = vadd.f32 %v2855_v1, %v2818_v14  ;;  %3504 = vmatpush.msrb.mxu0 %v615_v59  ;;  %v660_v14 = vld [vmem:[%s5005_s29 + $0x8e0] sm:$0xff]  ;;  %3620 = vmatpush.msrb.mxu3 %v753_v7  ;;  %v4673_v59 = vld [vmem:[%s8254_s0 + $0x528] sm:$0x1]  ;;  %v639_v7 = vld [vmem:[%s5005_s29 + $0x838] sm:$0xff] }
 0x2be   : > { %v2913_v11 = vpop.f32.mrf.mxu0  ;;  %3403 = vmatpush.msra.mxu1 %v432_v52  ;;  %v4670_v52 = vld [vmem:[%s8254_s0 + $0x478] sm:$0xff] }
 0x2bf   : > { %v2893_v20 = vpop.f32.mrf.mxu3  ;;  %v2914_v10 = vadd.f32 %v2913_v11, %v6893_v13  ;;  %v477_v13 = vld [vmem:[%s5005_s29 + $0x328] sm:$0xff]  ;;  %3505 = vmatpush.msrb.mxu0 %v612_v42  ;;  %v702_v11 = vld [vmem:[%s5005_s29 + $0xa30] sm:$0xff] }
 0x2c0   : > { %v7039_v44 = vadd.f32 %v2893_v20, %v2856_v21  ;;  %v2951_v39 = vpop.f32.mrf.mxu1  ;;  %3442 = vmatpush.msra.mxu2 %v477_v13  ;;  %3404 = vmatpush.msra.mxu1 %v429_v48  ;;  %v4666_v21 = vld [vmem:[%s8254_s0 + $0x3b8] sm:$0xff]  ;;  %v4667_v13 = vld [vmem:[%s8254_s0 + $0x460] sm:$0xff] }
 0x2c1   : > { %3222 = vmatmul.f32.gmra.mxu0 %v4655_v9  ;;  %3298 = vmatmul.f32.gmra.mxu2 %v4656_v25  ;;  %v2952_v29 = vadd.f32 %v2951_v39, %v2914_v10  ;;  %v606_v9 = vld [vmem:[%s5005_s29 + $0x730] sm:$0xff] }
 0x2c2   : > { %3443 = vmatpush.msra.mxu2 %v474_v46  ;;  %3405 = vmatpush.msra.mxu1 %v426_v54  ;;  %v750_v25 = vld [vmem:[%s5005_s29 + $0xbb0] sm:$0xff] }
 0x2c3   : > { %3260 = vmatmul.f32.gmra.mxu1 %v4657_v35  ;;  %3506 = vmatpush.msrb.mxu0 %v609_v17  ;;  %v747_v35 = vld [vmem:[%s5005_s29 + $0xb98] sm:$0xff]  ;;  %v4672_v54 = vld [vmem:[%s8254_s0 + $0x530] sm:$0x1]  ;;  %v4675_v17 = vld [vmem:[%s8254_s0] sm:$0xff] }
 0x2c4   : > { %3336 = vmatmul.f32.gmra.mxu3 %v4658_v45  ;;  %v2989_v28 = vpop.f32.mrf.mxu2  ;;  %3542 = vmatpush.msrb.mxu1 %v663_v4 }
 0x2c5   : > { %v2990_v40 = vadd.f32 %v2989_v28, %v2952_v29  ;;  %3507 = vmatpush.msrb.mxu0 %v606_v9  ;;  %3621 = vmatpush.msrb.mxu3 %v750_v25  ;;  %v603_v29 = vld [vmem:[%s5005_s29 + $0x718] sm:$0xff]  ;;  %v4669_v28 = vld [vmem:[%s8254_s0 + $0x468] sm:$0xff] }
 0x2c6   : > { %v2916_v34 = vpop.f32.mrf.mxu0  ;;  %3543 = vmatpush.msrb.mxu1 %v660_v14  ;;  %v735_v14 = vld [vmem:[%s5005_s29 + $0xb38] sm:$0xff] }
 0x2c7   : > { %v2917_v36 = vadd.f32 %v2916_v34, %v6918_v43  ;;  %v3027_v62 = vpop.f32.mrf.mxu3  ;;  %v711_v43 = vld [vmem:[%s5005_s29 + $0xa78] sm:$0xff]  ;;  %3508 = vmatpush.msrb.mxu0 %v603_v29  ;;  %3622 = vmatpush.msrb.mxu3 %v747_v35  ;;  %v4679_v29 = vld [vmem:[%s8254_s0 + $0xc0] sm:$0xff]  ;;  %v4680_v35 = vld [vmem:[%s8254_s0 + $0xd0] sm:$0xff] }
 0x2c8   : > { %v7062_v27 = vadd.f32 %v3027_v62, %v2990_v40  ;;  %v2954_v38 = vpop.f32.mrf.mxu1  ;;  %3580 = vmatpush.msrb.mxu2 %v711_v43  ;;  %3544 = vmatpush.msrb.mxu1 %v657_v58  ;;  %v744_v62 = vld [vmem:[%s5005_s29 + $0xb80] sm:$0xff] }
 0x2c9   : > { %3225 = vmatmul.f32.gmra.mxu0 %v4659_v50  ;;  %3301 = vmatmul.f32.gmra.mxu2 %v4660_v51  ;;  %v2955_v49 = vadd.f32 %v2954_v38, %v2917_v36  ;;  %v600_v36 = vld [vmem:[%s5005_s29 + $0x700] sm:$0xff]  ;;  %v693_v51 = vld [vmem:[%s5005_s29 + $0x9e8] sm:$0xff] }
 0x2ca   : > { %3581 = vmatpush.msrb.mxu2 %v708_v33  ;;  %3509 = vmatpush.msrb.mxu0 %v600_v36  ;;  %v648_v43 = vld [vmem:[%s5005_s29 + $0x880] sm:$0xff]  ;;  %v594_v33 = vld [vmem:[%s5005_s29 + $0x6d0] sm:$0xff]  ;;  %v675_v36 = vld [vmem:[%s5005_s29 + $0x958] sm:$0xff] }
 0x2cb   : > { %3263 = vmatmul.f32.gmra.mxu1 %v4661_v23  ;;  %3623 = vmatpush.msrb.mxu3 %v744_v62  ;;  %v741_v23 = vld [vmem:[%s5005_s29 + $0xb68] sm:$0xff]  ;;  %v588_v58 = vld [vmem:[%s5005_s29 + $0x6a0] sm:$0xff] }
 0x2cc   : > { %3339 = vmatmul.f32.gmra.mxu3 %v4662_v57  ;;  %v2992_v47 = vpop.f32.mrf.mxu2  ;;  %v690_v57 = vld [vmem:[%s5005_s29 + $0x9d0] sm:$0xff] }
 0x2cd   : > { %v2993_v3 = vadd.f32 %v2992_v47, %v2955_v49  ;;  %v645_v49 = vld [vmem:[%s5005_s29 + $0x868] sm:$0xff]  ;;  %3624 = vmatpush.msrb.mxu3 %v741_v23  ;;  %v4684_v23 = vld [vmem:[%s8254_s0 + $0x190] sm:$0xff] }
 0x2ce   : > { %v2919_v2 = vpop.f32.mrf.mxu0 }
 0x2cf   : > { %v2920_v6 = vadd.f32 %v2919_v2, %v6941_v12  ;;  %v3030_v15 = vpop.f32.mrf.mxu3  ;;  %v705_v12 = vld [vmem:[%s5005_s29 + $0xa48] sm:$0xff]  ;;  %v738_v2 = vld [vmem:[%s5005_s29 + $0xb50] sm:$0xff] }
 0x2d0   : > { %v7087_v60 = vadd.f32 %v3030_v15, %v2993_v3  ;;  %v2957_v55 = vpop.f32.mrf.mxu1  ;;  %3582 = vmatpush.msrb.mxu2 %v705_v12  ;;  %3625 = vmatpush.msrb.mxu3 %v738_v2  ;;  %v591_v12 = vld [vmem:[%s5005_s29 + $0x6b8] sm:$0xff]  ;;  %v573_v2 = vld [vmem:[%s5005_s29 + $0x628] sm:$0xff] }
 0x2d1   : > { %3228 = vmatmul.f32.gmra.mxu0 %v4663_v8  ;;  %3304 = vmatmul.f32.gmra.mxu2 %v4664_v5  ;;  %v2958_v1 = vadd.f32 %v2957_v55, %v2920_v6  ;;  %v687_v6 = vld [vmem:[%s5005_s29 + $0x9b8] sm:$0xff]  ;;  %v642_v5 = vld [vmem:[%s5005_s29 + $0x850] sm:$0xff] }
 0x2d2   : > { %3583 = vmatpush.msrb.mxu2 %v702_v11  ;;  %3626 = vmatpush.msrb.mxu3 %v735_v14  ;;  %v732_v11 = vld [vmem:[%s5005_s29 + $0xb20] sm:$0xff] }
 0x2d3   : > { %3266 = vmatmul.f32.gmra.mxu1 %v4665_v32  ;;  %v4687_v14 = vld [vmem:[%s8254_s0 + $0x240] sm:$0xff] }
 0x2d4   : > { %3342 = vmatmul.f32.gmra.mxu3 %v4666_v21  ;;  %v2995_v22 = vpop.f32.mrf.mxu2  ;;  %3584 = vmatpush.msrb.mxu2 %v699_v16  ;;  %v4677_v21 = vld [vmem:[%s8254_s0 + $0x8] sm:$0xff] }
 0x2d5   : > { %v2996_v18 = vadd.f32 %v2995_v22, %v2958_v1  ;;  %v684_v1 = vld [vmem:[%s5005_s29 + $0x9a0] sm:$0xff]  ;;  %v4678_v22 = vld [vmem:[%s8254_s0 + $0x18] sm:$0xff]  ;;  %3627 = vmatpush.msrb.mxu3 %v732_v11 }
 0x2d6   : > { %v2922_v20 = vpop.f32.mrf.mxu0  ;;  %3585 = vmatpush.msrb.mxu2 %v696_v37  ;;  %v4682_v37 = vld [vmem:[%s8254_s0 + $0xd8] sm:$0xff] }
 0x2d7   : > { %v2923_v10 = vadd.f32 %v2922_v20, %v6966_v24  ;;  %v3033_v39 = vpop.f32.mrf.mxu3  ;;  %v654_v24 = vld [vmem:[%s5005_s29 + $0x8b0] sm:$0xff]  ;;  %v855_v11 = vld [vmem:[%s5005_s29 + $0xef8] sm:$0xff] }
 0x2d8   : > { %v7110_v61 = vadd.f32 %v3033_v39, %v2996_v18  ;;  %v2960_v19 = vpop.f32.mrf.mxu1  ;;  %3545 = vmatpush.msrb.mxu1 %v654_v24  ;;  %3586 = vmatpush.msrb.mxu2 %v693_v51  ;;  %v636_v39 = vld [vmem:[%s5005_s29 + $0x820] sm:$0xff]  ;;  %v729_v24 = vld [vmem:[%s5005_s29 + $0xb08] sm:$0xff] }
 0x2d9   : > { %3231 = vmatmul.f32.gmra.mxu0 %v4667_v13  ;;  %3307 = vmatmul.f32.gmra.mxu2 %v4668_v26  ;;  %v2961_v45 = vadd.f32 %v2960_v19, %v2923_v10  ;;  %v681_v10 = vld [vmem:[%s5005_s29 + $0x988] sm:$0xff] }
 0x2da   : > { %3546 = vmatpush.msrb.mxu1 %v651_v31  ;;  %3587 = vmatpush.msrb.mxu2 %v690_v57  ;;  %v585_v26 = vld [vmem:[%s5005_s29 + $0x688] sm:$0xff]  ;;  %v576_v57 = vld [vmem:[%s5005_s29 + $0x640] sm:$0xff] }
 0x2db   : > { %3269 = vmatmul.f32.gmra.mxu1 %v4669_v28  ;;  %3628 = vmatpush.msrb.mxu3 %v729_v24  ;;  %v582_v28 = vld [vmem:[%s5005_s29 + $0x670] sm:$0xff]  ;;  %v4681_v31 = vld [vmem:[%s8254_s0 + $0xc8] sm:$0xff] }
 0x2dc   : > { %3345 = vmatmul.f32.gmra.mxu3 %v4670_v52  ;;  %v2998_v40 = vpop.f32.mrf.mxu2  ;;  %3547 = vmatpush.msrb.mxu1 %v648_v43  ;;  %v726_v52 = vld [vmem:[%s5005_s29 + $0xaf0] sm:$0xff]  ;;  %v897_v24 = vld [vmem:[%s5005_s29 + $0x1048] sm:$0xff] }
 0x2dd   : > { %v2999_v34 = vadd.f32 %v2998_v40, %v2961_v45  ;;  %3588 = vmatpush.msrb.mxu2 %v687_v6  ;;  %v678_v45 = vld [vmem:[%s5005_s29 + $0x970] sm:$0xff]  ;;  %3629 = vmatpush.msrb.mxu3 %v726_v52  ;;  %v717_v6 = vld [vmem:[%s5005_s29 + $0xaa8] sm:$0xff] }
 0x2de   : > { %v2925_v38 = vpop.f32.mrf.mxu0  ;;  %3548 = vmatpush.msrb.mxu1 %v645_v49  ;;  %v4683_v49 = vld [vmem:[%s8254_s0 + $0x180] sm:$0xff] }
 0x2df   : > { %v2926_v48 = vadd.f32 %v2925_v38, %v6990_v41  ;;  %v3036_v46 = vpop.f32.mrf.mxu3  ;;  %v597_v41 = vld [vmem:[%s5005_s29 + $0x6e8] sm:$0xff]  ;;  %3589 = vmatpush.msrb.mxu2 %v684_v1  ;;  %v630_v38 = vld [vmem:[%s5005_s29 + $0x7f0] sm:$0xff] }
 0x2e0   : > { %v7135_v30 = vadd.f32 %v3036_v46, %v2999_v34  ;;  %v2963_v50 = vpop.f32.mrf.mxu1  ;;  %3510 = vmatpush.msrb.mxu0 %v597_v41  ;;  %3549 = vmatpush.msrb.mxu1 %v642_v5  ;;  %v723_v46 = vld [vmem:[%s5005_s29 + $0xad8] sm:$0xff]  ;;  %v672_v41 = vld [vmem:[%s5005_s29 + $0x940] sm:$0xff]  ;;  %v666_v5 = vld [vmem:[%s5005_s29 + $0x910] sm:$0xff] }
 0x2e1   : > { %3234 = vmatmul.f32.gmra.mxu0 %v4671_v53  ;;  %3310 = vmatmul.f32.gmra.mxu2 %v4672_v54  ;;  %v2964_v47 = vadd.f32 %v2963_v50, %v2926_v48  ;;  %v579_v48 = vld [vmem:[%s5005_s29 + $0x658] sm:$0xff]  ;;  %v618_v1 = vld [vmem:[%s5005_s29 + $0x790] sm:$0xff] }
 0x2e2   : > { %3511 = vmatpush.msrb.mxu0 %v594_v33  ;;  %3550 = vmatpush.msrb.mxu1 %v639_v7  ;;  %v627_v54 = vld [vmem:[%s5005_s29 + $0x7d8] sm:$0xff]  ;;  %v624_v33 = vld [vmem:[%s5005_s29 + $0x7c0] sm:$0xff]  ;;  %v714_v7 = vld [vmem:[%s5005_s29 + $0xa90] sm:$0xff] }
 0x2e3   : > { %3272 = vmatmul.f32.gmra.mxu1 %v4673_v59  ;;  %3590 = vmatpush.msrb.mxu2 %v681_v10  ;;  %v720_v59 = vld [vmem:[%s5005_s29 + $0xac0] sm:$0xff] }
 0x2e4   : > { %3348 = vmatmul.f32.gmra.mxu3 %v4674_v56  ;;  %v3001_v3 = vpop.f32.mrf.mxu2  ;;  %3512 = vmatpush.msrb.mxu0 %v591_v12  ;;  %v4685_v56 = vld [vmem:[%s8254_s0 + $0x188] sm:$0xff]  ;;  %v570_v12 = vld [vmem:[%s5005_s29 + $0x610] sm:$0xff] }
 0x2e5   : > { %v3002_v4 = vadd.f32 %v3001_v3, %v2964_v47  ;;  %3551 = vmatpush.msrb.mxu1 %v636_v39  ;;  %3591 = vmatpush.msrb.mxu2 %v678_v45  ;;  %v669_v47 = vld [vmem:[%s5005_s29 + $0x928] sm:$0xff]  ;;  %v4686_v3 = vld [vmem:[%s8254_s0 + $0x198] sm:$0xff] }
 0x2e6   : > { %v2928_v15 = vpop.f32.mrf.mxu0  ;;  %3513 = vmatpush.msrb.mxu0 %v588_v58  ;;  %3630 = vmatpush.msrb.mxu3 %v723_v46  ;;  %v951_v58 = vld [vmem:[%s5005_s29 + $0x11f8] sm:$0xff]  ;;  %v4693_v45 = vld [vmem:[%s8254_s0 + $0x308] sm:$0xff]  ;;  %v4695_v46 = vld [vmem:[%s8254_s0 + $0x3c0] sm:$0xff] }
 0x2e7   : > { %v2929_v55 = vadd.f32 %v2928_v15, %v7014_v0  ;;  %v3039_v42 = vpop.f32.mrf.mxu3  ;;  %v4676_v0 = vld [vmem:[%s8254_s0 + $0x10] sm:$0xff]  ;;  %3592 = vmatpush.msrb.mxu2 %v675_v36 }
 0x2e8   : > { %v7159_v63 = vadd.f32 %v3039_v42, %v3002_v4  ;;  %v2966_v8 = vpop.f32.mrf.mxu1  ;;  %3514 = vmatpush.msrb.mxu0 %v585_v26  ;;  %3631 = vmatpush.msrb.mxu3 %v720_v59  ;;  %v4692_v26 = vld [vmem:[%s8254_s0 + $0x310] sm:$0xff]  ;;  %v843_v59 = vld [vmem:[%s5005_s29 + $0xe98] sm:$0xff] }
 0x2e9   : > { %3368 = vmatmul.f32.vlgmr.msra.gmra.mxu0 %v4675_v17  ;;  %3444 = vmatmul.f32.vlgmr.msra.gmra.mxu2 %v4676_v0  ;;  %v2967_v32 = vadd.f32 %v2966_v8, %v2929_v55  ;;  %v621_v8 = vld [vmem:[%s5005_s29 + $0x7a8] sm:$0xff]  ;;  %v4688_v17 = vld [vmem:[%s8254_s0 + $0x250] sm:$0xff]  ;;  %v903_v0 = vld [vmem:[%s5005_s29 + $0x1078] sm:$0xff] }
 0x2ea   : > { %3515 = vmatpush.msrb.mxu0 %v582_v28  ;;  %3593 = vmatpush.msrb.mxu2 %v672_v41  ;;  %v4694_v28 = vld [vmem:[%s8254_s0 + $0x318] sm:$0xff] }
 0x2eb   : > { %3406 = vmatmul.f32.vlgmr.msra.gmra.mxu1 %v4677_v21  ;;  %3632 = vmatpush.msrb.mxu3 %v717_v6  ;;  %v4690_v21 = vld [vmem:[%s8254_s0 + $0x258] sm:$0xff] }
 0x2ec   : > { %3482 = vmatmul.f32.vlgmr.msra.gmra.mxu3 %v4678_v22  ;;  %v3004_v18 = vpop.f32.mrf.mxu2  ;;  %3516 = vmatpush.msrb.mxu0 %v579_v48  ;;  %v891_v48 = vld [vmem:[%s5005_s29 + $0x1018] sm:$0xff] }
 0x2ed   : > { %v3005_v20 = vadd.f32 %v3004_v18, %v2967_v32  ;;  %3594 = vmatpush.msrb.mxu2 %v669_v47  ;;  %v4689_v32 = vld [vmem:[%s8254_s0 + $0x248] sm:$0xff]  ;;  %v807_v18 = vld [vmem:[%s5005_s29 + $0xd78] sm:$0xff]  ;;  %3633 = vmatpush.msrb.mxu3 %v714_v7 }
 0x2ee   : > { %v2931_v19 = vpop.f32.mrf.mxu0  ;;  %3517 = vmatpush.msrb.mxu0 %v576_v57  ;;  %v795_v41 = vld [vmem:[%s5005_s29 + $0xd18] sm:$0xff]  ;;  %v885_v7 = vld [vmem:[%s5005_s29 + $0xfe8] sm:$0xff] }
 0x2ef   : > { %v2932_v9 = vadd.f32 %v2931_v19, %v7039_v44  ;;  %v3042_v25 = vpop.f32.mrf.mxu3  ;;  %v633_v44 = vld [vmem:[%s5005_s29 + $0x808] sm:$0xff]  ;;  %3595 = vmatpush.msrb.mxu2 %v666_v5  ;;  %3770 = vmatpush.msra.mxu3 %v951_v58  ;;  %v4698_v57 = vld [vmem:[%s8254_s0 + $0x3d8] sm:$0xff]  ;;  %v4699_v5 = vld [vmem:[%s8254_s0 + $0x480] sm:$0x1] }
 0x2f0   : > { %v7183_v16 = vadd.f32 %v3042_v25, %v3005_v20  ;;  %v2969_v13 = vpop.f32.mrf.mxu1  ;;  %3552 = vmatpush.msrb.mxu1 %v633_v44  ;;  %3518 = vmatpush.msrb.mxu0 %v573_v2  ;;  %v900_v20 = vld [vmem:[%s5005_s29 + $0x1060] sm:$0xff]  ;;  %v945_v44 = vld [vmem:[%s5005_s29 + $0x11c8] sm:$0xff]  ;;  %v882_v58 = vld [vmem:[%s5005_s29 + $0xfd0] sm:$0xff] }
 0x2f1   : > { %3371 = vmatmul.f32.gmra.mxu0 %v4679_v29  ;;  %3447 = vmatmul.f32.gmra.mxu2 %v4680_v35  ;;  %v2970_v40 = vadd.f32 %v2969_v13, %v2932_v9  ;;  %v804_v9 = vld [vmem:[%s5005_s29 + $0xd60] sm:$0xff]  ;;  %v801_v35 = vld [vmem:[%s5005_s29 + $0xd48] sm:$0xff] }
 0x2f2   : > { %3553 = vmatpush.msrb.mxu1 %v630_v38  ;;  %3519 = vmatpush.msrb.mxu0 %v570_v12  ;;  %v948_v25 = vld [vmem:[%s5005_s29 + $0x11e0] sm:$0xff]  ;;  %v942_v38 = vld [vmem:[%s5005_s29 + $0x11b0] sm:$0xff] }
 0x2f3   : > { %3409 = vmatmul.f32.gmra.mxu1 %v4681_v31  ;;  %3732 = vmatpush.msra.mxu2 %v903_v0  ;;  %v4691_v13 = vld [vmem:[%s8254_s0 + $0x300] sm:$0xff]  ;;  %v894_v31 = vld [vmem:[%s5005_s29 + $0x1030] sm:$0xff] }
 0x2f4   : > { %3485 = vmatmul.f32.gmra.mxu3 %v4682_v37  ;;  %v3007_v34 = vpop.f32.mrf.mxu2  ;;  %3554 = vmatpush.msrb.mxu1 %v627_v54  ;;  %v852_v29 = vld [vmem:[%s5005_s29 + $0xee0] sm:$0xff]  ;;  %v846_v54 = vld [vmem:[%s5005_s29 + $0xeb0] sm:$0xff] }
 0x2f5   : > { %v3008_v62 = vadd.f32 %v3007_v34, %v2970_v40  ;;  %3656 = vmatpush.msra.mxu0 %v807_v18  ;;  %3733 = vmatpush.msra.mxu2 %v900_v20  ;;  %v849_v40 = vld [vmem:[%s5005_s29 + $0xec8] sm:$0xff]  ;;  %v4700_v12 = vld [vmem:[%s8254_s0 + $0x490] sm:$0x1] }
 0x2f6   : > { %v7207_v50 = vpop.f32.mrf.mxu0  ;;  %3555 = vmatpush.msrb.mxu1 %v624_v33  ;;  %3771 = vmatpush.msra.mxu3 %v948_v25  ;;  %v936_v33 = vld [vmem:[%s5005_s29 + $0x1180] sm:$0xff]  ;;  %v837_v18 = vld [vmem:[%s5005_s29 + $0xe68] sm:$0xff]  ;;  %v786_v20 = vld [vmem:[%s5005_s29 + $0xcd0] sm:$0xff] }
 0x2f7   : > { %v3045_v51 = vpop.f32.mrf.mxu3  ;;  %3657 = vmatpush.msra.mxu0 %v804_v9  ;;  %3734 = vmatpush.msra.mxu2 %v897_v24  ;;  %v930_v9 = vld [vmem:[%s5005_s29 + $0x1150] sm:$0xff]  ;;  %v4703_v24 = vld [vmem:[%s8254_s0 + $0x20] sm:$0xff] }
 0x2f8   : > { %v7209_v43 = vadd.f32 %v3045_v51, %v3008_v62  ;;  %v7211_v53 = vpop.f32.mrf.mxu1  ;;  %3556 = vmatpush.msrb.mxu1 %v621_v8  ;;  %3772 = vmatpush.msra.mxu3 %v945_v44  ;;  %v798_v62 = vld [vmem:[%s5005_s29 + $0xd30] sm:$0xff]  ;;  %v4705_v44 = vld [vmem:[%s8254_s0 + $0x28] sm:$0xff] }
 0x2f9   : > { %3374 = vmatmul.f32.gmra.mxu0 %v4683_v49  ;;  %3450 = vmatmul.f32.gmra.mxu2 %v4684_v23  ;;  %v4696_v51 = vld [vmem:[%s8254_s0 + $0x3d0] sm:$0xff]  ;;  %v939_v49 = vld [vmem:[%s5005_s29 + $0x1198] sm:$0xff]  ;;  %v4697_v23 = vld [vmem:[%s8254_s0 + $0x3c8] sm:$0xff] }
 0x2fa   : > { %3557 = vmatpush.msrb.mxu1 %v618_v1  ;;  %3658 = vmatpush.msra.mxu0 %v801_v35  ;;  %v840_v1 = vld [vmem:[%s5005_s29 + $0xe80] sm:$0xff]  ;;  %v3066_v35 = vadd.f32 %v7207_v50, %v7062_v27  ;;  %v831_v27 = vld [vmem:[%s5005_s29 + $0xe38] sm:$0xff] }
 0x2fb   : > { %3412 = vmatmul.f32.gmra.mxu1 %v4685_v56  ;;  %3735 = vmatpush.msra.mxu2 %v894_v31  ;;  %v888_v56 = vld [vmem:[%s5005_s29 + $0x1000] sm:$0xff]  ;;  %v783_v31 = vld [vmem:[%s5005_s29 + $0xcb8] sm:$0xff] }
 0x2fc   : > { %3488 = vmatmul.f32.gmra.mxu3 %v4686_v3  ;;  %v7230_v4 = vpop.f32.mrf.mxu2  ;;  %3694 = vmatpush.msra.mxu1 %v855_v11  ;;  %v792_v3 = vld [vmem:[%s5005_s29 + $0xd00] sm:$0xff] }
 0x2fd   : > { %3659 = vmatpush.msra.mxu0 %v798_v62  ;;  %3773 = vmatpush.msra.mxu3 %v942_v38  ;;  %v927_v62 = vld [vmem:[%s5005_s29 + $0x1138] sm:$0xff]  ;;  %v876_v50 = vld [vmem:[%s5005_s29 + $0xfa0] sm:$0xff] }
 0x2fe   : > { %v7235_v15 = vpop.f32.mrf.mxu0  ;;  %3695 = vmatpush.msra.mxu1 %v852_v29  ;;  %3736 = vmatpush.msra.mxu2 %v891_v48  ;;  %v4704_v29 = vld [vmem:[%s8254_s0 + $0x30] sm:$0xff]  ;;  %v780_v38 = vld [vmem:[%s5005_s29 + $0xca0] sm:$0xff] }
 0x2ff   : > { %v7237_v55 = vpop.f32.mrf.mxu3  ;;  %3660 = vmatpush.msra.mxu0 %v795_v41  ;;  %3774 = vmatpush.msra.mxu3 %v939_v49  ;;  %v828_v49 = vld [vmem:[%s5005_s29 + $0xe20] sm:$0xff] }
 0x300   : > { %v7239_v42 = vpop.f32.mrf.mxu1  ;;  %3696 = vmatpush.msra.mxu1 %v849_v40  ;;  %3737 = vmatpush.msra.mxu2 %v888_v56  ;;  %v834_v40 = vld [vmem:[%s5005_s29 + $0xe50] sm:$0xff]  ;;  %v3069_v56 = vadd.f32 %v7235_v15, %v7087_v60 }
 0x301   : > { %3377 = vmatmul.f32.gmra.mxu0 %v4687_v14  ;;  %3453 = vmatmul.f32.gmra.mxu2 %v4688_v17  ;;  %v4701_v14 = vld [vmem:[%s8254_s0 + $0x488] sm:$0x1]  ;;  %v4702_v17 = vld [vmem:[%s8254_s0 + $0x498] sm:$0x1]  ;;  %v870_v60 = vld [vmem:[%s5005_s29 + $0xf70] sm:$0xff] }
 0x302   : > { %3697 = vmatpush.msra.mxu1 %v846_v54  ;;  %3661 = vmatpush.msra.mxu0 %v792_v3  ;;  %v3104_v54 = vadd.f32 %v7211_v53, %v3066_v35  ;;  %v4708_v53 = vld [vmem:[%s8254_s0 + $0xf0] sm:$0xff]  ;;  %v4710_v3 = vld [vmem:[%s8254_s0 + $0xf8] sm:$0xff] }
 0x303   : > { %3415 = vmatmul.f32.gmra.mxu1 %v4689_v32  ;;  %3775 = vmatpush.msra.mxu3 %v936_v33  ;;  %v789_v32 = vld [vmem:[%s5005_s29 + $0xce8] sm:$0xff]  ;;  %v774_v15 = vld [vmem:[%s5005_s29 + $0xc70] sm:$0xff] }
 0x304   : > { %3491 = vmatmul.f32.gmra.mxu3 %v4690_v21  ;;  %v7259_v22 = vpop.f32.mrf.mxu2  ;;  %3698 = vmatpush.msra.mxu1 %v843_v59  ;;  %v933_v21 = vld [vmem:[%s5005_s29 + $0x1168] sm:$0xff]  ;;  %v4707_v59 = vld [vmem:[%s8254_s0 + $0xe0] sm:$0xff] }
 0x305   : > { %3738 = vmatpush.msra.mxu2 %v885_v7  ;;  %3662 = vmatpush.msra.mxu0 %v789_v32  ;;  %v918_v7 = vld [vmem:[%s5005_s29 + $0x10f0] sm:$0xff]  ;;  %v867_v32 = vld [vmem:[%s5005_s29 + $0xf58] sm:$0xff] }
 0x306   : > { %v7265_v10 = vpop.f32.mrf.mxu0  ;;  %3699 = vmatpush.msra.mxu1 %v840_v1  ;;  %3776 = vmatpush.msra.mxu3 %v933_v21  ;;  %v822_v21 = vld [vmem:[%s5005_s29 + $0xdf0] sm:$0xff] }
 0x307   : > { %v7267_v39 = vpop.f32.mrf.mxu3  ;;  %3739 = vmatpush.msra.mxu2 %v882_v58  ;;  %3663 = vmatpush.msra.mxu0 %v786_v20  ;;  %v3072_v35 = vadd.f32 %v7265_v10, %v7110_v61 }
 0x308   : > { %v7269_v19 = vpop.f32.mrf.mxu1  ;;  %3700 = vmatpush.msra.mxu1 %v837_v18  ;;  %3777 = vmatpush.msra.mxu3 %v930_v9  ;;  %v3107_v18 = vadd.f32 %v7239_v42, %v3069_v56  ;;  %v915_v9 = vld [vmem:[%s5005_s29 + $0x10d8] sm:$0xff]  ;;  %v4712_v42 = vld [vmem:[%s8254_s0 + $0x1b0] sm:$0xff] }
 0x309   : > { %3380 = vmatmul.f32.gmra.mxu0 %v4691_v13  ;;  %3456 = vmatmul.f32.gmra.mxu2 %v4692_v26  ;;  %v879_v13 = vld [vmem:[%s5005_s29 + $0xfb8] sm:$0xff] }
 0x30a   : > { %3740 = vmatpush.msra.mxu2 %v879_v13  ;;  %3701 = vmatpush.msra.mxu1 %v834_v40 }
 0x30b   : > { %3418 = vmatmul.f32.gmra.mxu1 %v4693_v45  ;;  %v4706_v45 = vld [vmem:[%s8254_s0 + $0x38] sm:$0xff]  ;;  %3664 = vmatpush.msra.mxu0 %v783_v31 }
 0x30c   : > { %3494 = vmatmul.f32.gmra.mxu3 %v4694_v28  ;;  %v7289_v52 = vpop.f32.mrf.mxu2  ;;  %3741 = vmatpush.msra.mxu2 %v876_v50  ;;  %v819_v31 = vld [vmem:[%s5005_s29 + $0xdd8] sm:$0xff]  ;;  %v912_v50 = vld [vmem:[%s5005_s29 + $0x10c0] sm:$0xff] }
 0x30d   : > { %3778 = vmatpush.msra.mxu3 %v927_v62  ;;  %3702 = vmatpush.msra.mxu1 %v831_v27  ;;  %v864_v62 = vld [vmem:[%s5005_s29 + $0xf40] sm:$0xff] }
 0x30e   : > { %v7293_v37 = vpop.f32.mrf.mxu0  ;;  %3665 = vmatpush.msra.mxu0 %v780_v38  ;;  %v768_v27 = vld [vmem:[%s5005_s29 + $0xc40] sm:$0xff]  ;;  %v861_v38 = vld [vmem:[%s5005_s29 + $0xf28] sm:$0xff] }
 0x30f   : > { %v7295_v34 = vpop.f32.mrf.mxu3  ;;  %3703 = vmatpush.msra.mxu1 %v828_v49 }
 0x310   : > { %v7297_v36 = vpop.f32.mrf.mxu1 }
 0x311   : > { %3383 = vmatmul.f32.gmra.mxu0 %v4695_v46  ;;  %3459 = vmatmul.f32.gmra.mxu2 %v4696_v51  ;;  %v924_v46 = vld [vmem:[%s5005_s29 + $0x1120] sm:$0xff]  ;;  %v873_v51 = vld [vmem:[%s5005_s29 + $0xf88] sm:$0xff] }
 0x312   : > { %3779 = vmatpush.msra.mxu3 %v924_v46  ;;  %3742 = vmatpush.msra.mxu2 %v873_v51  ;;  %v816_v46 = vld [vmem:[%s5005_s29 + $0xdc0] sm:$0xff] }
 0x313   : > { %3421 = vmatmul.f32.gmra.mxu1 %v4697_v23 }
 0x314   : > { %3497 = vmatmul.f32.gmra.mxu3 %v4698_v57  ;;  %v7317_v47 = vpop.f32.mrf.mxu2  ;;  %v3142_v57 = vadd.f32 %v7230_v4, %v3104_v54  ;;  %v4709_v4 = vld [vmem:[%s8254_s0 + $0xe8] sm:$0xff]  ;;  %3743 = vmatpush.msra.mxu2 %v870_v60  ;;  %v4715_v54 = vld [vmem:[%s6341_s18] sm:$0x7]  ;;  %v4717_v60 = vld [vmem:[%s8254_s0 + $0x270] sm:$0xff] }
 0x315   : > { %v7444_v49 = vperm.slane %v4715_v54, 1  ;;  %v1044_v54 = vld [vmem:[%s5005_s29 + $0x14e0] sm:$0xff] }
 0x316   : > { %v7323_v2 = vpop.f32.mrf.mxu0  ;;  %3744 = vmatpush.msra.mxu2 %v867_v32 }
 0x317   : > { %v7325_v6 = vpop.f32.mrf.mxu3 }
 0x318   : > { %v7327_v8 = vpop.f32.mrf.mxu1  ;;  %3745 = vmatpush.msra.mxu2 %v864_v62 }
 0x319   : > { %3386 = vmatmul.f32.gmra.mxu0 %v4699_v5  ;;  %3462 = vmatmul.f32.gmra.mxu2 %v4700_v12  ;;  %v777_v5 = vld [vmem:[%s5005_s29 + $0xc88] sm:$0xff] }
 0x31a   : > { %v921_v12 = vld [vmem:[%s5005_s29 + $0x1108] sm:$0xff]  ;;  %3666 = vmatpush.msra.mxu0 %v777_v5  ;;  %3746 = vmatpush.msra.mxu2 %v861_v38  ;;  %v996_v38 = vld [vmem:[%s5005_s29 + $0x1360] sm:$0xff] }
 0x31b   : > { %3424 = vmatmul.f32.gmra.mxu1 %v4701_v14  ;;  %v825_v14 = vld [vmem:[%s5005_s29 + $0xe08] sm:$0xff]  ;;  %3780 = vmatpush.msra.mxu3 %v921_v12  ;;  %v858_v12 = vld [vmem:[%s5005_s29 + $0xf10] sm:$0xff] }
 0x31c   : > { %3500 = vmatmul.f32.gmra.mxu3 %v4702_v17  ;;  %v7341_v0 = vpop.f32.mrf.mxu2  ;;  %v3180_v17 = vadd.f32 %v7237_v55, %v3142_v57  ;;  %3704 = vmatpush.msra.mxu1 %v825_v14  ;;  %v771_v55 = vld [vmem:[%s5005_s29 + $0xc58] sm:$0xff]  ;;  %v765_v57 = vld [vmem:[%s5005_s29 + $0xc28] sm:$0xff]  ;;  %v762_v14 = vld [vmem:[%s5005_s29 + $0xc10] sm:$0xff] }
 0x31d   : > { %3667 = vmatpush.msra.mxu0 %v774_v15  ;;  %3781 = vmatpush.msra.mxu3 %v918_v7  ;;  %v813_v5 = vld [vmem:[%s5005_s29 + $0xda8] sm:$0xff]  ;;  %v906_v7 = vld [vmem:[%s5005_s29 + $0x1090] sm:$0xff] }
 0x31e   : > { %v7349_v11 = vpop.f32.mrf.mxu0  ;;  %3705 = vmatpush.msra.mxu1 %v822_v21  ;;  %3747 = vmatpush.msra.mxu2 %v858_v12  ;;  %v4718_v21 = vld [vmem:[%s8254_s0 + $0x268] sm:$0xff] }
 0x31f   : > { %v7353_v25 = vpop.f32.mrf.mxu3  ;;  %3668 = vmatpush.msra.mxu0 %v771_v55  ;;  %3782 = vmatpush.msra.mxu3 %v915_v9  ;;  %v1095_v55 = vld [vmem:[%s5005_s29 + $0x1678] sm:$0xff] }
 0x320   : > { %v7356_v26 = vpop.f32.mrf.mxu1  ;;  %3706 = vmatpush.msra.mxu1 %v819_v31  ;;  %v999_v9 = vld [vmem:[%s5005_s29 + $0x1378] sm:$0xff]  ;;  %v4720_v31 = vld [vmem:[%s8254_s0 + $0x320] sm:$0xff] }
 0x321   : > { %3520 = vmatmul.f32.vlgmr.msrb.gmra.mxu0 %v4703_v24  ;;  %3596 = vmatmul.f32.vlgmr.msrb.gmra.mxu2 %v4704_v29  ;;  %v3145_v24 = vadd.f32 %v7259_v22, %v3107_v18  ;;  %v4711_v29 = vld [vmem:[%s8254_s0 + $0x1a0] sm:$0xff]  ;;  %v4719_v18 = vld [vmem:[%s8254_s0 + $0x278] sm:$0xff] }
 0x322   : > { %3669 = vmatpush.msra.mxu0 %v768_v27  ;;  %3783 = vmatpush.msra.mxu3 %v912_v50  ;;  %v3078_v27 = vadd.f32 %v7323_v2, %v7159_v63  ;;  %v1089_v63 = vld [vmem:[%s5005_s29 + $0x1648] sm:$0xff] }
 0x323   : > { %3558 = vmatmul.f32.vlgmr.msrb.gmra.mxu1 %v4705_v44  ;;  %v4713_v44 = vld [vmem:[%s8254_s0 + $0x1a8] sm:$0xff]  ;;  %v3183_v61 = vadd.f32 %v7267_v39, %v3145_v24  ;;  %3884 = vmatpush.msrb.mxu2 %v1095_v55  ;;  %v1047_v24 = vld [vmem:[%s5005_s29 + $0x14f8] sm:$0xff] }
 0x324   : > { %3634 = vmatmul.f32.vlgmr.msrb.gmra.mxu3 %v4706_v45  ;;  %v7372_v28 = vpop.f32.mrf.mxu2  ;;  %v4714_v45 = vld [vmem:[%s8254_s0 + $0x1b8] sm:$0xff]  ;;  %3707 = vmatpush.msra.mxu1 %v816_v46  ;;  %v1140_v46 = vld [vmem:[%s5005_s29 + $0x17e0] sm:$0xff] }
 0x325   : > { %3670 = vmatpush.msra.mxu0 %v765_v57  ;;  %v993_v57 = vld [vmem:[%s5005_s29 + $0x1348] sm:$0xff]  ;;  %v1131_v55 = vld [vmem:[%s5005_s29 + $0x1798] sm:$0xff] }
 0x326   : > { %v7380_v48 = vpop.f32.mrf.mxu0  ;;  %3708 = vmatpush.msra.mxu1 %v813_v5 }
 0x327   : > { %v7385_v41 = vpop.f32.mrf.mxu3  ;;  %3671 = vmatpush.msra.mxu0 %v762_v14 }
 0x328   : > { %v7388_v23 = vpop.f32.mrf.mxu1 }
 0x329   : > { %3523 = vmatmul.f32.gmra.mxu0 %v4707_v59  ;;  %3599 = vmatmul.f32.gmra.mxu2 %v4708_v53  ;;  %v909_v59 = vld [vmem:[%s5005_s29 + $0x10a8] sm:$0xff]  ;;  %v3110_v53 = vadd.f32 %v7269_v19, %v3072_v35  ;;  %v4716_v19 = vld [vmem:[%s8254_s0 + $0x260] sm:$0xff] }
 0x32a   : > { %3784 = vmatpush.msra.mxu3 %v909_v59  ;;  %3808 = vmatpush.msrb.mxu0 %v999_v9  ;;  %v1137_v59 = vld [vmem:[%s5005_s29 + $0x17c8] sm:$0xff] }
 0x32b   : > { %3561 = vmatmul.f32.gmra.mxu1 %v4709_v4 }
 0x32c   : > { %3637 = vmatmul.f32.gmra.mxu3 %v4710_v3  ;;  %v7405_v33 = vpop.f32.mrf.mxu2  ;;  %3809 = vmatpush.msrb.mxu0 %v996_v38 }
 0x32d   : > { %3785 = vmatpush.msra.mxu3 %v906_v7  ;;  %v4727_v7 = vld [vmem:[%s8254_s0 + $0x3f8] sm:$0xff] }
 0x32e   : > { %v3217_v1 = vpop.f32.mrf.mxu0  ;;  %3810 = vmatpush.msrb.mxu0 %v993_v57 }
 0x32f   : > { %v7417_v58 = vpop.f32.mrf.mxu3  ;;  %v3218_v20 = vadd.f32 %v3217_v1, %v3180_v17  ;;  %v3148_v17 = vadd.f32 %v7289_v52, %v3110_v53  ;;  %v810_v1 = vld [vmem:[%s5005_s29 + $0xd90] sm:$0xff]  ;;  %v3075_v52 = vadd.f32 %v7293_v37, %v7135_v30  ;;  %v1143_v30 = vld [vmem:[%s5005_s29 + $0x17f8] sm:$0xff] }
 0x330   : > { %v3255_v13 = vpop.f32.mrf.mxu1  ;;  %3709 = vmatpush.msra.mxu1 %v810_v1  ;;  %3922 = vmatpush.msrb.mxu3 %v1143_v30  ;;  %v1035_v30 = vld [vmem:[%s5005_s29 + $0x1498] sm:$0xff] }
 0x331   : > { %3526 = vmatmul.f32.gmra.mxu0 %v4711_v29  ;;  %3602 = vmatmul.f32.gmra.mxu2 %v4712_v42  ;;  %v3256_v22 = vadd.f32 %v3255_v13, %v3218_v20  ;;  %v3186_v37 = vadd.f32 %v7295_v34, %v3148_v17  ;;  %v1092_v29 = vld [vmem:[%s5005_s29 + $0x1660] sm:$0xff]  ;;  %v3113_v35 = vadd.f32 %v7297_v36, %v3075_v52  ;;  %v4721_v36 = vld [vmem:[%s8254_s0 + $0x330] sm:$0xff] }
 0x332   : > { %3846 = vmatpush.msrb.mxu1 %v1047_v24  ;;  %3885 = vmatpush.msrb.mxu2 %v1092_v29  ;;  %v4724_v17 = vld [vmem:[%s8254_s0 + $0x3e0] sm:$0xff]  ;;  %v990_v52 = vld [vmem:[%s5005_s29 + $0x1330] sm:$0xff] }
 0x333   : > { %3564 = vmatmul.f32.gmra.mxu1 %v4713_v44  ;;  %v3151_v34 = vadd.f32 %v7317_v47, %v3113_v35  ;;  %v4722_v47 = vld [vmem:[%s8254_s0 + $0x328] sm:$0xff]  ;;  %3923 = vmatpush.msrb.mxu3 %v1140_v46  ;;  %v978_v46 = vld [vmem:[%s5005_s29 + $0x12d0] sm:$0xff] }
 0x334   : > { %3640 = vmatmul.f32.gmra.mxu3 %v4714_v45  ;;  %v3293_v40 = vpop.f32.mrf.mxu2  ;;  %3886 = vmatpush.msrb.mxu2 %v1089_v63  ;;  %v1122_v63 = vld [vmem:[%s5005_s29 + $0x1750] sm:$0xff] }
 0x335   : > { %v3294_v10 = vadd.f32 %v3293_v40, %v3256_v22  ;;  %v3189_v2 = vadd.f32 %v7325_v6, %v3151_v34  ;;  %3847 = vmatpush.msrb.mxu1 %v1044_v54  ;;  %3924 = vmatpush.msrb.mxu3 %v1137_v59  ;;  %v1032_v34 = vld [vmem:[%s5005_s29 + $0x1480] sm:$0xff] }
 0x336   : > { %v3220_v51 = vpop.f32.mrf.mxu0  ;;  %3811 = vmatpush.msrb.mxu0 %v990_v52  ;;  %v1020_v52 = vld [vmem:[%s5005_s29 + $0x1420] sm:$0xff] }
 0x337   : > { %v3221_v39 = vadd.f32 %v3220_v51, %v3183_v61  ;;  %v3331_v56 = vpop.f32.mrf.mxu3 }
 0x338   : > { %v3332_v4 = vadd.f32 %v3331_v56, %v3294_v10  ;;  %v3258_v3 = vpop.f32.mrf.mxu1  ;;  %v4723_v10 = vld [vmem:[%s8254_s0 + $0x338] sm:$0xff]  ;;  %v1086_v56 = vld [vmem:[%s5005_s29 + $0x1630] sm:$0xff] }
 0x339   : > { %3529 = vmatmul.f32.gmra.mxu0 %v4716_v19  ;;  %3605 = vmatmul.f32.gmra.mxu2 %v4717_v60  ;;  %v3259_v32 = vadd.f32 %v3258_v3, %v3221_v39  ;;  %v1041_v39 = vld [vmem:[%s5005_s29 + $0x14c8] sm:$0xff]  ;;  %v3081_v60 = vadd.f32 %v7349_v11, %v7183_v16  ;;  %v1083_v16 = vld [vmem:[%s5005_s29 + $0x1618] sm:$0xff] }
 0x33a   : > { %v4273_v15 = vadd.f32 %v7444_v49, %v3332_v4  ;;  %v3116_v4 = vadd.f32 %v7327_v8, %v3078_v27  ;;  %3848 = vmatpush.msrb.mxu1 %v1041_v39  ;;  %3887 = vmatpush.msrb.mxu2 %v1086_v56  ;;  %v4725_v8 = vld [vmem:[%s8254_s0 + $0x3f0] sm:$0xff]  ;;  %v975_v56 = vld [vmem:[%s5005_s29 + $0x12b8] sm:$0xff] }
 0x33b   : > { %3567 = vmatmul.f32.gmra.mxu1 %v4718_v21  ;;  %v1026_v39 = vld [vmem:[%s5005_s29 + $0x1450] sm:$0xff] }
 0x33c   : > { %4294 = vst [vmem:[%s6392_s10 + $0x8] sm:$0xff] %v4273_v15  ;;  %3643 = vmatmul.f32.gmra.mxu3 %v4719_v18  ;;  %v3296_v20 = vpop.f32.mrf.mxu2  ;;  %v3154_v14 = vadd.f32 %v7341_v0, %v3116_v4  ;;  %v4726_v0 = vld [vmem:[%s8254_s0 + $0x3e8] sm:$0xff]  ;;  %v1038_v18 = vld [vmem:[%s5005_s29 + $0x14b0] sm:$0xff]  ;;  %3888 = vmatpush.msrb.mxu2 %v1083_v16  ;;  %v1119_v4 = vld [vmem:[%s5005_s29 + $0x1738] sm:$0xff] }
 0x33d   : > { %v3297_v13 = vadd.f32 %v3296_v20, %v3259_v32  ;;  %v1134_v32 = vld [vmem:[%s5005_s29 + $0x17b0] sm:$0xff]  ;;  %v987_v20 = vld [vmem:[%s5005_s29 + $0x1318] sm:$0xff]  ;;  %3849 = vmatpush.msrb.mxu1 %v1038_v18 }
 0x33e   : > { %v3223_v42 = vpop.f32.mrf.mxu0  ;;  %v3192_v11 = vadd.f32 %v7353_v25, %v3154_v14  ;;  %3925 = vmatpush.msrb.mxu3 %v1134_v32  ;;  %3812 = vmatpush.msrb.mxu0 %v987_v20  ;;  %v984_v25 = vld [vmem:[%s5005_s29 + $0x1300] sm:$0xff]  ;;  %v969_v20 = vld [vmem:[%s5005_s29 + $0x1288] sm:$0xff] }
 0x33f   : > { %v3224_v22 = vadd.f32 %v3223_v42, %v3186_v37  ;;  %v3334_v44 = vpop.f32.mrf.mxu3  ;;  %v1080_v37 = vld [vmem:[%s5005_s29 + $0x1600] sm:$0xff]  ;;  %3850 = vmatpush.msrb.mxu1 %v1035_v30  ;;  %v1017_v30 = vld [vmem:[%s5005_s29 + $0x1408] sm:$0xff] }
 0x340   : > { %v3335_v45 = vadd.f32 %v3334_v44, %v3297_v13  ;;  %v3261_v40 = vpop.f32.mrf.mxu1  ;;  %v3119_v13 = vadd.f32 %v7356_v26, %v3081_v60  ;;  %3926 = vmatpush.msrb.mxu3 %v1131_v55  ;;  %v1128_v42 = vld [vmem:[%s5005_s29 + $0x1780] sm:$0xff]  ;;  %3889 = vmatpush.msrb.mxu2 %v1080_v37  ;;  %v1077_v44 = vld [vmem:[%s5005_s29 + $0x15e8] sm:$0xff]  ;;  %v1062_v37 = vld [vmem:[%s5005_s29 + $0x1570] sm:$0xff] }
 0x341   : > { %3532 = vmatmul.f32.gmra.mxu0 %v4720_v31  ;;  %3608 = vmatmul.f32.gmra.mxu2 %v4721_v36  ;;  %v3262_v61 = vadd.f32 %v3261_v40, %v3224_v22  ;;  %v4728_v26 = vld [vmem:[%s8254_s0 + $0x4a0] sm:$0x1]  ;;  %v4729_v40 = vld [vmem:[%s8254_s0 + $0x4b0] sm:$0x1]  ;;  %v981_v36 = vld [vmem:[%s5005_s29 + $0x12e8] sm:$0xff] }
 0x342   : > { %v4276_v62 = vadd.f32 %v7444_v49, %v3335_v45  ;;  %v3157_v45 = vadd.f32 %v7372_v28, %v3119_v13  ;;  %3813 = vmatpush.msrb.mxu0 %v984_v25  ;;  %3927 = vmatpush.msrb.mxu3 %v1128_v42  ;;  %v1125_v28 = vld [vmem:[%s5005_s29 + $0x1768] sm:$0xff]  ;;  %v1068_v14 = vld [vmem:[%s5005_s29 + $0x15a0] sm:$0xff] }
 0x343   : > { %3570 = vmatmul.f32.gmra.mxu1 %v4722_v47  ;;  %3890 = vmatpush.msrb.mxu2 %v1077_v44  ;;  %v1029_v47 = vld [vmem:[%s5005_s29 + $0x1468] sm:$0xff]  ;;  %v972_v60 = vld [vmem:[%s5005_s29 + $0x12a0] sm:$0xff]  ;;  %v1059_v44 = vld [vmem:[%s5005_s29 + $0x1558] sm:$0xff] }
 0x344   : > { %4297 = vst [vmem:[%s6392_s10 + $0x20] sm:$0xff] %v4276_v62  ;;  %3646 = vmatmul.f32.gmra.mxu3 %v4723_v10  ;;  %v3299_v50 = vpop.f32.mrf.mxu2  ;;  %v3084_v62 = vadd.f32 %v7380_v48, %v7209_v43  ;;  %v1074_v10 = vld [vmem:[%s5005_s29 + $0x15d0] sm:$0xff]  ;;  %3851 = vmatpush.msrb.mxu1 %v1032_v34  ;;  %v3195_v43 = vadd.f32 %v7385_v41, %v3157_v45  ;;  %v1113_v55 = vld [vmem:[%s5005_s29 + $0x1708] sm:$0xff]  ;;  %v1107_v34 = vld [vmem:[%s5005_s29 + $0x16d8] sm:$0xff] }
 0x345   : > { %v3300_v51 = vadd.f32 %v3299_v50, %v3262_v61  ;;  %v4730_v61 = vld [vmem:[%s8254_s0 + $0x4a8] sm:$0x1]  ;;  %v4731_v50 = vld [vmem:[%s8254_s0 + $0x4b8] sm:$0x1]  ;;  %3814 = vmatpush.msrb.mxu0 %v981_v36  ;;  %3928 = vmatpush.msrb.mxu3 %v1125_v28 }
 0x346   : > { %v3226_v53 = vpop.f32.mrf.mxu0  ;;  %3852 = vmatpush.msrb.mxu1 %v1029_v47  ;;  %3891 = vmatpush.msrb.mxu2 %v1074_v10  ;;  %v3122_v54 = vadd.f32 %v7388_v23, %v3084_v62  ;;  %v4733_v23 = vld [vmem:[%s8254_s0 + $0x50] sm:$0xff]  ;;  %v4738_v42 = vld [vmem:[%s8254_s0 + $0x108] sm:$0xff]  ;;  %v4740_v47 = vld [vmem:[%s8254_s0 + $0x1c0] sm:$0xff] }
 0x347   : > { %v3227_v3 = vadd.f32 %v3226_v53, %v3189_v2  ;;  %v3337_v5 = vpop.f32.mrf.mxu3  ;;  %v1071_v2 = vld [vmem:[%s5005_s29 + $0x15b8] sm:$0xff]  ;;  %3815 = vmatpush.msrb.mxu0 %v978_v46  ;;  %3929 = vmatpush.msrb.mxu3 %v1122_v63  ;;  %v4741_v10 = vld [vmem:[%s8254_s0 + $0x1d0] sm:$0xff]  ;;  %v4742_v63 = vld [vmem:[%s8254_s0 + $0x1c8] sm:$0xff] }
 0x348   : > { %v3338_v12 = vadd.f32 %v3337_v5, %v3300_v51  ;;  %v3264_v6 = vpop.f32.mrf.mxu1  ;;  %3892 = vmatpush.msrb.mxu2 %v1071_v2  ;;  %v4732_v5 = vld [vmem:[%s8254_s0 + $0x40] sm:$0xff]  ;;  %3853 = vmatpush.msrb.mxu1 %v1026_v39  ;;  %v4743_v2 = vld [vmem:[%s8254_s0 + $0x1d8] sm:$0xff] }
 0x349   : > { %3535 = vmatmul.f32.gmra.mxu0 %v4724_v17  ;;  %3611 = vmatmul.f32.gmra.mxu2 %v4725_v8  ;;  %v3265_v15 = vadd.f32 %v3264_v6, %v3227_v3  ;;  %v3160_v3 = vadd.f32 %v7405_v33, %v3122_v54  ;;  %v4734_v17 = vld [vmem:[%s8254_s0 + $0x48] sm:$0xff]  ;;  %v4735_v8 = vld [vmem:[%s8254_s0 + $0x58] sm:$0xff] }
 0x34a   : > { %v4279_v19 = vadd.f32 %v7444_v49, %v3338_v12  ;;  %v1023_v12 = vld [vmem:[%s5005_s29 + $0x1438] sm:$0xff]  ;;  %3816 = vmatpush.msrb.mxu0 %v975_v56  ;;  %3930 = vmatpush.msrb.mxu3 %v1119_v4  ;;  %v1005_v4 = vld [vmem:[%s5005_s29 + $0x13a8] sm:$0xff] }
 0x34b   : > { %3573 = vmatmul.f32.gmra.mxu1 %v4726_v0  ;;  %v3198_v0 = vadd.f32 %v7417_v58, %v3160_v3  ;;  %3893 = vmatpush.msrb.mxu2 %v1068_v14  ;;  %v4736_v58 = vld [vmem:[%s8254_s0 + $0x100] sm:$0xff]  ;;  %v1050_v3 = vld [vmem:[%s5005_s29 + $0x1510] sm:$0xff] }
 0x34c   : > { %4300 = vst [vmem:[%s6392_s10 + $0x38] sm:$0xff] %v4279_v19  ;;  %3649 = vmatmul.f32.gmra.mxu3 %v4727_v7  ;;  %v3302_v1 = vpop.f32.mrf.mxu2  ;;  %3854 = vmatpush.msrb.mxu1 %v1023_v12  ;;  %v4745_v12 = vld [vmem:[%s8254_s0 + $0x290] sm:$0xff] }
 0x34d   : > { %v3303_v21 = vadd.f32 %v3302_v1, %v3265_v15  ;;  %v1116_v15 = vld [vmem:[%s5005_s29 + $0x1720] sm:$0xff]  ;;  %3817 = vmatpush.msrb.mxu0 %v972_v60  ;;  %v1065_v1 = vld [vmem:[%s5005_s29 + $0x1588] sm:$0xff]  ;;  %v1098_v14 = vld [vmem:[%s5005_s29 + $0x1690] sm:$0xff] }
 0x34e   : > { %v3229_v9 = vpop.f32.mrf.mxu0  ;;  %3931 = vmatpush.msrb.mxu3 %v1116_v15  ;;  %3855 = vmatpush.msrb.mxu1 %v1020_v52  ;;  %v1191_v15 = vld [vmem:[%s5005_s29 + $0x1978] sm:$0xff]  ;;  %v1284_v52 = vld [vmem:[%s5005_s29 + $0x1c60] sm:$0xff] }
 0x34f   : > { %v3230_v24 = vadd.f32 %v3229_v9, %v3192_v11  ;;  %v3340_v29 = vpop.f32.mrf.mxu3  ;;  %3894 = vmatpush.msrb.mxu2 %v1065_v1  ;;  %v4737_v9 = vld [vmem:[%s8254_s0 + $0x110] sm:$0xff]  ;;  %3818 = vmatpush.msrb.mxu0 %v969_v20  ;;  %v1239_v1 = vld [vmem:[%s5005_s29 + $0x1af8] sm:$0xff]  ;;  %v1332_v20 = vld [vmem:[%s5005_s29 + $0x1de0] sm:$0xff] }
 0x350   : > { %v3341_v35 = vadd.f32 %v3340_v29, %v3303_v21  ;;  %v3267_v22 = vpop.f32.mrf.mxu1  ;;  %3932 = vmatpush.msrb.mxu3 %v1113_v55  ;;  %v1110_v29 = vld [vmem:[%s5005_s29 + $0x16f0] sm:$0xff]  ;;  %3856 = vmatpush.msrb.mxu1 %v1017_v30  ;;  %v4748_v55 = vld [vmem:[%s8254_s0 + $0x340] sm:$0xff] }
 0x351   : > { %3538 = vmatmul.f32.gmra.mxu0 %v4728_v26  ;;  %3614 = vmatmul.f32.gmra.mxu2 %v4729_v40  ;;  %v3268_v27 = vadd.f32 %v3267_v22, %v3230_v24  ;;  %v966_v24 = vld [vmem:[%s5005_s29 + $0x1270] sm:$0xff]  ;;  %v963_v40 = vld [vmem:[%s5005_s29 + $0x1258] sm:$0xff]  ;;  %v1236_v30 = vld [vmem:[%s5005_s29 + $0x1ae0] sm:$0xff] }
 0x352   : > { %v4282_v31 = vadd.f32 %v7444_v49, %v3341_v35  ;;  %3895 = vmatpush.msrb.mxu2 %v1062_v37  ;;  %v4739_v35 = vld [vmem:[%s8254_s0 + $0x118] sm:$0xff]  ;;  %3819 = vmatpush.msrb.mxu0 %v966_v24  ;;  %v1014_v26 = vld [vmem:[%s5005_s29 + $0x13f0] sm:$0xff]  ;;  %v1185_v37 = vld [vmem:[%s5005_s29 + $0x1948] sm:$0xff] }
 0x353   : > { %3576 = vmatmul.f32.gmra.mxu1 %v4730_v61  ;;  %3933 = vmatpush.msrb.mxu3 %v1110_v29  ;;  %v1056_v61 = vld [vmem:[%s5005_s29 + $0x1540] sm:$0xff]  ;;  %v4750_v29 = vld [vmem:[%s8254_s0 + $0x348] sm:$0xff] }
 0x354   : > { %4303 = vst [vmem:[%s6392_s10 + $0x50] sm:$0xff] %v4282_v31  ;;  %3652 = vmatmul.f32.gmra.mxu3 %v4731_v50  ;;  %v3305_v38 = vpop.f32.mrf.mxu2  ;;  %3896 = vmatpush.msrb.mxu2 %v1059_v44  ;;  %v960_v50 = vld [vmem:[%s5005_s29 + $0x1240] sm:$0xff]  ;;  %v1278_v44 = vld [vmem:[%s5005_s29 + $0x1c30] sm:$0xff] }
 0x355   : > { %v3306_v48 = vadd.f32 %v3305_v38, %v3268_v27  ;;  %3857 = vmatpush.msrb.mxu1 %v1014_v26  ;;  %3820 = vmatpush.msrb.mxu0 %v963_v40  ;;  %v1011_v27 = vld [vmem:[%s5005_s29 + $0x13d8] sm:$0xff]  ;;  %v1053_v38 = vld [vmem:[%s5005_s29 + $0x1528] sm:$0xff] }
 0x356   : > { %v3232_v51 = vpop.f32.mrf.mxu0  ;;  %3934 = vmatpush.msrb.mxu3 %v1107_v34  ;;  %3897 = vmatpush.msrb.mxu2 %v1056_v61  ;;  %v1230_v61 = vld [vmem:[%s5005_s29 + $0x1ab0] sm:$0xff] }
 0x357   : > { %v3233_v57 = vadd.f32 %v3232_v51, %v3195_v43  ;;  %v3343_v59 = vpop.f32.mrf.mxu3  ;;  %3858 = vmatpush.msrb.mxu1 %v1011_v27  ;;  %3821 = vmatpush.msrb.mxu0 %v960_v50  ;;  %v1008_v51 = vld [vmem:[%s5005_s29 + $0x13c0] sm:$0xff]  ;;  %v4753_v27 = vld [vmem:[%s8254_s0 + $0x410] sm:$0xff] }
 0x358   : > { %v3344_v41 = vadd.f32 %v3343_v59, %v3306_v48  ;;  %v3270_v53 = vpop.f32.mrf.mxu1  ;;  %v1104_v48 = vld [vmem:[%s5005_s29 + $0x16c0] sm:$0xff]  ;;  %3898 = vmatpush.msrb.mxu2 %v1053_v38  ;;  %v1101_v59 = vld [vmem:[%s5005_s29 + $0x16a8] sm:$0xff] }
 0x359   : > { %3672 = vmatmul.f32.vlgmr.msra.gmra.mxu0 %v4732_v5  ;;  %3748 = vmatmul.f32.vlgmr.msra.gmra.mxu2 %v4733_v23  ;;  %v3271_v33 = vadd.f32 %v3270_v53, %v3233_v57  ;;  %v957_v57 = vld [vmem:[%s5005_s29 + $0x1228] sm:$0xff]  ;;  %v954_v5 = vld [vmem:[%s5005_s29 + $0x1210] sm:$0xff]  ;;  %v4744_v23 = vld [vmem:[%s8254_s0 + $0x280] sm:$0xff] }
 0x35a   : > { %v4285_v6 = vadd.f32 %v7444_v49, %v3344_v41  ;;  %3935 = vmatpush.msrb.mxu3 %v1104_v48  ;;  %3859 = vmatpush.msrb.mxu1 %v1008_v51  ;;  %v4754_v38 = vld [vmem:[%s8254_s0 + $0x408] sm:$0xff]  ;;  %v1320_v51 = vld [vmem:[%s5005_s29 + $0x1d80] sm:$0xff] }
 0x35b   : > { %3710 = vmatmul.f32.vlgmr.msra.gmra.mxu1 %v4734_v17  ;;  %3822 = vmatpush.msrb.mxu0 %v957_v57 }
 0x35c   : > { %4306 = vst [vmem:[%s6392_s10 + $0x68] sm:$0xff] %v4285_v6  ;;  %3786 = vmatmul.f32.vlgmr.msra.gmra.mxu3 %v4735_v8  ;;  %v3308_v19 = vpop.f32.mrf.mxu2  ;;  %v1287_v6 = vld [vmem:[%s5005_s29 + $0x1c78] sm:$0xff]  ;;  %3860 = vmatpush.msrb.mxu1 %v1005_v4  ;;  %v4746_v8 = vld [vmem:[%s8254_s0 + $0x288] sm:$0xff]  ;;  %v4756_v4 = vld [vmem:[%s8254_s0 + $0x4c0] sm:$0x1] }
 0x35d   : > { %v3309_v7 = vadd.f32 %v3308_v19, %v3271_v33  ;;  %3936 = vmatpush.msrb.mxu3 %v1101_v59  ;;  %3899 = vmatpush.msrb.mxu2 %v1050_v3  ;;  %v1002_v33 = vld [vmem:[%s5005_s29 + $0x1390] sm:$0xff]  ;;  %v4747_v19 = vld [vmem:[%s8254_s0 + $0x298] sm:$0xff] }
 0x35e   : > { %v3235_v32 = vpop.f32.mrf.mxu0  ;;  %3823 = vmatpush.msrb.mxu0 %v954_v5  ;;  %3861 = vmatpush.msrb.mxu1 %v1002_v33  ;;  %v4757_v3 = vld [vmem:[%s8254_s0 + $0x4d0] sm:$0x1]  ;;  %v1173_v5 = vld [vmem:[%s5005_s29 + $0x18e8] sm:$0xff] }
 0x35f   : > { %v3236_v16 = vadd.f32 %v3235_v32, %v3198_v0  ;;  %v3346_v11 = vpop.f32.mrf.mxu3  ;;  %4036 = vmatpush.msra.mxu2 %v1287_v6  ;;  %v1335_v0 = vld [vmem:[%s5005_s29 + $0x1df8] sm:$0xff]  ;;  %3937 = vmatpush.msrb.mxu3 %v1098_v14  ;;  %v1266_v6 = vld [vmem:[%s5005_s29 + $0x1bd0] sm:$0xff]  ;;  %v4758_v33 = vld [vmem:[%s8254_s0 + $0x4c8] sm:$0x1] }
 0x360   : > { %v3347_v21 = vadd.f32 %v3346_v11, %v3309_v7  ;;  %v3273_v18 = vpop.f32.mrf.mxu1  ;;  %3960 = vmatpush.msra.mxu0 %v1191_v15  ;;  %3998 = vmatpush.msra.mxu1 %v1239_v1  ;;  %v1314_v15 = vld [vmem:[%s5005_s29 + $0x1d50] sm:$0xff] }
 0x361   : > { %3675 = vmatmul.f32.gmra.mxu0 %v4736_v58  ;;  %3751 = vmatmul.f32.gmra.mxu2 %v4737_v9  ;;  %v3274_v25 = vadd.f32 %v3273_v18, %v3236_v16  ;;  %v1188_v18 = vld [vmem:[%s5005_s29 + $0x1960] sm:$0xff]  ;;  %v4749_v58 = vld [vmem:[%s8254_s0 + $0x350] sm:$0xff]  ;;  %v1281_v9 = vld [vmem:[%s5005_s29 + $0x1c48] sm:$0xff] }
 0x362   : > { %v4288_v13 = vadd.f32 %v7444_v49, %v3347_v21  ;;  %4074 = vmatpush.msra.mxu3 %v1335_v0  ;;  %4037 = vmatpush.msra.mxu2 %v1284_v52  ;;  %v1263_v0 = vld [vmem:[%s5005_s29 + $0x1bb8] sm:$0xff] }
 0x363   : > { %3713 = vmatmul.f32.gmra.mxu1 %v4738_v42  ;;  %3961 = vmatpush.msra.mxu0 %v1188_v18  ;;  %v1311_v18 = vld [vmem:[%s5005_s29 + $0x1d38] sm:$0xff] }
 0x364   : > { %4309 = vst [vmem:[%s6392_s10 + $0x80] sm:$0xff] %v4288_v13  ;;  %3789 = vmatmul.f32.gmra.mxu3 %v4739_v35  ;;  %v3311_v22 = vpop.f32.mrf.mxu2  ;;  %v1329_v13 = vld [vmem:[%s5005_s29 + $0x1dc8] sm:$0xff]  ;;  %4038 = vmatpush.msra.mxu2 %v1281_v9  ;;  %v1260_v9 = vld [vmem:[%s5005_s29 + $0x1ba0] sm:$0xff] }
 0x365   : > { %v3312_v45 = vadd.f32 %v3311_v22, %v3274_v25  ;;  %4075 = vmatpush.msra.mxu3 %v1332_v20  ;;  %v4751_v25 = vld [vmem:[%s8254_s0 + $0x358] sm:$0xff]  ;;  %3999 = vmatpush.msra.mxu1 %v1236_v30  ;;  %v1233_v22 = vld [vmem:[%s5005_s29 + $0x1ac8] sm:$0xff]  ;;  %v4760_v20 = vld [vmem:[%s8254_s0 + $0x60] sm:$0xff] }
 0x366   : > { %v3369_v31 = vpop.f32.mrf.mxu0  ;;  %3962 = vmatpush.msra.mxu0 %v1185_v37  ;;  %4039 = vmatpush.msra.mxu2 %v1278_v44  ;;  %v4762_v37 = vld [vmem:[%s8254_s0 + $0x68] sm:$0xff] }
 0x367   : > { %v3349_v36 = vpop.f32.mrf.mxu3  ;;  %4076 = vmatpush.msra.mxu3 %v1329_v13  ;;  %4000 = vmatpush.msra.mxu1 %v1233_v22  ;;  %v4763_v13 = vld [vmem:[%s8254_s0 + $0x78] sm:$0xff]  ;;  %v1212_v22 = vld [vmem:[%s5005_s29 + $0x1a20] sm:$0xff] }
 0x368   : > { %v3350_v28 = vadd.f32 %v3349_v36, %v3312_v45  ;;  %v3407_v62 = vpop.f32.mrf.mxu1  ;;  %v1326_v36 = vld [vmem:[%s5005_s29 + $0x1db0] sm:$0xff] }
 0x369   : > { %3678 = vmatmul.f32.gmra.mxu0 %v4740_v47  ;;  %3754 = vmatmul.f32.gmra.mxu2 %v4741_v10  ;;  %v3408_v46 = vadd.f32 %v3407_v62, %v3369_v31  ;;  %v1182_v31 = vld [vmem:[%s5005_s29 + $0x1930] sm:$0xff]  ;;  %v4752_v62 = vld [vmem:[%s8254_s0 + $0x400] sm:$0xff]  ;;  %v1179_v47 = vld [vmem:[%s5005_s29 + $0x1918] sm:$0xff] }
 0x36a   : > { %v4291_v43 = vadd.f32 %v7444_v49, %v3350_v28  ;;  %v1275_v28 = vld [vmem:[%s5005_s29 + $0x1c18] sm:$0xff]  ;;  %3963 = vmatpush.msra.mxu0 %v1182_v31  ;;  %4077 = vmatpush.msra.mxu3 %v1326_v36  ;;  %v1161_v31 = vld [vmem:[%s5005_s29 + $0x1888] sm:$0xff] }
 0x36b   : > { %3716 = vmatmul.f32.gmra.mxu1 %v4742_v63  ;;  %v1323_v10 = vld [vmem:[%s5005_s29 + $0x1d98] sm:$0xff]  ;;  %4040 = vmatpush.msra.mxu2 %v1275_v28  ;;  %v1272_v63 = vld [vmem:[%s5005_s29 + $0x1c00] sm:$0xff]  ;;  %v1305_v36 = vld [vmem:[%s5005_s29 + $0x1d08] sm:$0xff] }
 0x36c   : > { %4312 = vst [vmem:[%s6392_s10 + $0x98] sm:$0x1] %v4291_v43  ;;  %3792 = vmatmul.f32.gmra.mxu3 %v4743_v2  ;;  %v3445_v49 = vpop.f32.mrf.mxu2  ;;  %v4755_v43 = vld [vmem:[%s8254_s0 + $0x418] sm:$0xff]  ;;  %4001 = vmatpush.msra.mxu1 %v1230_v61  ;;  %v4764_v28 = vld [vmem:[%s8254_s0 + $0x120] sm:$0xff]  ;;  %v1254_v61 = vld [vmem:[%s5005_s29 + $0x1b70] sm:$0xff] }
 0x36d   : > { %v3446_v54 = vadd.f32 %v3445_v49, %v3408_v46  ;;  %v1227_v46 = vld [vmem:[%s5005_s29 + $0x1a98] sm:$0xff]  ;;  %3964 = vmatpush.msra.mxu0 %v1179_v47  ;;  %4078 = vmatpush.msra.mxu3 %v1323_v10  ;;  %v1176_v49 = vld [vmem:[%s5005_s29 + $0x1900] sm:$0xff]  ;;  %v1158_v47 = vld [vmem:[%s5005_s29 + $0x1870] sm:$0xff] }
 0x36e   : > { %v3372_v41 = vpop.f32.mrf.mxu0  ;;  %4002 = vmatpush.msra.mxu1 %v1227_v46  ;;  %4041 = vmatpush.msra.mxu2 %v1272_v63  ;;  %v1302_v10 = vld [vmem:[%s5005_s29 + $0x1cf0] sm:$0xff]  ;;  %v1251_v46 = vld [vmem:[%s5005_s29 + $0x1b58] sm:$0xff] }
 0x36f   : > { %v3483_v53 = vpop.f32.mrf.mxu3  ;;  %3965 = vmatpush.msra.mxu0 %v1176_v49  ;;  %4079 = vmatpush.msra.mxu3 %v1320_v51  ;;  %v1155_v49 = vld [vmem:[%s5005_s29 + $0x1858] sm:$0xff] }
 0x370   : > { %v7633_v39 = vadd.f32 %v3483_v53, %v3446_v54  ;;  %v3410_v56 = vpop.f32.mrf.mxu1  ;;  %v1269_v53 = vld [vmem:[%s5005_s29 + $0x1be8] sm:$0xff]  ;;  %v1299_v51 = vld [vmem:[%s5005_s29 + $0x1cd8] sm:$0xff] }
 0x371   : > { %3681 = vmatmul.f32.gmra.mxu0 %v4744_v23  ;;  %3757 = vmatmul.f32.gmra.mxu2 %v4745_v12  ;;  %v3411_v17 = vadd.f32 %v3410_v56, %v3372_v41  ;;  %v1224_v56 = vld [vmem:[%s5005_s29 + $0x1a80] sm:$0xff]  ;;  %v1221_v23 = vld [vmem:[%s5005_s29 + $0x1a68] sm:$0xff] }
 0x372   : > { %4042 = vmatpush.msra.mxu2 %v1269_v53  ;;  %4003 = vmatpush.msra.mxu1 %v1224_v56  ;;  %v1317_v12 = vld [vmem:[%s5005_s29 + $0x1d68] sm:$0xff] }
 0x373   : > { %3719 = vmatmul.f32.gmra.mxu1 %v4746_v8  ;;  %3966 = vmatpush.msra.mxu0 %v1173_v5  ;;  %v4768_v5 = vld [vmem:[%s8254_s0 + $0x1e0] sm:$0xff] }
 0x374   : > { %3795 = vmatmul.f32.gmra.mxu3 %v4747_v19  ;;  %v3448_v60 = vpop.f32.mrf.mxu2  ;;  %4004 = vmatpush.msra.mxu1 %v1221_v23  ;;  %v4769_v23 = vld [vmem:[%s8254_s0 + $0x1f0] sm:$0xff] }
 0x375   : > { %v3449_v7 = vadd.f32 %v3448_v60, %v3411_v17  ;;  %v4759_v17 = vld [vmem:[%s8254_s0 + $0x4d8] sm:$0x1]  ;;  %4080 = vmatpush.msra.mxu3 %v1317_v12  ;;  %4043 = vmatpush.msra.mxu2 %v1266_v6  ;;  %v1170_v60 = vld [vmem:[%s5005_s29 + $0x18d0] sm:$0xff]  ;;  %v1152_v12 = vld [vmem:[%s5005_s29 + $0x1840] sm:$0xff] }
 0x376   : > { %v3375_v32 = vpop.f32.mrf.mxu0  ;;  %3967 = vmatpush.msra.mxu0 %v1170_v60  ;;  %v1296_v6 = vld [vmem:[%s5005_s29 + $0x1cc0] sm:$0xff] }
 0x377   : > { %v3486_v16 = vpop.f32.mrf.mxu3  ;;  %4081 = vmatpush.msra.mxu3 %v1314_v15  ;;  %4044 = vmatpush.msra.mxu2 %v1263_v0  ;;  %v1149_v15 = vld [vmem:[%s5005_s29 + $0x1828] sm:$0xff] }
 0x378   : > { %v7657_v11 = vadd.f32 %v3486_v16, %v3449_v7  ;;  %v3413_v21 = vpop.f32.mrf.mxu1  ;;  %v1218_v16 = vld [vmem:[%s5005_s29 + $0x1a50] sm:$0xff]  ;;  %v1293_v0 = vld [vmem:[%s5005_s29 + $0x1ca8] sm:$0xff] }
 0x379   : > { %3684 = vmatmul.f32.gmra.mxu0 %v4748_v55  ;;  %3760 = vmatmul.f32.gmra.mxu2 %v4749_v58  ;;  %v3414_v24 = vadd.f32 %v3413_v21, %v3375_v32  ;;  %v1167_v21 = vld [vmem:[%s5005_s29 + $0x18b8] sm:$0xff]  ;;  %v4761_v55 = vld [vmem:[%s8254_s0 + $0x70] sm:$0xff] }
 0x37a   : > { %v1215_v58 = vld [vmem:[%s5005_s29 + $0x1a38] sm:$0xff]  ;;  %4005 = vmatpush.msra.mxu1 %v1218_v16  ;;  %3968 = vmatpush.msra.mxu0 %v1167_v21 }
 0x37b   : > { %3722 = vmatmul.f32.gmra.mxu1 %v4750_v29  ;;  %4082 = vmatpush.msra.mxu3 %v1311_v18  ;;  %v1164_v29 = vld [vmem:[%s5005_s29 + $0x18a0] sm:$0xff]  ;;  %v1197_v18 = vld [vmem:[%s5005_s29 + $0x19a8] sm:$0xff] }
 0x37c   : > { %3798 = vmatmul.f32.gmra.mxu3 %v4751_v25  ;;  %v3451_v42 = vpop.f32.mrf.mxu2  ;;  %4006 = vmatpush.msra.mxu1 %v1215_v58  ;;  %v1308_v25 = vld [vmem:[%s5005_s29 + $0x1d20] sm:$0xff] }
 0x37d   : > { %v3452_v35 = vadd.f32 %v3451_v42, %v3414_v24  ;;  %4045 = vmatpush.msra.mxu2 %v1260_v9  ;;  %3969 = vmatpush.msra.mxu0 %v1164_v29  ;;  %v4772_v58 = vld [vmem:[%s8254_s0 + $0x2a0] sm:$0xff]  ;;  %v4773_v9 = vld [vmem:[%s8254_s0 + $0x2b0] sm:$0xff]  ;;  %v4775_v29 = vld [vmem:[%s8254_s0 + $0x2b8] sm:$0xff] }
 0x37e   : > { %v3378_v45 = vpop.f32.mrf.mxu0  ;;  %4083 = vmatpush.msra.mxu3 %v1308_v25  ;;  %4007 = vmatpush.msra.mxu1 %v1212_v22 }
 0x37f   : > { %v3489_v26 = vpop.f32.mrf.mxu3  ;;  %3970 = vmatpush.msra.mxu0 %v1161_v31 }
 0x380   : > { %v7679_v40 = vadd.f32 %v3489_v26, %v3452_v35  ;;  %v3416_v34 = vpop.f32.mrf.mxu1  ;;  %v1257_v35 = vld [vmem:[%s5005_s29 + $0x1b88] sm:$0xff]  ;;  %4084 = vmatpush.msra.mxu3 %v1305_v36 }
 0x381   : > { %3687 = vmatmul.f32.gmra.mxu0 %v4752_v62  ;;  %3763 = vmatmul.f32.gmra.mxu2 %v4753_v27  ;;  %v3417_v50 = vadd.f32 %v3416_v34, %v3378_v45  ;;  %v4765_v62 = vld [vmem:[%s8254_s0 + $0x130] sm:$0xff]  ;;  %v1209_v27 = vld [vmem:[%s5005_s29 + $0x1a08] sm:$0xff] }
 0x382   : > { %4046 = vmatpush.msra.mxu2 %v1257_v35  ;;  %4008 = vmatpush.msra.mxu1 %v1209_v27  ;;  %v1527_v35 = vld [vmem:[%s5005_s29 + $0x23f8] sm:$0xff]  ;;  %v1380_v27 = vld [vmem:[%s5005_s29 + $0x1f60] sm:$0xff] }
 0x383   : > { %3725 = vmatmul.f32.gmra.mxu1 %v4754_v38  ;;  %v4766_v38 = vld [vmem:[%s8254_s0 + $0x128] sm:$0xff]  ;;  %3971 = vmatpush.msra.mxu0 %v1158_v47  ;;  %v4776_v47 = vld [vmem:[%s8254_s0 + $0x360] sm:$0xff] }
 0x384   : > { %3801 = vmatmul.f32.gmra.mxu3 %v4755_v43  ;;  %v3454_v48 = vpop.f32.mrf.mxu2  ;;  %4047 = vmatpush.msra.mxu2 %v1254_v61  ;;  %v4767_v43 = vld [vmem:[%s8254_s0 + $0x138] sm:$0xff]  ;;  %v1524_v61 = vld [vmem:[%s5005_s29 + $0x23e0] sm:$0xff] }
 0x385   : > { %v3455_v2 = vadd.f32 %v3454_v48, %v3417_v50  ;;  %4085 = vmatpush.msra.mxu3 %v1302_v10  ;;  %3972 = vmatpush.msra.mxu0 %v1155_v49  ;;  %v4777_v10 = vld [vmem:[%s8254_s0 + $0x370] sm:$0xff] }
 0x386   : > { %v3381_v54 = vpop.f32.mrf.mxu0  ;;  %4048 = vmatpush.msra.mxu2 %v1251_v46  ;;  %v4778_v46 = vld [vmem:[%s8254_s0 + $0x368] sm:$0xff] }
 0x387   : > { %v3492_v57 = vpop.f32.mrf.mxu3  ;;  %4086 = vmatpush.msra.mxu3 %v1299_v51  ;;  %3973 = vmatpush.msra.mxu0 %v1152_v12  ;;  %v1425_v51 = vld [vmem:[%s5005_s29 + $0x20c8] sm:$0xff]  ;;  %v1467_v12 = vld [vmem:[%s5005_s29 + $0x2218] sm:$0xff] }
 0x388   : > { %v7703_v59 = vadd.f32 %v3492_v57, %v3455_v2  ;;  %v3419_v41 = vpop.f32.mrf.mxu1  ;;  %v1206_v2 = vld [vmem:[%s5005_s29 + $0x19f0] sm:$0xff] }
 0x389   : > { %3690 = vmatmul.f32.gmra.mxu0 %v4756_v4  ;;  %3766 = vmatmul.f32.gmra.mxu2 %v4757_v3  ;;  %v3420_v14 = vadd.f32 %v3419_v41, %v3381_v54  ;;  %v1203_v4 = vld [vmem:[%s5005_s29 + $0x19d8] sm:$0xff]  ;;  %v1248_v3 = vld [vmem:[%s5005_s29 + $0x1b40] sm:$0xff] }
 0x38a   : > { %4009 = vmatpush.msra.mxu1 %v1206_v2  ;;  %4049 = vmatpush.msra.mxu2 %v1248_v3 }
 0x38b   : > { %3728 = vmatmul.f32.gmra.mxu1 %v4758_v33  ;;  %v4770_v33 = vld [vmem:[%s8254_s0 + $0x1e8] sm:$0xff]  ;;  %4087 = vmatpush.msra.mxu3 %v1296_v6  ;;  %v4781_v6 = vld [vmem:[%s8254_s0 + $0x430] sm:$0xff] }
 0x38c   : > { %3804 = vmatmul.f32.gmra.mxu3 %v4759_v17  ;;  %v3457_v8 = vpop.f32.mrf.mxu2  ;;  %4010 = vmatpush.msra.mxu1 %v1203_v4  ;;  %v4771_v17 = vld [vmem:[%s8254_s0 + $0x1f8] sm:$0xff] }
 0x38d   : > { %v3458_v19 = vadd.f32 %v3457_v8, %v3420_v14  ;;  %3974 = vmatpush.msra.mxu0 %v1149_v15  ;;  %4088 = vmatpush.msra.mxu3 %v1293_v0  ;;  %v1419_v15 = vld [vmem:[%s5005_s29 + $0x2098] sm:$0xff]  ;;  %v1464_v0 = vld [vmem:[%s5005_s29 + $0x2200] sm:$0xff] }
 0x38e   : > { %v3384_v7 = vpop.f32.mrf.mxu0 }
 0x38f   : > { %v3495_v1 = vpop.f32.mrf.mxu3 }
 0x390   : > { %v7726_v52 = vadd.f32 %v3495_v1, %v3458_v19  ;;  %v3422_v32 = vpop.f32.mrf.mxu1  ;;  %v1200_v19 = vld [vmem:[%s5005_s29 + $0x19c0] sm:$0xff] }
 0x391   : > { %3824 = vmatmul.f32.vlgmr.msrb.gmra.mxu0 %v4760_v20  ;;  %3900 = vmatmul.f32.vlgmr.msrb.gmra.mxu2 %v4761_v55  ;;  %v3423_v30 = vadd.f32 %v3422_v32, %v3384_v7  ;;  %v1242_v20 = vld [vmem:[%s5005_s29 + $0x1b10] sm:$0xff] }
 0x392   : > { %4011 = vmatpush.msra.mxu1 %v1200_v19  ;;  %v1146_v55 = vld [vmem:[%s5005_s29 + $0x1810] sm:$0xff]  ;;  %v4783_v19 = vld [vmem:[%s8254_s0 + $0x438] sm:$0xff] }
 0x393   : > { %3862 = vmatmul.f32.vlgmr.msrb.gmra.mxu1 %v4762_v37  ;;  %v1194_v37 = vld [vmem:[%s5005_s29 + $0x1990] sm:$0xff]  ;;  %3975 = vmatpush.msra.mxu0 %v1146_v55 }
 0x394   : > { %3938 = vmatmul.f32.vlgmr.msrb.gmra.mxu3 %v4763_v13  ;;  %v3460_v24 = vpop.f32.mrf.mxu2  ;;  %4012 = vmatpush.msra.mxu1 %v1197_v18 }
 0x395   : > { %v3461_v42 = vadd.f32 %v3460_v24, %v3423_v30  ;;  %v1290_v30 = vld [vmem:[%s5005_s29 + $0x1c90] sm:$0xff]  ;;  %v4774_v24 = vld [vmem:[%s8254_s0 + $0x2a8] sm:$0xff] }
 0x396   : > { %v3387_v44 = vpop.f32.mrf.mxu0  ;;  %4089 = vmatpush.msra.mxu3 %v1290_v30  ;;  %4013 = vmatpush.msra.mxu1 %v1194_v37  ;;  %v4784_v30 = vld [vmem:[%s8254_s0 + $0x4e0] sm:$0x1]  ;;  %v4785_v37 = vld [vmem:[%s8254_s0 + $0x4f0] sm:$0x1] }
 0x397   : > { %v3498_v45 = vpop.f32.mrf.mxu3 }
 0x398   : > { %v7749_v26 = vadd.f32 %v3498_v45, %v3461_v42  ;;  %v3425_v34 = vpop.f32.mrf.mxu1  ;;  %v1383_v42 = vld [vmem:[%s5005_s29 + $0x1f78] sm:$0xff]  ;;  %v1476_v45 = vld [vmem:[%s5005_s29 + $0x2260] sm:$0xff]  ;;  %4226 = vmatpush.msrb.mxu3 %v1527_v35 }
 0x399   : > { %3827 = vmatmul.f32.gmra.mxu0 %v4764_v28  ;;  %3903 = vmatmul.f32.gmra.mxu2 %v4765_v62  ;;  %v3426_v50 = vadd.f32 %v3425_v34, %v3387_v44  ;;  %v1431_v44 = vld [vmem:[%s5005_s29 + $0x20f8] sm:$0xff] }
 0x39a   : > { %4112 = vmatpush.msrb.mxu0 %v1383_v42  ;;  %4150 = vmatpush.msrb.mxu1 %v1431_v44  ;;  %v4786_v42 = vld [vmem:[%s8254_s0 + $0x4e8] sm:$0x1]  ;;  %v4787_v35 = vld [vmem:[%s8254_s0 + $0x4f8] sm:$0x1] }
 0x39b   : > { %3865 = vmatmul.f32.gmra.mxu1 %v4766_v38  ;;  %4227 = vmatpush.msrb.mxu3 %v1524_v61  ;;  %v1377_v38 = vld [vmem:[%s5005_s29 + $0x1f48] sm:$0xff] }
 0x39c   : > { %3941 = vmatmul.f32.gmra.mxu3 %v4767_v43  ;;  %v3463_v48 = vpop.f32.mrf.mxu2  ;;  %4113 = vmatpush.msrb.mxu0 %v1380_v27  ;;  %v1521_v43 = vld [vmem:[%s5005_s29 + $0x23c8] sm:$0xff] }
 0x39d   : > { %v3464_v63 = vadd.f32 %v3463_v48, %v3426_v50  ;;  %v1428_v50 = vld [vmem:[%s5005_s29 + $0x20e0] sm:$0xff]  ;;  %4228 = vmatpush.msrb.mxu3 %v1521_v43  ;;  %v1407_v43 = vld [vmem:[%s5005_s29 + $0x2038] sm:$0xff] }
 0x39e   : > { %v3521_v54 = vpop.f32.mrf.mxu0  ;;  %4151 = vmatpush.msrb.mxu1 %v1428_v50  ;;  %4114 = vmatpush.msrb.mxu0 %v1377_v38  ;;  %v1503_v50 = vld [vmem:[%s5005_s29 + $0x2338] sm:$0xff]  ;;  %v4788_v38 = vld [vmem:[%s8254_s0 + $0x80] sm:$0xff] }
 0x39f   : > { %v3501_v57 = vpop.f32.mrf.mxu3  ;;  %v3522_v41 = vadd.f32 %v3521_v54, %v7633_v39  ;;  %v1245_v39 = vld [vmem:[%s5005_s29 + $0x1b28] sm:$0xff]  ;;  %v1470_v54 = vld [vmem:[%s5005_s29 + $0x2230] sm:$0xff] }
 0x3a0   : > { %v7774_v53 = vadd.f32 %v3501_v57, %v3464_v63  ;;  %v3559_v56 = vpop.f32.mrf.mxu1  ;;  %4050 = vmatpush.msra.mxu2 %v1245_v39  ;;  %v4779_v63 = vld [vmem:[%s8254_s0 + $0x378] sm:$0xff]  ;;  %4152 = vmatpush.msrb.mxu1 %v1425_v51  ;;  %v4780_v39 = vld [vmem:[%s8254_s0 + $0x420] sm:$0xff] }
 0x3a1   : > { %3830 = vmatmul.f32.gmra.mxu0 %v4768_v5  ;;  %3906 = vmatmul.f32.gmra.mxu2 %v4769_v23  ;;  %v3560_v14 = vadd.f32 %v3559_v56, %v3522_v41  ;;  %v1374_v5 = vld [vmem:[%s5005_s29 + $0x1f30] sm:$0xff]  ;;  %v1356_v51 = vld [vmem:[%s5005_s29 + $0x1ea0] sm:$0xff] }
 0x3a2   : > { %4051 = vmatpush.msra.mxu2 %v1242_v20  ;;  %v1518_v23 = vld [vmem:[%s5005_s29 + $0x23b0] sm:$0xff]  ;;  %4115 = vmatpush.msrb.mxu0 %v1374_v5 }
 0x3a3   : > { %3868 = vmatmul.f32.gmra.mxu1 %v4770_v33  ;;  %4229 = vmatpush.msrb.mxu3 %v1518_v23  ;;  %v1515_v33 = vld [vmem:[%s5005_s29 + $0x2398] sm:$0xff] }
 0x3a4   : > { %3944 = vmatmul.f32.gmra.mxu3 %v4771_v17  ;;  %v3597_v8 = vpop.f32.mrf.mxu2 }
 0x3a5   : > { %v3598_v60 = vadd.f32 %v3597_v8, %v3560_v14  ;;  %v1371_v14 = vld [vmem:[%s5005_s29 + $0x1f18] sm:$0xff]  ;;  %v4782_v8 = vld [vmem:[%s8254_s0 + $0x428] sm:$0xff]  ;;  %4230 = vmatpush.msrb.mxu3 %v1515_v33  ;;  %v4793_v33 = vld [vmem:[%s8254_s0 + $0x150] sm:$0xff] }
 0x3a6   : > { %v3524_v7 = vpop.f32.mrf.mxu0  ;;  %4116 = vmatpush.msrb.mxu0 %v1371_v14  ;;  %v4792_v14 = vld [vmem:[%s8254_s0 + $0x140] sm:$0xff] }
 0x3a7   : > { %v3525_v1 = vadd.f32 %v3524_v7, %v7657_v11  ;;  %v3635_v32 = vpop.f32.mrf.mxu3  ;;  %v1479_v11 = vld [vmem:[%s5005_s29 + $0x2278] sm:$0xff] }
 0x3a8   : > { %v7797_v16 = vadd.f32 %v3635_v32, %v3598_v60  ;;  %v3562_v21 = vpop.f32.mrf.mxu1  ;;  %4188 = vmatpush.msrb.mxu2 %v1479_v11  ;;  %v1512_v32 = vld [vmem:[%s5005_s29 + $0x2380] sm:$0xff] }
 0x3a9   : > { %3833 = vmatmul.f32.gmra.mxu0 %v4772_v58  ;;  %3909 = vmatmul.f32.gmra.mxu2 %v4773_v9  ;;  %v3563_v13 = vadd.f32 %v3562_v21, %v3525_v1  ;;  %v1368_v1 = vld [vmem:[%s5005_s29 + $0x1f00] sm:$0xff]  ;;  %v1461_v9 = vld [vmem:[%s5005_s29 + $0x21e8] sm:$0xff] }
 0x3aa   : > { %4189 = vmatpush.msrb.mxu2 %v1476_v45  ;;  %4117 = vmatpush.msrb.mxu0 %v1368_v1  ;;  %v1416_v11 = vld [vmem:[%s5005_s29 + $0x2080] sm:$0xff]  ;;  %v1362_v45 = vld [vmem:[%s5005_s29 + $0x1ed0] sm:$0xff]  ;;  %v1443_v1 = vld [vmem:[%s5005_s29 + $0x2158] sm:$0xff] }
 0x3ab   : > { %3871 = vmatmul.f32.gmra.mxu1 %v4774_v24  ;;  %4231 = vmatpush.msrb.mxu3 %v1512_v32  ;;  %v1509_v24 = vld [vmem:[%s5005_s29 + $0x2368] sm:$0xff] }
 0x3ac   : > { %3947 = vmatmul.f32.gmra.mxu3 %v4775_v29  ;;  %v3600_v25 = vpop.f32.mrf.mxu2  ;;  %v1458_v29 = vld [vmem:[%s5005_s29 + $0x21d0] sm:$0xff] }
 0x3ad   : > { %v3601_v22 = vadd.f32 %v3600_v25, %v3563_v13  ;;  %v1413_v13 = vld [vmem:[%s5005_s29 + $0x2068] sm:$0xff]  ;;  %4232 = vmatpush.msrb.mxu3 %v1509_v24  ;;  %v4796_v24 = vld [vmem:[%s8254_s0 + $0x200] sm:$0xff] }
 0x3ae   : > { %v3527_v34 = vpop.f32.mrf.mxu0 }
 0x3af   : > { %v3528_v31 = vadd.f32 %v3527_v34, %v7679_v40  ;;  %v3638_v36 = vpop.f32.mrf.mxu3  ;;  %v1473_v40 = vld [vmem:[%s5005_s29 + $0x2248] sm:$0xff]  ;;  %v1506_v34 = vld [vmem:[%s5005_s29 + $0x2350] sm:$0xff] }
 0x3b0   : > { %v7822_v28 = vadd.f32 %v3638_v36, %v3601_v22  ;;  %v3565_v62 = vpop.f32.mrf.mxu1  ;;  %4190 = vmatpush.msrb.mxu2 %v1473_v40  ;;  %4233 = vmatpush.msrb.mxu3 %v1506_v34  ;;  %v1359_v40 = vld [vmem:[%s5005_s29 + $0x1eb8] sm:$0xff]  ;;  %v1392_v34 = vld [vmem:[%s5005_s29 + $0x1fc0] sm:$0xff] }
 0x3b1   : > { %3836 = vmatmul.f32.gmra.mxu0 %v4776_v47  ;;  %3912 = vmatmul.f32.gmra.mxu2 %v4777_v10  ;;  %v3566_v48 = vadd.f32 %v3565_v62, %v3528_v31  ;;  %v1455_v31 = vld [vmem:[%s5005_s29 + $0x21b8] sm:$0xff]  ;;  %v1410_v10 = vld [vmem:[%s5005_s29 + $0x2050] sm:$0xff] }
 0x3b2   : > { %4191 = vmatpush.msrb.mxu2 %v1470_v54  ;;  %4234 = vmatpush.msrb.mxu3 %v1503_v50  ;;  %v1500_v54 = vld [vmem:[%s5005_s29 + $0x2320] sm:$0xff] }
 0x3b3   : > { %3874 = vmatmul.f32.gmra.mxu1 %v4778_v46 }
 0x3b4   : > { %3950 = vmatmul.f32.gmra.mxu3 %v4779_v63  ;;  %v3603_v2 = vpop.f32.mrf.mxu2  ;;  %4192 = vmatpush.msrb.mxu2 %v1467_v12  ;;  %v4790_v63 = vld [vmem:[%s8254_s0 + $0x88] sm:$0xff] }
 0x3b5   : > { %v3604_v49 = vadd.f32 %v3603_v2, %v3566_v48  ;;  %v1452_v48 = vld [vmem:[%s5005_s29 + $0x21a0] sm:$0xff]  ;;  %v4791_v2 = vld [vmem:[%s8254_s0 + $0x98] sm:$0xff]  ;;  %4235 = vmatpush.msrb.mxu3 %v1500_v54 }
 0x3b6   : > { %v3530_v57 = vpop.f32.mrf.mxu0  ;;  %4193 = vmatpush.msrb.mxu2 %v1464_v0  ;;  %v4795_v0 = vld [vmem:[%s8254_s0 + $0x158] sm:$0xff] }
 0x3b7   : > { %v3531_v41 = vadd.f32 %v3530_v57, %v7703_v59  ;;  %v3641_v56 = vpop.f32.mrf.mxu3  ;;  %v1422_v59 = vld [vmem:[%s5005_s29 + $0x20b0] sm:$0xff] }
 0x3b8   : > { %v7845_v4 = vadd.f32 %v3641_v56, %v3604_v49  ;;  %v3568_v3 = vpop.f32.mrf.mxu1  ;;  %4153 = vmatpush.msrb.mxu1 %v1422_v59  ;;  %4194 = vmatpush.msrb.mxu2 %v1461_v9  ;;  %v1404_v56 = vld [vmem:[%s5005_s29 + $0x2020] sm:$0xff]  ;;  %v1497_v59 = vld [vmem:[%s5005_s29 + $0x2308] sm:$0xff] }
 0x3b9   : > { %3839 = vmatmul.f32.gmra.mxu0 %v4780_v39  ;;  %3915 = vmatmul.f32.gmra.mxu2 %v4781_v6  ;;  %v3569_v17 = vadd.f32 %v3568_v3, %v3531_v41  ;;  %v1449_v41 = vld [vmem:[%s5005_s29 + $0x2188] sm:$0xff] }
 0x3ba   : > { %4154 = vmatpush.msrb.mxu1 %v1419_v15  ;;  %4195 = vmatpush.msrb.mxu2 %v1458_v29  ;;  %v1353_v6 = vld [vmem:[%s5005_s29 + $0x1e88] sm:$0xff]  ;;  %v4797_v29 = vld [vmem:[%s8254_s0 + $0x210] sm:$0xff] }
 0x3bb   : > { %3877 = vmatmul.f32.gmra.mxu1 %v4782_v8  ;;  %4236 = vmatpush.msrb.mxu3 %v1497_v59  ;;  %v1350_v8 = vld [vmem:[%s5005_s29 + $0x1e70] sm:$0xff]  ;;  %v4794_v15 = vld [vmem:[%s8254_s0 + $0x148] sm:$0xff] }
 0x3bc   : > { %3953 = vmatmul.f32.gmra.mxu3 %v4783_v19  ;;  %v3606_v60 = vpop.f32.mrf.mxu2  ;;  %4155 = vmatpush.msrb.mxu1 %v1416_v11  ;;  %v1494_v19 = vld [vmem:[%s5005_s29 + $0x22f0] sm:$0xff] }
 0x3bd   : > { %v3607_v7 = vadd.f32 %v3606_v60, %v3569_v17  ;;  %4196 = vmatpush.msrb.mxu2 %v1455_v31  ;;  %v1446_v17 = vld [vmem:[%s5005_s29 + $0x2170] sm:$0xff]  ;;  %4237 = vmatpush.msrb.mxu3 %v1494_v19 }
 0x3be   : > { %v3533_v21 = vpop.f32.mrf.mxu0  ;;  %4156 = vmatpush.msrb.mxu1 %v1413_v13  ;;  %v1440_v13 = vld [vmem:[%s5005_s29 + $0x2140] sm:$0xff] }
 0x3bf   : > { %v3534_v18 = vadd.f32 %v3533_v21, %v7726_v52  ;;  %v3644_v20 = vpop.f32.mrf.mxu3  ;;  %v1365_v52 = vld [vmem:[%s5005_s29 + $0x1ee8] sm:$0xff]  ;;  %4197 = vmatpush.msrb.mxu2 %v1452_v48  ;;  %v1398_v21 = vld [vmem:[%s5005_s29 + $0x1ff0] sm:$0xff]  ;;  %v4800_v48 = vld [vmem:[%s8254_s0 + $0x2c0] sm:$0xff] }
 0x3c0   : > { %v7870_v55 = vadd.f32 %v3644_v20, %v3607_v7  ;;  %v3571_v58 = vpop.f32.mrf.mxu1  ;;  %4118 = vmatpush.msrb.mxu0 %v1365_v52  ;;  %4157 = vmatpush.msrb.mxu1 %v1410_v10  ;;  %v1491_v20 = vld [vmem:[%s5005_s29 + $0x22d8] sm:$0xff] }
 0x3c1   : > { %3842 = vmatmul.f32.gmra.mxu0 %v4784_v30  ;;  %3918 = vmatmul.f32.gmra.mxu2 %v4785_v37  ;;  %v3572_v25 = vadd.f32 %v3571_v58, %v3534_v18  ;;  %v1347_v18 = vld [vmem:[%s5005_s29 + $0x1e58] sm:$0xff] }
 0x3c2   : > { %4119 = vmatpush.msrb.mxu0 %v1362_v45  ;;  %4158 = vmatpush.msrb.mxu1 %v1407_v43  ;;  %v1395_v52 = vld [vmem:[%s5005_s29 + $0x1fd8] sm:$0xff]  ;;  %v1338_v43 = vld [vmem:[%s5005_s29 + $0x1e10] sm:$0xff] }
 0x3c3   : > { %3880 = vmatmul.f32.gmra.mxu1 %v4786_v42  ;;  %4198 = vmatpush.msrb.mxu2 %v1449_v41  ;;  %v1488_v42 = vld [vmem:[%s5005_s29 + $0x22c0] sm:$0xff] }
 0x3c4   : > { %3956 = vmatmul.f32.gmra.mxu3 %v4787_v35  ;;  %v3609_v22 = vpop.f32.mrf.mxu2  ;;  %4120 = vmatpush.msrb.mxu0 %v1359_v40 }
 0x3c5   : > { %v3610_v44 = vadd.f32 %v3609_v22, %v3572_v25  ;;  %4159 = vmatpush.msrb.mxu1 %v1404_v56  ;;  %4199 = vmatpush.msrb.mxu2 %v1446_v17  ;;  %v1344_v25 = vld [vmem:[%s5005_s29 + $0x1e40] sm:$0xff]  ;;  %v4798_v22 = vld [vmem:[%s8254_s0 + $0x208] sm:$0xff] }
 0x3c6   : > { %v3536_v36 = vpop.f32.mrf.mxu0  ;;  %4121 = vmatpush.msrb.mxu0 %v1356_v51  ;;  %4238 = vmatpush.msrb.mxu3 %v1491_v20  ;;  %v4803_v51 = vld [vmem:[%s8254_s0 + $0x2d8] sm:$0xff] }
 0x3c7   : > { %v3537_v62 = vadd.f32 %v3536_v36, %v7749_v26  ;;  %v3647_v27 = vpop.f32.mrf.mxu3  ;;  %v4789_v26 = vld [vmem:[%s8254_s0 + $0x90] sm:$0xff]  ;;  %4200 = vmatpush.msrb.mxu2 %v1443_v1  ;;  %v1341_v36 = vld [vmem:[%s5005_s29 + $0x1e28] sm:$0xff] }
 0x3c8   : > { %v7894_v61 = vadd.f32 %v3647_v27, %v3610_v44  ;;  %v3574_v47 = vpop.f32.mrf.mxu1  ;;  %4122 = vmatpush.msrb.mxu0 %v1353_v6  ;;  %v4799_v44 = vld [vmem:[%s8254_s0 + $0x218] sm:$0xff]  ;;  %4239 = vmatpush.msrb.mxu3 %v1488_v42  ;;  %v4805_v6 = vld [vmem:[%s8254_s0 + $0x390] sm:$0xff] }
 0x3c9   : > { %3976 = vmatmul.f32.vlgmr.msra.gmra.mxu0 %v4788_v38  ;;  %4052 = vmatmul.f32.vlgmr.msra.gmra.mxu2 %v4789_v26  ;;  %v3575_v46 = vadd.f32 %v3574_v47, %v3537_v62  ;;  %v1485_v62 = vld [vmem:[%s5005_s29 + $0x22a8] sm:$0xff]  ;;  %v1434_v26 = vld [vmem:[%s5005_s29 + $0x2110] sm:$0xff] }
 0x3ca   : > { %4123 = vmatpush.msrb.mxu0 %v1350_v8  ;;  %4201 = vmatpush.msrb.mxu2 %v1440_v13  ;;  %v1389_v38 = vld [vmem:[%s5005_s29 + $0x1fa8] sm:$0xff]  ;;  %v4812_v13 = vld [vmem:[%s8254_s0 + $0x500] sm:$0x1] }
 0x3cb   : > { %4014 = vmatmul.f32.vlgmr.msra.gmra.mxu1 %v4790_v63  ;;  %4240 = vmatpush.msrb.mxu3 %v1485_v62  ;;  %v1386_v63 = vld [vmem:[%s5005_s29 + $0x1f90] sm:$0xff]  ;;  %v4818_v62 = vld [vmem:[%s8254_s0 + $0xa8] sm:$0xff] }
 0x3cc   : > { %4090 = vmatmul.f32.vlgmr.msra.gmra.mxu3 %v4791_v2  ;;  %v3612_v49 = vpop.f32.mrf.mxu2  ;;  %4124 = vmatpush.msrb.mxu0 %v1347_v18 }
 0x3cd   : > { %v3613_v57 = vadd.f32 %v3612_v49, %v3575_v46  ;;  %v4801_v46 = vld [vmem:[%s8254_s0 + $0x2d0] sm:$0xff]  ;;  %v4802_v49 = vld [vmem:[%s8254_s0 + $0x2c8] sm:$0xff] }
 0x3ce   : > { %v3539_v3 = vpop.f32.mrf.mxu0  ;;  %4125 = vmatpush.msrb.mxu0 %v1344_v25 }
 0x3cf   : > { %v3540_v5 = vadd.f32 %v3539_v3, %v7774_v53  ;;  %v3650_v23 = vpop.f32.mrf.mxu3  ;;  %v1401_v53 = vld [vmem:[%s5005_s29 + $0x2008] sm:$0xff] }
 0x3d0   : > { %v7918_v12 = vadd.f32 %v3650_v23, %v3613_v57  ;;  %v3577_v39 = vpop.f32.mrf.mxu1  ;;  %4160 = vmatpush.msrb.mxu1 %v1401_v53  ;;  %4126 = vmatpush.msrb.mxu0 %v1341_v36  ;;  %v4817_v36 = vld [vmem:[%s8254_s0 + $0xb0] sm:$0xff] }
 0x3d1   : > { %3979 = vmatmul.f32.gmra.mxu0 %v4792_v14  ;;  %4055 = vmatmul.f32.gmra.mxu2 %v4793_v33  ;;  %v3578_v60 = vadd.f32 %v3577_v39, %v3540_v5  ;;  %v4804_v39 = vld [vmem:[%s8254_s0 + $0x380] sm:$0xff]  ;;  %v4806_v14 = vld [vmem:[%s8254_s0 + $0x388] sm:$0xff] }
 0x3d2   : > { %4161 = vmatpush.msrb.mxu1 %v1398_v21  ;;  %4127 = vmatpush.msrb.mxu0 %v1338_v43 }
 0x3d3   : > { %4017 = vmatmul.f32.gmra.mxu1 %v4794_v15 }
 0x3d4   : > { %4093 = vmatmul.f32.gmra.mxu3 %v4795_v0  ;;  %v3615_v7 = vpop.f32.mrf.mxu2  ;;  %4162 = vmatpush.msrb.mxu1 %v1395_v52  ;;  %v4808_v0 = vld [vmem:[%s8254_s0 + $0x440] sm:$0xff] }
 0x3d5   : > { %v3616_v32 = vadd.f32 %v3615_v7, %v3578_v60  ;;  %v4809_v7 = vld [vmem:[%s8254_s0 + $0x450] sm:$0xff] }
 0x3d6   : > { %v3673_v58 = vpop.f32.mrf.mxu0  ;;  %4163 = vmatpush.msrb.mxu1 %v1392_v34 }
 0x3d7   : > { %v3653_v9 = vpop.f32.mrf.mxu3  ;;  %v3674_v11 = vadd.f32 %v3673_v58, %v7797_v16  ;;  %v1437_v16 = vld [vmem:[%s5005_s29 + $0x2128] sm:$0xff] }
 0x3d8   : > { %v7943_v30 = vadd.f32 %v3653_v9, %v3616_v32  ;;  %v3711_v37 = vpop.f32.mrf.mxu1  ;;  %4202 = vmatpush.msrb.mxu2 %v1437_v16  ;;  %4164 = vmatpush.msrb.mxu1 %v1389_v38  ;;  %v4810_v32 = vld [vmem:[%s8254_s0 + $0x448] sm:$0xff] }
 0x3d9   : > { %3982 = vmatmul.f32.gmra.mxu0 %v4796_v24  ;;  %4058 = vmatmul.f32.gmra.mxu2 %v4797_v29  ;;  %v3712_v35 = vadd.f32 %v3711_v37, %v3674_v11  ;;  %v4813_v24 = vld [vmem:[%s8254_s0 + $0x510] sm:$0x1]  ;;  %v4814_v29 = vld [vmem:[%s8254_s0 + $0x508] sm:$0x1] }
 0x3da   : > { %4203 = vmatpush.msrb.mxu2 %v1434_v26  ;;  %4165 = vmatpush.msrb.mxu1 %v1386_v63  ;;  %v4821_v63 = vld [vmem:[%s8254_s0 + $0x170] sm:$0xff] }
 0x3db   : > { %4020 = vmatmul.f32.gmra.mxu1 %v4798_v22 }
 0x3dc   : > { %4096 = vmatmul.f32.gmra.mxu3 %v4799_v44  ;;  %v3749_v45 = vpop.f32.mrf.mxu2 }
 0x3dd   : > { %v3750_v31 = vadd.f32 %v3749_v45, %v3712_v35 }
 0x3de   : > { %v3676_v27 = vpop.f32.mrf.mxu0 }
 0x3df   : > { %v3677_v47 = vadd.f32 %v3676_v27, %v7822_v28  ;;  %v3787_v10 = vpop.f32.mrf.mxu3  ;;  %v1482_v28 = vld [vmem:[%s5005_s29 + $0x2290] sm:$0xff] }
 0x3e0   : > { %v7966_v40 = vadd.f32 %v3787_v10, %v3750_v31  ;;  %v3714_v50 = vpop.f32.mrf.mxu1  ;;  %4241 = vmatpush.msrb.mxu3 %v1482_v28  ;;  %v4816_v31 = vld [vmem:[%s8254_s0 + $0xa0] sm:$0xff]  ;;  %v4822_v28 = vld [vmem:[%s8254_s0 + $0x168] sm:$0xff] }
 0x3e1   : > { %3985 = vmatmul.f32.gmra.mxu0 %v4800_v48  ;;  %4061 = vmatmul.f32.gmra.mxu2 %v4801_v46  ;;  %v3715_v2 = vadd.f32 %v3714_v50, %v3677_v47  ;;  %v4820_v46 = vld [vmem:[%s8254_s0 + $0x160] sm:$0xff] }
 0x3e3   : > { %4023 = vmatmul.f32.gmra.mxu1 %v4802_v49 }
 0x3e4   : > { %4099 = vmatmul.f32.gmra.mxu3 %v4803_v51  ;;  %v3752_v54 = vpop.f32.mrf.mxu2 }
 0x3e5   : > { %v3753_v57 = vadd.f32 %v3752_v54, %v3715_v2 }
 0x3e6   : > { %v3679_v41 = vpop.f32.mrf.mxu0 }
 0x3e7   : > { %v3680_v56 = vadd.f32 %v3679_v41, %v7845_v4  ;;  %v3790_v3 = vpop.f32.mrf.mxu3  ;;  %v4807_v4 = vld [vmem:[%s8254_s0 + $0x398] sm:$0xff] }
 0x3e8   : > { %v7986_v5 = vadd.f32 %v3790_v3, %v3753_v57  ;;  %v3717_v23 = vpop.f32.mrf.mxu1 }
 0x3e9   : > { %3988 = vmatmul.f32.gmra.mxu0 %v4804_v39  ;;  %4064 = vmatmul.f32.gmra.mxu2 %v4805_v6  ;;  %v3718_v59 = vadd.f32 %v3717_v23, %v3680_v56  ;;  %v4824_v23 = vld [vmem:[%s8254_s0 + $0x220] sm:$0xff]  ;;  %v4825_v39 = vld [vmem:[%s8254_s0 + $0x230] sm:$0xff]  ;;  %v4826_v6 = vld [vmem:[%s8254_s0 + $0x228] sm:$0xff] }
 0x3eb   : > { %4026 = vmatmul.f32.gmra.mxu1 %v4806_v14 }
 0x3ec   : > { %4102 = vmatmul.f32.gmra.mxu3 %v4807_v4  ;;  %v3755_v33 = vpop.f32.mrf.mxu2 }
 0x3ed   : > { %v3756_v53 = vadd.f32 %v3755_v33, %v3718_v59 }
 0x3ee   : > { %v3682_v17 = vpop.f32.mrf.mxu0 }
 0x3ef   : > { %v3683_v8 = vadd.f32 %v3682_v17, %v7870_v55  ;;  %v3793_v19 = vpop.f32.mrf.mxu3  ;;  %v4811_v55 = vld [vmem:[%s8254_s0 + $0x458] sm:$0xff] }
 0x3f0   : > { %v8001_v60 = vadd.f32 %v3793_v19, %v3756_v53  ;;  %v3720_v15 = vpop.f32.mrf.mxu1 }
 0x3f1   : > { %3991 = vmatmul.f32.gmra.mxu0 %v4808_v0  ;;  %4067 = vmatmul.f32.gmra.mxu2 %v4809_v7  ;;  %v3721_v1 = vadd.f32 %v3720_v15, %v3683_v8  ;;  %v4828_v15 = vld [vmem:[%s8254_s0 + $0x2e0] sm:$0xff]  ;;  %v4829_v0 = vld [vmem:[%s8254_s0 + $0x2f0] sm:$0xff]  ;;  %v4830_v7 = vld [vmem:[%s8254_s0 + $0x2e8] sm:$0xff] }
 0x3f3   : > { %4029 = vmatmul.f32.gmra.mxu1 %v4810_v32 }
 0x3f4   : > { %4105 = vmatmul.f32.gmra.mxu3 %v4811_v55  ;;  %v3758_v21 = vpop.f32.mrf.mxu2 }
 0x3f5   : > { %v3759_v18 = vadd.f32 %v3758_v21, %v3721_v1 }
 0x3f6   : > { %v3685_v20 = vpop.f32.mrf.mxu0 }
 0x3f7   : > { %v3686_v58 = vadd.f32 %v3685_v20, %v7894_v61  ;;  %v3796_v9 = vpop.f32.mrf.mxu3  ;;  %v4815_v61 = vld [vmem:[%s8254_s0 + $0x518] sm:$0x1] }
 0x3f8   : > { %v8016_v11 = vadd.f32 %v3796_v9, %v3759_v18  ;;  %v3723_v37 = vpop.f32.mrf.mxu1 }
 0x3f9   : > { %v3724_v52 = vadd.f32 %v3723_v37, %v3686_v58  ;;  %3994 = vmatmul.f32.gmra.mxu0 %v4812_v13  ;;  %4070 = vmatmul.f32.gmra.mxu2 %v4813_v24  ;;  %v4832_v37 = vld [vmem:[%s8254_s0 + $0x3a0] sm:$0xff]  ;;  %v4834_v13 = vld [vmem:[%s8254_s0 + $0x3a8] sm:$0xff] }
 0x3fb   : > { %4032 = vmatmul.f32.gmra.mxu1 %v4814_v29 }
 0x3fc   : > { %4108 = vmatmul.f32.gmra.mxu3 %v4815_v61  ;;  %v3761_v25 = vpop.f32.mrf.mxu2 }
 0x3fd   : > { %v3762_v16 = vadd.f32 %v3761_v25, %v3724_v52  ;;  %v4833_v52 = vld [vmem:[%s8254_s0 + $0x3b0] sm:$0xff] }
 0x3fe   : > { %v3688_v42 = vpop.f32.mrf.mxu0 }
 0x3ff   : > { %v3689_v35 = vadd.f32 %v3688_v42, %v7918_v12  ;;  %v3799_v22 = vpop.f32.mrf.mxu3  ;;  %v4819_v12 = vld [vmem:[%s8254_s0 + $0xb8] sm:$0xff] }
 0x400   : > { %v8031_v44 = vadd.f32 %v3799_v22, %v3762_v16  ;;  %v3726_v45 = vpop.f32.mrf.mxu1 }
 0x401   : > { %v3727_v34 = vadd.f32 %v3726_v45, %v3689_v35  ;;  %4128 = vmatmul.f32.vlgmr.msrb.gmra.mxu0 %v4816_v31  ;;  %4204 = vmatmul.f32.vlgmr.msrb.gmra.mxu2 %v4817_v36  ;;  %v4836_v45 = vld [vmem:[%s8254_s0 + $0x460] sm:$0xff]  ;;  %v4838_v31 = vld [vmem:[%s8254_s0 + $0x468] sm:$0xff] }
 0x403   : > { %4166 = vmatmul.f32.vlgmr.msrb.gmra.mxu1 %v4818_v62 }
 0x404   : > { %4242 = vmatmul.f32.vlgmr.msrb.gmra.mxu3 %v4819_v12  ;;  %v3764_v27 = vpop.f32.mrf.mxu2 }
 0x405   : > { %v3765_v47 = vadd.f32 %v3764_v27, %v3727_v34  ;;  %v4837_v34 = vld [vmem:[%s8254_s0 + $0x470] sm:$0xff] }
 0x406   : > { %v3691_v10 = vpop.f32.mrf.mxu0 }
 0x407   : > { %v3692_v50 = vadd.f32 %v3691_v10, %v7943_v30  ;;  %v3802_v38 = vpop.f32.mrf.mxu3  ;;  %v4823_v30 = vld [vmem:[%s8254_s0 + $0x178] sm:$0xff] }
 0x408   : > { %v8046_v26 = vadd.f32 %v3802_v38, %v3765_v47  ;;  %v3729_v43 = vpop.f32.mrf.mxu1 }
 0x409   : > { %v3730_v48 = vadd.f32 %v3729_v43, %v3692_v50  ;;  %4131 = vmatmul.f32.gmra.mxu0 %v4820_v46  ;;  %4207 = vmatmul.f32.gmra.mxu2 %v4821_v63  ;;  %v4840_v43 = vld [vmem:[%s8254_s0 + $0x520] sm:$0x1]  ;;  %v4842_v46 = vld [vmem:[%s8254_s0 + $0x528] sm:$0x1] }
 0x40b   : > { %4169 = vmatmul.f32.gmra.mxu1 %v4822_v28 }
 0x40c   : > { %4245 = vmatmul.f32.gmra.mxu3 %v4823_v30  ;;  %v3767_v2 = vpop.f32.mrf.mxu2 }
 0x40d   : > { %v3768_v49 = vadd.f32 %v3767_v2, %v3730_v48  ;;  %v4841_v48 = vld [vmem:[%s8254_s0 + $0x530] sm:$0x1] }
 0x40e   : > { %v3825_v51 = vpop.f32.mrf.mxu0 }
 0x40f   : > { %v3805_v54 = vpop.f32.mrf.mxu3  ;;  %v3826_v57 = vadd.f32 %v3825_v51, %v7966_v40  ;;  %v4827_v40 = vld [vmem:[%s8254_s0 + $0x238] sm:$0xff] }
 0x410   : > { %v8061_v41 = vadd.f32 %v3805_v54, %v3768_v49  ;;  %v3863_v56 = vpop.f32.mrf.mxu1 }
 0x411   : > { %v3864_v3 = vadd.f32 %v3863_v56, %v3826_v57  ;;  %4134 = vmatmul.f32.gmra.mxu0 %v4824_v23  ;;  %4210 = vmatmul.f32.gmra.mxu2 %v4825_v39 }
 0x413   : > { %4172 = vmatmul.f32.gmra.mxu1 %v4826_v6 }
 0x414   : > { %4248 = vmatmul.f32.gmra.mxu3 %v4827_v40  ;;  %v3901_v59 = vpop.f32.mrf.mxu2 }
 0x415   : > { %v3902_v14 = vadd.f32 %v3901_v59, %v3864_v3 }
 0x416   : > { %v3828_v4 = vpop.f32.mrf.mxu0 }
 0x417   : > { %v3829_v33 = vadd.f32 %v3828_v4, %v7986_v5  ;;  %v3939_v53 = vpop.f32.mrf.mxu3  ;;  %v4831_v5 = vld [vmem:[%s8254_s0 + $0x2f8] sm:$0xff] }
 0x418   : > { %v8076_v17 = vadd.f32 %v3939_v53, %v3902_v14  ;;  %v3866_v8 = vpop.f32.mrf.mxu1 }
 0x419   : > { %v3867_v19 = vadd.f32 %v3866_v8, %v3829_v33  ;;  %4137 = vmatmul.f32.gmra.mxu0 %v4828_v15  ;;  %4213 = vmatmul.f32.gmra.mxu2 %v4829_v0 }
 0x41b   : > { %4175 = vmatmul.f32.gmra.mxu1 %v4830_v7 }
 0x41c   : > { %4251 = vmatmul.f32.gmra.mxu3 %v4831_v5  ;;  %v3904_v1 = vpop.f32.mrf.mxu2 }
 0x41d   : > { %v3905_v32 = vadd.f32 %v3904_v1, %v3867_v19 }
 0x41e   : > { %v3831_v55 = vpop.f32.mrf.mxu0 }
 0x41f   : > { %v3832_v21 = vadd.f32 %v3831_v55, %v8001_v60  ;;  %v3942_v18 = vpop.f32.mrf.mxu3  ;;  %v4835_v60 = vld [vmem:[%s8254_s0 + $0x3b8] sm:$0xff] }
 0x420   : > { %v8091_v20 = vadd.f32 %v3942_v18, %v3905_v32  ;;  %v3869_v58 = vpop.f32.mrf.mxu1 }
 0x421   : > { %v3870_v9 = vadd.f32 %v3869_v58, %v3832_v21  ;;  %4140 = vmatmul.f32.gmra.mxu0 %v4832_v37  ;;  %4216 = vmatmul.f32.gmra.mxu2 %v4833_v52 }
 0x423   : > { %4178 = vmatmul.f32.gmra.mxu1 %v4834_v13 }
 0x424   : > { %4254 = vmatmul.f32.gmra.mxu3 %v4835_v60  ;;  %v3907_v24 = vpop.f32.mrf.mxu2 }
 0x425   : > { %v3908_v29 = vadd.f32 %v3907_v24, %v3870_v9 }
 0x426   : > { %v3834_v61 = vpop.f32.mrf.mxu0 }
 0x427   : > { %v3835_v25 = vadd.f32 %v3834_v61, %v8016_v11  ;;  %v3945_v16 = vpop.f32.mrf.mxu3  ;;  %v4839_v11 = vld [vmem:[%s8254_s0 + $0x478] sm:$0xff] }
 0x428   : > { %v8106_v42 = vadd.f32 %v3945_v16, %v3908_v29  ;;  %v3872_v35 = vpop.f32.mrf.mxu1 }
 0x429   : > { %v3873_v22 = vadd.f32 %v3872_v35, %v3835_v25  ;;  %4143 = vmatmul.f32.gmra.mxu0 %v4836_v45  ;;  %4219 = vmatmul.f32.gmra.mxu2 %v4837_v34 }
 0x42b   : > { %4181 = vmatmul.f32.gmra.mxu1 %v4838_v31 }
 0x42c   : > { %4257 = vmatmul.f32.gmra.mxu3 %v4839_v11  ;;  %v3910_v36 = vpop.f32.mrf.mxu2 }
 0x42d   : > { %v3911_v62 = vadd.f32 %v3910_v36, %v3873_v22 }
 0x42e   : > { %v3837_v12 = vpop.f32.mrf.mxu0 }
 0x42f   : > { %v3838_v27 = vadd.f32 %v3837_v12, %v8031_v44  ;;  %v3948_v47 = vpop.f32.mrf.mxu3  ;;  %v4843_v44 = vld [vmem:[%s8254_s0 + $0x538] sm:$0x1] }
 0x430   : > { %v8121_v10 = vadd.f32 %v3948_v47, %v3911_v62  ;;  %v3875_v50 = vpop.f32.mrf.mxu1 }
 0x431   : > { %v3876_v38 = vadd.f32 %v3875_v50, %v3838_v27  ;;  %4146 = vmatmul.f32.gmra.mxu0 %v4840_v43  ;;  %4222 = vmatmul.f32.gmra.mxu2 %v4841_v48 }
 0x433   : > { %4184 = vmatmul.f32.gmra.mxu1 %v4842_v46 }
 0x434   : > { %4260 = vmatmul.f32.gmra.mxu3 %v4843_v44  ;;  %v3913_v63 = vpop.f32.mrf.mxu2 }
 0x435   : > { %v3914_v28 = vadd.f32 %v3913_v63, %v3876_v38 }
 0x436   : > { %v3840_v30 = vpop.f32.mrf.mxu0 }
 0x437   : > { %v3841_v2 = vadd.f32 %v3840_v30, %v8046_v26  ;;  %v3951_v49 = vpop.f32.mrf.mxu3 }
 0x438   : > { %v8136_v51 = vadd.f32 %v3951_v49, %v3914_v28  ;;  %v3878_v54 = vpop.f32.mrf.mxu1 }
 0x439   : > { %v3879_v57 = vadd.f32 %v3878_v54, %v3841_v2  ;;  %v4844_v2 = vld [vmem:[%s6341_s18] sm:$0x7]  ;;  %s4461_s18 = smul.u32 (%p4975_p9), 24, %s4953_s16 }
 0x43b   : > { %s8199_s28 = scalar_lea.vmem (%p4975_p9), %s8257_s3, %s4461_s18 }
 0x43c   : > { %v3916_v56 = vpop.f32.mrf.mxu2 }
 0x43d   : > { %v3917_v3 = vadd.f32 %v3916_v56, %v3879_v57 }
 0x43e   : > { %v3843_v23 = vpop.f32.mrf.mxu0 }
 0x43f   : > { %v3844_v39 = vadd.f32 %v3843_v23, %v8061_v41  ;;  %v3954_v6 = vpop.f32.mrf.mxu3 }
 0x440   : > { %v8139_v40 = vadd.f32 %v3954_v6, %v3917_v3  ;;  %v3881_v59 = vpop.f32.mrf.mxu1 }
 0x441   : > { %v3882_v14 = vadd.f32 %v3881_v59, %v3844_v39 }
 0x444   : > { %v3919_v4 = vpop.f32.mrf.mxu2 }
 0x445   : > { %v3920_v33 = vadd.f32 %v3919_v4, %v3882_v14 }
 0x446   : > { %v3977_v53 = vpop.f32.mrf.mxu0 }
 0x447   : > { %v3957_v8 = vpop.f32.mrf.mxu3  ;;  %v3978_v16 = vadd.f32 %v3977_v53, %v8076_v17 }
 0x448   : > { %v8141_v26 = vadd.f32 %v3957_v8, %v3920_v33  ;;  %v4015_v19 = vpop.f32.mrf.mxu1 }
 0x449   : > { %v4016_v45 = vadd.f32 %v4015_v19, %v3978_v16 }
 0x44c   : > { %v4053_v15 = vpop.f32.mrf.mxu2 }
 0x44d   : > { %v4054_v11 = vadd.f32 %v4053_v15, %v4016_v45 }
 0x44e   : > { %v3980_v0 = vpop.f32.mrf.mxu0 }
 0x44f   : > { %v4091_v7 = vpop.f32.mrf.mxu3  ;;  %v3981_v36 = vadd.f32 %v3980_v0, %v8091_v20  ;;  %v8163_v20 = vperm.slane %v4844_v2, 2 }
 0x450   : > { %v4018_v5 = vpop.f32.mrf.mxu1  ;;  %v4092_v12 = vadd.f32 %v4091_v7, %v4054_v11 }
 0x451   : > { %v4019_v47 = vadd.f32 %v4018_v5, %v3981_v36 }
 0x454   : > { %v4056_v1 = vpop.f32.mrf.mxu2 }
 0x455   : > { %v4057_v43 = vadd.f32 %v4056_v1, %v4019_v47 }
 0x456   : > { %v3983_v32 = vpop.f32.mrf.mxu0 }
 0x457   : > { %v4094_v55 = vpop.f32.mrf.mxu3  ;;  %v3984_v48 = vadd.f32 %v3983_v32, %v8106_v42 }
 0x458   : > { %v4021_v41 = vpop.f32.mrf.mxu1  ;;  %v4095_v63 = vadd.f32 %v4094_v55, %v4057_v43 }
 0x459   : > { %v4022_v49 = vadd.f32 %v4021_v41, %v3984_v48 }
 0x45c   : > { %v4059_v21 = vpop.f32.mrf.mxu2 }
 0x45d   : > { %v4060_v23 = vadd.f32 %v4059_v21, %v4022_v49 }
 0x45e   : > { %v3986_v18 = vpop.f32.mrf.mxu0 }
 0x45f   : > { %v4097_v58 = vpop.f32.mrf.mxu3  ;;  %v3987_v6 = vadd.f32 %v3986_v18, %v8121_v10 }
 0x460   : > { %v4024_v9 = vpop.f32.mrf.mxu1  ;;  %v4098_v14 = vadd.f32 %v4097_v58, %v4060_v23 }
 0x461   : > { %v4025_v53 = vadd.f32 %v4024_v9, %v3987_v6 }
 0x464   : > { %v4062_v37 = vpop.f32.mrf.mxu2 }
 0x465   : > { %v4063_v7 = vadd.f32 %v4062_v37, %v4025_v53  ;;  %v4338_v53 = vld [vmem:[%s6392_s10 + $0x8] sm:$0xff] (%p4975_p9) }
 0x466   : > { %v3989_v52 = vpop.f32.mrf.mxu0  ;;  %4339 = vst [vmem:[%s8199_s28 + $0x8] sm:$0xff] (%p4975_p9), %v4338_v53 }
 0x467   : > { %v4100_v13 = vpop.f32.mrf.mxu3  ;;  %v3990_v1 = vadd.f32 %v3989_v52, %v8136_v51 }
 0x468   : > { %v4027_v60 = vpop.f32.mrf.mxu1  ;;  %v4101_v55 = vadd.f32 %v4100_v13, %v4063_v7  ;;  %v4350_v7 = vld [vmem:[%s6392_s10 + $0x38] sm:$0xff] (%p4975_p9) }
 0x469   : > { %v4028_v18 = vadd.f32 %v4027_v60, %v3990_v1  ;;  %v4354_v1 = vld [vmem:[%s6392_s10 + $0x48] sm:$0xff] (%p4975_p9)  ;;  %4351 = vst [vmem:[%s8199_s28 + $0x68] sm:$0xff] (%p4975_p9), %v4350_v7 }
 0x46a   : > { %4355 = vst [vmem:[%s8199_s28 + $0x90] sm:$0xff] (%p4975_p9), %v4354_v1 }
 0x46c   : > { %v4065_v24 = vpop.f32.mrf.mxu2 }
 0x46d   : > { %v4066_v11 = vadd.f32 %v4065_v24, %v4028_v18  ;;  %v4366_v18 = vld [vmem:[%s6392_s10 + $0x78] sm:$0xff] (%p4975_p9) }
 0x46e   : > { %v3992_v29 = vpop.f32.mrf.mxu0  ;;  %4367 = vst [vmem:[%s8199_s28 + $0xf0] sm:$0xff] (%p4975_p9), %v4366_v18 }
 0x46f   : > { %v8143_v61 = vpop.f32.mrf.mxu3  ;;  %v3993_v37 = vadd.f32 %v3992_v29, %v8139_v40 }
 0x470   : > { %v8145_v25 = vpop.f32.mrf.mxu1  ;;  %v4104_v52 = vadd.f32 %v8143_v61, %v4066_v11 }
 0x471   : > { %v4031_v47 = vadd.f32 %v8145_v25, %v3993_v37 }
 0x474   : > { %v8148_v35 = vpop.f32.mrf.mxu2 }
 0x475   : > { %v4069_v24 = vadd.f32 %v8148_v35, %v4031_v47 }
 0x476   : > { %v8150_v22 = vpop.f32.mrf.mxu0 }
 0x477   : > { %v8152_v34 = vpop.f32.mrf.mxu3  ;;  %v3996_v40 = vadd.f32 %v8150_v22, %v8141_v26 }
 0x478   : > { %v8154_v31 = vpop.f32.mrf.mxu1  ;;  %v4107_v61 = vadd.f32 %v8152_v34, %v4069_v24 }
 0x479   : > { %v4034_v25 = vadd.f32 %v8154_v31, %v3996_v40 }
 0x47c   : > { %v8157_v62 = vpop.f32.mrf.mxu2 }
 0x47d   : > { %v4072_v49 = vadd.f32 %v8157_v62, %v4034_v25 }
 0x47e   : > { %v4129_v27 = vpop.f32.mrf.mxu0 }
 0x47f   : > { %v8159_v50 = vpop.f32.mrf.mxu3  ;;  %v4130_v17 = vadd.f32 %v4129_v27, %v4092_v12 }
 0x480   : > { %v4167_v38 = vpop.f32.mrf.mxu1  ;;  %v4110_v22 = vadd.f32 %v8159_v50, %v4072_v49  ;;  %v4336_v50 = vld [vmem:[%s6392_s10] sm:$0xff] (%p4975_p9) }
 0x481   : > { %v4168_v46 = vadd.f32 %v4167_v38, %v4130_v17  ;;  %4337 = vst [vmem:[%s8199_s28] sm:$0xff] (%p4975_p9), %v4336_v50 }
 0x484   : > { %v4205_v44 = vpop.f32.mrf.mxu2 }
 0x485   : > { %v4206_v28 = vadd.f32 %v4205_v44, %v4168_v46 }
 0x486   : > { %v4132_v30 = vpop.f32.mrf.mxu0 }
 0x487   : > { %v4133_v54 = vadd.f32 %v4132_v30, %v4095_v63  ;;  %v4243_v57 = vpop.f32.mrf.mxu3 }
 0x488   : > { %v4244_v56 = vadd.f32 %v4243_v57, %v4206_v28  ;;  %v4170_v3 = vpop.f32.mrf.mxu1 }
 0x489   : > { %v4171_v42 = vadd.f32 %v4170_v3, %v4133_v54 }
 0x48a   : > { %v4274_v39 = vadd.f32 %v8163_v20, %v4244_v56 }
 0x48c   : > { %4295 = vst [vmem:[%s6392_s10 + $0x10] sm:$0xff] %v4274_v39  ;;  %v4208_v59 = vpop.f32.mrf.mxu2 }
 0x48d   : > { %v4209_v4 = vadd.f32 %v4208_v59, %v4171_v42 }
 0x48e   : > { %v4135_v33 = vpop.f32.mrf.mxu0 }
 0x48f   : > { %v4136_v8 = vadd.f32 %v4135_v33, %v4098_v14  ;;  %v4246_v19 = vpop.f32.mrf.mxu3 }
 0x490   : > { %v4247_v15 = vadd.f32 %v4246_v19, %v4209_v4  ;;  %v4173_v0 = vpop.f32.mrf.mxu1  ;;  %v4344_v19 = vld [vmem:[%s6392_s10 + $0x20] sm:$0xff] (%p4975_p9) }
 0x491   : > { %v4174_v32 = vadd.f32 %v4173_v0, %v4136_v8  ;;  %v4342_v8 = vld [vmem:[%s6392_s10 + $0x18] sm:$0xff] (%p4975_p9)  ;;  %v4348_v0 = vld [vmem:[%s6392_s10 + $0x30] sm:$0xff] (%p4975_p9)  ;;  %4345 = vst [vmem:[%s8199_s28 + $0x38] sm:$0xff] (%p4975_p9), %v4344_v19 }
 0x492   : > { %v4277_v5 = vadd.f32 %v8163_v20, %v4247_v15  ;;  %4343 = vst [vmem:[%s8199_s28 + $0x30] sm:$0xff] (%p4975_p9), %v4342_v8 }
 0x493   : > { %4349 = vst [vmem:[%s8199_s28 + $0x60] sm:$0xff] (%p4975_p9), %v4348_v0 }
 0x494   : > { %4298 = vst [vmem:[%s6392_s10 + $0x28] sm:$0xff] %v4277_v5  ;;  %v4211_v10 = vpop.f32.mrf.mxu2 }
 0x495   : > { %v4212_v41 = vadd.f32 %v4211_v10, %v4174_v32  ;;  %v4356_v32 = vld [vmem:[%s6392_s10 + $0x50] sm:$0xff] (%p4975_p9) }
 0x496   : > { %v4138_v21 = vpop.f32.mrf.mxu0  ;;  %4357 = vst [vmem:[%s8199_s28 + $0x98] sm:$0xff] (%p4975_p9), %v4356_v32 }
 0x497   : > { %v4139_v58 = vadd.f32 %v4138_v21, %v4101_v55  ;;  %v4249_v16 = vpop.f32.mrf.mxu3  ;;  %v4360_v55 = vld [vmem:[%s6392_s10 + $0x60] sm:$0xff] (%p4975_p9) }
 0x498   : > { %v4250_v9 = vadd.f32 %v4249_v16, %v4212_v41  ;;  %v4176_v45 = vpop.f32.mrf.mxu1  ;;  %v4362_v41 = vld [vmem:[%s6392_s10 + $0x68] sm:$0xff] (%p4975_p9)  ;;  %4361 = vst [vmem:[%s8199_s28 + $0xc0] sm:$0xff] (%p4975_p9), %v4360_v55 }
 0x499   : > { %v4177_v12 = vadd.f32 %v4176_v45, %v4139_v58  ;;  %4363 = vst [vmem:[%s8199_s28 + $0xc8] sm:$0xff] (%p4975_p9), %v4362_v41  ;;  %v4368_v58 = vld [vmem:[%s6392_s10 + $0x80] sm:$0xff] (%p4975_p9)  ;;  %v4374_v45 = vld [vmem:[%s6392_s10 + $0x98] sm:$0xff] (%p4975_p9) }
 0x49a   : > { %v4280_v36 = vadd.f32 %v8163_v20, %v4250_v9  ;;  %v4372_v9 = vld [vmem:[%s6392_s10 + $0x90] sm:$0xff] (%p4975_p9)  ;;  %4369 = vst [vmem:[%s8199_s28 + $0xf8] sm:$0xff] (%p4975_p9), %v4368_v58 }
 0x49b   : > { %v4346_v15 = vld [vmem:[%s6392_s10 + $0x28] sm:$0xff] (%p4975_p9)  ;;  %4373 = vst [vmem:[%s8199_s28 + $0x120] sm:$0xff] (%p4975_p9), %v4372_v9 }
 0x49c   : > { %4301 = vst [vmem:[%s6392_s10 + $0x40] sm:$0xff] %v4280_v36  ;;  %v4214_v51 = vpop.f32.mrf.mxu2 }
 0x49d   : > { %v4215_v27 = vadd.f32 %v4214_v51, %v4177_v12  ;;  %4347 = vst [vmem:[%s8199_s28 + $0x40] sm:$0xff] (%p4975_p9), %v4346_v15 }
 0x49e   : > { %v4141_v13 = vpop.f32.mrf.mxu0  ;;  %4375 = vst [vmem:[%s8199_s28 + $0x128] sm:$0xff] (%p4975_p9), %v4374_v45 }
 0x49f   : > { %v4142_v60 = vadd.f32 %v4141_v13, %v4104_v52  ;;  %v4252_v17 = vpop.f32.mrf.mxu3 }
 0x4a0   : > { %v4253_v38 = vadd.f32 %v4252_v17, %v4215_v27  ;;  %v4179_v43 = vpop.f32.mrf.mxu1 }
 0x4a1   : > { %v4180_v29 = vadd.f32 %v4179_v43, %v4142_v60 }
 0x4a2   : > { %v4283_v48 = vadd.f32 %v8163_v20, %v4253_v38 }
 0x4a3   : > { %v4352_v5 = vld [vmem:[%s6392_s10 + $0x40] sm:$0xff] (%p4975_p9) }
 0x4a4   : > { %4304 = vst [vmem:[%s6392_s10 + $0x58] sm:$0xff] %v4283_v48  ;;  %v4217_v46 = vpop.f32.mrf.mxu2 }
 0x4a5   : > { %v4218_v44 = vadd.f32 %v4217_v46, %v4180_v29  ;;  %4353 = vst [vmem:[%s8199_s28 + $0x70] sm:$0xff] (%p4975_p9), %v4352_v5 }
 0x4a6   : > { %v4144_v63 = vpop.f32.mrf.mxu0 }
 0x4a7   : > { %v4145_v28 = vadd.f32 %v4144_v63, %v4107_v61  ;;  %v4255_v30 = vpop.f32.mrf.mxu3 }
 0x4a8   : > { %v4256_v2 = vadd.f32 %v4255_v30, %v4218_v44  ;;  %v4182_v35 = vpop.f32.mrf.mxu1 }
 0x4a9   : > { %v4183_v57 = vadd.f32 %v4182_v35, %v4145_v28 }
 0x4aa   : > { %v4286_v54 = vadd.f32 %v8163_v20, %v4256_v2 }
 0x4ab   : > { %v4358_v10 = vld [vmem:[%s6392_s10 + $0x58] sm:$0xff] (%p4975_p9) }
 0x4ac   : > { %4307 = vst [vmem:[%s6392_s10 + $0x70] sm:$0xff] %v4286_v54  ;;  %v4220_v26 = vpop.f32.mrf.mxu2 }
 0x4ad   : > { %v4221_v34 = vadd.f32 %v4220_v26, %v4183_v57  ;;  %4359 = vst [vmem:[%s8199_s28 + $0xa0] sm:$0xff] (%p4975_p9), %v4358_v10 }
 0x4ae   : > { %v4147_v56 = vpop.f32.mrf.mxu0 }
 0x4af   : > { %v4148_v3 = vadd.f32 %v4147_v56, %v4110_v22  ;;  %v4258_v23 = vpop.f32.mrf.mxu3 }
 0x4b0   : > { %v4259_v31 = vadd.f32 %v4258_v23, %v4221_v34  ;;  %v4185_v39 = vpop.f32.mrf.mxu1 }
 0x4b1   : > { %v4186_v42 = vadd.f32 %v4185_v39, %v4148_v3 }
 0x4b2   : > { %v4289_v6 = vadd.f32 %v8163_v20, %v4259_v31 }
 0x4b3   : > { %v4364_v21 = vld [vmem:[%s6392_s10 + $0x70] sm:$0xff] (%p4975_p9) }
 0x4b4   : > { %4310 = vst [vmem:[%s6392_s10 + $0x88] sm:$0xff] %v4289_v6  ;;  %v4223_v59 = vpop.f32.mrf.mxu2 }
 0x4b5   : > { %v4224_v62 = vadd.f32 %v4223_v59, %v4186_v42  ;;  %4365 = vst [vmem:[%s8199_s28 + $0xd0] sm:$0xff] (%p4975_p9), %v4364_v21 }
 0x4b7   : > { %v4261_v14 = vpop.f32.mrf.mxu3 }
 0x4b8   : > { %v4262_v4 = vadd.f32 %v4261_v14, %v4224_v62  ;;  %4320 = sbr.rel (!%p4975_p9) target bundleno = 1221 (0x4c5), region = 40 }
 0x4ba   : > { %v4292_v33 = vadd.f32 %v8163_v20, %v4262_v4  ;;  %v4340_v20 = vld [vmem:[%s6392_s10 + $0x10] sm:$0xff] (%p4975_p9) }
 0x4bb   : > { %4341 = vst [vmem:[%s8199_s28 + $0x10] sm:$0xff] (%p4975_p9), %v4340_v20  ;;  %v4370_v16 = vld [vmem:[%s6392_s10 + $0x88] sm:$0xff] (%p4975_p9) }
 0x4bc   : > { %4313 = vst [vmem:[%s6392_s10 + $0xa0] sm:$0x1] %v4292_v33 }
 0x4bd   : > { %4371 = vst [vmem:[%s8199_s28 + $0x100] sm:$0xff] %v4370_v16 }
 0x4c3   : > { %v4376_v11 = vld [vmem:[%s6392_s10 + $0xa0] sm:$0xff] }
 0x4c4   : > { %4377 = vst [vmem:[%s8199_s28 + $0x130] sm:$0xff] %v4376_v11 }
 0x4c5 PF: > { %p13_p9 = scmp.ge.s32.totalorder %s4956_s17, 4   ;;  %s8262_s12 = smov %s4901_s13 }
 0x4c6   : > { %s8263_s13 = smov %s4905_s14  ;;  %s8264_s14 = smov %s4966_s20 }
 0x4c7   : > { %s8265_s15 = smov %s4956_s17  ;;  %15 = sbr.rel (!%p13_p9) target bundleno = 3 (0x3), region = 98 }
 0x4cc   :  { %4393 = vsyncpa [#allocation3], 1 }
 0x4cd   :  { %4395 = vsyncpa [#allocation3 + $0x1], 1 }

</bundles_post_ra>
